<compile_context>
chip_gen: v7x
topology: tpu7x:2x2x1
jax: 0.10.0
libtpu: 0.0.40
codegen_flags: <defaults>
</compile_context>

<pallas_src>
import numpy as np
import jax
import jax.numpy as jnp
from jax import lax
from jax.experimental import pallas as pl
from jax.experimental.pallas import tpu as pltpu


# ----------------------------------------------------------------------------
# static geometry (28x28 input, as required by fc1 = 16*5*5)
# ----------------------------------------------------------------------------
H = W = 28
C1_OUT, C2_OUT = 6, 16
W1A = 726                 # conv1 accumulator width (flat anchor 28*i+j, i,j in [0,26))
W1M = W1A - 1 - 28        # 697: width after the 2x2 pairwise max (offsets {0,1,28,29})
NP1 = 13 * 13             # 169: dense pooled1 map (lane index 13*I+J)
W2A = 11 * 11             # 121: dense conv2 output block per channel (lane 11*i+j)
NW2 = C2_OUT * W2A        # 1936: 16 channel-major conv2 blocks
W2M = NW2 - 1 - 11        # 1924: width after the 2x2 pairwise max (offsets {0,1,11,12})
NFC = 128                 # padded fc width (fc1: 120 valid, fc2: 84 valid)
NCLS = 10


# ----------------------------------------------------------------------------
# fused kernel: conv1 -> relu -> pool -> conv2 -> relu -> pool -> fc1/2/3 -> log_softmax
# ----------------------------------------------------------------------------
def _mnist_fused_kernel(x_ref, c1w_ref, c1b_ref, sel1_ref, wb_ref, b2e_ref,
                        w1e_ref, b1f_ref, w2f_ref, b2f_ref, w3f_ref, b3f_ref,
                        o_ref):
    x = x_ref[...]                                              # (TB, 784) f32
    # 9 shared conv1 tap views (lane shifts of the flattened 28x28 image).
    xs = [x[:, 28 * di + dj: 28 * di + dj + W1A]
          for di in range(3) for dj in range(3)]
    sel1 = sel1_ref[...]                                        # (697, 169) f32, 0/1

    # --- conv1 + ReLU + 2x2/2 max-pool + stride-2 compaction (per output channel) ---
    d1 = []
    for o in range(C1_OUT):
        a = c1w_ref[9 * o] * xs[0]
        for t in range(1, 9):
            a = a + c1w_ref[9 * o + t] * xs[t]
        a = jnp.maximum(a + c1b_ref[o], 0.0)                    # (TB, 726)
        m = jnp.maximum(a[:, :W1A - 1], a[:, 1:])               # +{0,1}
        m = jnp.maximum(m[:, :W1M], m[:, 28:])                  # +{0,28}   -> (TB, 697)
        # MXU 0/1 selection matmul: keep the 13x13 stride-2 anchors, lane-dense.
        d1.append(jnp.dot(m, sel1, preferred_element_type=jnp.float32))  # (TB, 169)

    # --- conv2 as 6 banded MXU matmuls (weights folded offline), f32 accumulation ---
    acc2 = jnp.dot(d1[0].astype(jnp.bfloat16), wb_ref[0],
                   preferred_element_type=jnp.float32)
    for c in range(1, C1_OUT):
        acc2 = acc2 + jnp.dot(d1[c].astype(jnp.bfloat16), wb_ref[c],
                              preferred_element_type=jnp.float32)
    r2 = jnp.maximum(acc2 + b2e_ref[...], 0.0)                  # (TB, 1936)

    # --- ReLU'd conv2 maps -> 2x2/2 max-pool (channel-major 11x11 blocks) ---
    m2 = jnp.maximum(r2[:, :NW2 - 1], r2[:, 1:])                # +{0,1}
    m2 = jnp.maximum(m2[:, :W2M], m2[:, 11:])                   # +{0,11}  -> (TB, 1924)

    # --- flatten + pool2 stride-2 select + fc1 folded into one matmul, then fc2, fc3 ---
    h = jnp.dot(m2, w1e_ref[...], preferred_element_type=jnp.float32) + b1f_ref[...]
    h = jnp.maximum(h, 0.0)                                     # (TB, 128), 120 valid
    h = jnp.dot(h, w2f_ref[...], preferred_element_type=jnp.float32) + b2f_ref[...]
    h = jnp.maximum(h, 0.0)                                     # (TB, 128), 84 valid
    y = jnp.dot(h, w3f_ref[...], preferred_element_type=jnp.float32) + b3f_ref[...]

    # --- log_softmax over the 10 real classes ---
    ymax = jnp.max(y, axis=1, keepdims=True)
    s = y - ymax
    lse = jnp.log(jnp.sum(jnp.exp(s), axis=1, keepdims=True))
    o_ref[...] = (s - lse).astype(o_ref.dtype)


# ----------------------------------------------------------------------------
# pallas_call wrapper
# ----------------------------------------------------------------------------
_SMEM = pl.BlockSpec(memory_space=pltpu.MemorySpace.SMEM)


@jax.jit
def mnist_cnn_forward(x, p):
    """x: (B, 1, 28, 28) f32 NCHW -> (B, 10) f32 log-probabilities."""
    B = x.shape[0]
    xf = x.reshape(B, H * W).astype(jnp.float32)                # free NCHW flatten
    TB = min(64, B)                                             # batch tile (lane-dense work)
    Bp = ((B + TB - 1) // TB) * TB
    if Bp != B:
        xf = jnp.pad(xf, ((0, Bp - B), (0, 0)))
    out = pl.pallas_call(
        _mnist_fused_kernel,
        out_shape=jax.ShapeDtypeStruct((Bp, NCLS), jnp.float32),
        grid=(Bp // TB,),
        in_specs=[
            pl.BlockSpec((TB, H * W), lambda i: (i, 0)),        # images (batch tile)
            _SMEM, _SMEM,                                       # conv1 w (54,), b (6,)
            pl.BlockSpec((W1M, NP1), lambda i: (0, 0)),         # pool1 selection (697,169)
            pl.BlockSpec((C1_OUT, NP1, NW2), lambda i: (0, 0, 0)),  # conv2 band (6,169,1936)
            pl.BlockSpec((1, NW2), lambda i: (0, 0)),           # conv2 bias (expanded)
            pl.BlockSpec((W2M, NFC), lambda i: (0, 0)),         # pool2+flatten+fc1 folded
            pl.BlockSpec((1, NFC), lambda i: (0, 0)),           # fc1 bias (padded)
            pl.BlockSpec((NFC, NFC), lambda i: (0, 0)),         # fc2 weight (padded)
            pl.BlockSpec((1, NFC), lambda i: (0, 0)),           # fc2 bias (padded)
            pl.BlockSpec((NFC, NCLS), lambda i: (0, 0)),        # fc3 weight (padded in)
            pl.BlockSpec((1, NCLS), lambda i: (0, 0)),          # fc3 bias
        ],
        out_specs=pl.BlockSpec((TB, NCLS), lambda i: (i, 0)),
        compiler_params=pltpu.CompilerParams(
            dimension_semantics=("parallel",),
            vmem_limit_bytes=48 * 1024 * 1024,
        ),
    )(xf, p["c1w"], p["c1b"], p["sel1"], p["wb"], p["b2e"],
      p["w1e"], p["b1f"], p["w2f"], p["b2f"], p["w3f"], p["b3f"])
    return out[:B] if Bp != B else out


# ----------------------------------------------------------------------------
# parameters
# ----------------------------------------------------------------------------
def init_params(key):
    """PyTorch-layout parameters with PyTorch-style uniform(-1/sqrt(fan_in)) init."""
    ks = jax.random.split(key, 10)

    def u(k, shape, fan_in):
        bound = 1.0 / jnp.sqrt(fan_in)
        return jax.random.uniform(k, shape, jnp.float32, -bound, bound)

    return {
        "conv1_w": u(ks[0], (6, 1, 3, 3), 1 * 3 * 3),
        "conv1_b": u(ks[1], (6,), 1 * 3 * 3),
        "conv2_w": u(ks[2], (16, 6, 3, 3), 6 * 3 * 3),
        "conv2_b": u(ks[3], (16,), 6 * 3 * 3),
        "fc1_w": u(ks[4], (120, 400), 400),
        "fc1_b": u(ks[5], (120,), 400),
        "fc2_w": u(ks[6], (84, 120), 120),
        "fc2_b": u(ks[7], (84,), 120),
        "fc3_w": u(ks[8], (10, 84), 84),
        "fc3_b": u(ks[9], (10,), 84),
    }


def prepare_params(params):
    """One-time numpy re-layout OUTSIDE the jitted forward (selection / band folding)."""
    c1w = np.asarray(params["conv1_w"], np.float32).reshape(C1_OUT, 9)
    c1b = np.asarray(params["conv1_b"], np.float32)
    c2w = np.asarray(params["conv2_w"], np.float32)            # (16, 6, 3, 3)
    c2b = np.asarray(params["conv2_b"], np.float32)
    f1w = np.asarray(params["fc1_w"], np.float32)              # (120, 400)
    f1b = np.asarray(params["fc1_b"], np.float32)
    f2w = np.asarray(params["fc2_w"], np.float32)              # (84, 120)
    f2b = np.asarray(params["fc2_b"], np.float32)
    f3w = np.asarray(params["fc3_w"], np.float32)              # (10, 84)
    f3b = np.asarray(params["fc3_b"], np.float32)

    # pool1 stride-2 selection + compaction: flat anchor 56*I+2*J -> dense lane 13*I+J.
    sel1 = np.zeros((W1M, NP1), np.float32)
    for I in range(13):
        for J in range(13):
            sel1[56 * I + 2 * J, 13 * I + J] = 1.0

    # conv2 folded into banded matrices (one per input channel):
    #   wb[c, 13*(i+di)+(j+dj), 121*o + 11*i + j] = conv2_w[o, c, di, dj]
    wb = np.zeros((C1_OUT, NP1, NW2), np.float32)
    for o in range(C2_OUT):
        for i in range(11):
            for j in range(11):
                col = W2A * o + 11 * i + j
                for di in range(3):
                    for dj in range(3):
                        wb[:, 13 * (i + di) + (j + dj), col] = c2w[o, :, di, dj]
    b2e = np.repeat(c2b, W2A)[None, :]                          # (1, 1936)

    # pool2 stride-2 selection + channel-major flatten + fc1 folded:
    #   w1e[121*o + 22*I + 2*J, k] = fc1_w[k, 25*o + 5*I + J]
    w1e = np.zeros((W2M, NFC), np.float32)
    for o in range(C2_OUT):
        for I in range(5):
            for J in range(5):
                w1e[W2A * o + 22 * I + 2 * J, :120] = f1w[:, 25 * o + 5 * I + J]
    b1f = np.zeros((1, NFC), np.float32)
    b1f[0, :120] = f1b
    w2f = np.zeros((NFC, NFC), np.float32)
    w2f[:120, :84] = f2w.T
    b2f = np.zeros((1, NFC), np.float32)
    b2f[0, :84] = f2b
    w3f = np.zeros((NFC, NCLS), np.float32)
    w3f[:84, :] = f3w.T
    b3f = f3b[None, :]

    return {
        "c1w": jnp.asarray(c1w.reshape(-1)),                    # (54,)  SMEM scalars
        "c1b": jnp.asarray(c1b),                                # (6,)   SMEM scalars
        "sel1": jnp.asarray(sel1),                              # f32 0/1 (exact)
        "wb": jnp.asarray(wb, dtype=jnp.bfloat16),              # bf16 MXU operands
        "b2e": jnp.asarray(b2e),
        "w1e": jnp.asarray(w1e),
        "b1f": jnp.asarray(b1f),
        "w2f": jnp.asarray(w2f),
        "b2f": jnp.asarray(b2f),
        "w3f": jnp.asarray(w3f),
        "b3f": jnp.asarray(b3f),
    }


# ----------------------------------------------------------------------------
# pure-JAX reference (for validation only)
# ----------------------------------------------------------------------------
def _reference_forward(x, params):
    y = lax.conv_general_dilated(x, params["conv1_w"], (1, 1), "VALID",
                                 dimension_numbers=("NCHW", "OIHW", "NCHW"))
    y = jnp.maximum(y + params["conv1_b"][None, :, None, None], 0.0)
    y = lax.reduce_window(y, -jnp.inf, lax.max, (1, 1, 2, 2), (1, 1, 2, 2), "VALID")
    y = lax.conv_general_dilated(y, params["conv2_w"], (1, 1), "VALID",
                                 dimension_numbers=("NCHW", "OIHW", "NCHW"))
    y = jnp.maximum(y + params["conv2_b"][None, :, None, None], 0.0)
    y = lax.reduce_window(y, -jnp.inf, lax.max, (1, 1, 2, 2), (1, 1, 2, 2), "VALID")
    f = y.reshape(x.shape[0], 16 * 5 * 5)
    h = jnp.maximum(f @ params["fc1_w"].T + params["fc1_b"], 0.0)
    h = jnp.maximum(h @ params["fc2_w"].T + params["fc2_b"], 0.0)
    logits = h @ params["fc3_w"].T + params["fc3_b"]
    return jax.nn.log_softmax(logits, axis=1)


if __name__ == "__main__":
    key = jax.random.PRNGKey(0)
    pkey, xkey = jax.random.split(key)
    params = init_params(pkey)
    prepared = prepare_params(params)

    # MNIST-shaped input (28x28 is required by the hardcoded fc1 = 16*5*5).
    x = jax.random.normal(xkey, (2, 1, 28, 28), jnp.float32)

    out = jax.block_until_ready(mnist_cnn_forward(x, prepared))
    assert out.shape == (2, 10), out.shape

    # log_softmax sanity: rows of exp(out) must sum to ~1.
    row_sums = jnp.exp(out).sum(axis=1)
    assert bool(jnp.all(jnp.abs(row_sums - 1.0) < 1e-4)), row_sums

    # numerical parity vs. a pure-JAX f32 reference (conv2 matmul runs in bf16).
    ref = _reference_forward(x, params)
    err = float(jnp.max(jnp.abs(out - ref)))
    assert err < 2e-2, f"max |diff| vs reference = {err}"

    print("KERNEL_OK")
</pallas_src>

<mosaic_0001>
module attributes {stable_mosaic.version = 11 : i64} {
  func.func @_mnist_fused_kernel(%arg0: i32, %arg1: memref<2x784xf32, #tpu.memory_space<vmem>>, %arg2: memref<54xf32, #tpu.memory_space<smem>>, %arg3: memref<6xf32, #tpu.memory_space<smem>>, %arg4: memref<697x169xf32, #tpu.memory_space<vmem>>, %arg5: memref<6x169x1936xbf16, #tpu.memory_space<vmem>>, %arg6: memref<1x1936xf32, #tpu.memory_space<vmem>>, %arg7: memref<1924x128xf32, #tpu.memory_space<vmem>>, %arg8: memref<1x128xf32, #tpu.memory_space<vmem>>, %arg9: memref<128x128xf32, #tpu.memory_space<vmem>>, %arg10: memref<1x128xf32, #tpu.memory_space<vmem>>, %arg11: memref<128x10xf32, #tpu.memory_space<vmem>>, %arg12: memref<1x10xf32, #tpu.memory_space<vmem>>, %arg13: memref<2x10xf32, #tpu.memory_space<vmem>>) attributes {dimension_semantics = [#tpu.dimension_semantics<parallel>], iteration_bounds = array<i64: 1>, scalar_prefetch = 0 : i64, scratch_operands = 0 : i64, tpu.core_type = #tpu.core_type<tc>, window_params = [{transform_indices = @transform_0, window_bounds = array<i64: 2, 784>}, {transform_indices = @transform_1, window_bounds = array<i64: 54>}, {transform_indices = @transform_2, window_bounds = array<i64: 6>}, {pipeline_mode = #tpu.pipeline_mode<synchronous>, transform_indices = @transform_3, window_bounds = array<i64: 697, 169>}, {pipeline_mode = #tpu.pipeline_mode<synchronous>, transform_indices = @transform_4, window_bounds = array<i64: 6, 169, 1936>}, {pipeline_mode = #tpu.pipeline_mode<synchronous>, transform_indices = @transform_5, window_bounds = array<i64: 1, 1936>}, {pipeline_mode = #tpu.pipeline_mode<synchronous>, transform_indices = @transform_6, window_bounds = array<i64: 1924, 128>}, {pipeline_mode = #tpu.pipeline_mode<synchronous>, transform_indices = @transform_7, window_bounds = array<i64: 1, 128>}, {pipeline_mode = #tpu.pipeline_mode<synchronous>, transform_indices = @transform_8, window_bounds = array<i64: 128, 128>}, {pipeline_mode = #tpu.pipeline_mode<synchronous>, transform_indices = @transform_9, window_bounds = array<i64: 1, 128>}, {pipeline_mode = #tpu.pipeline_mode<synchronous>, transform_indices = @transform_10, window_bounds = array<i64: 128, 10>}, {pipeline_mode = #tpu.pipeline_mode<synchronous>, transform_indices = @transform_11, window_bounds = array<i64: 1, 10>}, {transform_indices = @transform_12, window_bounds = array<i64: 2, 10>}]} {
    %c0 = arith.constant 0 : index
    %c0_0 = arith.constant 0 : index
    %0 = vector.load %arg1[%c0, %c0_0] : memref<2x784xf32, #tpu.memory_space<vmem>>, vector<2x784xf32>
    %1 = vector.extract_strided_slice %0 {offsets = [0, 0], sizes = [2, 726], strides = [1, 1]} : vector<2x784xf32> to vector<2x726xf32>
    %2 = vector.extract_strided_slice %0 {offsets = [0, 1], sizes = [2, 726], strides = [1, 1]} : vector<2x784xf32> to vector<2x726xf32>
    %3 = vector.extract_strided_slice %0 {offsets = [0, 2], sizes = [2, 726], strides = [1, 1]} : vector<2x784xf32> to vector<2x726xf32>
    %4 = vector.extract_strided_slice %0 {offsets = [0, 28], sizes = [2, 726], strides = [1, 1]} : vector<2x784xf32> to vector<2x726xf32>
    %5 = vector.extract_strided_slice %0 {offsets = [0, 29], sizes = [2, 726], strides = [1, 1]} : vector<2x784xf32> to vector<2x726xf32>
    %6 = vector.extract_strided_slice %0 {offsets = [0, 30], sizes = [2, 726], strides = [1, 1]} : vector<2x784xf32> to vector<2x726xf32>
    %7 = vector.extract_strided_slice %0 {offsets = [0, 56], sizes = [2, 726], strides = [1, 1]} : vector<2x784xf32> to vector<2x726xf32>
    %8 = vector.extract_strided_slice %0 {offsets = [0, 57], sizes = [2, 726], strides = [1, 1]} : vector<2x784xf32> to vector<2x726xf32>
    %9 = vector.extract_strided_slice %0 {offsets = [0, 58], sizes = [2, 726], strides = [1, 1]} : vector<2x784xf32> to vector<2x726xf32>
    %c0_1 = arith.constant 0 : index
    %c0_2 = arith.constant 0 : index
    %10 = vector.load %arg4[%c0_1, %c0_2] : memref<697x169xf32, #tpu.memory_space<vmem>>, vector<697x169xf32>
    %c0_3 = arith.constant 0 : index
    %11 = memref.load %arg2[%c0_3] : memref<54xf32, #tpu.memory_space<smem>>
    %12 = vector.broadcast %11 : f32 to vector<2x726xf32>
    %13 = arith.mulf %12, %1 : vector<2x726xf32>
    %c1 = arith.constant 1 : index
    %14 = memref.load %arg2[%c1] : memref<54xf32, #tpu.memory_space<smem>>
    %15 = vector.broadcast %14 : f32 to vector<2x726xf32>
    %16 = arith.mulf %15, %2 : vector<2x726xf32>
    %17 = arith.addf %13, %16 : vector<2x726xf32>
    %c2 = arith.constant 2 : index
    %18 = memref.load %arg2[%c2] : memref<54xf32, #tpu.memory_space<smem>>
    %19 = vector.broadcast %18 : f32 to vector<2x726xf32>
    %20 = arith.mulf %19, %3 : vector<2x726xf32>
    %21 = arith.addf %17, %20 : vector<2x726xf32>
    %c3 = arith.constant 3 : index
    %22 = memref.load %arg2[%c3] : memref<54xf32, #tpu.memory_space<smem>>
    %23 = vector.broadcast %22 : f32 to vector<2x726xf32>
    %24 = arith.mulf %23, %4 : vector<2x726xf32>
    %25 = arith.addf %21, %24 : vector<2x726xf32>
    %c4 = arith.constant 4 : index
    %26 = memref.load %arg2[%c4] : memref<54xf32, #tpu.memory_space<smem>>
    %27 = vector.broadcast %26 : f32 to vector<2x726xf32>
    %28 = arith.mulf %27, %5 : vector<2x726xf32>
    %29 = arith.addf %25, %28 : vector<2x726xf32>
    %c5 = arith.constant 5 : index
    %30 = memref.load %arg2[%c5] : memref<54xf32, #tpu.memory_space<smem>>
    %31 = vector.broadcast %30 : f32 to vector<2x726xf32>
    %32 = arith.mulf %31, %6 : vector<2x726xf32>
    %33 = arith.addf %29, %32 : vector<2x726xf32>
    %c6 = arith.constant 6 : index
    %34 = memref.load %arg2[%c6] : memref<54xf32, #tpu.memory_space<smem>>
    %35 = vector.broadcast %34 : f32 to vector<2x726xf32>
    %36 = arith.mulf %35, %7 : vector<2x726xf32>
    %37 = arith.addf %33, %36 : vector<2x726xf32>
    %c7 = arith.constant 7 : index
    %38 = memref.load %arg2[%c7] : memref<54xf32, #tpu.memory_space<smem>>
    %39 = vector.broadcast %38 : f32 to vector<2x726xf32>
    %40 = arith.mulf %39, %8 : vector<2x726xf32>
    %41 = arith.addf %37, %40 : vector<2x726xf32>
    %c8 = arith.constant 8 : index
    %42 = memref.load %arg2[%c8] : memref<54xf32, #tpu.memory_space<smem>>
    %43 = vector.broadcast %42 : f32 to vector<2x726xf32>
    %44 = arith.mulf %43, %9 : vector<2x726xf32>
    %45 = arith.addf %41, %44 : vector<2x726xf32>
    %c0_4 = arith.constant 0 : index
    %46 = memref.load %arg3[%c0_4] : memref<6xf32, #tpu.memory_space<smem>>
    %47 = vector.broadcast %46 : f32 to vector<2x726xf32>
    %48 = arith.addf %45, %47 : vector<2x726xf32>
    %cst = arith.constant 0.000000e+00 : f32
    %49 = vector.broadcast %cst : f32 to vector<2x726xf32>
    %50 = arith.maximumf %48, %49 : vector<2x726xf32>
    %51 = vector.extract_strided_slice %50 {offsets = [0, 0], sizes = [2, 725], strides = [1, 1]} : vector<2x726xf32> to vector<2x725xf32>
    %52 = vector.extract_strided_slice %50 {offsets = [0, 1], sizes = [2, 725], strides = [1, 1]} : vector<2x726xf32> to vector<2x725xf32>
    %53 = arith.maximumf %51, %52 : vector<2x725xf32>
    %54 = vector.extract_strided_slice %53 {offsets = [0, 0], sizes = [2, 697], strides = [1, 1]} : vector<2x725xf32> to vector<2x697xf32>
    %55 = vector.extract_strided_slice %53 {offsets = [0, 28], sizes = [2, 697], strides = [1, 1]} : vector<2x725xf32> to vector<2x697xf32>
    %56 = arith.maximumf %54, %55 : vector<2x697xf32>
    %cst_5 = arith.constant dense<0.000000e+00> : vector<2x169xf32>
    %57 = tpu.matmul %56, %10, %cst_5 {dimension_numbers = #tpu.dot_dimension_numbers<[1], [0], [0], [1], [0, 0, 1, 1], [], []>} : vector<2x697xf32>, vector<697x169xf32>, vector<2x169xf32> -> vector<2x169xf32>
    %c9 = arith.constant 9 : index
    %58 = memref.load %arg2[%c9] : memref<54xf32, #tpu.memory_space<smem>>
    %59 = vector.broadcast %58 : f32 to vector<2x726xf32>
    %60 = arith.mulf %59, %1 : vector<2x726xf32>
    %c10 = arith.constant 10 : index
    %61 = memref.load %arg2[%c10] : memref<54xf32, #tpu.memory_space<smem>>
    %62 = vector.broadcast %61 : f32 to vector<2x726xf32>
    %63 = arith.mulf %62, %2 : vector<2x726xf32>
    %64 = arith.addf %60, %63 : vector<2x726xf32>
    %c11 = arith.constant 11 : index
    %65 = memref.load %arg2[%c11] : memref<54xf32, #tpu.memory_space<smem>>
    %66 = vector.broadcast %65 : f32 to vector<2x726xf32>
    %67 = arith.mulf %66, %3 : vector<2x726xf32>
    %68 = arith.addf %64, %67 : vector<2x726xf32>
    %c12 = arith.constant 12 : index
    %69 = memref.load %arg2[%c12] : memref<54xf32, #tpu.memory_space<smem>>
    %70 = vector.broadcast %69 : f32 to vector<2x726xf32>
    %71 = arith.mulf %70, %4 : vector<2x726xf32>
    %72 = arith.addf %68, %71 : vector<2x726xf32>
    %c13 = arith.constant 13 : index
    %73 = memref.load %arg2[%c13] : memref<54xf32, #tpu.memory_space<smem>>
    %74 = vector.broadcast %73 : f32 to vector<2x726xf32>
    %75 = arith.mulf %74, %5 : vector<2x726xf32>
    %76 = arith.addf %72, %75 : vector<2x726xf32>
    %c14 = arith.constant 14 : index
    %77 = memref.load %arg2[%c14] : memref<54xf32, #tpu.memory_space<smem>>
    %78 = vector.broadcast %77 : f32 to vector<2x726xf32>
    %79 = arith.mulf %78, %6 : vector<2x726xf32>
    %80 = arith.addf %76, %79 : vector<2x726xf32>
    %c15 = arith.constant 15 : index
    %81 = memref.load %arg2[%c15] : memref<54xf32, #tpu.memory_space<smem>>
    %82 = vector.broadcast %81 : f32 to vector<2x726xf32>
    %83 = arith.mulf %82, %7 : vector<2x726xf32>
    %84 = arith.addf %80, %83 : vector<2x726xf32>
    %c16 = arith.constant 16 : index
    %85 = memref.load %arg2[%c16] : memref<54xf32, #tpu.memory_space<smem>>
    %86 = vector.broadcast %85 : f32 to vector<2x726xf32>
    %87 = arith.mulf %86, %8 : vector<2x726xf32>
    %88 = arith.addf %84, %87 : vector<2x726xf32>
    %c17 = arith.constant 17 : index
    %89 = memref.load %arg2[%c17] : memref<54xf32, #tpu.memory_space<smem>>
    %90 = vector.broadcast %89 : f32 to vector<2x726xf32>
    %91 = arith.mulf %90, %9 : vector<2x726xf32>
    %92 = arith.addf %88, %91 : vector<2x726xf32>
    %c1_6 = arith.constant 1 : index
    %93 = memref.load %arg3[%c1_6] : memref<6xf32, #tpu.memory_space<smem>>
    %94 = vector.broadcast %93 : f32 to vector<2x726xf32>
    %95 = arith.addf %92, %94 : vector<2x726xf32>
    %cst_7 = arith.constant 0.000000e+00 : f32
    %96 = vector.broadcast %cst_7 : f32 to vector<2x726xf32>
    %97 = arith.maximumf %95, %96 : vector<2x726xf32>
    %98 = vector.extract_strided_slice %97 {offsets = [0, 0], sizes = [2, 725], strides = [1, 1]} : vector<2x726xf32> to vector<2x725xf32>
    %99 = vector.extract_strided_slice %97 {offsets = [0, 1], sizes = [2, 725], strides = [1, 1]} : vector<2x726xf32> to vector<2x725xf32>
    %100 = arith.maximumf %98, %99 : vector<2x725xf32>
    %101 = vector.extract_strided_slice %100 {offsets = [0, 0], sizes = [2, 697], strides = [1, 1]} : vector<2x725xf32> to vector<2x697xf32>
    %102 = vector.extract_strided_slice %100 {offsets = [0, 28], sizes = [2, 697], strides = [1, 1]} : vector<2x725xf32> to vector<2x697xf32>
    %103 = arith.maximumf %101, %102 : vector<2x697xf32>
    %cst_8 = arith.constant dense<0.000000e+00> : vector<2x169xf32>
    %104 = tpu.matmul %103, %10, %cst_8 {dimension_numbers = #tpu.dot_dimension_numbers<[1], [0], [0], [1], [0, 0, 1, 1], [], []>} : vector<2x697xf32>, vector<697x169xf32>, vector<2x169xf32> -> vector<2x169xf32>
    %c18 = arith.constant 18 : index
    %105 = memref.load %arg2[%c18] : memref<54xf32, #tpu.memory_space<smem>>
    %106 = vector.broadcast %105 : f32 to vector<2x726xf32>
    %107 = arith.mulf %106, %1 : vector<2x726xf32>
    %c19 = arith.constant 19 : index
    %108 = memref.load %arg2[%c19] : memref<54xf32, #tpu.memory_space<smem>>
    %109 = vector.broadcast %108 : f32 to vector<2x726xf32>
    %110 = arith.mulf %109, %2 : vector<2x726xf32>
    %111 = arith.addf %107, %110 : vector<2x726xf32>
    %c20 = arith.constant 20 : index
    %112 = memref.load %arg2[%c20] : memref<54xf32, #tpu.memory_space<smem>>
    %113 = vector.broadcast %112 : f32 to vector<2x726xf32>
    %114 = arith.mulf %113, %3 : vector<2x726xf32>
    %115 = arith.addf %111, %114 : vector<2x726xf32>
    %c21 = arith.constant 21 : index
    %116 = memref.load %arg2[%c21] : memref<54xf32, #tpu.memory_space<smem>>
    %117 = vector.broadcast %116 : f32 to vector<2x726xf32>
    %118 = arith.mulf %117, %4 : vector<2x726xf32>
    %119 = arith.addf %115, %118 : vector<2x726xf32>
    %c22 = arith.constant 22 : index
    %120 = memref.load %arg2[%c22] : memref<54xf32, #tpu.memory_space<smem>>
    %121 = vector.broadcast %120 : f32 to vector<2x726xf32>
    %122 = arith.mulf %121, %5 : vector<2x726xf32>
    %123 = arith.addf %119, %122 : vector<2x726xf32>
    %c23 = arith.constant 23 : index
    %124 = memref.load %arg2[%c23] : memref<54xf32, #tpu.memory_space<smem>>
    %125 = vector.broadcast %124 : f32 to vector<2x726xf32>
    %126 = arith.mulf %125, %6 : vector<2x726xf32>
    %127 = arith.addf %123, %126 : vector<2x726xf32>
    %c24 = arith.constant 24 : index
    %128 = memref.load %arg2[%c24] : memref<54xf32, #tpu.memory_space<smem>>
    %129 = vector.broadcast %128 : f32 to vector<2x726xf32>
    %130 = arith.mulf %129, %7 : vector<2x726xf32>
    %131 = arith.addf %127, %130 : vector<2x726xf32>
    %c25 = arith.constant 25 : index
    %132 = memref.load %arg2[%c25] : memref<54xf32, #tpu.memory_space<smem>>
    %133 = vector.broadcast %132 : f32 to vector<2x726xf32>
    %134 = arith.mulf %133, %8 : vector<2x726xf32>
    %135 = arith.addf %131, %134 : vector<2x726xf32>
    %c26 = arith.constant 26 : index
    %136 = memref.load %arg2[%c26] : memref<54xf32, #tpu.memory_space<smem>>
    %137 = vector.broadcast %136 : f32 to vector<2x726xf32>
    %138 = arith.mulf %137, %9 : vector<2x726xf32>
    %139 = arith.addf %135, %138 : vector<2x726xf32>
    %c2_9 = arith.constant 2 : index
    %140 = memref.load %arg3[%c2_9] : memref<6xf32, #tpu.memory_space<smem>>
    %141 = vector.broadcast %140 : f32 to vector<2x726xf32>
    %142 = arith.addf %139, %141 : vector<2x726xf32>
    %cst_10 = arith.constant 0.000000e+00 : f32
    %143 = vector.broadcast %cst_10 : f32 to vector<2x726xf32>
    %144 = arith.maximumf %142, %143 : vector<2x726xf32>
    %145 = vector.extract_strided_slice %144 {offsets = [0, 0], sizes = [2, 725], strides = [1, 1]} : vector<2x726xf32> to vector<2x725xf32>
    %146 = vector.extract_strided_slice %144 {offsets = [0, 1], sizes = [2, 725], strides = [1, 1]} : vector<2x726xf32> to vector<2x725xf32>
    %147 = arith.maximumf %145, %146 : vector<2x725xf32>
    %148 = vector.extract_strided_slice %147 {offsets = [0, 0], sizes = [2, 697], strides = [1, 1]} : vector<2x725xf32> to vector<2x697xf32>
    %149 = vector.extract_strided_slice %147 {offsets = [0, 28], sizes = [2, 697], strides = [1, 1]} : vector<2x725xf32> to vector<2x697xf32>
    %150 = arith.maximumf %148, %149 : vector<2x697xf32>
    %cst_11 = arith.constant dense<0.000000e+00> : vector<2x169xf32>
    %151 = tpu.matmul %150, %10, %cst_11 {dimension_numbers = #tpu.dot_dimension_numbers<[1], [0], [0], [1], [0, 0, 1, 1], [], []>} : vector<2x697xf32>, vector<697x169xf32>, vector<2x169xf32> -> vector<2x169xf32>
    %c27 = arith.constant 27 : index
    %152 = memref.load %arg2[%c27] : memref<54xf32, #tpu.memory_space<smem>>
    %153 = vector.broadcast %152 : f32 to vector<2x726xf32>
    %154 = arith.mulf %153, %1 : vector<2x726xf32>
    %c28 = arith.constant 28 : index
    %155 = memref.load %arg2[%c28] : memref<54xf32, #tpu.memory_space<smem>>
    %156 = vector.broadcast %155 : f32 to vector<2x726xf32>
    %157 = arith.mulf %156, %2 : vector<2x726xf32>
    %158 = arith.addf %154, %157 : vector<2x726xf32>
    %c29 = arith.constant 29 : index
    %159 = memref.load %arg2[%c29] : memref<54xf32, #tpu.memory_space<smem>>
    %160 = vector.broadcast %159 : f32 to vector<2x726xf32>
    %161 = arith.mulf %160, %3 : vector<2x726xf32>
    %162 = arith.addf %158, %161 : vector<2x726xf32>
    %c30 = arith.constant 30 : index
    %163 = memref.load %arg2[%c30] : memref<54xf32, #tpu.memory_space<smem>>
    %164 = vector.broadcast %163 : f32 to vector<2x726xf32>
    %165 = arith.mulf %164, %4 : vector<2x726xf32>
    %166 = arith.addf %162, %165 : vector<2x726xf32>
    %c31 = arith.constant 31 : index
    %167 = memref.load %arg2[%c31] : memref<54xf32, #tpu.memory_space<smem>>
    %168 = vector.broadcast %167 : f32 to vector<2x726xf32>
    %169 = arith.mulf %168, %5 : vector<2x726xf32>
    %170 = arith.addf %166, %169 : vector<2x726xf32>
    %c32 = arith.constant 32 : index
    %171 = memref.load %arg2[%c32] : memref<54xf32, #tpu.memory_space<smem>>
    %172 = vector.broadcast %171 : f32 to vector<2x726xf32>
    %173 = arith.mulf %172, %6 : vector<2x726xf32>
    %174 = arith.addf %170, %173 : vector<2x726xf32>
    %c33 = arith.constant 33 : index
    %175 = memref.load %arg2[%c33] : memref<54xf32, #tpu.memory_space<smem>>
    %176 = vector.broadcast %175 : f32 to vector<2x726xf32>
    %177 = arith.mulf %176, %7 : vector<2x726xf32>
    %178 = arith.addf %174, %177 : vector<2x726xf32>
    %c34 = arith.constant 34 : index
    %179 = memref.load %arg2[%c34] : memref<54xf32, #tpu.memory_space<smem>>
    %180 = vector.broadcast %179 : f32 to vector<2x726xf32>
    %181 = arith.mulf %180, %8 : vector<2x726xf32>
    %182 = arith.addf %178, %181 : vector<2x726xf32>
    %c35 = arith.constant 35 : index
    %183 = memref.load %arg2[%c35] : memref<54xf32, #tpu.memory_space<smem>>
    %184 = vector.broadcast %183 : f32 to vector<2x726xf32>
    %185 = arith.mulf %184, %9 : vector<2x726xf32>
    %186 = arith.addf %182, %185 : vector<2x726xf32>
    %c3_12 = arith.constant 3 : index
    %187 = memref.load %arg3[%c3_12] : memref<6xf32, #tpu.memory_space<smem>>
    %188 = vector.broadcast %187 : f32 to vector<2x726xf32>
    %189 = arith.addf %186, %188 : vector<2x726xf32>
    %cst_13 = arith.constant 0.000000e+00 : f32
    %190 = vector.broadcast %cst_13 : f32 to vector<2x726xf32>
    %191 = arith.maximumf %189, %190 : vector<2x726xf32>
    %192 = vector.extract_strided_slice %191 {offsets = [0, 0], sizes = [2, 725], strides = [1, 1]} : vector<2x726xf32> to vector<2x725xf32>
    %193 = vector.extract_strided_slice %191 {offsets = [0, 1], sizes = [2, 725], strides = [1, 1]} : vector<2x726xf32> to vector<2x725xf32>
    %194 = arith.maximumf %192, %193 : vector<2x725xf32>
    %195 = vector.extract_strided_slice %194 {offsets = [0, 0], sizes = [2, 697], strides = [1, 1]} : vector<2x725xf32> to vector<2x697xf32>
    %196 = vector.extract_strided_slice %194 {offsets = [0, 28], sizes = [2, 697], strides = [1, 1]} : vector<2x725xf32> to vector<2x697xf32>
    %197 = arith.maximumf %195, %196 : vector<2x697xf32>
    %cst_14 = arith.constant dense<0.000000e+00> : vector<2x169xf32>
    %198 = tpu.matmul %197, %10, %cst_14 {dimension_numbers = #tpu.dot_dimension_numbers<[1], [0], [0], [1], [0, 0, 1, 1], [], []>} : vector<2x697xf32>, vector<697x169xf32>, vector<2x169xf32> -> vector<2x169xf32>
    %c36 = arith.constant 36 : index
    %199 = memref.load %arg2[%c36] : memref<54xf32, #tpu.memory_space<smem>>
    %200 = vector.broadcast %199 : f32 to vector<2x726xf32>
    %201 = arith.mulf %200, %1 : vector<2x726xf32>
    %c37 = arith.constant 37 : index
    %202 = memref.load %arg2[%c37] : memref<54xf32, #tpu.memory_space<smem>>
    %203 = vector.broadcast %202 : f32 to vector<2x726xf32>
    %204 = arith.mulf %203, %2 : vector<2x726xf32>
    %205 = arith.addf %201, %204 : vector<2x726xf32>
    %c38 = arith.constant 38 : index
    %206 = memref.load %arg2[%c38] : memref<54xf32, #tpu.memory_space<smem>>
    %207 = vector.broadcast %206 : f32 to vector<2x726xf32>
    %208 = arith.mulf %207, %3 : vector<2x726xf32>
    %209 = arith.addf %205, %208 : vector<2x726xf32>
    %c39 = arith.constant 39 : index
    %210 = memref.load %arg2[%c39] : memref<54xf32, #tpu.memory_space<smem>>
    %211 = vector.broadcast %210 : f32 to vector<2x726xf32>
    %212 = arith.mulf %211, %4 : vector<2x726xf32>
    %213 = arith.addf %209, %212 : vector<2x726xf32>
    %c40 = arith.constant 40 : index
    %214 = memref.load %arg2[%c40] : memref<54xf32, #tpu.memory_space<smem>>
    %215 = vector.broadcast %214 : f32 to vector<2x726xf32>
    %216 = arith.mulf %215, %5 : vector<2x726xf32>
    %217 = arith.addf %213, %216 : vector<2x726xf32>
    %c41 = arith.constant 41 : index
    %218 = memref.load %arg2[%c41] : memref<54xf32, #tpu.memory_space<smem>>
    %219 = vector.broadcast %218 : f32 to vector<2x726xf32>
    %220 = arith.mulf %219, %6 : vector<2x726xf32>
    %221 = arith.addf %217, %220 : vector<2x726xf32>
    %c42 = arith.constant 42 : index
    %222 = memref.load %arg2[%c42] : memref<54xf32, #tpu.memory_space<smem>>
    %223 = vector.broadcast %222 : f32 to vector<2x726xf32>
    %224 = arith.mulf %223, %7 : vector<2x726xf32>
    %225 = arith.addf %221, %224 : vector<2x726xf32>
    %c43 = arith.constant 43 : index
    %226 = memref.load %arg2[%c43] : memref<54xf32, #tpu.memory_space<smem>>
    %227 = vector.broadcast %226 : f32 to vector<2x726xf32>
    %228 = arith.mulf %227, %8 : vector<2x726xf32>
    %229 = arith.addf %225, %228 : vector<2x726xf32>
    %c44 = arith.constant 44 : index
    %230 = memref.load %arg2[%c44] : memref<54xf32, #tpu.memory_space<smem>>
    %231 = vector.broadcast %230 : f32 to vector<2x726xf32>
    %232 = arith.mulf %231, %9 : vector<2x726xf32>
    %233 = arith.addf %229, %232 : vector<2x726xf32>
    %c4_15 = arith.constant 4 : index
    %234 = memref.load %arg3[%c4_15] : memref<6xf32, #tpu.memory_space<smem>>
    %235 = vector.broadcast %234 : f32 to vector<2x726xf32>
    %236 = arith.addf %233, %235 : vector<2x726xf32>
    %cst_16 = arith.constant 0.000000e+00 : f32
    %237 = vector.broadcast %cst_16 : f32 to vector<2x726xf32>
    %238 = arith.maximumf %236, %237 : vector<2x726xf32>
    %239 = vector.extract_strided_slice %238 {offsets = [0, 0], sizes = [2, 725], strides = [1, 1]} : vector<2x726xf32> to vector<2x725xf32>
    %240 = vector.extract_strided_slice %238 {offsets = [0, 1], sizes = [2, 725], strides = [1, 1]} : vector<2x726xf32> to vector<2x725xf32>
    %241 = arith.maximumf %239, %240 : vector<2x725xf32>
    %242 = vector.extract_strided_slice %241 {offsets = [0, 0], sizes = [2, 697], strides = [1, 1]} : vector<2x725xf32> to vector<2x697xf32>
    %243 = vector.extract_strided_slice %241 {offsets = [0, 28], sizes = [2, 697], strides = [1, 1]} : vector<2x725xf32> to vector<2x697xf32>
    %244 = arith.maximumf %242, %243 : vector<2x697xf32>
    %cst_17 = arith.constant dense<0.000000e+00> : vector<2x169xf32>
    %245 = tpu.matmul %244, %10, %cst_17 {dimension_numbers = #tpu.dot_dimension_numbers<[1], [0], [0], [1], [0, 0, 1, 1], [], []>} : vector<2x697xf32>, vector<697x169xf32>, vector<2x169xf32> -> vector<2x169xf32>
    %c45 = arith.constant 45 : index
    %246 = memref.load %arg2[%c45] : memref<54xf32, #tpu.memory_space<smem>>
    %247 = vector.broadcast %246 : f32 to vector<2x726xf32>
    %248 = arith.mulf %247, %1 : vector<2x726xf32>
    %c46 = arith.constant 46 : index
    %249 = memref.load %arg2[%c46] : memref<54xf32, #tpu.memory_space<smem>>
    %250 = vector.broadcast %249 : f32 to vector<2x726xf32>
    %251 = arith.mulf %250, %2 : vector<2x726xf32>
    %252 = arith.addf %248, %251 : vector<2x726xf32>
    %c47 = arith.constant 47 : index
    %253 = memref.load %arg2[%c47] : memref<54xf32, #tpu.memory_space<smem>>
    %254 = vector.broadcast %253 : f32 to vector<2x726xf32>
    %255 = arith.mulf %254, %3 : vector<2x726xf32>
    %256 = arith.addf %252, %255 : vector<2x726xf32>
    %c48 = arith.constant 48 : index
    %257 = memref.load %arg2[%c48] : memref<54xf32, #tpu.memory_space<smem>>
    %258 = vector.broadcast %257 : f32 to vector<2x726xf32>
    %259 = arith.mulf %258, %4 : vector<2x726xf32>
    %260 = arith.addf %256, %259 : vector<2x726xf32>
    %c49 = arith.constant 49 : index
    %261 = memref.load %arg2[%c49] : memref<54xf32, #tpu.memory_space<smem>>
    %262 = vector.broadcast %261 : f32 to vector<2x726xf32>
    %263 = arith.mulf %262, %5 : vector<2x726xf32>
    %264 = arith.addf %260, %263 : vector<2x726xf32>
    %c50 = arith.constant 50 : index
    %265 = memref.load %arg2[%c50] : memref<54xf32, #tpu.memory_space<smem>>
    %266 = vector.broadcast %265 : f32 to vector<2x726xf32>
    %267 = arith.mulf %266, %6 : vector<2x726xf32>
    %268 = arith.addf %264, %267 : vector<2x726xf32>
    %c51 = arith.constant 51 : index
    %269 = memref.load %arg2[%c51] : memref<54xf32, #tpu.memory_space<smem>>
    %270 = vector.broadcast %269 : f32 to vector<2x726xf32>
    %271 = arith.mulf %270, %7 : vector<2x726xf32>
    %272 = arith.addf %268, %271 : vector<2x726xf32>
    %c52 = arith.constant 52 : index
    %273 = memref.load %arg2[%c52] : memref<54xf32, #tpu.memory_space<smem>>
    %274 = vector.broadcast %273 : f32 to vector<2x726xf32>
    %275 = arith.mulf %274, %8 : vector<2x726xf32>
    %276 = arith.addf %272, %275 : vector<2x726xf32>
    %c53 = arith.constant 53 : index
    %277 = memref.load %arg2[%c53] : memref<54xf32, #tpu.memory_space<smem>>
    %278 = vector.broadcast %277 : f32 to vector<2x726xf32>
    %279 = arith.mulf %278, %9 : vector<2x726xf32>
    %280 = arith.addf %276, %279 : vector<2x726xf32>
    %c5_18 = arith.constant 5 : index
    %281 = memref.load %arg3[%c5_18] : memref<6xf32, #tpu.memory_space<smem>>
    %282 = vector.broadcast %281 : f32 to vector<2x726xf32>
    %283 = arith.addf %280, %282 : vector<2x726xf32>
    %cst_19 = arith.constant 0.000000e+00 : f32
    %284 = vector.broadcast %cst_19 : f32 to vector<2x726xf32>
    %285 = arith.maximumf %283, %284 : vector<2x726xf32>
    %286 = vector.extract_strided_slice %285 {offsets = [0, 0], sizes = [2, 725], strides = [1, 1]} : vector<2x726xf32> to vector<2x725xf32>
    %287 = vector.extract_strided_slice %285 {offsets = [0, 1], sizes = [2, 725], strides = [1, 1]} : vector<2x726xf32> to vector<2x725xf32>
    %288 = arith.maximumf %286, %287 : vector<2x725xf32>
    %289 = vector.extract_strided_slice %288 {offsets = [0, 0], sizes = [2, 697], strides = [1, 1]} : vector<2x725xf32> to vector<2x697xf32>
    %290 = vector.extract_strided_slice %288 {offsets = [0, 28], sizes = [2, 697], strides = [1, 1]} : vector<2x725xf32> to vector<2x697xf32>
    %291 = arith.maximumf %289, %290 : vector<2x697xf32>
    %cst_20 = arith.constant dense<0.000000e+00> : vector<2x169xf32>
    %292 = tpu.matmul %291, %10, %cst_20 {dimension_numbers = #tpu.dot_dimension_numbers<[1], [0], [0], [1], [0, 0, 1, 1], [], []>} : vector<2x697xf32>, vector<697x169xf32>, vector<2x169xf32> -> vector<2x169xf32>
    %293 = arith.truncf %57 : vector<2x169xf32> to vector<2x169xbf16>
    %c0_21 = arith.constant 0 : index
    %c0_22 = arith.constant 0 : index
    %c0_23 = arith.constant 0 : index
    %294 = vector.load %arg5[%c0_21, %c0_22, %c0_23] : memref<6x169x1936xbf16, #tpu.memory_space<vmem>>, vector<1x169x1936xbf16>
    %295 = vector.shape_cast %294 : vector<1x169x1936xbf16> to vector<169x1936xbf16>
    %cst_24 = arith.constant dense<0.000000e+00> : vector<2x1936xf32>
    %296 = tpu.matmul %293, %295, %cst_24 {dimension_numbers = #tpu.dot_dimension_numbers<[1], [0], [0], [1], [0, 0, 1, 1], [], []>} : vector<2x169xbf16>, vector<169x1936xbf16>, vector<2x1936xf32> -> vector<2x1936xf32>
    %297 = arith.truncf %104 : vector<2x169xf32> to vector<2x169xbf16>
    %c1_25 = arith.constant 1 : index
    %c0_26 = arith.constant 0 : index
    %c0_27 = arith.constant 0 : index
    %298 = vector.load %arg5[%c1_25, %c0_26, %c0_27] : memref<6x169x1936xbf16, #tpu.memory_space<vmem>>, vector<1x169x1936xbf16>
    %299 = vector.shape_cast %298 : vector<1x169x1936xbf16> to vector<169x1936xbf16>
    %cst_28 = arith.constant dense<0.000000e+00> : vector<2x1936xf32>
    %300 = tpu.matmul %297, %299, %cst_28 {dimension_numbers = #tpu.dot_dimension_numbers<[1], [0], [0], [1], [0, 0, 1, 1], [], []>} : vector<2x169xbf16>, vector<169x1936xbf16>, vector<2x1936xf32> -> vector<2x1936xf32>
    %301 = arith.addf %296, %300 : vector<2x1936xf32>
    %302 = arith.truncf %151 : vector<2x169xf32> to vector<2x169xbf16>
    %c2_29 = arith.constant 2 : index
    %c0_30 = arith.constant 0 : index
    %c0_31 = arith.constant 0 : index
    %303 = vector.load %arg5[%c2_29, %c0_30, %c0_31] : memref<6x169x1936xbf16, #tpu.memory_space<vmem>>, vector<1x169x1936xbf16>
    %304 = vector.shape_cast %303 : vector<1x169x1936xbf16> to vector<169x1936xbf16>
    %cst_32 = arith.constant dense<0.000000e+00> : vector<2x1936xf32>
    %305 = tpu.matmul %302, %304, %cst_32 {dimension_numbers = #tpu.dot_dimension_numbers<[1], [0], [0], [1], [0, 0, 1, 1], [], []>} : vector<2x169xbf16>, vector<169x1936xbf16>, vector<2x1936xf32> -> vector<2x1936xf32>
    %306 = arith.addf %301, %305 : vector<2x1936xf32>
    %307 = arith.truncf %198 : vector<2x169xf32> to vector<2x169xbf16>
    %c3_33 = arith.constant 3 : index
    %c0_34 = arith.constant 0 : index
    %c0_35 = arith.constant 0 : index
    %308 = vector.load %arg5[%c3_33, %c0_34, %c0_35] : memref<6x169x1936xbf16, #tpu.memory_space<vmem>>, vector<1x169x1936xbf16>
    %309 = vector.shape_cast %308 : vector<1x169x1936xbf16> to vector<169x1936xbf16>
    %cst_36 = arith.constant dense<0.000000e+00> : vector<2x1936xf32>
    %310 = tpu.matmul %307, %309, %cst_36 {dimension_numbers = #tpu.dot_dimension_numbers<[1], [0], [0], [1], [0, 0, 1, 1], [], []>} : vector<2x169xbf16>, vector<169x1936xbf16>, vector<2x1936xf32> -> vector<2x1936xf32>
    %311 = arith.addf %306, %310 : vector<2x1936xf32>
    %312 = arith.truncf %245 : vector<2x169xf32> to vector<2x169xbf16>
    %c4_37 = arith.constant 4 : index
    %c0_38 = arith.constant 0 : index
    %c0_39 = arith.constant 0 : index
    %313 = vector.load %arg5[%c4_37, %c0_38, %c0_39] : memref<6x169x1936xbf16, #tpu.memory_space<vmem>>, vector<1x169x1936xbf16>
    %314 = vector.shape_cast %313 : vector<1x169x1936xbf16> to vector<169x1936xbf16>
    %cst_40 = arith.constant dense<0.000000e+00> : vector<2x1936xf32>
    %315 = tpu.matmul %312, %314, %cst_40 {dimension_numbers = #tpu.dot_dimension_numbers<[1], [0], [0], [1], [0, 0, 1, 1], [], []>} : vector<2x169xbf16>, vector<169x1936xbf16>, vector<2x1936xf32> -> vector<2x1936xf32>
    %316 = arith.addf %311, %315 : vector<2x1936xf32>
    %317 = arith.truncf %292 : vector<2x169xf32> to vector<2x169xbf16>
    %c5_41 = arith.constant 5 : index
    %c0_42 = arith.constant 0 : index
    %c0_43 = arith.constant 0 : index
    %318 = vector.load %arg5[%c5_41, %c0_42, %c0_43] : memref<6x169x1936xbf16, #tpu.memory_space<vmem>>, vector<1x169x1936xbf16>
    %319 = vector.shape_cast %318 : vector<1x169x1936xbf16> to vector<169x1936xbf16>
    %cst_44 = arith.constant dense<0.000000e+00> : vector<2x1936xf32>
    %320 = tpu.matmul %317, %319, %cst_44 {dimension_numbers = #tpu.dot_dimension_numbers<[1], [0], [0], [1], [0, 0, 1, 1], [], []>} : vector<2x169xbf16>, vector<169x1936xbf16>, vector<2x1936xf32> -> vector<2x1936xf32>
    %321 = arith.addf %316, %320 : vector<2x1936xf32>
    %c0_45 = arith.constant 0 : index
    %c0_46 = arith.constant 0 : index
    %322 = vector.load %arg6[%c0_45, %c0_46] : memref<1x1936xf32, #tpu.memory_space<vmem>>, vector<1x1936xf32>
    %323 = vector.broadcast %322 : vector<1x1936xf32> to vector<2x1936xf32>
    %324 = arith.addf %321, %323 : vector<2x1936xf32>
    %cst_47 = arith.constant 0.000000e+00 : f32
    %325 = vector.broadcast %cst_47 : f32 to vector<2x1936xf32>
    %326 = arith.maximumf %324, %325 : vector<2x1936xf32>
    %327 = vector.extract_strided_slice %326 {offsets = [0, 0], sizes = [2, 1935], strides = [1, 1]} : vector<2x1936xf32> to vector<2x1935xf32>
    %328 = vector.extract_strided_slice %326 {offsets = [0, 1], sizes = [2, 1935], strides = [1, 1]} : vector<2x1936xf32> to vector<2x1935xf32>
    %329 = arith.maximumf %327, %328 : vector<2x1935xf32>
    %330 = vector.extract_strided_slice %329 {offsets = [0, 0], sizes = [2, 1924], strides = [1, 1]} : vector<2x1935xf32> to vector<2x1924xf32>
    %331 = vector.extract_strided_slice %329 {offsets = [0, 11], sizes = [2, 1924], strides = [1, 1]} : vector<2x1935xf32> to vector<2x1924xf32>
    %332 = arith.maximumf %330, %331 : vector<2x1924xf32>
    %c0_48 = arith.constant 0 : index
    %c0_49 = arith.constant 0 : index
    %333 = vector.load %arg7[%c0_48, %c0_49] : memref<1924x128xf32, #tpu.memory_space<vmem>>, vector<1924x128xf32>
    %cst_50 = arith.constant dense<0.000000e+00> : vector<2x128xf32>
    %334 = tpu.matmul %332, %333, %cst_50 {dimension_numbers = #tpu.dot_dimension_numbers<[1], [0], [0], [1], [0, 0, 1, 1], [], []>} : vector<2x1924xf32>, vector<1924x128xf32>, vector<2x128xf32> -> vector<2x128xf32>
    %c0_51 = arith.constant 0 : index
    %c0_52 = arith.constant 0 : index
    %335 = vector.load %arg8[%c0_51, %c0_52] : memref<1x128xf32, #tpu.memory_space<vmem>>, vector<1x128xf32>
    %336 = vector.broadcast %335 : vector<1x128xf32> to vector<2x128xf32>
    %337 = arith.addf %334, %336 : vector<2x128xf32>
    %cst_53 = arith.constant 0.000000e+00 : f32
    %338 = vector.broadcast %cst_53 : f32 to vector<2x128xf32>
    %339 = arith.maximumf %337, %338 : vector<2x128xf32>
    %c0_54 = arith.constant 0 : index
    %c0_55 = arith.constant 0 : index
    %340 = vector.load %arg9[%c0_54, %c0_55] : memref<128x128xf32, #tpu.memory_space<vmem>>, vector<128x128xf32>
    %cst_56 = arith.constant dense<0.000000e+00> : vector<2x128xf32>
    %341 = tpu.matmul %339, %340, %cst_56 {dimension_numbers = #tpu.dot_dimension_numbers<[1], [0], [0], [1], [0, 0, 1, 1], [], []>} : vector<2x128xf32>, vector<128x128xf32>, vector<2x128xf32> -> vector<2x128xf32>
    %c0_57 = arith.constant 0 : index
    %c0_58 = arith.constant 0 : index
    %342 = vector.load %arg10[%c0_57, %c0_58] : memref<1x128xf32, #tpu.memory_space<vmem>>, vector<1x128xf32>
    %343 = vector.broadcast %342 : vector<1x128xf32> to vector<2x128xf32>
    %344 = arith.addf %341, %343 : vector<2x128xf32>
    %cst_59 = arith.constant 0.000000e+00 : f32
    %345 = vector.broadcast %cst_59 : f32 to vector<2x128xf32>
    %346 = arith.maximumf %344, %345 : vector<2x128xf32>
    %c0_60 = arith.constant 0 : index
    %c0_61 = arith.constant 0 : index
    %347 = vector.load %arg11[%c0_60, %c0_61] : memref<128x10xf32, #tpu.memory_space<vmem>>, vector<128x10xf32>
    %cst_62 = arith.constant dense<0.000000e+00> : vector<2x10xf32>
    %348 = tpu.matmul %346, %347, %cst_62 {dimension_numbers = #tpu.dot_dimension_numbers<[1], [0], [0], [1], [0, 0, 1, 1], [], []>} : vector<2x128xf32>, vector<128x10xf32>, vector<2x10xf32> -> vector<2x10xf32>
    %c0_63 = arith.constant 0 : index
    %c0_64 = arith.constant 0 : index
    %349 = vector.load %arg12[%c0_63, %c0_64] : memref<1x10xf32, #tpu.memory_space<vmem>>, vector<1x10xf32>
    %350 = vector.broadcast %349 : vector<1x10xf32> to vector<2x10xf32>
    %351 = arith.addf %348, %350 : vector<2x10xf32>
    %cst_65 = arith.constant dense<0xFF800000> : vector<2xf32>
    %352 = vector.multi_reduction <maximumf>, %351, %cst_65 [1] : vector<2x10xf32> to vector<2xf32>
    %353 = vector.shape_cast %352 : vector<2xf32> to vector<2x1xf32>
    %354 = vector.broadcast %353 : vector<2x1xf32> to vector<2x10xf32>
    %355 = arith.subf %351, %354 : vector<2x10xf32>
    %356 = math.exp %355 : vector<2x10xf32>
    %cst_66 = arith.constant dense<0.000000e+00> : vector<2xf32>
    %357 = vector.multi_reduction <add>, %356, %cst_66 [1] : vector<2x10xf32> to vector<2xf32>
    %358 = vector.shape_cast %357 : vector<2xf32> to vector<2x1xf32>
    %359 = math.log %358 : vector<2x1xf32>
    %360 = vector.broadcast %359 : vector<2x1xf32> to vector<2x10xf32>
    %361 = arith.subf %355, %360 : vector<2x10xf32>
    %c0_67 = arith.constant 0 : index
    %c0_68 = arith.constant 0 : index
    %362 = vector.load %arg13[%c0_67, %c0_68] : memref<2x10xf32, #tpu.memory_space<vmem>>, vector<2x10xf32>
    tpu.vector_store %arg13[%c0_67, %c0_68], %361 {strides = array<i32>} : memref<2x10xf32, #tpu.memory_space<vmem>>, vector<2x10xf32>,
    return
  }
  func.func @transform_0(%arg0: i32) -> (i32, i32) {
    %c0_i32 = arith.constant 0 : i32
    %c0_i32_0 = arith.constant 0 : i32
    return %arg0, %c0_i32 : i32, i32
  }
  func.func @transform_1(%arg0: i32) -> i32 {
    %c0_i32 = arith.constant 0 : i32
    %c0_i32_0 = arith.constant 0 : i32
    return %c0_i32 : i32
  }
  func.func @transform_2(%arg0: i32) -> i32 {
    %c0_i32 = arith.constant 0 : i32
    %c0_i32_0 = arith.constant 0 : i32
    return %c0_i32 : i32
  }
  func.func @transform_3(%arg0: i32) -> (i32, i32) {
    %c0_i32 = arith.constant 0 : i32
    %c0_i32_0 = arith.constant 0 : i32
    %c0_i32_1 = arith.constant 0 : i32
    return %c0_i32, %c0_i32_0 : i32, i32
  }
  func.func @transform_4(%arg0: i32) -> (i32, i32, i32) {
    %c0_i32 = arith.constant 0 : i32
    %c0_i32_0 = arith.constant 0 : i32
    %c0_i32_1 = arith.constant 0 : i32
    %c0_i32_2 = arith.constant 0 : i32
    return %c0_i32, %c0_i32_0, %c0_i32_1 : i32, i32, i32
  }
  func.func @transform_5(%arg0: i32) -> (i32, i32) {
    %c0_i32 = arith.constant 0 : i32
    %c0_i32_0 = arith.constant 0 : i32
    %c0_i32_1 = arith.constant 0 : i32
    return %c0_i32, %c0_i32_0 : i32, i32
  }
  func.func @transform_6(%arg0: i32) -> (i32, i32) {
    %c0_i32 = arith.constant 0 : i32
    %c0_i32_0 = arith.constant 0 : i32
    %c0_i32_1 = arith.constant 0 : i32
    return %c0_i32, %c0_i32_0 : i32, i32
  }
  func.func @transform_7(%arg0: i32) -> (i32, i32) {
    %c0_i32 = arith.constant 0 : i32
    %c0_i32_0 = arith.constant 0 : i32
    %c0_i32_1 = arith.constant 0 : i32
    return %c0_i32, %c0_i32_0 : i32, i32
  }
  func.func @transform_8(%arg0: i32) -> (i32, i32) {
    %c0_i32 = arith.constant 0 : i32
    %c0_i32_0 = arith.constant 0 : i32
    %c0_i32_1 = arith.constant 0 : i32
    return %c0_i32, %c0_i32_0 : i32, i32
  }
  func.func @transform_9(%arg0: i32) -> (i32, i32) {
    %c0_i32 = arith.constant 0 : i32
    %c0_i32_0 = arith.constant 0 : i32
    %c0_i32_1 = arith.constant 0 : i32
    return %c0_i32, %c0_i32_0 : i32, i32
  }
  func.func @transform_10(%arg0: i32) -> (i32, i32) {
    %c0_i32 = arith.constant 0 : i32
    %c0_i32_0 = arith.constant 0 : i32
    %c0_i32_1 = arith.constant 0 : i32
    return %c0_i32, %c0_i32_0 : i32, i32
  }
  func.func @transform_11(%arg0: i32) -> (i32, i32) {
    %c0_i32 = arith.constant 0 : i32
    %c0_i32_0 = arith.constant 0 : i32
    %c0_i32_1 = arith.constant 0 : i32
    return %c0_i32, %c0_i32_0 : i32, i32
  }
  func.func @transform_12(%arg0: i32) -> (i32, i32) {
    %c0_i32 = arith.constant 0 : i32
    %c0_i32_0 = arith.constant 0 : i32
    return %arg0, %c0_i32 : i32, i32
  }
}

</mosaic_0001>

<bundles_post_ra>
// kernel: mnist_cnn_forward.1
= control target key start
LH: loop header
LB: loop body
LE: loop exit
PB: predicated region body
PF: predicated region fallthrough
CT: control target
= control target key end

     0   :  { %17 = vsyncpa [#allocation5], 0  ;;  %s19509_s0 = inlined_call_operand.vmem [shape: f32[2,784], index: 0, kind: input, shape index: {}]   ;;  %s19510_s1 = inlined_call_operand.hbm [shape: f32[54], index: 1, kind: input, shape index: {}]   ;;  %s19511_s2 = inlined_call_operand.hbm [shape: f32[6], index: 2, kind: input, shape index: {}]   ;;  %s19512_s3 = inlined_call_operand.vmem [shape: f32[697,169], index: 3, kind: input, shape index: {}]   ;;  %s19513_s4 = inlined_call_operand.hbm [shape: bf16[6,169,1936], index: 4, kind: input, shape index: {}]   ;;  %s19514_s5 = inlined_call_operand.hbm [shape: f32[1,1936], index: 5, kind: input, shape index: {}]   ;;  %s19515_s6 = inlined_call_operand.hbm [shape: f32[1924,128], index: 6, kind: input, shape index: {}]   ;;  %s19516_s7 = inlined_call_operand.hbm [shape: f32[1,128], index: 7, kind: input, shape index: {}]   ;;  %s19517_s8 = inlined_call_operand.hbm [shape: f32[128,128], index: 8, kind: input, shape index: {}]   ;;  %s19518_s9 = inlined_call_operand.hbm [shape: f32[1,128], index: 9, kind: input, shape index: {}]   ;;  %s19519_s10 = inlined_call_operand.vmem [shape: f32[128,10], index: 10, kind: input, shape index: {}]   ;;  %s19520_s11 = inlined_call_operand.hbm [shape: f32[1,10], index: 11, kind: input, shape index: {}]   ;;  %s19521_s12 = inlined_call_operand.hbm [shape: f32[2,10], index: 12, kind: output, shape index: {}]  }
   0x1   :  { %18 = vsyncpa [#allocation7], 0 }
   0x2   :  { %19 = vsyncpa [#allocation3], 0 }
   0x3   :  { %20 = vsyncpa [#allocation10], 0 }
   0x4   :  { %21 = vsyncpa [#allocation13], 0 }
   0x5   :  { %22 = vsyncpa [#allocation16], 0 }
   0x6   :  { %23 = vsyncpa [#allocation4], 0  ;;  %s16163_s21 = smov [#allocation9]   ;;  %s16164_s23 = smov [#allocation12]  }
   0x7   :  { %s62_s22 = sshll.u32 %s16163_s21, 4  ;;  %s84_s24 = sshll.u32 %s16164_s23, 4  ;;  %s63_s22 = int_to_ptr.vmem [resolvable:$true] %s62_s22  ;;  %s85_s24 = int_to_ptr.vmem [resolvable:$true] %s84_s24 }
   0x8   :  { %s15953_s27 = scalar_lea.hbm %s19514_s5, 256 }
   0x9   :  { %p15954_p0 = scmp.ne.s32.totalorder %s19514_s5, %s15953_s27  ;;  %p15957_p1 = scmp.lt.u32.totalorder %s15953_s27, %s19514_s5 }
   0xb   :  { %p15959_p2 = pnand %p15957_p1, %p15954_p0 }
   0xd   :  { %15962 = shalt.err (!%p15959_p2)
}
   0xe   :  { %s15963_s14 = scalar_lea.vmem %s63_s22, 256  ;;  %p15968_p4 = scmp.lt.s32.totalorder %s63_s22, %s63_s22 }
   0xf   :  { %p15964_p3 = scmp.ne.s32.totalorder %s63_s22, %s15963_s14  ;;  %p15969_p5 = scmp.lt.s32.totalorder %s15963_s14, %s15963_s14 }
  0x11   :  { %p15970_p6 = por %p15969_p5, %p15968_p4 }
  0x13   :  { %p15971_p7 = pnand %p15970_p6, %p15964_p3 }
  0x15   :  { %15974 = shalt.err (!%p15971_p7)
}
  0x16   :  { %65 = dma.hbm_to_vmem [thread:$0]  %s19514_s5, 256, %s63_s22, [#allocation10]  }
  0x17   :  { %s15975_s19 = scalar_lea.hbm %s19516_s7, 16 }
  0x18   :  { %p15976_p8 = scmp.ne.s32.totalorder %s19516_s7, %s15975_s19  ;;  %p15979_p9 = scmp.lt.u32.totalorder %s15975_s19, %s19516_s7 }
  0x1a   :  { %p15981_p10 = pnand %p15979_p9, %p15976_p8 }
  0x1c   :  { %15984 = shalt.err (!%p15981_p10)
}
  0x1d   :  { %s15985_s26 = scalar_lea.vmem %s85_s24, 16  ;;  %s15989_s27 = scalar_lea.vmem %s85_s24, 32 }
  0x1e   :  { %p15986_p11 = scmp.ne.s32.totalorder %s85_s24, %s15985_s26  ;;  %p15990_p12 = scmp.lt.s32.totalorder %s85_s24, %s85_s24 }
  0x1f   :  { %p15991_p13 = scmp.lt.s32.totalorder %s15989_s27, %s15985_s26 }
  0x21   :  { %p15992_p0 = por %p15991_p13, %p15990_p12 }
  0x23   :  { %p15993_p1 = pnand %p15992_p0, %p15986_p11 }
  0x25   :  { %15996 = shalt.err (!%p15993_p1)
}
  0x26   :  { %87 = dma.hbm_to_vmem [thread:$0]  %s19516_s7, 16, %s85_s24, [#allocation13]  }
  0x27   :  { %s16165_s28 = smov [#allocation15]   ;;  %s15997_s14 = scalar_lea.hbm %s19518_s9, 16 }
  0x28   :  { %s106_s29 = sshll.u32 %s16165_s28, 4  ;;  %p15998_p2 = scmp.ne.s32.totalorder %s19518_s9, %s15997_s14  ;;  %s107_s29 = int_to_ptr.vmem [resolvable:$true] %s106_s29 }
  0x29   :  { %p16001_p3 = scmp.lt.u32.totalorder %s15997_s14, %s19518_s9 }
  0x2b   :  { %p16003_p4 = pnand %p16001_p3, %p15998_p2 }
  0x2d   :  { %16006 = shalt.err (!%p16003_p4)
}
  0x2e   :  { %s16007_s19 = scalar_lea.vmem %s107_s29, 16  ;;  %s16011_s7 = scalar_lea.vmem %s107_s29, 32 }
  0x2f   :  { %p16008_p5 = scmp.ne.s32.totalorder %s107_s29, %s16007_s19  ;;  %p16012_p6 = scmp.lt.s32.totalorder %s107_s29, %s107_s29 }
  0x30   :  { %p16013_p7 = scmp.lt.s32.totalorder %s16011_s7, %s16007_s19 }
  0x32   :  { %p16014_p8 = por %p16013_p7, %p16012_p6 }
  0x34   :  { %p16015_p9 = pnand %p16014_p8, %p16008_p5 }
  0x36   :  { %16018 = shalt.err (!%p16015_p9)
}
  0x37   :  { %109 = dma.hbm_to_vmem [thread:$0]  %s19518_s9, 16, %s107_s29, [#allocation16]  }
  0x38   :  { %s16019_s25 = scalar_lea.hbm %s19510_s1, 16 }
  0x39   :  { %p16020_p10 = scmp.ne.s32.totalorder %s19510_s1, %s16019_s25  ;;  %p16023_p11 = scmp.lt.u32.totalorder %s16019_s25, %s19510_s1 }
  0x3b   :  { %p16025_p12 = pnand %p16023_p11, %p16020_p10 }
  0x3d   :  { %16028 = shalt.err (!%p16025_p12)
}
  0x3e   :  { %s16166_s28 = smov [#allocation2]   ;;  %s16029_s14 = scalar_lea.hbm %s19511_s2, 16 }
  0x3f   :  { %33 = dma.hbm_to_smem %s19510_s1, 16, %s16166_s28, [#allocation5]  }
  0x40   :  { %p16030_p13 = scmp.ne.s32.totalorder %s19511_s2, %s16029_s14  ;;  %p16033_p0 = scmp.lt.u32.totalorder %s16029_s14, %s19511_s2 }
  0x42   :  { %p16035_p1 = pnand %p16033_p0, %p16030_p13 }
  0x44   :  { %16038 = shalt.err (!%p16035_p1)
}
  0x45   :  { %s16167_s19 = smov [#allocation6]   ;;  %s16168_s1 = smov [#allocation8]  }
  0x46   :  { %41 = dma.hbm_to_smem %s19511_s2, 16, %s16167_s19, [#allocation7]  }
  0x47   :  { %s49_s20 = sshll.u32 %s16168_s1, 4  ;;  %s16039_s25 = scalar_lea.hbm %s19513_s4, 135168  ;;  %s50_s20 = int_to_ptr.vmem [resolvable:$true] %s49_s20 }
  0x48   :  { %p16040_p2 = scmp.ne.s32.totalorder %s19513_s4, %s16039_s25  ;;  %p16043_p3 = scmp.lt.u32.totalorder %s16039_s25, %s19513_s4 }
  0x4a   :  { %p16045_p4 = pnand %p16043_p3, %p16040_p2 }
  0x4c   :  { %16048 = shalt.err (!%p16045_p4)
}
  0x4d   :  { %s16049_s28 = scalar_lea.vmem %s50_s20, 135168  ;;  %p16054_p6 = scmp.lt.s32.totalorder %s50_s20, %s50_s20 }
  0x4e   :  { %p16050_p5 = scmp.ne.s32.totalorder %s50_s20, %s16049_s28  ;;  %p16055_p7 = scmp.lt.s32.totalorder %s16049_s28, %s16049_s28 }
  0x50   :  { %p16056_p8 = por %p16055_p7, %p16054_p6 }
  0x52   :  { %p16057_p9 = pnand %p16056_p8, %p16050_p5 }
  0x54   :  { %16060 = shalt.err (!%p16057_p9)
}
  0x55   :  { %s16169_s2 = smov 1024   ;;  %s16170_s30 = smov 64  }
  0x56   :  { %55 = dma.hbm_to_vmem [thread:$0]  %s19513_s4, 135168, %s50_s20, [#allocation3], %s16169_s2, %s16169_s2, %s16170_s30  }
  0x57   :  { %s16171_s29 = smov [#allocation11]   ;;  %s16061_s17 = scalar_lea.hbm %s19515_s6, 30848 }
  0x58   :  { %s71_s14 = sshll.u32 %s16171_s29, 4  ;;  %p16062_p10 = scmp.ne.s32.totalorder %s19515_s6, %s16061_s17  ;;  %s72_s14 = int_to_ptr.vmem [resolvable:$true] %s71_s14 }
  0x59   :  { %p16065_p11 = scmp.lt.u32.totalorder %s16061_s17, %s19515_s6 }
  0x5b   :  { %p16067_p12 = pnand %p16065_p11, %p16062_p10 }
  0x5d   :  { %16070 = shalt.err (!%p16067_p12)
}
  0x5e   :  { %s16071_s1 = scalar_lea.vmem %s72_s14, 30848  ;;  %p16076_p0 = scmp.lt.s32.totalorder %s72_s14, %s72_s14 }
  0x5f   :  { %p16072_p13 = scmp.ne.s32.totalorder %s72_s14, %s16071_s1  ;;  %p16077_p1 = scmp.lt.s32.totalorder %s16071_s1, %s16071_s1 }
  0x61   :  { %p16078_p2 = por %p16077_p1, %p16076_p0 }
  0x63   :  { %p16079_p3 = pnand %p16078_p2, %p16072_p13 }
  0x65   :  { %16082 = shalt.err (!%p16079_p3)
}
  0x66   :  { %s16172_s4 = smov 128   ;;  %s16173_s20 = smov 8  }
  0x67   :  { %77 = dma.hbm_to_vmem [thread:$0]  %s19515_s6, 30848, %s72_s14, [#allocation10], %s16172_s4, %s16172_s4, %s16173_s20  }
  0x68   :  { %s16174_s25 = smov [#allocation14]   ;;  %s16175_s27 = smov [#allocation17]  }
  0x69   :  { %s93_s26 = sshll.u32 %s16174_s25, 4  ;;  %s118_s5 = sshll.u32 %s16175_s27, 4  ;;  %s94_s26 = int_to_ptr.vmem [resolvable:$true] %s93_s26  ;;  %s119_s5 = int_to_ptr.vmem [resolvable:$true] %s118_s5 }
  0x6a   :  { %s16083_s2 = scalar_lea.hbm %s19517_s8, 2048 }
  0x6b   :  { %p16084_p4 = scmp.ne.s32.totalorder %s19517_s8, %s16083_s2  ;;  %p16087_p5 = scmp.lt.u32.totalorder %s16083_s2, %s19517_s8 }
  0x6d   :  { %p16089_p6 = pnand %p16087_p5, %p16084_p4 }
  0x6f   :  { %16092 = shalt.err (!%p16089_p6)
}
  0x70   :  { %s16093_s6 = scalar_lea.vmem %s94_s26, 2048  ;;  %p16098_p8 = scmp.lt.s32.totalorder %s94_s26, %s94_s26 }
  0x71   :  { %p16094_p7 = scmp.ne.s32.totalorder %s94_s26, %s16093_s6  ;;  %p16099_p9 = scmp.lt.s32.totalorder %s16093_s6, %s16093_s6 }
  0x73   :  { %p16100_p10 = por %p16099_p9, %p16098_p8 }
  0x75   :  { %p16101_p11 = pnand %p16100_p10, %p16094_p7 }
  0x77   :  { %16104 = shalt.err (!%p16101_p11)
}
  0x78   :  { %99 = dma.hbm_to_vmem [thread:$0]  %s19517_s8, 2048, %s94_s26, [#allocation13], %s16172_s4, %s16172_s4, %s16173_s20  }
  0x79   :  { %s16105_s18 = scalar_lea.hbm %s19520_s11, 16 }
  0x7a   :  { %p16106_p12 = scmp.ne.s32.totalorder %s19520_s11, %s16105_s18  ;;  %p16109_p13 = scmp.lt.u32.totalorder %s16105_s18, %s19520_s11 }
  0x7c   :  { %p16111_p0 = pnand %p16109_p13, %p16106_p12 }
  0x7e   :  { %16114 = shalt.err (!%p16111_p0)
}
  0x7f   :  { %s16115_s21 = scalar_lea.vmem %s119_s5, 16  ;;  %s16119_s23 = scalar_lea.vmem %s119_s5, 32 }
  0x80   :  { %p16116_p1 = scmp.ne.s32.totalorder %s119_s5, %s16115_s21  ;;  %p16120_p2 = scmp.lt.s32.totalorder %s119_s5, %s119_s5 }
  0x81   :  { %p16121_p3 = scmp.lt.s32.totalorder %s16119_s23, %s16115_s21 }
  0x83   :  { %p16122_p4 = por %p16121_p3, %p16120_p2 }
  0x85   :  { %p16123_p5 = pnand %p16122_p4, %p16116_p1 }
  0x87   :  { %16126 = shalt.err (!%p16123_p5)
}
  0x88   :  { %121 = dma.hbm_to_vmem [thread:$0]  %s19520_s11, 16, %s119_s5, [#allocation16]  }
  0x89   :  { %16149 = dma.done.wait [#allocation5], 16  }
  0x8a   :  { %16150 = vsyncadd [#allocation5], 4294967280 }
  0x8b   :  { %16151 = dma.done.wait [#allocation7], 16  }
  0x8c   :  { %16152 = vsyncadd [#allocation7], 4294967280 }
  0x8d   :  { %16153 = dma.done.wait [#allocation3], 135168  }
  0x8e   :  { %16154 = vsyncadd [#allocation3], 4294832128 }
  0x8f   :  { %16155 = dma.done.wait [#allocation10], 31104  }
  0x90   :  { %16156 = vsyncadd [#allocation10], 4294936192 }
  0x91   :  { %16157 = dma.done.wait [#allocation13], 2064  }
  0x92   :  { %16158 = vsyncadd [#allocation13], 4294965232 }
  0x93   :  { %16159 = dma.done.wait [#allocation16], 32  }
  0x94   :  { %16160 = vsyncadd [#allocation16], 4294967264 }
  0x95   :  { %149 = sfence }
  0x96   :  { %s12925_s20 = sld [smem:[#allocation2 + $0x2]]  ;;  %s12924_s25 = sld [smem:[#allocation2 + $0x1]]  ;;  %v16368_v0 = vld [vmem:[%s19509_s0] sm:$0xff]  ;;  %v16373_v1 = vld [vmem:[%s19509_s0 + $0x8] sm:$0x3f]  ;;  %vm345_vm0 = vcmask 1045504  }
  0x97   :  { %s12926_s26 = sld [smem:[#allocation2 + $0x3]]  ;;  %s12927_s28 = sld [smem:[#allocation2 + $0x4]]  ;;  %vm347_vm1 = vcmask 1039360   ;;  %vm367_vm2 = vcmask 1031168   ;;  %vm387_vm3 = vcmask 818176   ;;  %vm407_vm4 = vcmask 809984  }
  0x98   :  { %s16176_s2 = smov 126   ;;  %s16177_s30 = smov 127   ;;  %vm427_vm5 = vcmask 801792   ;;  %vm447_vm6 = vcmask 588800   ;;  %vm467_vm7 = vcmask 580608   ;;  %vm487_vm8 = vcmask 572416  }
  0x99   :  { %s12928_s13 = sld [smem:[#allocation2 + $0x5]]  ;;  %s12929_s9 = sld [smem:[#allocation2 + $0x6]]  ;;  %vm562_vm9 = vcmask 465920   ;;  %vm565_vm10 = vcmask 1040384   ;;  %vm16185_vm11 = vmmov 1   ;;  %vm4201_vm13 = vcmask 334848  }
  0x9a   :  { %s16178_s29 = smov 100   ;;  %s12930_s6 = sld [smem:[#allocation2 + $0x7]]  ;;  %vm17740_vm12 = vmpackc.low %vm565_vm10, %vm16185_vm11  ;;  %vm4205_vm14 = vcmask 1043456   ;;  %vm4206_vm15 = vcmask 1044480  }
  0x9b   :  { %s16179_s14 = smov 99   ;;  %s12931_s15 = sld [smem:[#allocation2 + $0x8]] }
  0x9c   :  { %v355_v2 = vstv %s12925_s20  ;;  %v334_v4 = vstv %s12924_s25  ;;  %s16180_s16 = smov 98   ;;  %s12936_s17 = sld [smem:[#allocation2 + $0xa]] }
  0x9d   :  { %v356_v3 = vmul.f32 %v355_v2, %v16368_v0  ;;  %v335_v5 = vmul.f32 %v334_v4, %v16368_v0  ;;  %v357_v6 = vmul.f32 %v355_v2, %v16373_v1  ;;  %v336_v7 = vmul.f32 %v334_v4, %v16373_v1  ;;  %s16181_s18 = smov 72   ;;  %s12937_s19 = sld [smem:[#allocation2 + $0xb]] }
  0x9e   :  { %v375_v8 = vstv %s12926_s26  ;;  %v395_v11 = vstv %s12927_s28  ;;  %s16182_s7 = smov 71   ;;  %s12938_s24 = sld [smem:[#allocation2 + $0xc]] }
  0x9f   :  { %360 = vrot.lane.b32.xlu1 %v356_v3, %s16176_s2  ;;  %339 = vrot.lane.b32.xlu0 %v335_v5, %s16177_s30  ;;  %v377_v9 = vmul.f32 %v375_v8, %v16373_v1  ;;  %v376_v10 = vmul.f32 %v375_v8, %v16368_v0  ;;  %v397_v12 = vmul.f32 %v395_v11, %v16373_v1  ;;  %v415_v14 = vstv %s12928_s13  ;;  %s16183_s1 = smov 70   ;;  %s12939_s21 = sld [smem:[#allocation2 + $0xd]] }
  0xa0   :  { %v396_v13 = vmul.f32 %v395_v11, %v16368_v0  ;;  %v417_v15 = vmul.f32 %v415_v14, %v16373_v1  ;;  %v416_v16 = vmul.f32 %v415_v14, %v16368_v0  ;;  %v435_v17 = vstv %s12929_s9  ;;  %s12940_s23 = sld [smem:[#allocation2 + $0xe]]  ;;  %s12941_s8 = sld [smem:[#allocation2 + $0xf]] }
  0xa1   :  { %v437_v18 = vmul.f32 %v435_v17, %v16373_v1  ;;  %v436_v19 = vmul.f32 %v435_v17, %v16368_v0  ;;  %v455_v20 = vstv %s12930_s6  ;;  %v475_v23 = vstv %s12931_s15  ;;  %s12942_s4 = sld [smem:[#allocation2 + $0x10]]  ;;  %s12943_s20 = sld [smem:[#allocation2 + $0x11]] }
  0xa2   :  { %v457_v21 = vmul.f32 %v455_v20, %v16373_v1  ;;  %v456_v22 = vmul.f32 %v455_v20, %v16368_v0  ;;  %v477_v24 = vmul.f32 %v475_v23, %v16373_v1  ;;  %v476_v25 = vmul.f32 %v475_v23, %v16368_v0  ;;  %s329_s25 = sld [smem:[#allocation2]]  ;;  %s12935_s27 = sld [smem:[#allocation2 + $0x9]] }
  0xa3   :  { %362 = vrot.lane.b32.xlu1 %v357_v6, %s16176_s2  ;;  %341 = vrot.lane.b32.xlu0 %v336_v7, %s16177_s30  ;;  %v790_v26 = vstv %s12936_s17  ;;  %v809_v29 = vstv %s12937_s19  ;;  %s16455_s26 = sld [smem:[#allocation6]]  ;;  %s16496_s22 = sld [smem:[#allocation6 + $0x1]] }
  0xa4   :  { %v792_v27 = vmul.f32 %v790_v26, %v16373_v1  ;;  %v791_v28 = vmul.f32 %v790_v26, %v16368_v0  ;;  %v811_v30 = vmul.f32 %v809_v29, %v16373_v1  ;;  %v810_v31 = vmul.f32 %v809_v29, %v16368_v0  ;;  %s16817_s15 = sld [smem:[#allocation2 + $0x13]]  ;;  %s16863_s5 = sld [smem:[#allocation2 + $0x15]] }
  0xa5   :  { %v828_v32 = vstv %s12938_s24  ;;  %v847_v35 = vstv %s12939_s21  ;;  %s16875_s28 = sld [smem:[#allocation2 + $0x16]]  ;;  %s16880_s13 = sld [smem:[#allocation2 + $0x17]] }
  0xa6   :  { %v830_v33 = vmul.f32 %v828_v32, %v16373_v1  ;;  %v829_v34 = vmul.f32 %v828_v32, %v16368_v0  ;;  %v849_v36 = vmul.f32 %v847_v35, %v16373_v1  ;;  %v848_v37 = vmul.f32 %v847_v35, %v16368_v0  ;;  %s16891_s9 = sld [smem:[#allocation2 + $0x18]]  ;;  %s16893_s6 = sld [smem:[#allocation2 + $0x19]] }
  0xa7   :  { %382 = vrot.lane.b32.xlu1 %v377_v9, %s16178_s29  ;;  %380 = vrot.lane.b32.xlu0 %v376_v10, %s16178_s29  ;;  %v866_v38 = vstv %s12940_s23  ;;  %v885_v41 = vstv %s12941_s8  ;;  %s16918_s17 = sld [smem:[#allocation2 + $0x1c]]  ;;  %s16925_s19 = sld [smem:[#allocation2 + $0x1d]] }
  0xa8   :  { %v868_v39 = vmul.f32 %v866_v38, %v16373_v1  ;;  %v867_v40 = vmul.f32 %v866_v38, %v16368_v0  ;;  %v887_v42 = vmul.f32 %v885_v41, %v16373_v1  ;;  %v886_v43 = vmul.f32 %v885_v41, %v16368_v0  ;;  %s16932_s24 = sld [smem:[#allocation2 + $0x1e]]  ;;  %s16939_s21 = sld [smem:[#allocation2 + $0x1f]] }
  0xa9   :  { %v904_v44 = vstv %s12942_s4  ;;  %v923_v47 = vstv %s12943_s20  ;;  %v330_v56 = vstv %s329_s25  ;;  %s16839_s25 = sld [smem:[#allocation2 + $0x14]]  ;;  %s17568_s11 = sld [smem:[#allocation6 + $0x3]] }
  0xaa   :  { %v906_v45 = vmul.f32 %v904_v44, %v16373_v1  ;;  %v905_v46 = vmul.f32 %v904_v44, %v16368_v0  ;;  %v925_v48 = vmul.f32 %v923_v47, %v16373_v1  ;;  %v924_v49 = vmul.f32 %v923_v47, %v16368_v0  ;;  %s17954_s23 = sld [smem:[#allocation2 + $0x33]]  ;;  %s12994_s8 = sld [smem:[#allocation2 + $0x34]] }
  0xab   :  { %402 = vrot.lane.b32.xlu1 %v397_v12, %s16179_s14  ;;  %400 = vrot.lane.b32.xlu0 %v396_v13, %s16179_s14  ;;  %v332_v59 = vmul.f32 %v330_v56, %v16373_v1  ;;  %v331_v63 = vmul.f32 %v330_v56, %v16368_v0  ;;  %s12995_s4 = sld [smem:[#allocation2 + $0x35]] }
  0xaf   :  { %422 = vrot.lane.b32.xlu1 %v417_v15, %s16180_s16  ;;  %420 = vrot.lane.b32.xlu0 %v416_v16, %s16180_s16 }
  0xb3   :  { %442 = vrot.lane.b32.xlu1 %v437_v18, %s16181_s18  ;;  %440 = vrot.lane.b32.xlu0 %v436_v19, %s16181_s18 }
  0xb7   :  { %462 = vrot.lane.b32.xlu1 %v457_v21, %s16182_s7  ;;  %460 = vrot.lane.b32.xlu0 %v456_v22, %s16182_s7 }
  0xbb   :  { %482 = vrot.lane.b32.xlu1 %v477_v24, %s16183_s1  ;;  %480 = vrot.lane.b32.xlu0 %v476_v25, %s16183_s1 }
  0xbf   :  { %797 = vrot.lane.b32.xlu1 %v792_v27, %s16177_s30  ;;  %795 = vrot.lane.b32.xlu0 %v791_v28, %s16177_s30 }
  0xc3   :  { %816 = vrot.lane.b32.xlu1 %v811_v30, %s16176_s2  ;;  %814 = vrot.lane.b32.xlu0 %v810_v31, %s16176_s2 }
  0xc7   :  { %835 = vrot.lane.b32.xlu1 %v830_v33, %s16178_s29  ;;  %833 = vrot.lane.b32.xlu0 %v829_v34, %s16178_s29 }
  0xcb   :  { %854 = vrot.lane.b32.xlu1 %v849_v36, %s16179_s14  ;;  %852 = vrot.lane.b32.xlu0 %v848_v37, %s16179_s14 }
  0xcf   :  { %873 = vrot.lane.b32.xlu1 %v868_v39, %s16180_s16  ;;  %871 = vrot.lane.b32.xlu0 %v867_v40, %s16180_s16 }
  0xd3   :  { %892 = vrot.lane.b32.xlu1 %v887_v42, %s16181_s18  ;;  %890 = vrot.lane.b32.xlu0 %v886_v43, %s16181_s18 }
  0xd7   :  { %911 = vrot.lane.b32.xlu1 %v906_v45, %s16182_s7  ;;  %909 = vrot.lane.b32.xlu0 %v905_v46, %s16182_s7 }
  0xdb   :  { %930 = vrot.lane.b32.xlu1 %v925_v48, %s16183_s1  ;;  %928 = vrot.lane.b32.xlu0 %v924_v49, %s16183_s1 }
 0x111   :  { %v361_v50 = vpop.permute.xlu1 %360  ;;  %v340_v51 = vpop.permute.xlu0 %339 }
 0x112   :  { %v343_v54 = vrot.slane %v340_v51, 2  ;;  %v364_v5 = vrot.slane %v361_v50, 2 }
 0x115   :  { %v363_v52 = vpop.permute.xlu1 %362  ;;  %v342_v53 = vpop.permute.xlu0 %341 }
 0x116   :  { %v344_v55 = vrot.slane %v342_v53, 2  ;;  %v365_v62 = vrot.slane %v363_v52, 2 }
 0x118   :  { %v346_v60 = vsel %vm345_vm0, %v343_v54, %v344_v55  ;;  %v349_v61 = vsel %vm347_vm1, %v342_v53, %v344_v55  ;;  %v366_v9 = vsel %vm345_vm0, %v364_v5, %v365_v62  ;;  %v369_v14 = vsel %vm367_vm2, %v363_v52, %v365_v62 }
 0x119   :  { %v383_v57 = vpop.permute.xlu1 %382  ;;  %v381_v58 = vpop.permute.xlu0 %380  ;;  %v348_v3 = vsel %vm347_vm1, %v340_v51, %v346_v60  ;;  %v353_v6 = vadd.f32 %v349_v61, %v332_v59  ;;  %v368_v21 = vsel %vm367_vm2, %v361_v50, %v366_v9 }
 0x11a   :  { %v385_v7 = vrot.slane %v383_v57, 2  ;;  %v384_v8 = vrot.slane %v381_v58, 2  ;;  %v352_v10 = vadd.f32 %v348_v3, %v331_v63 }
 0x11b   :  { %v373_v16 = vadd.f32 %v369_v14, %v353_v6  ;;  %v786_v14 = vstv %s12935_s27  ;;  %s12968_s27 = sld [smem:[#allocation2 + $0x22]] }
 0x11c   :  { %v386_v17 = vsel %vm345_vm0, %v384_v8, %v385_v7  ;;  %v389_v20 = vsel %vm387_vm3, %v383_v57, %v385_v7  ;;  %v372_v22 = vadd.f32 %v368_v21, %v352_v10 }
 0x11d   :  { %v403_v2 = vpop.permute.xlu1 %402  ;;  %v401_v4 = vpop.permute.xlu0 %400  ;;  %v388_v25 = vsel %vm387_vm3, %v381_v58, %v386_v17  ;;  %v393_v29 = vadd.f32 %v389_v20, %v373_v16  ;;  %v495_v58 = vstv %s16455_s26  ;;  %s16963_s26 = sld [smem:[#allocation2 + $0x21]] }
 0x11e   :  { %v405_v11 = vrot.slane %v403_v2, 2  ;;  %v404_v12 = vrot.slane %v401_v4, 2  ;;  %v392_v34 = vadd.f32 %v388_v25, %v372_v22 }
 0x120   :  { %v406_v23 = vsel %vm345_vm0, %v404_v12, %v405_v11  ;;  %v409_v26 = vsel %vm407_vm4, %v403_v2, %v405_v11 }
 0x121   :  { %v423_v13 = vpop.permute.xlu1 %422  ;;  %v421_v15 = vpop.permute.xlu0 %420  ;;  %v408_v32 = vsel %vm407_vm4, %v401_v4, %v406_v23  ;;  %v413_v35 = vadd.f32 %v409_v26, %v393_v29 }
 0x122   :  { %v425_v18 = vrot.slane %v423_v13, 2  ;;  %v424_v19 = vrot.slane %v421_v15, 2  ;;  %v412_v42 = vadd.f32 %v408_v32, %v392_v34 }
 0x124   :  { %v426_v30 = vsel %vm345_vm0, %v424_v19, %v425_v18  ;;  %v429_v33 = vsel %vm427_vm5, %v423_v13, %v425_v18  ;;  %v788_v19 = vmul.f32 %v786_v14, %v16373_v1 }
 0x125   :  { %v443_v24 = vpop.permute.xlu1 %442  ;;  %v441_v28 = vpop.permute.xlu0 %440  ;;  %v428_v38 = vsel %vm427_vm5, %v421_v15, %v426_v30  ;;  %v433_v43 = vadd.f32 %v429_v33, %v413_v35 }
 0x126   :  { %v445_v27 = vrot.slane %v443_v24, 2  ;;  %v444_v31 = vrot.slane %v441_v28, 2  ;;  %v432_v47 = vadd.f32 %v428_v38, %v412_v42 }
 0x128   :  { %v446_v36 = vsel %vm345_vm0, %v444_v31, %v445_v27  ;;  %v449_v39 = vsel %vm447_vm6, %v443_v24, %v445_v27  ;;  %v787_v24 = vmul.f32 %v786_v14, %v16368_v0 }
 0x129   :  { %v463_v37 = vpop.permute.xlu1 %462  ;;  %v461_v41 = vpop.permute.xlu0 %460  ;;  %v448_v45 = vsel %vm447_vm6, %v441_v28, %v446_v36  ;;  %v453_v48 = vadd.f32 %v449_v39, %v433_v43 }
 0x12a   :  { %v465_v40 = vrot.slane %v463_v37, 2  ;;  %v464_v44 = vrot.slane %v461_v41, 2  ;;  %v452_v54 = vadd.f32 %v448_v45, %v432_v47 }
 0x12c   :  { %v469_v46 = vsel %vm467_vm7, %v463_v37, %v465_v40  ;;  %v466_v49 = vsel %vm345_vm0, %v464_v44, %v465_v40 }
 0x12d   :  { %v483_v50 = vpop.permute.xlu1 %482  ;;  %v468_v51 = vsel %vm467_vm7, %v461_v41, %v466_v49  ;;  %v481_v53 = vpop.permute.xlu0 %480  ;;  %v473_v55 = vadd.f32 %v469_v46, %v453_v48 }
 0x12e   :  { %v485_v52 = vrot.slane %v483_v50, 2  ;;  %v484_v56 = vrot.slane %v481_v53, 2  ;;  %v472_v59 = vadd.f32 %v468_v51, %v452_v54 }
 0x130   :  { %v489_v57 = vsel %vm487_vm8, %v483_v50, %v485_v52  ;;  %v486_v61 = vsel %vm345_vm0, %v484_v56, %v485_v52 }
 0x131   :  { %v493_v60 = vadd.f32 %v489_v57, %v473_v55  ;;  %v798_v62 = vpop.permute.xlu1 %797  ;;  %v488_v63 = vsel %vm487_vm8, %v481_v53, %v486_v61  ;;  %v796_v2 = vpop.permute.xlu0 %795 }
 0x132   :  { %v492_v3 = vadd.f32 %v488_v63, %v472_v59  ;;  %v800_v12 = vrot.slane %v798_v62, 2  ;;  %v799_v13 = vrot.slane %v796_v2, 2 }
 0x133   :  { %v16468_v4 = vadd.f32 %v495_v58, %v493_v60 }
 0x134   :  { %v16471_v7 = vadd.f32 %v495_v58, %v492_v3  ;;  %v801_v20 = vsel %vm345_vm0, %v799_v13, %v800_v12  ;;  %v803_v23 = vsel %vm347_vm1, %v798_v62, %v800_v12 }
 0x135   :  { %v817_v5 = vpop.permute.xlu1 %816  ;;  %v499_v6 = vmax.f32 %v16468_v4, 0.0  ;;  %v815_v8 = vpop.permute.xlu0 %814  ;;  %v802_v29 = vsel %vm347_vm1, %v796_v2, %v801_v20  ;;  %v807_v32 = vadd.f32 %v803_v23, %v788_v19 }
 0x136   :  { %v498_v9 = vmax.f32 %v16471_v7, 0.0  ;;  %v819_v15 = vrot.slane %v817_v5, 2  ;;  %v818_v16 = vrot.slane %v815_v8, 2  ;;  %v806_v38 = vadd.f32 %v802_v29, %v787_v24  ;;  %v156_v29 = vld [vmem:[%s19512_s3 + $0x18] sm:$0xff] }
 0x137   :  { %504 = vrot.lane.b32.xlu1 %v499_v6, %s16177_s30 }
 0x138   :  { %502 = vrot.lane.b32.xlu0 %v498_v9, %s16177_s30  ;;  %v820_v25 = vsel %vm345_vm0, %v818_v16, %v819_v15  ;;  %v822_v30 = vsel %vm367_vm2, %v817_v5, %v819_v15 }
 0x139   :  { %v836_v10 = vpop.permute.xlu1 %835  ;;  %v834_v11 = vpop.permute.xlu0 %833  ;;  %v821_v36 = vsel %vm367_vm2, %v815_v8, %v820_v25  ;;  %v826_v39 = vadd.f32 %v822_v30, %v807_v32  ;;  %v153_v30 = vld [vmem:[%s19512_s3] sm:$0xff]  ;;  %v155_v32 = vld [vmem:[%s19512_s3 + $0x10] sm:$0xff] }
 0x13a   :  { %v838_v21 = vrot.slane %v836_v10, 2  ;;  %v837_v22 = vrot.slane %v834_v11, 2  ;;  %v825_v46 = vadd.f32 %v821_v36, %v806_v38  ;;  %v157_v36 = vld [vmem:[%s19512_s3 + $0x20] sm:$0xff]  ;;  %v159_v38 = vld [vmem:[%s19512_s3 + $0x30] sm:$0xff] }
 0x13c   :  { %v839_v33 = vsel %vm345_vm0, %v837_v22, %v838_v21  ;;  %v841_v37 = vsel %vm387_vm3, %v836_v10, %v838_v21 }
 0x13d   :  { %v855_v17 = vpop.permute.xlu1 %854  ;;  %v853_v18 = vpop.permute.xlu0 %852  ;;  %v840_v42 = vsel %vm387_vm3, %v834_v11, %v839_v33  ;;  %v845_v47 = vadd.f32 %v841_v37, %v826_v39  ;;  %v16535_v33 = vpack.c.bf16 %v155_v32, %v153_v30  ;;  %v16555_v39 = vpack.c.bf16 %v159_v38, %v157_v36  ;;  %v189_v30 = vld [vmem:[%s19512_s3 + $0x120] sm:$0xff]  ;;  %v196_v36 = vld [vmem:[%s19512_s3 + $0x158] sm:$0xff] }
 0x13e   :  { %v857_v26 = vrot.slane %v855_v17, 2  ;;  %v856_v27 = vrot.slane %v853_v18, 2  ;;  %v844_v52 = vadd.f32 %v840_v42, %v825_v46  ;;  %v161_v42 = vld [vmem:[%s19512_s3 + $0x40] sm:$0xff]  ;;  %v166_v46 = vld [vmem:[%s19512_s3 + $0x68] sm:$0xff] }
 0x13f   :  { %19734 = vst [vmem:[#allocation27_spill] sm:$0xff] %v16535_v33  ;;  %19736 = vst [vmem:[#allocation29_spill] sm:$0xff] %v16555_v39 }
 0x140   :  { %v858_v40 = vsel %vm345_vm0, %v856_v27, %v857_v26  ;;  %v860_v43 = vsel %vm407_vm4, %v855_v17, %v857_v26 }
 0x141   :  { %v874_v28 = vpop.permute.xlu1 %873  ;;  %v872_v31 = vpop.permute.xlu0 %871  ;;  %v859_v50 = vsel %vm407_vm4, %v853_v18, %v858_v40  ;;  %v864_v53 = vadd.f32 %v860_v43, %v845_v47  ;;  %v942_v18 = vstv %s16496_s22  ;;  %v162_v40 = vld [vmem:[%s19512_s3 + $0x48] sm:$0xff]  ;;  %v168_v47 = vld [vmem:[%s19512_s3 + $0x78] sm:$0xff]  ;;  %s12969_s22 = sld [smem:[#allocation2 + $0x23]] }
 0x142   :  { %v876_v34 = vrot.slane %v874_v28, 2  ;;  %v875_v35 = vrot.slane %v872_v31, 2  ;;  %v863_v60 = vadd.f32 %v859_v50, %v844_v52  ;;  %v167_v50 = vld [vmem:[%s19512_s3 + $0x70] sm:$0xff]  ;;  %v170_v52 = vld [vmem:[%s19512_s3 + $0x88] sm:$0xff] }
 0x144   :  { %v877_v48 = vsel %vm345_vm0, %v875_v35, %v876_v34  ;;  %v879_v51 = vsel %vm427_vm5, %v874_v28, %v876_v34  ;;  %v154_v28 = vld [vmem:[%s19512_s3 + $0x8] sm:$0xff]  ;;  %v160_v35 = vld [vmem:[%s19512_s3 + $0x38] sm:$0xff] }
 0x145   :  { %v893_v41 = vpop.permute.xlu1 %892  ;;  %v891_v45 = vpop.permute.xlu0 %890  ;;  %v878_v56 = vsel %vm427_vm5, %v872_v31, %v877_v48  ;;  %v883_v61 = vadd.f32 %v879_v51, %v864_v53  ;;  %v16530_v31 = vpack.c.bf16 %v156_v29, %v154_v28  ;;  %v158_v34 = vld [vmem:[%s19512_s3 + $0x28] sm:$0xff]  ;;  %v165_v48 = vld [vmem:[%s19512_s3 + $0x60] sm:$0xff]  ;;  %v172_v53 = vld [vmem:[%s19512_s3 + $0x98] sm:$0xff] }
 0x146   :  { %v895_v44 = vrot.slane %v893_v41, 2  ;;  %v894_v49 = vrot.slane %v891_v45, 2  ;;  %v882_v3 = vadd.f32 %v878_v56, %v863_v60  ;;  %v16550_v37 = vpack.c.bf16 %v160_v35, %v158_v34  ;;  %v171_v56 = vld [vmem:[%s19512_s3 + $0x90] sm:$0xff]  ;;  %v173_v60 = vld [vmem:[%s19512_s3 + $0xa0] sm:$0xff]  ;;  %v190_v28 = vld [vmem:[%s19512_s3 + $0x128] sm:$0xff] }
 0x147   :  { %19733 = vst [vmem:[#allocation26_spill] sm:$0xff] %v16530_v31  ;;  %14459 = vmatprep.subr.bf16.mxu0 %v16530_v31  ;;  %14637 = vmatprep.subr.bf16.mxu1 %v16530_v31  ;;  %v16595_v51 = vpack.c.bf16 %v167_v50, %v165_v48  ;;  %v192_v29 = vld [vmem:[%s19512_s3 + $0x138] sm:$0xff]  ;;  %v191_v34 = vld [vmem:[%s19512_s3 + $0x130] sm:$0xff]  ;;  %v194_v35 = vld [vmem:[%s19512_s3 + $0x148] sm:$0xff] }
 0x148   :  { %v896_v54 = vsel %vm345_vm0, %v894_v49, %v895_v44  ;;  %v898_v57 = vsel %vm447_vm6, %v893_v41, %v895_v44  ;;  %14461 = vmatpush1.bf16.msra.mxu0 %v16535_v33  ;;  %14639 = vmatpush1.bf16.msra.mxu1 %v16535_v33  ;;  %19735 = vst [vmem:[#allocation28_spill] sm:$0xff] %v16550_v37  ;;  %v164_v41 = vld [vmem:[%s19512_s3 + $0x58] sm:$0xff]  ;;  %v163_v44 = vld [vmem:[%s19512_s3 + $0x50] sm:$0xff]  ;;  %v197_v50 = vld [vmem:[%s19512_s3 + $0x160] sm:$0xff] }
 0x149   :  { %v912_v55 = vpop.permute.xlu1 %911  ;;  %v910_v59 = vpop.permute.xlu0 %909  ;;  %v897_v63 = vsel %vm447_vm6, %v891_v45, %v896_v54  ;;  %v902_v5 = vadd.f32 %v898_v57, %v883_v61  ;;  %14463 = vmatprep.subr.bf16.mxu0 %v16550_v37  ;;  %14641 = vmatprep.subr.bf16.mxu1 %v16550_v37  ;;  %v16570_v43 = vpack.c.bf16 %v164_v41, %v162_v40  ;;  %v169_v54 = vld [vmem:[%s19512_s3 + $0x80] sm:$0xff] }
 0x14a   :  { %v914_v58 = vrot.slane %v912_v55, 2  ;;  %v913_v62 = vrot.slane %v910_v59, 2  ;;  %v901_v14 = vadd.f32 %v897_v63, %v882_v3  ;;  %v16575_v45 = vpack.c.bf16 %v163_v44, %v161_v42  ;;  %19740 = vst [vmem:[#allocation33_spill] sm:$0xff] %v16595_v51  ;;  %v180_v3 = vld [vmem:[%s19512_s3 + $0xd8] sm:$0xff]  ;;  %v193_v41 = vld [vmem:[%s19512_s3 + $0x140] sm:$0xff]  ;;  %v195_v42 = vld [vmem:[%s19512_s3 + $0x150] sm:$0xff] }
 0x14b   :  { %19737 = vst [vmem:[#allocation30_spill] sm:$0xff] %v16570_v43  ;;  %v16590_v49 = vpack.c.bf16 %v168_v47, %v166_v46  ;;  %v16615_v57 = vpack.c.bf16 %v171_v56, %v169_v54  ;;  %v16710_v32 = vpack.c.bf16 %v192_v29, %v190_v28  ;;  %v16721_v38 = vpack.c.bf16 %v191_v34, %v189_v30  ;;  %v198_v44 = vld [vmem:[%s19512_s3 + $0x168] sm:$0xff]  ;;  %v200_v46 = vld [vmem:[%s19512_s3 + $0x178] sm:$0xff]  ;;  %v213_v30 = vld [vmem:[%s19512_s3 + $0x1e0] sm:$0xff] }
 0x14c   :  { %v917_v2 = vsel %vm467_vm7, %v912_v55, %v914_v58  ;;  %v915_v8 = vsel %vm345_vm0, %v913_v62, %v914_v58  ;;  %14465 = vmatpush1.bf16.msra.mxu0 %v16555_v39  ;;  %14643 = vmatpush1.bf16.msra.mxu1 %v16555_v39  ;;  %19738 = vst [vmem:[#allocation31_spill] sm:$0xff] %v16575_v45  ;;  %v174_v58 = vld [vmem:[%s19512_s3 + $0xa8] sm:$0xff]  ;;  %v175_v62 = vld [vmem:[%s19512_s3 + $0xb0] sm:$0xff]  ;;  %v204_v54 = vld [vmem:[%s19512_s3 + $0x198] sm:$0xff] }
 0x14d   :  { %v931_v10 = vpop.permute.xlu1 %930  ;;  %v916_v11 = vsel %vm467_vm7, %v910_v59, %v915_v8  ;;  %v929_v13 = vpop.permute.xlu0 %928  ;;  %v921_v15 = vadd.f32 %v917_v2, %v902_v5  ;;  %14467 = vmatprep.subr.bf16.mxu0 %v16570_v43  ;;  %14645 = vmatprep.subr.bf16.mxu1 %v16570_v43  ;;  %19739 = vst [vmem:[#allocation32_spill] sm:$0xff] %v16590_v49  ;;  %19742 = vst [vmem:[#allocation35_spill] sm:$0xff] %v16615_v57  ;;  %v176_v59 = vld [vmem:[%s19512_s3 + $0xb8] sm:$0xff]  ;;  %v178_v2 = vld [vmem:[%s19512_s3 + $0xc8] sm:$0xff] }
 0x14e   :  { %v933_v12 = vrot.slane %v931_v10, 2  ;;  %v932_v16 = vrot.slane %v929_v13, 2  ;;  %v920_v19 = vadd.f32 %v916_v11, %v901_v14  ;;  %v16610_v55 = vpack.c.bf16 %v172_v53, %v170_v52  ;;  %v177_v5 = vld [vmem:[%s19512_s3 + $0xc0] sm:$0xff]  ;;  %19751 = vst [vmem:[#allocation44_spill] sm:$0xff] %v16710_v32  ;;  %19752 = vst [vmem:[#allocation45_spill] sm:$0xff] %v16721_v38  ;;  %v199_v52 = vld [vmem:[%s19512_s3 + $0x170] sm:$0xff] }
 0x14f   :  { %v16630_v61 = vpack.c.bf16 %v176_v59, %v174_v58  ;;  %v16635_v63 = vpack.c.bf16 %v175_v62, %v173_v60  ;;  %v16650_v8 = vpack.c.bf16 %v180_v3, %v178_v2  ;;  %v181_v14 = vld [vmem:[%s19512_s3 + $0xe0] sm:$0xff]  ;;  %v16723_v40 = vpack.c.bf16 %v196_v36, %v194_v35  ;;  %v202_v53 = vld [vmem:[%s19512_s3 + $0x188] sm:$0xff]  ;;  %v203_v60 = vld [vmem:[%s19512_s3 + $0x190] sm:$0xff] }
 0x150   :  { %v936_v17 = vsel %vm487_vm8, %v931_v10, %v933_v12  ;;  %v934_v21 = vsel %vm345_vm0, %v932_v16, %v933_v12  ;;  %14469 = vmatpush1.bf16.msra.mxu0 %v16575_v45  ;;  %14647 = vmatpush1.bf16.msra.mxu1 %v16575_v45  ;;  %19741 = vst [vmem:[#allocation34_spill] sm:$0xff] %v16610_v55  ;;  %v179_v10 = vld [vmem:[%s19512_s3 + $0xd0] sm:$0xff]  ;;  %v182_v12 = vld [vmem:[%s19512_s3 + $0xe8] sm:$0xff]  ;;  %v201_v59 = vld [vmem:[%s19512_s3 + $0x180] sm:$0xff] }
 0x151   :  { %v940_v20 = vadd.f32 %v936_v17, %v921_v15  ;;  %v935_v22 = vsel %vm487_vm8, %v929_v13, %v934_v21  ;;  %14471 = vmatprep.subr.bf16.mxu0 %v16590_v49  ;;  %14649 = vmatprep.subr.bf16.mxu1 %v16590_v49  ;;  %19743 = vst [vmem:[#allocation36_spill] sm:$0xff] %v16630_v61  ;;  %19744 = vst [vmem:[#allocation37_spill] sm:$0xff] %v16635_v63  ;;  %v184_v13 = vld [vmem:[%s19512_s3 + $0xf8] sm:$0xff]  ;;  %v183_v16 = vld [vmem:[%s19512_s3 + $0xf0] sm:$0xff] }
 0x152   :  { %v939_v23 = vadd.f32 %v935_v22, %v920_v19  ;;  %19745 = vst [vmem:[#allocation38_spill] sm:$0xff] %v16650_v8  ;;  %v16655_v11 = vpack.c.bf16 %v179_v10, %v177_v5  ;;  %v16670_v15 = vpack.c.bf16 %v184_v13, %v182_v12  ;;  %v16675_v17 = vpack.c.bf16 %v183_v16, %v181_v14  ;;  %v188_v19 = vld [vmem:[%s19512_s3 + $0x118] sm:$0xff]  ;;  %v187_v22 = vld [vmem:[%s19512_s3 + $0x110] sm:$0xff]  ;;  %v206_v2 = vld [vmem:[%s19512_s3 + $0x1a8] sm:$0xff] }
 0x153   :  { %v16509_v24 = vadd.f32 %v942_v18, %v940_v20  ;;  %v185_v20 = vld [vmem:[%s19512_s3 + $0x100] sm:$0xff]  ;;  %19753 = vst [vmem:[#allocation46_spill] sm:$0xff] %v16723_v40  ;;  %v16740_v47 = vpack.c.bf16 %v195_v42, %v193_v41  ;;  %v16744_v48 = vpack.c.bf16 %v200_v46, %v198_v44  ;;  %v16760_v56 = vpack.c.bf16 %v199_v52, %v197_v50  ;;  %v208_v3 = vld [vmem:[%s19512_s3 + $0x1b8] sm:$0xff]  ;;  %v207_v12 = vld [vmem:[%s19512_s3 + $0x1b0] sm:$0xff] }
 0x154   :  { %v16512_v26 = vadd.f32 %v942_v18, %v939_v23  ;;  %14473 = vmatpush1.bf16.msra.mxu0 %v16595_v51  ;;  %14651 = vmatpush1.bf16.msra.mxu1 %v16595_v51  ;;  %19746 = vst [vmem:[#allocation39_spill] sm:$0xff] %v16655_v11  ;;  %19747 = vst [vmem:[#allocation40_spill] sm:$0xff] %v16670_v15  ;;  %v186_v18 = vld [vmem:[%s19512_s3 + $0x108] sm:$0xff]  ;;  %v16695_v23 = vpack.c.bf16 %v187_v22, %v185_v20  ;;  %v205_v10 = vld [vmem:[%s19512_s3 + $0x1a0] sm:$0xff] }
 0x155   :  { %v946_v25 = vmax.f32 %v16509_v24, 0.0  ;;  %14475 = vmatprep.subr.bf16.mxu0 %v16610_v55  ;;  %14653 = vmatprep.subr.bf16.mxu1 %v16610_v55  ;;  %19748 = vst [vmem:[#allocation41_spill] sm:$0xff] %v16675_v17  ;;  %v16690_v21 = vpack.c.bf16 %v188_v19, %v186_v18  ;;  %19754 = vst [vmem:[#allocation47_spill] sm:$0xff] %v16740_v47  ;;  %v16764_v58 = vpack.c.bf16 %v204_v54, %v202_v53  ;;  %v210_v14 = vld [vmem:[%s19512_s3 + $0x1c8] sm:$0xff]  ;;  %v212_v16 = vld [vmem:[%s19512_s3 + $0x1d8] sm:$0xff] }
 0x156   :  { %v945_v27 = vmax.f32 %v16512_v26, 0.0  ;;  %19750 = vst [vmem:[#allocation43_spill] sm:$0xff] %v16695_v23  ;;  %19755 = vst [vmem:[#allocation48_spill] sm:$0xff] %v16744_v48  ;;  %v16774_v62 = vpack.c.bf16 %v203_v60, %v201_v59  ;;  %v16787_v5 = vpack.c.bf16 %v208_v3, %v206_v2  ;;  %v16795_v13 = vpack.c.bf16 %v207_v12, %v205_v10  ;;  %v209_v19 = vld [vmem:[%s19512_s3 + $0x1c0] sm:$0xff]  ;;  %v211_v20 = vld [vmem:[%s19512_s3 + $0x1d0] sm:$0xff] }
 0x157   :  { %951 = vrot.lane.b32.xlu1 %v946_v25, %s16177_s30  ;;  %19749 = vst [vmem:[#allocation42_spill] sm:$0xff] %v16690_v21  ;;  %19756 = vst [vmem:[#allocation49_spill] sm:$0xff] %v16760_v56  ;;  %v16807_v18 = vpack.c.bf16 %v212_v16, %v210_v14  ;;  %v16815_v22 = vpack.c.bf16 %v211_v20, %v209_v19  ;;  %v214_v28 = vld [vmem:[%s19512_s3 + $0x1e8] sm:$0xff]  ;;  %v216_v29 = vld [vmem:[%s19512_s3 + $0x1f8] sm:$0xff]  ;;  %v1229_v3 = vstv %s16817_s15  ;;  %s16906_s15 = sld [smem:[#allocation2 + $0x1a]] }
 0x158   :  { %949 = vrot.lane.b32.xlu0 %v945_v27, %s16177_s30  ;;  %14477 = vmatpush1.bf16.msra.mxu0 %v16615_v57  ;;  %19757 = vst [vmem:[#allocation50_spill] sm:$0xff] %v16764_v58  ;;  %19758 = vst [vmem:[#allocation51_spill] sm:$0xff] %v16774_v62  ;;  %v16832_v35 = vpack.c.bf16 %v216_v29, %v214_v28  ;;  %v215_v36 = vld [vmem:[%s19512_s3 + $0x1f0] sm:$0xff]  ;;  %v218_v52 = vld [vmem:[%s19512_s3 + $0x208] sm:$0xff]  ;;  %v1248_v10 = vstv %s16839_s25  ;;  %s16956_s25 = sld [smem:[#allocation2 + $0x20]] }
 0x159   :  { %14655 = vmatpush1.bf16.msra.mxu1 %v16615_v57  ;;  %14479 = vmatprep.subr.bf16.mxu0 %v16630_v61  ;;  %19759 = vst [vmem:[#allocation52_spill] sm:$0xff] %v16787_v5  ;;  %19760 = vst [vmem:[#allocation53_spill] sm:$0xff] %v16795_v13  ;;  %v16837_v42 = vpack.c.bf16 %v215_v36, %v213_v30  ;;  %v220_v53 = vld [vmem:[%s19512_s3 + $0x218] sm:$0xff]  ;;  %v1249_v12 = vmul.f32 %v1248_v10, %v16368_v0  ;;  %v1267_v14 = vstv %s16863_s5  ;;  %v261_v49 = vld [vmem:[%s19512_s3 + $0x360] sm:$0xff]  ;;  %s17866_s5 = sld [smem:[#allocation2 + $0x29]] }
 0x15a   :  { %14657 = vmatprep.subr.bf16.mxu1 %v16630_v61  ;;  %19761 = vst [vmem:[#allocation54_spill] sm:$0xff] %v16807_v18  ;;  %19762 = vst [vmem:[#allocation55_spill] sm:$0xff] %v16815_v22  ;;  %v16856_v59 = vpack.c.bf16 %v220_v53, %v218_v52  ;;  %v1268_v7 = vmul.f32 %v1267_v14, %v16368_v0  ;;  %v1305_v19 = vstv %s16880_s13  ;;  %v1324_v52 = vstv %s16891_s9  ;;  %v263_v45 = vld [vmem:[%s19512_s3 + $0x370] sm:$0xff]  ;;  %s17889_s13 = sld [smem:[#allocation2 + $0x2b]]  ;;  %s17901_s9 = sld [smem:[#allocation2 + $0x2c]] }
 0x15b   :  { %19763 = vst [vmem:[#allocation56_spill] sm:$0xff] %v16832_v35  ;;  %19764 = vst [vmem:[#allocation57_spill] sm:$0xff] %v16837_v42  ;;  %v1306_v20 = vmul.f32 %v1305_v19, %v16368_v0  ;;  %v1325_v24 = vmul.f32 %v1324_v52, %v16368_v0 }
 0x15c   :  { %14481 = vmatpush1.bf16.msra.mxu0 %v16635_v63  ;;  %19765 = vst [vmem:[#allocation58_spill] sm:$0xff] %v16856_v59 }
 0x15d   :  { %14659 = vmatpush1.bf16.msra.mxu1 %v16635_v63  ;;  %14483 = vmatprep.subr.bf16.mxu0 %v16650_v8 }
 0x15e   :  { %14661 = vmatprep.subr.bf16.mxu1 %v16650_v8  ;;  %v257_v8 = vld [vmem:[%s19512_s3 + $0x340] sm:$0xff] }
 0x160   :  { %14485 = vmatpush1.bf16.msra.mxu0 %v16655_v11 }
 0x161   :  { %14663 = vmatpush1.bf16.msra.mxu1 %v16655_v11  ;;  %14487 = vmatprep.subr.bf16.mxu0 %v16670_v15 }
 0x162   :  { %14665 = vmatprep.subr.bf16.mxu1 %v16670_v15 }
 0x164   :  { %14489 = vmatpush1.bf16.msra.mxu0 %v16675_v17 }
 0x165   :  { %14667 = vmatpush1.bf16.msra.mxu1 %v16675_v17  ;;  %14491 = vmatprep.subr.bf16.mxu0 %v16690_v21 }
 0x166   :  { %14669 = vmatprep.subr.bf16.mxu1 %v16690_v21 }
 0x168   :  { %14493 = vmatpush1.bf16.msra.mxu0 %v16695_v23 }
 0x169   :  { %14671 = vmatpush1.bf16.msra.mxu1 %v16695_v23  ;;  %14495 = vmatprep.subr.bf16.mxu0 %v16710_v32  ;;  %v253_v23 = vld [vmem:[%s19512_s3 + $0x320] sm:$0xff] }
 0x16a   :  { %14673 = vmatprep.subr.bf16.mxu1 %v16710_v32 }
 0x16c   :  { %14497 = vmatpush1.bf16.msra.mxu0 %v16721_v38 }
 0x16d   :  { %14675 = vmatpush1.bf16.msra.mxu1 %v16721_v38  ;;  %14499 = vmatprep.subr.bf16.mxu0 %v16723_v40 }
 0x16e   :  { %14677 = vmatprep.subr.bf16.mxu1 %v16723_v40 }
 0x170   :  { %14501 = vmatpush1.bf16.msra.mxu0 %v16740_v47 }
 0x171   :  { %14679 = vmatpush1.bf16.msra.mxu1 %v16740_v47  ;;  %14503 = vmatprep.subr.bf16.mxu0 %v16744_v48 }
 0x172   :  { %14681 = vmatprep.subr.bf16.mxu1 %v16744_v48 }
 0x174   :  { %14505 = vmatpush1.bf16.msra.mxu0 %v16760_v56 }
 0x175   :  { %14683 = vmatpush1.bf16.msra.mxu1 %v16760_v56  ;;  %14507 = vmatprep.subr.bf16.mxu0 %v16764_v58 }
 0x176   :  { %14685 = vmatprep.subr.bf16.mxu1 %v16764_v58 }
 0x178   :  { %14509 = vmatpush1.bf16.msra.mxu0 %v16774_v62 }
 0x179   :  { %14687 = vmatpush1.bf16.msra.mxu1 %v16774_v62  ;;  %14511 = vmatprep.subr.bf16.mxu0 %v16787_v5 }
 0x17a   :  { %14689 = vmatprep.subr.bf16.mxu1 %v16787_v5  ;;  %v247_v5 = vld [vmem:[%s19512_s3 + $0x2f0] sm:$0xff] }
 0x17c   :  { %14513 = vmatpush1.bf16.msra.mxu0 %v16795_v13 }
 0x17d   :  { %14691 = vmatpush1.bf16.msra.mxu1 %v16795_v13  ;;  %14515 = vmatprep.subr.bf16.mxu0 %v16807_v18  ;;  %v245_v13 = vld [vmem:[%s19512_s3 + $0x2e0] sm:$0xff] }
 0x17e   :  { %14693 = vmatprep.subr.bf16.mxu1 %v16807_v18 }
 0x180   :  { %14517 = vmatpush1.bf16.msra.mxu0 %v16815_v22 }
 0x181   :  { %14695 = vmatpush1.bf16.msra.mxu1 %v16815_v22  ;;  %14519 = vmatprep.subr.bf16.mxu0 %v16832_v35 }
 0x182   :  { %14697 = vmatprep.subr.bf16.mxu1 %v16832_v35 }
 0x184   :  { %14521 = vmatpush1.bf16.msra.mxu0 %v16837_v42 }
 0x185   :  { %14699 = vmatpush1.bf16.msra.mxu1 %v16837_v42  ;;  %14523 = vmatprep.subr.bf16.mxu0 %v16856_v59  ;;  %v246_v42 = vld [vmem:[%s19512_s3 + $0x2e8] sm:$0xff] }
 0x186   :  { %14701 = vmatprep.subr.bf16.mxu1 %v16856_v59  ;;  %v243_v59 = vld [vmem:[%s19512_s3 + $0x2d0] sm:$0xff] }
 0x1a9   :  { %v505_v34 = vpop.permute.xlu1 %504 }
 0x1aa   :  { %v507_v41 = vrot.slane %v505_v34, 2  ;;  %v503_v44 = vpop.permute.xlu0 %502 }
 0x1ab   :  { %v506_v50 = vrot.slane %v503_v44, 2 }
 0x1ac   :  { %v510_v46 = vsel %vm347_vm1, %v505_v34, %v507_v41 }
 0x1ad   :  { %v16854_v54 = vmax.f32 %v499_v6, %v510_v46  ;;  %v508_v60 = vsel %vm345_vm0, %v506_v50, %v507_v41  ;;  %v1230_v6 = vmul.f32 %v1229_v3, %v16368_v0  ;;  %v1231_v50 = vmul.f32 %v1229_v3, %v16373_v1 }
 0x1ae   :  { %v509_v2 = vsel %vm347_vm1, %v503_v44, %v508_v60  ;;  %v1343_v60 = vstv %s16893_s6 }
 0x1af   :  { %519 = vrot.lane.b32.xlu1 %v16854_v54, %s16178_s29  ;;  %v16868_v4 = vmax.f32 %v498_v9, %v509_v2  ;;  %v1286_v9 = vstv %s16875_s28  ;;  %v1344_v26 = vmul.f32 %v1343_v60, %v16368_v0  ;;  %v1362_v2 = vstv %s16906_s15  ;;  %s17885_s28 = sld [smem:[#allocation2 + $0x2a]] }
 0x1b0   :  { %v1287_v16 = vmul.f32 %v1286_v9, %v16368_v0  ;;  %v1363_v3 = vmul.f32 %v1362_v2, %v16368_v0 }
 0x1b1   :  { %517 = vrot.lane.b32.xlu0 %v16868_v4, %s16178_s29 }
 0x1b5   :  { %1234 = vrot.lane.b32.xlu0 %v1230_v6, %s16177_s30  ;;  %v1288_v6 = vmul.f32 %v1286_v9, %v16373_v1  ;;  %v16945_v9 = vld [vmem:[%s19509_s0] sm:$0xff] }
 0x1b9   :  { %1253 = vrot.lane.b32.xlu0 %v1249_v12, %s16176_s2 }
 0x1bd   :  { %1272 = vrot.lane.b32.xlu0 %v1268_v7, %s16178_s29  ;;  %v1687_v7 = vstv %s16925_s19  ;;  %s17933_s19 = sld [smem:[#allocation2 + $0x30]] }
 0x1c1   :  { %1291 = vrot.lane.b32.xlu0 %v1287_v16, %s16179_s14  ;;  %v1688_v16 = vmul.f32 %v16945_v9, %v1687_v7 }
 0x1c5   :  { %1310 = vrot.lane.b32.xlu0 %v1306_v20, %s16180_s16 }
 0x1c9   :  { %v952_v28 = vpop.permute.xlu1 %951 }
 0x1ca   :  { %v954_v29 = vrot.slane %v952_v28, 2  ;;  %v950_v30 = vpop.permute.xlu0 %949 }
 0x1cb   :  { %v953_v36 = vrot.slane %v950_v30, 2 }
 0x1cc   :  { %v957_v34 = vsel %vm347_vm1, %v952_v28, %v954_v29 }
 0x1cd   :  { %v16898_v41 = vmax.f32 %v946_v25, %v957_v34  ;;  %v955_v44 = vsel %vm345_vm0, %v953_v36, %v954_v29  ;;  %v1250_v25 = vmul.f32 %v1248_v10, %v16373_v1  ;;  %v1668_v10 = vstv %s16918_s17  ;;  %s17171_s17 = sld [smem:[#allocation2 + $0x12]] }
 0x1ce   :  { %v956_v46 = vsel %vm347_vm1, %v950_v30, %v955_v44  ;;  %v1669_v12 = vmul.f32 %v1668_v10, %v16368_v0  ;;  %v16952_v0 = vld [vmem:[%s19509_s0 + $0x8] sm:$0x3f]  ;;  %v1725_v29 = vstv %s16939_s21  ;;  %v1744_v36 = vstv %s16956_s25  ;;  %s17318_s21 = sld [smem:[#allocation6 + $0x2]]  ;;  %s17827_s25 = sld [smem:[#allocation2 + $0x26]] }
 0x1cf   :  { %966 = vrot.lane.b32.xlu1 %v16898_v41, %s16178_s29  ;;  %v16910_v53 = vmax.f32 %v945_v27, %v956_v46  ;;  %v1269_v27 = vmul.f32 %v1267_v14, %v16373_v1  ;;  %v1307_v14 = vmul.f32 %v1305_v19, %v16373_v1  ;;  %v1326_v1 = vmul.f32 %v16952_v0, %v1324_v52 }
 0x1d0   :  { %v1706_v19 = vstv %s16932_s24  ;;  %v1345_v28 = vmul.f32 %v16952_v0, %v1343_v60  ;;  %v1726_v30 = vmul.f32 %v16945_v9, %v1725_v29  ;;  %v1364_v34 = vmul.f32 %v16952_v0, %v1362_v2  ;;  %s17940_s24 = sld [smem:[#allocation2 + $0x31]] }
 0x1d1   :  { %964 = vrot.lane.b32.xlu0 %v16910_v53, %s16178_s29  ;;  %v1707_v20 = vmul.f32 %v16945_v9, %v1706_v19  ;;  %v1745_v44 = vmul.f32 %v16945_v9, %v1744_v36  ;;  %v1670_v46 = vmul.f32 %v16952_v0, %v1668_v10 }
 0x1d3   :  { %1236 = vrot.lane.b32.xlu1 %v1231_v50, %s16177_s30  ;;  %v1763_v50 = vstv %s16963_s26  ;;  %v1225_v21 = vstv %s17171_s17  ;;  %s17411_s26 = sld [smem:[#allocation2 + $0x1b]]  ;;  %s17919_s17 = sld [smem:[#allocation2 + $0x2e]] }
 0x1d4   :  { %v1764_v52 = vmul.f32 %v16945_v9, %v1763_v50  ;;  %v1765_v10 = vmul.f32 %v16952_v0, %v1763_v50 }
 0x1d5   :  { %1329 = vrot.lane.b32.xlu0 %v1325_v24, %s16181_s18  ;;  %v1689_v24 = vmul.f32 %v16952_v0, %v1687_v7  ;;  %v16184_v7 = vmov 1983009808  }
 0x1d7   :  { %1255 = vrot.lane.b32.xlu1 %v1250_v25, %s16176_s2  ;;  %v1782_v25 = vstv %s12968_s27 }
 0x1d8   :  { %v1783_v60 = vmul.f32 %v16945_v9, %v1782_v25 }
 0x1d9   :  { %1348 = vrot.lane.b32.xlu0 %v1344_v26, %s16182_s7  ;;  %v1708_v26 = vmul.f32 %v16952_v0, %v1706_v19 }
 0x1db   :  { %1274 = vrot.lane.b32.xlu1 %v1269_v27, %s16178_s29  ;;  %v1801_v27 = vstv %s12969_s22 }
 0x1dc   :  { %v1802_v2 = vmul.f32 %v16945_v9, %v1801_v27 }
 0x1dd   :  { %1367 = vrot.lane.b32.xlu0 %v1363_v3, %s16183_s1  ;;  %v1727_v3 = vmul.f32 %v16952_v0, %v1725_v29 }
 0x1df   :  { %1293 = vrot.lane.b32.xlu1 %v1288_v6, %s16179_s14  ;;  %v1746_v6 = vmul.f32 %v16952_v0, %v1744_v36 }
 0x1e1   :  { %1673 = vrot.lane.b32.xlu0 %v1669_v12, %s16177_s30  ;;  %v1784_v12 = vmul.f32 %v16952_v0, %v1782_v25  ;;  %v219_v25 = vld [vmem:[%s19512_s3 + $0x210] sm:$0xff] }
 0x1e3   :  { %1312 = vrot.lane.b32.xlu1 %v1307_v14, %s16180_s16  ;;  %v1803_v14 = vmul.f32 %v16952_v0, %v1801_v27  ;;  %v222_v27 = vld [vmem:[%s19512_s3 + $0x228] sm:$0xff] }
 0x1e5   :  { %1692 = vrot.lane.b32.xlu0 %v1688_v16, %s16176_s2  ;;  %v534_v16 = vunpack.c.l.s4 %v16184_v7  ;;  %v223_v7 = vld [vmem:[%s19512_s3 + $0x230] sm:$0xff] }
 0x1e7   :  { %1331 = vrot.lane.b32.xlu1 %v1326_v1, %s16181_s18  ;;  %v536_v1 = vlaneseq }
 0x1e9   :  { %1711 = vrot.lane.b32.xlu0 %v1707_v20, %s16178_s29  ;;  %v16999_v29 = vshrl.u32 %v536_v1, 7  ;;  %v226_v1 = vld [vmem:[%s19512_s3 + $0x248] sm:$0xff] }
 0x1eb   :  { %1350 = vrot.lane.b32.xlu1 %v1345_v28, %s16182_s7  ;;  %v535_v28 = vunpack.c.0.s8 %v534_v16  ;;  %19766 = vst [vmem:[#allocation59_spill] sm:$0xff] %v16999_v29 }
 0x1ed   :  { %1730 = vrot.lane.b32.xlu0 %v1726_v30, %s16179_s14  ;;  %v17009_v50 = vsub.s32 %v535_v28, %v16999_v29  ;;  %v241_v29 = vld [vmem:[%s19512_s3 + $0x2c0] sm:$0xff] }
 0x1ee   :  { %v17150_v22 = vpack.c.bf16 %v243_v59, %v241_v29  ;;  %v250_v59 = vld [vmem:[%s19512_s3 + $0x308] sm:$0xff] }
 0x1ef   :  { %1369 = vrot.lane.b32.xlu1 %v1364_v34, %s16183_s1 }
 0x1f0   :  { %19775 = vst [vmem:[#allocation68_spill] sm:$0xff] %v17150_v22 }
 0x1f1   :  { %1749 = vrot.lane.b32.xlu0 %v1745_v44, %s16180_s16 }
 0x1f3   :  { %1675 = vrot.lane.b32.xlu1 %v1670_v46, %s16177_s30 }
 0x1f5   :  { %1768 = vrot.lane.b32.xlu0 %v1764_v52, %s16181_s18 }
 0x1f7   :  { %1694 = vrot.lane.b32.xlu1 %v1689_v24, %s16176_s2  ;;  %v217_v24 = vld [vmem:[%s19512_s3 + $0x200] sm:$0xff] }
 0x1f9   :  { %1787 = vrot.lane.b32.xlu0 %v1783_v60, %s16182_s7 }
 0x1fb   :  { %1713 = vrot.lane.b32.xlu1 %v1708_v26, %s16178_s29 }
 0x1fd   :  { %1806 = vrot.lane.b32.xlu0 %v1802_v2, %s16183_s1  ;;  %v224_v2 = vld [vmem:[%s19512_s3 + $0x238] sm:$0xff] }
 0x1ff   :  { %1732 = vrot.lane.b32.xlu1 %v1727_v3, %s16179_s14 }
 0x203   :  { %1751 = vrot.lane.b32.xlu1 %v1746_v6, %s16180_s16  ;;  %v17027_v6 = vpack.c.bf16 %v219_v25, %v217_v24  ;;  %v230_v24 = vld [vmem:[%s19512_s3 + $0x268] sm:$0xff]  ;;  %v232_v25 = vld [vmem:[%s19512_s3 + $0x278] sm:$0xff] }
 0x205   :  { %19767 = vst [vmem:[#allocation60_spill] sm:$0xff] %v17027_v6 }
 0x207   :  { %1770 = vrot.lane.b32.xlu1 %v1765_v10, %s16181_s18 }
 0x20b   :  { %1789 = vrot.lane.b32.xlu1 %v1784_v12, %s16182_s7  ;;  %v17032_v12 = vpack.c.bf16 %v224_v2, %v222_v27  ;;  %v229_v27 = vld [vmem:[%s19512_s3 + $0x260] sm:$0xff]  ;;  %v231_v2 = vld [vmem:[%s19512_s3 + $0x270] sm:$0xff] }
 0x20d   :  { %19768 = vst [vmem:[#allocation61_spill] sm:$0xff] %v17032_v12 }
 0x20f   :  { %1808 = vrot.lane.b32.xlu1 %v1803_v14, %s16183_s1  ;;  %v221_v14 = vld [vmem:[%s19512_s3 + $0x220] sm:$0xff] }
 0x210   :  { %v17049_v28 = vpack.c.bf16 %v223_v7, %v221_v14  ;;  %v236_v14 = vld [vmem:[%s19512_s3 + $0x298] sm:$0xff] }
 0x212   :  { %19769 = vst [vmem:[#allocation62_spill] sm:$0xff] %v17049_v28 }
 0x221   :  { %v16997_v19 = vpop.permute.xlu1 %519 }
 0x222   :  { %v19522_v30 = vrot.slane %v16997_v19, 2 }
 0x223   :  { %v518_v20 = vpop.permute.xlu0 %517 }
 0x224   :  { %v521_v34 = vrot.slane %v518_v20, 2 }
 0x226   :  { %v523_v36 = vsel %vm345_vm0, %v521_v34, %v19522_v30  ;;  %v242_v30 = vld [vmem:[%s19512_s3 + $0x2c8] sm:$0xff] }
 0x227   :  { %v524_v44 = vsel %vm387_vm3, %v518_v20, %v523_v36  ;;  %v17006_v46 = vpop.permute.xlu0 %1234  ;;  %v228_v20 = vld [vmem:[%s19512_s3 + $0x258] sm:$0xff]  ;;  %v225_v36 = vld [vmem:[%s19512_s3 + $0x240] sm:$0xff] }
 0x228   :  { %v528_v52 = vmax.f32 %v16868_v4, %v524_v44  ;;  %v17052_v34 = vpack.c.bf16 %v228_v20, %v226_v1  ;;  %v227_v44 = vld [vmem:[%s19512_s3 + $0x250] sm:$0xff]  ;;  %v233_v20 = vld [vmem:[%s19512_s3 + $0x280] sm:$0xff] }
 0x22a   :  { %v532_v60 = vcombine.high %v528_v52, %v528_v52  ;;  %v539_v26 = vrot.slane %v528_v52, %v17009_v50  ;;  %19770 = vst [vmem:[#allocation63_spill] sm:$0xff] %v17052_v34 }
 0x22b   :  { %v17025_v4 = vpop.permute.xlu0 %1253 }
 0x22c   :  { %v547_v3 = vcombine.high %v539_v26, %v539_v26  ;;  %v17030_v10 = vrot.slane %v532_v60, %v17009_v50  ;;  %v17069_v60 = vpack.c.bf16 %v227_v44, %v225_v36  ;;  %v235_v36 = vld [vmem:[%s19512_s3 + $0x290] sm:$0xff]  ;;  %v238_v44 = vld [vmem:[%s19512_s3 + $0x2a8] sm:$0xff] }
 0x22e   :  { %636 = vmatprep.mubr.f32.mxu0 %v547_v3  ;;  %v548_v16 = vcombine.high %v17030_v10, %v17030_v10  ;;  %v234_v3 = vld [vmem:[%s19512_s3 + $0x288] sm:$0xff] }
 0x22f   :  { %637 = vmatmul.mubr.f32.vlgmr.msra.gmra.mrb[0].mxu0 %v539_v26  ;;  %v17060_v52 = vpop.permute.xlu0 %1272  ;;  %v17072_v26 = vpack.c.bf16 %v232_v25, %v230_v24  ;;  %v17092_v1 = vpack.c.bf16 %v236_v14, %v234_v3  ;;  %v240_v24 = vld [vmem:[%s19512_s3 + $0x2b8] sm:$0xff]  ;;  %v17107_v25 = vpack.c.bf16 %v235_v36, %v233_v20  ;;  %v237_v3 = vld [vmem:[%s19512_s3 + $0x2a0] sm:$0xff]  ;;  %v239_v14 = vld [vmem:[%s19512_s3 + $0x2b0] sm:$0xff] }
 0x230   :  { %14525 = vmatpush1.bf16.msra.mxu0 %v17027_v6  ;;  %707 = vmatprep.mubr.f32.mxu0 %v548_v16  ;;  %v17089_v16 = vpack.c.bf16 %v231_v2, %v229_v27  ;;  %v17112_v2 = vpack.c.bf16 %v240_v24, %v238_v44  ;;  %v244_v20 = vld [vmem:[%s19512_s3 + $0x2d8] sm:$0xff]  ;;  %v17129_v44 = vpack.c.bf16 %v239_v14, %v237_v3  ;;  %v1276_v63 = vrot.slane %v17060_v52, 2 }
 0x231   :  { %14527 = vmatprep.subr.bf16.mxu0 %v17032_v12  ;;  %19771 = vst [vmem:[#allocation64_spill] sm:$0xff] %v17107_v25  ;;  %v17132_v24 = vpack.c.bf16 %v244_v20, %v242_v30  ;;  %v248_v3 = vld [vmem:[%s19512_s3 + $0x2f8] sm:$0xff] }
 0x232   :  { %19772 = vst [vmem:[#allocation65_spill] sm:$0xff] %v17112_v2  ;;  %19773 = vst [vmem:[#allocation66_spill] sm:$0xff] %v17129_v44  ;;  %v17153_v18 = vpack.c.bf16 %v248_v3, %v246_v42  ;;  %v252_v42 = vld [vmem:[%s19512_s3 + $0x318] sm:$0xff] }
 0x233   :  { %v17086_v7 = vpop.permute.xlu0 %1291  ;;  %19774 = vst [vmem:[#allocation67_spill] sm:$0xff] %v17132_v24 }
 0x234   :  { %14529 = vmatpush1.bf16.msra.mxu0 %v17049_v28  ;;  %19776 = vst [vmem:[#allocation69_spill] sm:$0xff] %v17153_v18 }
 0x235   :  { %14531 = vmatprep.subr.bf16.mxu0 %v17052_v34 }
 0x237   :  { %v17110_v27 = vpop.permute.xlu0 %1310 }
 0x238   :  { %14533 = vmatpush1.bf16.msra.mxu0 %v17069_v60 }
 0x239   :  { %14535 = vmatprep.subr.bf16.mxu0 %v17072_v26 }
 0x23c   :  { %14537 = vmatpush1.bf16.msra.mxu0 %v17089_v16 }
 0x23d   :  { %14539 = vmatprep.subr.bf16.mxu0 %v17092_v1 }
 0x240   :  { %14541 = vmatpush1.bf16.msra.mxu0 %v17107_v25 }
 0x241   :  { %v17127_v36 = vpop.permute.xlu1 %966  ;;  %14543 = vmatprep.subr.bf16.mxu0 %v17112_v2 }
 0x242   :  { %v19545_v30 = vrot.slane %v17127_v36, 2 }
 0x243   :  { %v965_v14 = vpop.permute.xlu0 %964 }
 0x244   :  { %14545 = vmatpush1.bf16.msra.mxu0 %v17129_v44  ;;  %v968_v20 = vrot.slane %v965_v14, 2 }
 0x245   :  { %v17148_v35 = vpop.permute.xlu1 %1236  ;;  %14547 = vmatprep.subr.bf16.mxu0 %v17132_v24 }
 0x246   :  { %v970_v62 = vsel %vm345_vm0, %v968_v20, %v19545_v30  ;;  %v17179_v20 = vpack.c.bf16 %v247_v5, %v245_v13  ;;  %v17182_v30 = vpack.c.bf16 %v252_v42, %v250_v59  ;;  %v254_v5 = vld [vmem:[%s19512_s3 + $0x328] sm:$0xff]  ;;  %v256_v13 = vld [vmem:[%s19512_s3 + $0x338] sm:$0xff]  ;;  %v1239_v38 = vrot.slane %v17148_v35, 2 }
 0x247   :  { %v971_v29 = vsel %vm387_vm3, %v965_v14, %v970_v62  ;;  %v17173_v3 = vpop.permute.xlu0 %1329  ;;  %v249_v62 = vld [vmem:[%s19512_s3 + $0x300] sm:$0xff]  ;;  %v251_v14 = vld [vmem:[%s19512_s3 + $0x310] sm:$0xff]  ;;  %v17208_v32 = vpack.c.bf16 %v256_v13, %v254_v5  ;;  %v260_v5 = vld [vmem:[%s19512_s3 + $0x358] sm:$0xff]  ;;  %v1257_v13 = vrot.slane %v17025_v4, 2 }
 0x248   :  { %v975_v58 = vmax.f32 %v16910_v53, %v971_v29  ;;  %14549 = vmatpush1.bf16.msra.mxu0 %v17150_v22  ;;  %19777 = vst [vmem:[#allocation70_spill] sm:$0xff] %v17179_v20  ;;  %19778 = vst [vmem:[#allocation71_spill] sm:$0xff] %v17182_v30  ;;  %v17200_v47 = vpack.c.bf16 %v251_v14, %v249_v62  ;;  %v255_v62 = vld [vmem:[%s19512_s3 + $0x330] sm:$0xff]  ;;  %v258_v14 = vld [vmem:[%s19512_s3 + $0x348] sm:$0xff] }
 0x249   :  { %v17177_v56 = vpop.permute.xlu1 %1255  ;;  %14551 = vmatprep.subr.bf16.mxu0 %v17153_v18  ;;  %19780 = vst [vmem:[#allocation73_spill] sm:$0xff] %v17208_v32  ;;  %v17231_v11 = vpack.c.bf16 %v255_v62, %v253_v23  ;;  %v262_v23 = vld [vmem:[%s19512_s3 + $0x368] sm:$0xff]  ;;  %v264_v62 = vld [vmem:[%s19512_s3 + $0x378] sm:$0xff] }
 0x24a   :  { %v979_v48 = vcombine.high %v975_v58, %v975_v58  ;;  %v986_v53 = vrot.slane %v975_v58, %v17009_v50  ;;  %19779 = vst [vmem:[#allocation72_spill] sm:$0xff] %v17200_v47  ;;  %v1238_v58 = vrot.slane %v17006_v46, 2  ;;  %v1258_v17 = vrot.slane %v17177_v56, 2 }
 0x24b   :  { %v17197_v59 = vpop.permute.xlu0 %1348  ;;  %19781 = vst [vmem:[#allocation74_spill] sm:$0xff] %v17231_v11 }
 0x24c   :  { %14553 = vmatpush1.bf16.msra.mxu0 %v17179_v20  ;;  %v994_v29 = vcombine.high %v986_v53, %v986_v53  ;;  %v17203_v40 = vrot.slane %v979_v48, %v17009_v50  ;;  %v1240_v61 = vsel %vm345_vm0, %v1238_v58, %v1239_v38  ;;  %v1226_v58 = vmul.f32 %v16945_v9, %v1225_v21 }
 0x24d   :  { %v1275_v42 = vpop.permute.xlu1 %1274  ;;  %14555 = vmatprep.subr.bf16.mxu0 %v17182_v30  ;;  %v1259_v55 = vsel %vm345_vm0, %v1257_v13, %v1258_v17  ;;  %v17271_v13 = vpack.c.bf16 %v264_v62, %v262_v23  ;;  %v1261_v39 = vsel %vm367_vm2, %v17177_v56, %v1258_v17  ;;  %v17287_v17 = vpack.c.bf16 %v263_v45, %v261_v49 }
 0x24e   :  { %1075 = vmatprep.mubr.f32.mxu1 %v994_v29  ;;  %v995_v48 = vcombine.high %v17203_v40, %v17203_v40  ;;  %v1277_v57 = vrot.slane %v1275_v42, 2  ;;  %v1333_v62 = vrot.slane %v17173_v3, 2 }
 0x24f   :  { %1076 = vmatmul.mubr.f32.vlgmr.msra.gmra.mrb[0].mxu1 %v986_v53  ;;  %v17227_v15 = vpop.permute.xlu0 %1367  ;;  %v17239_v53 = vpack.c.bf16 %v260_v5, %v258_v14  ;;  %v1295_v14 = vrot.slane %v17086_v7, 2  ;;  %v1242_v5 = vsel %vm347_vm1, %v17148_v35, %v1239_v38 }
 0x250   :  { %14557 = vmatpush1.bf16.msra.mxu0 %v17200_v47  ;;  %14703 = vmatpush1.bf16.msra.mxu1 %v17027_v6  ;;  %v259_v6 = vld [vmem:[%s19512_s3 + $0x350] sm:$0xff]  ;;  %v1278_v37 = vsel %vm345_vm0, %v1276_v63, %v1277_v57  ;;  %v1280_v56 = vsel %vm387_vm3, %v1275_v42, %v1277_v57 }
 0x251   :  { %v1294_v29 = vpop.permute.xlu1 %1293  ;;  %1146 = vmatprep.mubr.f32.mxu1 %v995_v48  ;;  %14559 = vmatprep.subr.bf16.mxu0 %v17208_v32  ;;  %19782 = vst [vmem:[#allocation75_spill] sm:$0xff] %v17239_v53  ;;  %v1227_v48 = vmul.f32 %v16952_v0, %v1225_v21  ;;  %v1241_v21 = vsel %vm347_vm1, %v17006_v46, %v1240_v61  ;;  %v266_v61 = vld [vmem:[%s19512_s3 + $0x388] sm:$0xff] }
 0x252   :  { %14705 = vmatprep.subr.bf16.mxu1 %v17032_v12  ;;  %v1296_v51 = vrot.slane %v1294_v29, 2  ;;  %v17269_v35 = vpack.c.bf16 %v259_v6, %v257_v8  ;;  %v1314_v12 = vrot.slane %v17110_v27, 2  ;;  %v268_v8 = vld [vmem:[%s19512_s3 + $0x398] sm:$0xff]  ;;  %v1260_v6 = vsel %vm367_vm2, %v17025_v4, %v1259_v55 }
 0x253   :  { %v17263_v43 = vpop.permute.xlu0 %1673  ;;  %v1246_v46 = vadd.f32 %v1242_v5, %v1227_v48  ;;  %v1245_v63 = vadd.f32 %v1241_v21, %v1226_v58  ;;  %v17296_v5 = vpack.c.bf16 %v268_v8, %v266_v61 }
 0x254   :  { %14561 = vmatpush1.bf16.msra.mxu0 %v17231_v11  ;;  %14707 = vmatpush1.bf16.msra.mxu1 %v17049_v28  ;;  %v1297_v23 = vsel %vm345_vm0, %v1295_v14, %v1296_v51  ;;  %v1279_v28 = vsel %vm387_vm3, %v17060_v52, %v1278_v37  ;;  %v1299_v55 = vsel %vm407_vm4, %v1294_v29, %v1296_v51  ;;  %v265_v37 = vld [vmem:[%s19512_s3 + $0x380] sm:$0xff]  ;;  %v270_v51 = vld [vmem:[%s19512_s3 + $0x3a8] sm:$0xff] }
 0x255   :  { %v1313_v38 = vpop.permute.xlu1 %1312  ;;  %14563 = vmatprep.subr.bf16.mxu0 %v17239_v53  ;;  %14709 = vmatprep.subr.bf16.mxu1 %v17052_v34  ;;  %v1265_v34 = vadd.f32 %v1261_v39, %v1246_v46  ;;  %v1264_v49 = vadd.f32 %v1260_v6, %v1245_v63  ;;  %v267_v39 = vld [vmem:[%s19512_s3 + $0x390] sm:$0xff]  ;;  %v1298_v42 = vsel %vm407_vm4, %v17086_v7, %v1297_v23  ;;  %v274_v23 = vld [vmem:[%s19512_s3 + $0x3c8] sm:$0xff] }
 0x256   :  { %v1315_v33 = vrot.slane %v1313_v38, 2  ;;  %v17327_v8 = vpack.c.bf16 %v267_v39, %v265_v37 }
 0x257   :  { %v17298_v45 = vpop.permute.xlu0 %1692  ;;  %v1284_v52 = vadd.f32 %v1280_v56, %v1265_v34  ;;  %v1283_v58 = vadd.f32 %v1279_v28, %v1264_v49  ;;  %v1352_v34 = vrot.slane %v17197_v59, 2 }
 0x258   :  { %14565 = vmatpush1.bf16.msra.mxu0 %v17269_v35  ;;  %14711 = vmatpush1.bf16.msra.mxu1 %v17069_v60  ;;  %v1316_v57 = vsel %vm345_vm0, %v1314_v12, %v1315_v33  ;;  %v272_v12 = vld [vmem:[%s19512_s3 + $0x3b8] sm:$0xff]  ;;  %v1318_v29 = vsel %vm427_vm5, %v1313_v38, %v1315_v33  ;;  %v271_v38 = vld [vmem:[%s19512_s3 + $0x3b0] sm:$0xff] }
 0x259   :  { %v1332_v48 = vpop.permute.xlu1 %1331  ;;  %14567 = vmatprep.subr.bf16.mxu0 %v17271_v13  ;;  %14713 = vmatprep.subr.bf16.mxu1 %v17072_v26  ;;  %v1303_v21 = vadd.f32 %v1299_v55, %v1284_v52  ;;  %v1317_v7 = vsel %vm427_vm5, %v17110_v27, %v1316_v57  ;;  %v1302_v6 = vadd.f32 %v1298_v42, %v1283_v58  ;;  %v269_v27 = vld [vmem:[%s19512_s3 + $0x3a0] sm:$0xff] }
 0x25a   :  { %v1334_v4 = vrot.slane %v1332_v48, 2  ;;  %v17332_v28 = vpack.c.bf16 %v272_v12, %v270_v51  ;;  %v17357_v52 = vpack.c.bf16 %v271_v38, %v269_v27 }
 0x25b   :  { %v1322_v63 = vadd.f32 %v1318_v29, %v1303_v21  ;;  %v1321_v49 = vadd.f32 %v1317_v7, %v1302_v6  ;;  %v273_v29 = vld [vmem:[%s19512_s3 + $0x3c0] sm:$0xff]  ;;  %v1381_v21 = vstv %s17318_s21  ;;  %v19783_v7 = vrot.slane %v16997_v19, 2  ;;  %s17947_s21 = sld [smem:[#allocation2 + $0x32]] }
 0x25c   :  { %v1335_v14 = vsel %vm345_vm0, %v1333_v62, %v1334_v4  ;;  %14569 = vmatpush1.bf16.msra.mxu0 %v17287_v17  ;;  %14715 = vmatpush1.bf16.msra.mxu1 %v17089_v16  ;;  %v1337_v46 = vsel %vm447_vm6, %v1332_v48, %v1334_v4  ;;  %v276_v62 = vld [vmem:[%s19512_s3 + $0x3d8] sm:$0xff]  ;;  %v17348_v48 = vpop.permute.xlu0 %1711  ;;  %v1371_v4 = vrot.slane %v17227_v15, 2 }
 0x25d   :  { %v1351_v61 = vpop.permute.xlu1 %1350  ;;  %14571 = vmatprep.subr.bf16.mxu0 %v17296_v5  ;;  %14717 = vmatprep.subr.bf16.mxu1 %v17092_v1  ;;  %v1336_v56 = vsel %vm447_vm6, %v17173_v3, %v1335_v14  ;;  %v1341_v37 = vadd.f32 %v1337_v46, %v1322_v63  ;;  %v17361_v12 = vpack.c.bf16 %v276_v62, %v274_v23  ;;  %v278_v14 = vld [vmem:[%s19512_s3 + $0x3e8] sm:$0xff] }
 0x25e   :  { %v1353_v33 = vrot.slane %v1351_v61, 2  ;;  %v1340_v42 = vadd.f32 %v1336_v56, %v1321_v49  ;;  %v279_v49 = vld [vmem:[%s19512_s3 + $0x3f0] sm:$0xff] }
 0x260   :  { %v1356_v55 = vsel %vm467_vm7, %v1351_v61, %v1353_v33  ;;  %v1354_v57 = vsel %vm345_vm0, %v1352_v34, %v1353_v33  ;;  %14573 = vmatpush1.bf16.msra.mxu0 %v17327_v8  ;;  %14719 = vmatpush1.bf16.msra.mxu1 %v17107_v25  ;;  %v280_v34 = vld [vmem:[%s19512_s3 + $0x3f8] sm:$0xff]  ;;  %v525_v61 = vsel %vm387_vm3, %v16997_v19, %v19783_v7  ;;  %v17390_v23 = vpop.permute.xlu0 %1730 }
 0x261   :  { %v1355_v3 = vsel %vm467_vm7, %v17197_v59, %v1354_v57  ;;  %v1370_v39 = vpop.permute.xlu1 %1369  ;;  %14575 = vmatprep.subr.bf16.mxu0 %v17332_v28  ;;  %14721 = vmatprep.subr.bf16.mxu1 %v17112_v2  ;;  %v275_v59 = vld [vmem:[%s19512_s3 + $0x3d0] sm:$0xff]  ;;  %v1360_v58 = vadd.f32 %v1356_v55, %v1341_v37  ;;  %v17394_v62 = vpack.c.bf16 %v280_v34, %v278_v14  ;;  %v284_v37 = vld [vmem:[%s19512_s3 + $0x418] sm:$0xff]  ;;  %v286_v34 = vld [vmem:[%s19512_s3 + $0x428] sm:$0xff] }
 0x262   :  { %v1372_v51 = vrot.slane %v1370_v39, 2  ;;  %v1359_v46 = vadd.f32 %v1355_v3, %v1340_v42  ;;  %v17388_v56 = vpack.c.bf16 %v275_v59, %v273_v29  ;;  %v529_v55 = vmax.f32 %v16854_v54, %v525_v61  ;;  %v281_v59 = vld [vmem:[%s19512_s3 + $0x400] sm:$0xff] }
 0x264   :  { %v1375_v6 = vsel %vm487_vm8, %v1370_v39, %v1372_v51  ;;  %v1373_v33 = vsel %vm345_vm0, %v1371_v4, %v1372_v51  ;;  %14577 = vmatpush1.bf16.msra.mxu0 %v17357_v52  ;;  %14723 = vmatpush1.bf16.msra.mxu1 %v17129_v44  ;;  %v282_v4 = vld [vmem:[%s19512_s3 + $0x408] sm:$0xff]  ;;  %v17434_v14 = vrot.slane %v529_v55, %v17009_v50  ;;  %v17445_v7 = vpop.permute.xlu0 %1749  ;;  %v292_v55 = vld [vmem:[%s19512_s3 + $0x458] sm:$0xff] }
 0x265   :  { %v1379_v27 = vadd.f32 %v1375_v6, %v1360_v58  ;;  %v1374_v38 = vsel %vm487_vm8, %v17227_v15, %v1373_v33  ;;  %v17386_v63 = vpop.permute.xlu1 %1675  ;;  %14579 = vmatprep.subr.bf16.mxu0 %v17361_v12  ;;  %14725 = vmatprep.subr.bf16.mxu1 %v17132_v24  ;;  %v277_v15 = vld [vmem:[%s19512_s3 + $0x3e0] sm:$0xff]  ;;  %v17425_v29 = vpack.c.bf16 %v284_v37, %v282_v4  ;;  %v283_v58 = vld [vmem:[%s19512_s3 + $0x410] sm:$0xff]  ;;  %v1677_v33 = vrot.slane %v17263_v43, 2 }
 0x266   :  { %v1378_v19 = vadd.f32 %v1374_v38, %v1359_v46  ;;  %v17420_v42 = vpack.c.bf16 %v279_v49, %v277_v15  ;;  %v17452_v46 = vpack.c.bf16 %v283_v58, %v281_v59  ;;  %v1678_v6 = vrot.slane %v17386_v63, 2  ;;  %v285_v38 = vld [vmem:[%s19512_s3 + $0x420] sm:$0xff]  ;;  %v290_v49 = vld [vmem:[%s19512_s3 + $0x448] sm:$0xff] }
 0x267   :  { %v17403_v57 = vadd.f32 %v1381_v21, %v1379_v27  ;;  %v556_v15 = vcombine.high %v17434_v14, %v17434_v14  ;;  %v1664_v4 = vstv %s17411_s26  ;;  %v1696_v59 = vrot.slane %v17298_v45, 2  ;;  %s17840_s26 = sld [smem:[#allocation2 + $0x27]] }
 0x268   :  { %v17413_v3 = vadd.f32 %v1381_v21, %v1378_v19  ;;  %14581 = vmatpush1.bf16.msra.mxu0 %v17388_v56  ;;  %14727 = vmatpush1.bf16.msra.mxu1 %v17150_v22  ;;  %v288_v21 = vld [vmem:[%s19512_s3 + $0x438] sm:$0xff]  ;;  %v287_v19 = vld [vmem:[%s19512_s3 + $0x430] sm:$0xff]  ;;  %v1734_v22 = vrot.slane %v17390_v23, 2 }
 0x269   :  { %v17417_v39 = vpop.permute.xlu1 %1694  ;;  %v19599_v54 = vmax.f32 %v17403_v57, 0.0  ;;  %14583 = vmatprep.subr.bf16.mxu0 %v17394_v62  ;;  %14729 = vmatprep.subr.bf16.mxu1 %v17153_v18  ;;  %v17458_v27 = vpack.c.bf16 %v288_v21, %v286_v34  ;;  %v17480_v34 = vpack.c.bf16 %v287_v19, %v285_v38  ;;  %v289_v21 = vld [vmem:[%s19512_s3 + $0x440] sm:$0xff]  ;;  %v291_v38 = vld [vmem:[%s19512_s3 + $0x450] sm:$0xff]  ;;  %v294_v19 = vld [vmem:[%s19512_s3 + $0x468] sm:$0xff] }
 0x26a   :  { %v19598_v51 = vmax.f32 %v17413_v3, 0.0  ;;  %v1697_v37 = vrot.slane %v17417_v39, 2  ;;  %v17512_v2 = vpack.c.bf16 %v291_v38, %v289_v21 }
 0x26b   :  { %1390 = vrot.lane.b32.xlu1 %v19599_v54, %s16177_s30  ;;  %19784 = vst [vmem:[#allocation76_spill] sm:$0xff] %v17480_v34  ;;  %v1679_v54 = vsel %vm345_vm0, %v1677_v33, %v1678_v6  ;;  %v296_v33 = vld [vmem:[%s19512_s3 + $0x478] sm:$0xff] }
 0x26c   :  { %1388 = vrot.lane.b32.xlu0 %v19598_v51, %s16177_s30  ;;  %14585 = vmatpush1.bf16.msra.mxu0 %v17420_v42  ;;  %v17485_v51 = vpop.permute.xlu0 %1768  ;;  %v1680_v24 = vsel %vm347_vm1, %v17263_v43, %v1679_v54  ;;  %19786 = vst [vmem:[#allocation78_spill] sm:$0xff] %v17512_v2  ;;  %v1753_v43 = vrot.slane %v17445_v7, 2  ;;  %v295_v54 = vld [vmem:[%s19512_s3 + $0x470] sm:$0xff] }
 0x26d   :  { %14731 = vmatpush1.bf16.msra.mxu1 %v17179_v20  ;;  %v1714_v61 = vpop.permute.xlu1 %1713  ;;  %14587 = vmatprep.subr.bf16.mxu0 %v17425_v29  ;;  %v1715_v20 = vrot.slane %v17348_v48, 2 }
 0x26e   :  { %14733 = vmatprep.subr.bf16.mxu1 %v17182_v30  ;;  %v1716_v30 = vrot.slane %v1714_v61, 2 }
 0x26f   :  { %708 = vmatmul.mubr.f32.vlgmr.msra.gmra.mrb[0].mxu0 %v17030_v10  ;;  %v17491_v10 = vpack.c.bf16 %v292_v55, %v290_v49  ;;  %v1681_v49 = vsel %vm347_vm1, %v17386_v63, %v1678_v6  ;;  %v1698_v55 = vsel %vm345_vm0, %v1696_v59, %v1697_v37  ;;  %v1700_v63 = vsel %vm367_vm2, %v17417_v39, %v1697_v37  ;;  %v298_v59 = vld [vmem:[%s19512_s3 + $0x488] sm:$0xff]  ;;  %v300_v39 = vld [vmem:[%s19512_s3 + $0x498] sm:$0xff] }
 0x270   :  { %14589 = vmatpush1.bf16.msra.mxu0 %v17452_v46  ;;  %12934 = vmatprep.mubr.msk.f32.mxu0 %vm562_vm9, %v556_v15  ;;  %v1666_v15 = vmul.f32 %v16952_v0, %v1664_v4  ;;  %v17514_v0 = vpack.c.bf16 %v296_v33, %v294_v19  ;;  %v1717_v6 = vsel %vm345_vm0, %v1715_v20, %v1716_v30  ;;  %v1788_v21 = vpop.permute.xlu0 %1787 }
 0x271   :  { %v1733_v58 = vpop.permute.xlu1 %1732  ;;  %14735 = vmatpush1.bf16.msra.mxu1 %v17200_v47  ;;  %14591 = vmatprep.subr.bf16.mxu0 %v17458_v27  ;;  %19785 = vst [vmem:[#allocation77_spill] sm:$0xff] %v17491_v10  ;;  %v1665_v47 = vmul.f32 %v16945_v9, %v1664_v4  ;;  %v293_v9 = vld [vmem:[%s19512_s3 + $0x460] sm:$0xff]  ;;  %v1699_v37 = vsel %vm367_vm2, %v17298_v45, %v1698_v55 }
 0x272   :  { %14737 = vmatprep.subr.bf16.mxu1 %v17208_v32  ;;  %v1735_v18 = vrot.slane %v1733_v58, 2  ;;  %19787 = vst [vmem:[#allocation79_spill] sm:$0xff] %v17514_v0  ;;  %v1685_v20 = vadd.f32 %v1681_v49, %v1666_v15  ;;  %v1719_v19 = vsel %vm387_vm3, %v1714_v61, %v1716_v30  ;;  %v1718_v25 = vsel %vm387_vm3, %v17348_v48, %v1717_v6  ;;  %v297_v30 = vld [vmem:[%s19512_s3 + $0x480] sm:$0xff]  ;;  %v299_v48 = vld [vmem:[%s19512_s3 + $0x490] sm:$0xff] }
 0x273   :  { %v1684_v38 = vadd.f32 %v1680_v24, %v1665_v47  ;;  %v17543_v49 = vpack.c.bf16 %v295_v54, %v293_v9  ;;  %v17545_v45 = vpack.c.bf16 %v300_v39, %v298_v59  ;;  %v1791_v54 = vrot.slane %v1788_v21, 2 }
 0x274   :  { %14593 = vmatpush1.bf16.msra.mxu0 %v17480_v34  ;;  %v1736_v33 = vsel %vm345_vm0, %v1734_v22, %v1735_v18  ;;  %v1704_v32 = vadd.f32 %v1700_v63, %v1685_v20  ;;  %v1738_v47 = vsel %vm407_vm4, %v1733_v58, %v1735_v18  ;;  %v302_v18 = vld [vmem:[%s19512_s3 + $0x4a8] sm:$0xff]  ;;  %v304_v58 = vld [vmem:[%s19512_s3 + $0x4b8] sm:$0xff]  ;;  %v17573_v39 = vpack.c.bf16 %v299_v48, %v297_v30  ;;  %v1807_v20 = vpop.permute.xlu0 %1806 }
 0x275   :  { %v1752_v44 = vpop.permute.xlu1 %1751  ;;  %14739 = vmatpush1.bf16.msra.mxu1 %v17231_v11  ;;  %14595 = vmatprep.subr.bf16.mxu0 %v17491_v10  ;;  %v1772_v11 = vrot.slane %v17485_v51, 2  ;;  %19788 = vst [vmem:[#allocation80_spill] sm:$0xff] %v17543_v49  ;;  %19789 = vst [vmem:[#allocation81_spill] sm:$0xff] %v17545_v45  ;;  %v1703_v55 = vadd.f32 %v1699_v37, %v1684_v38  ;;  %v1737_v9 = vsel %vm407_vm4, %v17390_v23, %v1736_v33  ;;  %v306_v33 = vld [vmem:[%s19512_s3 + $0x4c8] sm:$0xff] }
 0x276   :  { %v1754_v4 = vrot.slane %v1752_v44, 2  ;;  %14741 = vmatprep.subr.bf16.mxu1 %v17239_v53  ;;  %v1723_v61 = vadd.f32 %v1719_v19, %v1704_v32  ;;  %19790 = vst [vmem:[#allocation82_spill] sm:$0xff] %v17573_v39 }
 0x277   :  { %v1722_v63 = vadd.f32 %v1718_v25, %v1703_v55 }
 0x278   :  { %14597 = vmatpush1.bf16.msra.mxu0 %v17512_v2  ;;  %v1755_v24 = vsel %vm345_vm0, %v1753_v43, %v1754_v4  ;;  %v1757_v6 = vsel %vm427_vm5, %v1752_v44, %v1754_v4  ;;  %v1742_v32 = vadd.f32 %v1738_v47, %v1723_v61  ;;  %v303_v4 = vld [vmem:[%s19512_s3 + $0x4b0] sm:$0xff] }
 0x279   :  { %v1771_v15 = vpop.permute.xlu1 %1770  ;;  %14743 = vmatpush1.bf16.msra.mxu1 %v17269_v35  ;;  %14599 = vmatprep.subr.bf16.mxu0 %v17514_v0  ;;  %v1756_v23 = vsel %vm427_vm5, %v17445_v7, %v1755_v24  ;;  %v1741_v37 = vadd.f32 %v1737_v9, %v1722_v63  ;;  %v301_v7 = vld [vmem:[%s19512_s3 + $0x4a0] sm:$0xff] }
 0x27a   :  { %v1773_v22 = vrot.slane %v1771_v15, 2  ;;  %14745 = vmatprep.subr.bf16.mxu1 %v17271_v13  ;;  %v1761_v38 = vadd.f32 %v1757_v6, %v1742_v32  ;;  %v17599_v61 = vpack.c.bf16 %v303_v4, %v301_v7  ;;  %v305_v63 = vld [vmem:[%s19512_s3 + $0x4c0] sm:$0xff] }
 0x27b   :  { %v1760_v55 = vadd.f32 %v1756_v23, %v1741_v37  ;;  %v1820_v37 = vstv %s17568_s11  ;;  %s17859_s11 = sld [smem:[#allocation2 + $0x28]] }
 0x27c   :  { %v1774_v43 = vsel %vm345_vm0, %v1772_v11, %v1773_v22  ;;  %14601 = vmatpush1.bf16.msra.mxu0 %v17543_v49  ;;  %v1776_v25 = vsel %vm447_vm6, %v1771_v15, %v1773_v22  ;;  %v17578_v11 = vpack.c.bf16 %v304_v58, %v302_v18  ;;  %v308_v15 = vld [vmem:[%s19512_s3 + $0x4d8] sm:$0xff]  ;;  %v1810_v22 = vrot.slane %v1807_v20, 2  ;;  %19792 = vst [vmem:[#allocation84_spill] sm:$0xff] %v17599_v61 }
 0x27d   :  { %v1790_v59 = vpop.permute.xlu1 %1789  ;;  %14747 = vmatpush1.bf16.msra.mxu1 %v17287_v17  ;;  %14603 = vmatprep.subr.bf16.mxu0 %v17545_v45  ;;  %v1775_v19 = vsel %vm447_vm6, %v17485_v51, %v1774_v43  ;;  %v1780_v30 = vadd.f32 %v1776_v25, %v1761_v38  ;;  %v17603_v58 = vpack.c.bf16 %v308_v15, %v306_v33  ;;  %v310_v43 = vld [vmem:[%s19512_s3 + $0x4e8] sm:$0xff]  ;;  %v19794_v25 = vrot.slane %v17127_v36, 2  ;;  %v309_v15 = vld [vmem:[%s19512_s3 + $0x4e0] sm:$0xff] }
 0x27e   :  { %v1792_v44 = vrot.slane %v1790_v59, 2  ;;  %19791 = vst [vmem:[#allocation83_spill] sm:$0xff] %v17578_v11  ;;  %14749 = vmatprep.subr.bf16.mxu1 %v17296_v5  ;;  %v1779_v9 = vadd.f32 %v1775_v19, %v1760_v55  ;;  %v314_v55 = vld [vmem:[%s19512_s3 + $0x508] sm:$0xff] }
 0x27f   :  { %19793 = vst [vmem:[#allocation85_spill] sm:$0xff] %v17603_v58 }
 0x280   :  { %v1795_v47 = vsel %vm467_vm7, %v1790_v59, %v1792_v44  ;;  %v1793_v24 = vsel %vm345_vm0, %v1791_v54, %v1792_v44  ;;  %14605 = vmatpush1.bf16.msra.mxu0 %v17573_v39  ;;  %v312_v54 = vld [vmem:[%s19512_s3 + $0x4f8] sm:$0xff]  ;;  %v972_v44 = vsel %vm387_vm3, %v17127_v36, %v19794_v25  ;;  %v311_v36 = vld [vmem:[%s19512_s3 + $0x4f0] sm:$0xff] }
 0x281   :  { %v1794_v48 = vsel %vm467_vm7, %v1788_v21, %v1793_v24  ;;  %v1809_v51 = vpop.permute.xlu1 %1808  ;;  %14751 = vmatpush1.bf16.msra.mxu1 %v17327_v8  ;;  %14607 = vmatprep.subr.bf16.mxu0 %v17578_v11  ;;  %v307_v21 = vld [vmem:[%s19512_s3 + $0x4d0] sm:$0xff]  ;;  %v1799_v6 = vadd.f32 %v1795_v47, %v1780_v30  ;;  %v17631_v33 = vpack.c.bf16 %v312_v54, %v310_v43  ;;  %v316_v47 = vld [vmem:[%s19512_s3 + $0x518] sm:$0xff]  ;;  %v317_v54 = vld [vmem:[%s19512_s3 + $0x520] sm:$0xff] }
 0x282   :  { %v1811_v18 = vrot.slane %v1809_v51, 2  ;;  %14753 = vmatprep.subr.bf16.mxu1 %v17332_v28  ;;  %v1798_v32 = vadd.f32 %v1794_v48, %v1779_v9  ;;  %v17627_v38 = vpack.c.bf16 %v307_v21, %v305_v63  ;;  %v976_v24 = vmax.f32 %v16898_v41, %v972_v44  ;;  %v313_v41 = vld [vmem:[%s19512_s3 + $0x500] sm:$0xff]  ;;  %v318_v21 = vld [vmem:[%s19512_s3 + $0x528] sm:$0xff] }
 0x283   :  { %19796 = vst [vmem:[#allocation87_spill] sm:$0xff] %v17631_v33  ;;  %v17653_v48 = vpack.c.bf16 %v311_v36, %v309_v15  ;;  %v17658_v9 = vpack.c.bf16 %v316_v47, %v314_v55  ;;  %v328_v15 = vld [vmem:[%s19512_s3 + $0x578] sm:$0x1]  ;;  %v325_v47 = vld [vmem:[%s19512_s3 + $0x560] sm:$0xff] }
 0x284   :  { %v1814_v23 = vsel %vm487_vm8, %v1809_v51, %v1811_v18  ;;  %v1812_v59 = vsel %vm345_vm0, %v1810_v22, %v1811_v18  ;;  %14609 = vmatpush1.bf16.msra.mxu0 %v17599_v61  ;;  %19795 = vst [vmem:[#allocation86_spill] sm:$0xff] %v17627_v38  ;;  %v315_v18 = vld [vmem:[%s19512_s3 + $0x510] sm:$0xff]  ;;  %v17671_v63 = vrot.slane %v976_v24, %v17009_v50 }
 0x285   :  { %v1818_v7 = vadd.f32 %v1814_v23, %v1799_v6  ;;  %v1813_v4 = vsel %vm487_vm8, %v1807_v20, %v1812_v59  ;;  %14755 = vmatpush1.bf16.msra.mxu1 %v17357_v52  ;;  %14611 = vmatprep.subr.bf16.mxu0 %v17603_v58  ;;  %19797 = vst [vmem:[#allocation88_spill] sm:$0xff] %v17653_v48  ;;  %19798 = vst [vmem:[#allocation89_spill] sm:$0xff] %v17658_v9  ;;  %v320_v6 = vld [vmem:[%s19512_s3 + $0x538] sm:$0xff]  ;;  %v322_v59 = vld [vmem:[%s19512_s3 + $0x548] sm:$0xff] }
 0x286   :  { %v1817_v19 = vadd.f32 %v1813_v4, %v1798_v32  ;;  %14757 = vmatprep.subr.bf16.mxu1 %v17361_v12  ;;  %v17683_v43 = vpack.c.bf16 %v315_v18, %v313_v41  ;;  %v319_v32 = vld [vmem:[%s19512_s3 + $0x530] sm:$0xff]  ;;  %v17694_v23 = vpack.c.bf16 %v320_v6, %v318_v21  ;;  %v1003_v25 = vcombine.high %v17671_v63, %v17671_v63  ;;  %v321_v4 = vld [vmem:[%s19512_s3 + $0x540] sm:$0xff]  ;;  %v19809_v21 = vld [vmem:[#allocation27_spill] sm:$0xff] }
 0x287   :  { %v17640_v20 = vadd.f32 %v1820_v37, %v1818_v7  ;;  %v17706_v44 = vpack.c.bf16 %v319_v32, %v317_v54  ;;  %v327_v24 = vld [vmem:[%s19512_s3 + $0x570] sm:$0x1]  ;;  %v19805_v41 = vmov 0  ;;  %v19811_v54 = vld [vmem:[#allocation29_spill] sm:$0xff]  ;;  %v19812_v32 = vld [vmem:[#allocation30_spill] sm:$0xff] }
 0x288   :  { %v17649_v22 = vadd.f32 %v1820_v37, %v1817_v19  ;;  %14613 = vmatpush1.bf16.msra.mxu0 %v17627_v38  ;;  %19799 = vst [vmem:[#allocation90_spill] sm:$0xff] %v17683_v43  ;;  %19800 = vst [vmem:[#allocation91_spill] sm:$0xff] %v17694_v23  ;;  %v324_v37 = vld [vmem:[%s19512_s3 + $0x558] sm:$0xff]  ;;  %v323_v19 = vld [vmem:[%s19512_s3 + $0x550] sm:$0xff]  ;;  %v19806_v41 = vsel %vm17740_vm12, 4294967295, %v19805_v41  ;;  %v17745_v18 = vpack.c.bf16 %v327_v24, %v325_v47 }
 0x289   :  { %v19623_v30 = vmax.f32 %v17640_v20, 0.0  ;;  %14759 = vmatpush1.bf16.msra.mxu1 %v17388_v56  ;;  %14615 = vmatprep.subr.bf16.mxu0 %v17631_v33  ;;  %19801 = vst [vmem:[#allocation92_spill] sm:$0xff] %v17706_v44  ;;  %v17710_v7 = vpack.c.bf16 %v324_v37, %v322_v59  ;;  %v17727_v36 = vpack.c.bf16 %v323_v19, %v321_v4  ;;  %19807 = vst [vmem:[#allocation96_spill] sm:$0xff] %v19806_v41  ;;  %v19810_v6 = vld [vmem:[#allocation28_spill] sm:$0xff]  ;;  %v19813_v59 = vld [vmem:[#allocation31_spill] sm:$0xff] }
 0x28a   :  { %v19622_v51 = vmax.f32 %v17649_v22, 0.0  ;;  %14761 = vmatprep.subr.bf16.mxu1 %v17394_v62  ;;  %19808 = vst [vmem:[#allocation97_spill] sm:$0xff] %v17745_v18  ;;  %v19815_v37 = vld [vmem:[#allocation33_spill] sm:$0xff]  ;;  %v19817_v4 = vld [vmem:[#allocation35_spill] sm:$0xff]  ;;  %v19818_v19 = vld [vmem:[#allocation36_spill] sm:$0xff] }
 0x28b   :  { %1829 = vrot.lane.b32.xlu1 %v19623_v30, %s16177_s30  ;;  %19802 = vst [vmem:[#allocation93_spill] sm:$0xff] %v17710_v7  ;;  %19803 = vst [vmem:[#allocation94_spill] sm:$0xff] %v17727_v36  ;;  %v19821_v47 = vld [vmem:[#allocation39_spill] sm:$0xff]  ;;  %v19822_v24 = vld [vmem:[#allocation40_spill] sm:$0xff] }
 0x28c   :  { %1827 = vrot.lane.b32.xlu0 %v19622_v51, %s16177_s30  ;;  %14617 = vmatpush1.bf16.msra.mxu0 %v17653_v48  ;;  %v19823_v51 = vld [vmem:[#allocation41_spill] sm:$0xff]  ;;  %v19824_v30 = vld [vmem:[#allocation42_spill] sm:$0xff] }
 0x28d   :  { %14763 = vmatpush1.bf16.msra.mxu1 %v17420_v42  ;;  %14619 = vmatprep.subr.bf16.mxu0 %v17658_v9  ;;  %v19828_v41 = vld [vmem:[#allocation46_spill] sm:$0xff] }
 0x28e   :  { %14765 = vmatprep.subr.bf16.mxu1 %v17425_v29 }
 0x290   :  { %1147 = vmatmul.mubr.f32.vlgmr.msra.gmra.mrb[0].mxu1 %v17203_v40  ;;  %14621 = vmatpush1.bf16.msra.mxu0 %v17683_v43  ;;  %v326_v40 = vld [vmem:[%s19512_s3 + $0x568] sm:$0xff]  ;;  %s17821_s3 = sld [smem:[#allocation2 + $0x25]] }
 0x291   :  { %14767 = vmatpush1.bf16.msra.mxu1 %v17452_v46  ;;  %12947 = vmatprep.mubr.msk.f32.mxu1 %vm562_vm9, %v1003_v25  ;;  %v17731_v55 = vpack.c.bf16 %v328_v15, %v326_v40  ;;  %v19816_v25 = vld [vmem:[#allocation34_spill] sm:$0xff]  ;;  %v19819_v40 = vld [vmem:[#allocation37_spill] sm:$0xff] }
 0x292   :  { %14623 = vmatprep.subr.bf16.mxu0 %v17694_v23  ;;  %14769 = vmatprep.subr.bf16.mxu1 %v17458_v27  ;;  %v19820_v15 = vld [vmem:[#allocation38_spill] sm:$0xff] }
 0x293   :  { %19804 = vst [vmem:[#allocation95_spill] sm:$0xff] %v17731_v55 }
 0x294   :  { %14625 = vmatpush1.bf16.msra.mxu0 %v17706_v44 }
 0x295   :  { %14771 = vmatpush1.bf16.msra.mxu1 %v17480_v34  ;;  %14627 = vmatprep.subr.bf16.mxu0 %v17710_v7 }
 0x296   :  { %14773 = vmatprep.subr.bf16.mxu1 %v17491_v10 }
 0x298   :  { %14629 = vmatpush1.bf16.msra.mxu0 %v17727_v36 }
 0x299   :  { %14775 = vmatpush1.bf16.msra.mxu1 %v17512_v2  ;;  %14632 = vmatprep.subr.msk.bf16.mxu0 %vm17740_vm12, %v17731_v55 }
 0x29a   :  { %14777 = vmatprep.subr.bf16.mxu1 %v17514_v0 }
 0x29c   :  { %14635 = vmatpush1.bf16.msk.msra.mxu0 %vm17740_vm12, %v17745_v18 }
 0x29d   :  { %14779 = vmatpush1.bf16.msra.mxu1 %v17543_v49  ;;  %14815 = vmatprep.subr.bf16.mxu0 %v16530_v31 }
 0x29e   :  { %14781 = vmatprep.subr.bf16.mxu1 %v17545_v45  ;;  %v19865_v45 = vld [vmem:[#allocation73_spill] sm:$0xff] }
 0x29f   :  { %779 = vmatmul.mubr.f32.vlgmr.msra.gmra.mrb[0].mxu0 %v17434_v14  ;;  %v19814_v14 = vld [vmem:[#allocation32_spill] sm:$0xff] }
 0x2a0   :  { %14817 = vmatpush1.bf16.msra.mxu0 %v19809_v21 }
 0x2a1   :  { %14783 = vmatpush1.bf16.msra.mxu1 %v17573_v39  ;;  %14819 = vmatprep.subr.bf16.mxu0 %v19810_v6  ;;  %v19864_v39 = vld [vmem:[#allocation72_spill] sm:$0xff] }
 0x2a2   :  { %14785 = vmatprep.subr.bf16.mxu1 %v17578_v11 }
 0x2a4   :  { %14821 = vmatpush1.bf16.msra.mxu0 %v19811_v54 }
 0x2a5   :  { %14787 = vmatpush1.bf16.msra.mxu1 %v17599_v61  ;;  %14823 = vmatprep.subr.bf16.mxu0 %v19812_v32 }
 0x2a6   :  { %14789 = vmatprep.subr.bf16.mxu1 %v17603_v58 }
 0x2a8   :  { %14825 = vmatpush1.bf16.msra.mxu0 %v19813_v59 }
 0x2a9   :  { %14791 = vmatpush1.bf16.msra.mxu1 %v17627_v38  ;;  %14827 = vmatprep.subr.bf16.mxu0 %v19814_v14 }
 0x2aa   :  { %14793 = vmatprep.subr.bf16.mxu1 %v17631_v33 }
 0x2ac   :  { %14829 = vmatpush1.bf16.msra.mxu0 %v19815_v37 }
 0x2ad   :  { %14795 = vmatpush1.bf16.msra.mxu1 %v17653_v48  ;;  %14831 = vmatprep.subr.bf16.mxu0 %v19816_v25  ;;  %v2107_v48 = vstv %s17821_s3 }
 0x2ae   :  { %14797 = vmatprep.subr.bf16.mxu1 %v17658_v9 }
 0x2b0   :  { %14833 = vmatpush1.bf16.msra.mxu0 %v19817_v4 }
 0x2b1   :  { %14799 = vmatpush1.bf16.msra.mxu1 %v17683_v43  ;;  %14835 = vmatprep.subr.bf16.mxu0 %v19818_v19 }
 0x2b2   :  { %14801 = vmatprep.subr.bf16.mxu1 %v17694_v23  ;;  %v19841_v23 = vmax.f32 %v17403_v57, 0.0 }
 0x2b4   :  { %14837 = vmatpush1.bf16.msra.mxu0 %v19819_v40 }
 0x2b5   :  { %14803 = vmatpush1.bf16.msra.mxu1 %v17706_v44  ;;  %14839 = vmatprep.subr.bf16.mxu0 %v19820_v15 }
 0x2b6   :  { %14805 = vmatprep.subr.bf16.mxu1 %v17710_v7  ;;  %v19825_v7 = vld [vmem:[#allocation43_spill] sm:$0xff] }
 0x2b8   :  { %14841 = vmatpush1.bf16.msra.mxu0 %v19821_v47 }
 0x2b9   :  { %14807 = vmatpush1.bf16.msra.mxu1 %v17727_v36  ;;  %14843 = vmatprep.subr.bf16.mxu0 %v19822_v24  ;;  %v19826_v36 = vld [vmem:[#allocation44_spill] sm:$0xff] }
 0x2ba   :  { %14810 = vmatprep.subr.msk.bf16.mxu1 %vm17740_vm12, %v17731_v55  ;;  %v19827_v55 = vld [vmem:[#allocation45_spill] sm:$0xff] }
 0x2bc   :  { %14845 = vmatpush1.bf16.msra.mxu0 %v19823_v51 }
 0x2bd   :  { %14813 = vmatpush1.bf16.msk.msra.mxu1 %vm17740_vm12, %v17745_v18  ;;  %14847 = vmatprep.subr.bf16.mxu0 %v19824_v30  ;;  %v19829_v18 = vld [vmem:[#allocation47_spill] sm:$0xff] }
 0x2be   :  { %14993 = vmatprep.subr.bf16.mxu1 %v16530_v31 }
 0x2c0   :  { %1218 = vmatmul.mubr.f32.vlgmr.msra.gmra.mrb[0].mxu1 %v17671_v63  ;;  %14849 = vmatpush1.bf16.msra.mxu0 %v19825_v7  ;;  %v19830_v63 = vld [vmem:[#allocation48_spill] sm:$0xff] }
 0x2c1   :  { %14995 = vmatpush1.bf16.msra.mxu1 %v19809_v21  ;;  %14851 = vmatprep.subr.bf16.mxu0 %v19826_v36  ;;  %v19831_v21 = vld [vmem:[#allocation49_spill] sm:$0xff] }
 0x2c2   :  { %14997 = vmatprep.subr.bf16.mxu1 %v19810_v6  ;;  %v19832_v6 = vld [vmem:[#allocation50_spill] sm:$0xff] }
 0x2c4   :  { %14853 = vmatpush1.bf16.msra.mxu0 %v19827_v55 }
 0x2c5   :  { %14999 = vmatpush1.bf16.msra.mxu1 %v19811_v54  ;;  %14855 = vmatprep.subr.bf16.mxu0 %v19828_v41  ;;  %v19833_v54 = vld [vmem:[#allocation51_spill] sm:$0xff] }
 0x2c6   :  { %15001 = vmatprep.subr.bf16.mxu1 %v19812_v32  ;;  %v19834_v32 = vld [vmem:[#allocation52_spill] sm:$0xff] }
 0x2c8   :  { %14857 = vmatpush1.bf16.msra.mxu0 %v19829_v18 }
 0x2c9   :  { %15003 = vmatpush1.bf16.msra.mxu1 %v19813_v59  ;;  %14859 = vmatprep.subr.bf16.mxu0 %v19830_v63  ;;  %v19835_v59 = vld [vmem:[#allocation53_spill] sm:$0xff] }
 0x2ca   :  { %15005 = vmatprep.subr.bf16.mxu1 %v19814_v14  ;;  %v19836_v14 = vld [vmem:[#allocation54_spill] sm:$0xff] }
 0x2cc   :  { %14861 = vmatpush1.bf16.msra.mxu0 %v19831_v21 }
 0x2cd   :  { %15007 = vmatpush1.bf16.msra.mxu1 %v19815_v37  ;;  %14863 = vmatprep.subr.bf16.mxu0 %v19832_v6  ;;  %v19837_v37 = vld [vmem:[#allocation55_spill] sm:$0xff] }
 0x2ce   :  { %15009 = vmatprep.subr.bf16.mxu1 %v19816_v25  ;;  %v19838_v25 = vld [vmem:[#allocation56_spill] sm:$0xff] }
 0x2d0   :  { %14865 = vmatpush1.bf16.msra.mxu0 %v19833_v54 }
 0x2d1   :  { %15011 = vmatpush1.bf16.msra.mxu1 %v19817_v4  ;;  %14867 = vmatprep.subr.bf16.mxu0 %v19834_v32  ;;  %v19839_v4 = vld [vmem:[#allocation57_spill] sm:$0xff] }
 0x2d2   :  { %15013 = vmatprep.subr.bf16.mxu1 %v19818_v19 }
 0x2d4   :  { %14869 = vmatpush1.bf16.msra.mxu0 %v19835_v59 }
 0x2d5   :  { %15015 = vmatpush1.bf16.msra.mxu1 %v19819_v40  ;;  %14871 = vmatprep.subr.bf16.mxu0 %v19836_v14 }
 0x2d6   :  { %15017 = vmatprep.subr.bf16.mxu1 %v19820_v15  ;;  %v19840_v15 = vld [vmem:[#allocation58_spill] sm:$0xff] }
 0x2d8   :  { %14873 = vmatpush1.bf16.msra.mxu0 %v19837_v37 }
 0x2d9   :  { %15019 = vmatpush1.bf16.msra.mxu1 %v19821_v47  ;;  %14875 = vmatprep.subr.bf16.mxu0 %v19838_v25 }
 0x2da   :  { %15021 = vmatprep.subr.bf16.mxu1 %v19822_v24 }
 0x2dc   :  { %14877 = vmatpush1.bf16.msra.mxu0 %v19839_v4 }
 0x2dd   :  { %v1391_v19 = vpop.permute.xlu1 %1390  ;;  %15023 = vmatpush1.bf16.msra.mxu1 %v19823_v51  ;;  %14879 = vmatprep.subr.bf16.mxu0 %v19840_v15  ;;  %v19842_v51 = vmax.f32 %v17413_v3, 0.0 }
 0x2de   :  { %v1393_v31 = vrot.slane %v1391_v19, 2  ;;  %v1389_v40 = vpop.permute.xlu0 %1388  ;;  %15025 = vmatprep.subr.bf16.mxu1 %v19824_v30 }
 0x2df   :  { %v1392_v44 = vrot.slane %v1389_v40, 2 }
 0x2e0   :  { %v1396_v47 = vsel %vm347_vm1, %v1391_v19, %v1393_v31  ;;  %v2183_v19 = vstv %s17866_s5 }
 0x2e1   :  { %v17835_v24 = vmax.f32 %v19841_v23, %v1396_v47  ;;  %v1394_v43 = vsel %vm345_vm0, %v1392_v44, %v1393_v31  ;;  %15027 = vmatpush1.bf16.msra.mxu1 %v19825_v7  ;;  %v17855_v31 = vld [vmem:[%s19509_s0] sm:$0xff]  ;;  %v2164_v23 = vstv %s17859_s11 }
 0x2e2   :  { %v1395_v9 = vsel %vm347_vm1, %v1389_v40, %v1394_v43  ;;  %15029 = vmatprep.subr.bf16.mxu1 %v19826_v36  ;;  %19843 = vst [vmem:[#allocation98_spill] sm:$0xff] %v17855_v31  ;;  %v2108_v57 = vmul.f32 %v17855_v31, %v2107_v48  ;;  %v2126_v43 = vstv %s17827_s25  ;;  %v2165_v44 = vmul.f32 %v17855_v31, %v2164_v23  ;;  %v19859_v36 = vld [vmem:[#allocation68_spill] sm:$0xff] }
 0x2e3   :  { %v17845_v33 = vmax.f32 %v19842_v51, %v1395_v9  ;;  %1405 = vrot.lane.b32.xlu1 %v17835_v24, %s16178_s29  ;;  %v2127_v3 = vmul.f32 %v17855_v31, %v2126_v43  ;;  %v2145_v51 = vstv %s17840_s26  ;;  %v2184_v40 = vmul.f32 %v17855_v31, %v2183_v19 }
 0x2e4   :  { %v2146_v9 = vmul.f32 %v17855_v31, %v2145_v51 }
 0x2e5   :  { %1403 = vrot.lane.b32.xlu0 %v17845_v33, %s16178_s29  ;;  %15031 = vmatpush1.bf16.msra.mxu1 %v19827_v55 }
 0x2e6   :  { %15033 = vmatprep.subr.bf16.mxu1 %v19828_v41 }
 0x2e9   :  { %2112 = vrot.lane.b32.xlu0 %v2108_v57, %s16177_s30  ;;  %15035 = vmatpush1.bf16.msra.mxu1 %v19829_v18  ;;  %v19858_v18 = vld [vmem:[#allocation67_spill] sm:$0xff] }
 0x2ea   :  { %15037 = vmatprep.subr.bf16.mxu1 %v19830_v63 }
 0x2ed   :  { %2131 = vrot.lane.b32.xlu0 %v2127_v3, %s16176_s2  ;;  %15039 = vmatpush1.bf16.msra.mxu1 %v19831_v21 }
 0x2ee   :  { %15041 = vmatprep.subr.bf16.mxu1 %v19832_v6  ;;  %v19857_v6 = vld [vmem:[#allocation66_spill] sm:$0xff] }
 0x2f1   :  { %2150 = vrot.lane.b32.xlu0 %v2146_v9, %s16178_s29  ;;  %15043 = vmatpush1.bf16.msra.mxu1 %v19833_v54 }
 0x2f2   :  { %15045 = vmatprep.subr.bf16.mxu1 %v19834_v32  ;;  %v19846_v32 = vmax.f32 %v17649_v22, 0.0 }
 0x2f5   :  { %2169 = vrot.lane.b32.xlu0 %v2165_v44, %s16179_s14  ;;  %15047 = vmatpush1.bf16.msra.mxu1 %v19835_v59  ;;  %v2202_v59 = vstv %s17885_s28 }
 0x2f6   :  { %15049 = vmatprep.subr.bf16.mxu1 %v19836_v14 }
 0x2f9   :  { %2188 = vrot.lane.b32.xlu0 %v2184_v40, %s16180_s16  ;;  %15051 = vmatpush1.bf16.msra.mxu1 %v19837_v37  ;;  %v19844_v40 = vmax.f32 %v17640_v20, 0.0  ;;  %v17912_v20 = vld [vmem:[%s19509_s0 + $0x8] sm:$0x3f]  ;;  %s17926_s0 = sld [smem:[#allocation2 + $0x2f]] }
 0x2fa   :  { %15053 = vmatprep.subr.bf16.mxu1 %v19838_v25  ;;  %19847 = vst [vmem:[#allocation100_spill] sm:$0xff] %v17912_v20  ;;  %v2128_v22 = vmul.f32 %v17912_v20, %v2126_v43  ;;  %v2166_v43 = vmul.f32 %v17912_v20, %v2164_v23  ;;  %v2204_v23 = vmul.f32 %v17912_v20, %v2202_v59 }
 0x2fd   :  { %v1830_v47 = vpop.permute.xlu1 %1829  ;;  %15055 = vmatpush1.bf16.msra.mxu1 %v19839_v4 }
 0x2fe   :  { %v1832_v57 = vrot.slane %v1830_v47, 2  ;;  %v1828_v3 = vpop.permute.xlu0 %1827  ;;  %15057 = vmatprep.subr.bf16.mxu1 %v19840_v15 }
 0x2ff   :  { %v1831_v9 = vrot.slane %v1828_v3, 2 }
 0x300   :  { %v1835_v44 = vsel %vm347_vm1, %v1830_v47, %v1832_v57  ;;  %v2109_v47 = vmul.f32 %v17912_v20, %v2107_v48  ;;  %v2147_v48 = vmul.f32 %v17912_v20, %v2145_v51  ;;  %v2185_v51 = vmul.f32 %v17912_v20, %v2183_v19 }
 0x301   :  { %v17896_v14 = vmax.f32 %v19844_v40, %v1835_v44  ;;  %v1833_v37 = vsel %vm345_vm0, %v1831_v9, %v1832_v57  ;;  %v2221_v57 = vstv %s17889_s13  ;;  %v2546_v9 = vstv %s17919_s17 }
 0x302   :  { %v1834_v25 = vsel %vm347_vm1, %v1828_v3, %v1833_v37  ;;  %v2203_v37 = vmul.f32 %v17855_v31, %v2202_v59  ;;  %v2547_v44 = vmul.f32 %v17855_v31, %v2546_v9  ;;  %v2565_v40 = vstv %s17926_s0 }
 0x303   :  { %19845 = vst [vmem:[#allocation99_spill] sm:$0xff] %v17896_v14  ;;  %v17905_v4 = vmax.f32 %v19846_v32, %v1834_v25  ;;  %1844 = vrot.lane.b32.xlu1 %v17896_v14, %s16178_s29  ;;  %v2222_v32 = vmul.f32 %v17855_v31, %v2221_v57  ;;  %v2240_v25 = vstv %s17901_s9  ;;  %v2223_v19 = vmul.f32 %v17912_v20, %v2221_v57 }
 0x304   :  { %v2241_v3 = vmul.f32 %v17855_v31, %v2240_v25  ;;  %v2242_v59 = vmul.f32 %v17912_v20, %v2240_v25  ;;  %v2548_v57 = vmul.f32 %v17912_v20, %v2546_v9 }
 0x305   :  { %1842 = vrot.lane.b32.xlu0 %v17905_v4, %s16178_s29 }
 0x307   :  { %2114 = vrot.lane.b32.xlu1 %v2109_v47, %s16177_s30  ;;  %v2566_v47 = vmul.f32 %v17855_v31, %v2565_v40 }
 0x309   :  { %2207 = vrot.lane.b32.xlu0 %v2203_v37, %s16181_s18  ;;  %v2584_v37 = vstv %s17933_s19 }
 0x30b   :  { %2133 = vrot.lane.b32.xlu1 %v2128_v22, %s16176_s2  ;;  %v2585_v22 = vmul.f32 %v17855_v31, %v2584_v37 }
 0x30d   :  { %2226 = vrot.lane.b32.xlu0 %v2222_v32, %s16182_s7  ;;  %v2603_v32 = vstv %s17940_s24 }
 0x30f   :  { %2152 = vrot.lane.b32.xlu1 %v2147_v48, %s16178_s29  ;;  %v2604_v48 = vmul.f32 %v17855_v31, %v2603_v32 }
 0x311   :  { %2245 = vrot.lane.b32.xlu0 %v2241_v3, %s16183_s1  ;;  %v2622_v3 = vstv %s17947_s21 }
 0x313   :  { %2171 = vrot.lane.b32.xlu1 %v2166_v43, %s16179_s14  ;;  %v2623_v43 = vmul.f32 %v17855_v31, %v2622_v3 }
 0x315   :  { %2551 = vrot.lane.b32.xlu0 %v2547_v44, %s16177_s30  ;;  %v2641_v44 = vstv %s17954_s23 }
 0x317   :  { %2190 = vrot.lane.b32.xlu1 %v2185_v51, %s16180_s16  ;;  %v2642_v51 = vmul.f32 %v17855_v31, %v2641_v44 }
 0x319   :  { %2570 = vrot.lane.b32.xlu0 %v2566_v47, %s16176_s2  ;;  %v2660_v47 = vstv %s12994_s8 }
 0x31a   :  { %v2661_v25 = vmul.f32 %v17855_v31, %v2660_v47 }
 0x31b   :  { %2209 = vrot.lane.b32.xlu1 %v2204_v23, %s16181_s18  ;;  %v2567_v23 = vmul.f32 %v17912_v20, %v2565_v40  ;;  %v2624_v40 = vmul.f32 %v17912_v20, %v2622_v3 }
 0x31d   :  { %2589 = vrot.lane.b32.xlu0 %v2585_v22, %s16178_s29  ;;  %v2679_v22 = vstv %s12995_s4 }
 0x31e   :  { %v2680_v9 = vmul.f32 %v17855_v31, %v2679_v22 }
 0x31f   :  { %2228 = vrot.lane.b32.xlu1 %v2223_v19, %s16182_s7  ;;  %v2586_v19 = vmul.f32 %v17912_v20, %v2584_v37  ;;  %v2662_v37 = vmul.f32 %v17912_v20, %v2660_v47 }
 0x321   :  { %2608 = vrot.lane.b32.xlu0 %v2604_v48, %s16179_s14  ;;  %v2605_v48 = vmul.f32 %v17912_v20, %v2603_v32 }
 0x323   :  { %2247 = vrot.lane.b32.xlu1 %v2242_v59, %s16183_s1  ;;  %v2643_v59 = vmul.f32 %v17912_v20, %v2641_v44 }
 0x325   :  { %2627 = vrot.lane.b32.xlu0 %v2623_v43, %s16180_s16  ;;  %v2681_v43 = vmul.f32 %v17912_v20, %v2679_v22 }
 0x327   :  { %2553 = vrot.lane.b32.xlu1 %v2548_v57, %s16177_s30 }
 0x329   :  { %2646 = vrot.lane.b32.xlu0 %v2642_v51, %s16181_s18 }
 0x32b   :  { %2572 = vrot.lane.b32.xlu1 %v2567_v23, %s16176_s2  ;;  %s12974_s2 = sld [smem:[#allocation2 + $0x24]] }
 0x32d   :  { %2665 = vrot.lane.b32.xlu0 %v2661_v25, %s16182_s7 }
 0x32f   :  { %2591 = vrot.lane.b32.xlu1 %v2586_v19, %s16178_s29 }
 0x331   :  { %2684 = vrot.lane.b32.xlu0 %v2680_v9, %s16183_s1  ;;  %v2103_v61 = vstv %s12974_s2 }
 0x332   :  { %v2105_v0 = vmul.f32 %v17912_v20, %v2103_v61 }
 0x333   :  { %2610 = vrot.lane.b32.xlu1 %v2605_v48, %s16179_s14  ;;  %s18096_s14 = sld [smem:[#allocation6 + $0x4]] }
 0x337   :  { %2629 = vrot.lane.b32.xlu1 %v2624_v40, %s16180_s16  ;;  %s18137_s16 = sld [smem:[#allocation2 + $0x2d]] }
 0x33b   :  { %2648 = vrot.lane.b32.xlu1 %v2643_v59, %s16181_s18  ;;  %s18204_s18 = sld [smem:[#allocation6 + $0x5]] }
 0x33f   :  { %2667 = vrot.lane.b32.xlu1 %v2662_v37, %s16182_s7 }
 0x343   :  { %2686 = vrot.lane.b32.xlu1 %v2681_v43, %s16183_s1  ;;  %v19848_v43 = vld [vmem:[#allocation60_spill] sm:$0xff] }
 0x355   :  { %v1406_v32 = vpop.permute.xlu1 %1405 }
 0x356   :  { %v1408_v57 = vrot.slane %v1406_v32, 2 }
 0x357   :  { %v1404_v51 = vpop.permute.xlu0 %1403 }
 0x358   :  { %v17991_v23 = vsel %vm387_vm3, %v1406_v32, %v1408_v57  ;;  %v1407_v3 = vrot.slane %v1404_v51, 2  ;;  %v19849_v32 = vld [vmem:[#allocation61_spill] sm:$0xff] }
 0x35a   :  { %v1409_v25 = vsel %vm345_vm0, %v1407_v3, %v1408_v57  ;;  %v19850_v57 = vld [vmem:[#allocation62_spill] sm:$0xff] }
 0x35b   :  { %v1410_v44 = vsel %vm387_vm3, %v1404_v51, %v1409_v25  ;;  %v17995_v19 = vpop.permute.xlu0 %2112  ;;  %v19851_v51 = vld [vmem:[#allocation63_spill] sm:$0xff] }
 0x35c   :  { %v1414_v47 = vmax.f32 %v17845_v33, %v1410_v44 }
 0x35e   :  { %v1418_v9 = vcombine.high %v1414_v47, %v1414_v47  ;;  %v1425_v22 = vrot.slane %v1414_v47, %v17009_v50 }
 0x35f   :  { %v17999_v48 = vpop.permute.xlu0 %2131 }
 0x360   :  { %v1433_v40 = vcombine.high %v1425_v22, %v1425_v22  ;;  %v18002_v59 = vrot.slane %v1418_v9, %v17009_v50  ;;  %v19854_v9 = vld [vmem:[#allocation64_spill] sm:$0xff] }
 0x362   :  { %1514 = vmatprep.mubr.f32.mxu0 %v1433_v40  ;;  %v1434_v37 = vcombine.high %v18002_v59, %v18002_v59  ;;  %v19855_v40 = vld [vmem:[#allocation65_spill] sm:$0xff] }
 0x363   :  { %1515 = vmatmul.mubr.f32.vlgmr.msra.gmra.mrb[2].mxu0 %v1425_v22  ;;  %v18008_v33 = vpop.permute.xlu0 %2150 }
 0x364   :  { %14881 = vmatpush1.bf16.msra.mxu0 %v19848_v43  ;;  %1585 = vmatprep.mubr.f32.mxu0 %v1434_v37  ;;  %v2154_v10 = vrot.slane %v18008_v33, 2 }
 0x365   :  { %14883 = vmatprep.subr.bf16.mxu0 %v19849_v32 }
 0x367   :  { %v18012_v3 = vpop.permute.xlu0 %2169 }
 0x368   :  { %14885 = vmatpush1.bf16.msra.mxu0 %v19850_v57 }
 0x369   :  { %14887 = vmatprep.subr.bf16.mxu0 %v19851_v51 }
 0x36b   :  { %v18018_v25 = vpop.permute.xlu0 %2188 }
 0x36c   :  { %14889 = vmatpush1.bf16.msra.mxu0 %v17069_v60 }
 0x36d   :  { %14891 = vmatprep.subr.bf16.mxu0 %v17072_v26 }
 0x370   :  { %14893 = vmatpush1.bf16.msra.mxu0 %v17089_v16 }
 0x371   :  { %14895 = vmatprep.subr.bf16.mxu0 %v17092_v1 }
 0x372   :  { %v18020_v44 = vpop.f32.mrb[0].mxu0 }
 0x373   :  { %19852 = vst [vmem:[#allocation101_spill] sm:$0xff] %v18020_v44  ;;  %v18022_v47 = vpop.f32.mrb[1].mxu0 }
 0x374   :  { %19853 = vst [vmem:[#allocation102_spill] sm:$0xff] %v18022_v47  ;;  %14897 = vmatpush1.bf16.msra.mxu0 %v19854_v9 }
 0x375   :  { %v1845_v22 = vpop.permute.xlu1 %1844  ;;  %14899 = vmatprep.subr.bf16.mxu0 %v19855_v40 }
 0x376   :  { %v1847_v37 = vrot.slane %v1845_v22, 2 }
 0x377   :  { %v1843_v15 = vpop.permute.xlu0 %1842 }
 0x378   :  { %v18027_v54 = vsel %vm387_vm3, %v1845_v22, %v1847_v37  ;;  %14901 = vmatpush1.bf16.msra.mxu0 %v19857_v6  ;;  %v1846_v21 = vrot.slane %v1843_v15, 2  ;;  %v19860_v22 = vld [vmem:[#allocation69_spill] sm:$0xff] }
 0x379   :  { %19856 = vst [vmem:[#allocation64_spill] sm:$0xff] %v18027_v54  ;;  %v2115_v63 = vpop.permute.xlu1 %2114  ;;  %14903 = vmatprep.subr.bf16.mxu0 %v19858_v18  ;;  %v19861_v54 = vld [vmem:[#allocation70_spill] sm:$0xff] }
 0x37a   :  { %v1848_v44 = vsel %vm345_vm0, %v1846_v21, %v1847_v37  ;;  %v19863_v37 = vld [vmem:[#allocation71_spill] sm:$0xff] }
 0x37b   :  { %v1849_v47 = vsel %vm387_vm3, %v1843_v15, %v1848_v44  ;;  %v18033_v41 = vpop.permute.xlu0 %2207 }
 0x37c   :  { %v1853_v55 = vmax.f32 %v17905_v4, %v1849_v47  ;;  %14905 = vmatpush1.bf16.msra.mxu0 %v19859_v36  ;;  %v2117_v4 = vrot.slane %v2115_v63, 2 }
 0x37d   :  { %v2134_v7 = vpop.permute.xlu1 %2133  ;;  %14907 = vmatprep.subr.bf16.mxu0 %v19860_v22 }
 0x37e   :  { %v1857_v30 = vcombine.high %v1853_v55, %v1853_v55  ;;  %v1864_v38 = vrot.slane %v1853_v55, %v17009_v50  ;;  %v2116_v55 = vrot.slane %v17995_v19, 2  ;;  %v2136_v11 = vrot.slane %v2134_v7, 2 }
 0x37f   :  { %v18039_v14 = vpop.permute.xlu0 %2226 }
 0x380   :  { %14909 = vmatpush1.bf16.msra.mxu0 %v19861_v54  ;;  %v1872_v21 = vcombine.high %v1864_v38, %v1864_v38  ;;  %v18043_v15 = vrot.slane %v1857_v30, %v17009_v50  ;;  %v2118_v49 = vsel %vm345_vm0, %v2116_v55, %v2117_v4 }
 0x381   :  { %v2153_v44 = vpop.permute.xlu1 %2152  ;;  %14911 = vmatprep.subr.bf16.mxu0 %v19863_v37  ;;  %v2119_v55 = vsel %vm347_vm1, %v17995_v19, %v2118_v49 }
 0x382   :  { %19862 = vst [vmem:[#allocation65_spill] sm:$0xff] %v18043_v15  ;;  %1953 = vmatprep.mubr.f32.mxu1 %v1872_v21  ;;  %v1873_v47 = vcombine.high %v18043_v15, %v18043_v15  ;;  %v2135_v21 = vrot.slane %v17999_v48, 2  ;;  %v2155_v15 = vrot.slane %v2153_v44, 2 }
 0x383   :  { %1954 = vmatmul.mubr.f32.vlgmr.msra.gmra.mrb[2].mxu1 %v1864_v38  ;;  %v18048_v58 = vpop.permute.xlu0 %2245  ;;  %v2104_v38 = vmul.f32 %v17855_v31, %v2103_v61  ;;  %v2173_v61 = vrot.slane %v18012_v3, 2  ;;  %v2139_v31 = vsel %vm367_vm2, %v2134_v7, %v2136_v11 }
 0x384   :  { %14913 = vmatpush1.bf16.msra.mxu0 %v19864_v39  ;;  %15059 = vmatpush1.bf16.msra.mxu1 %v19848_v43  ;;  %v2137_v43 = vsel %vm345_vm0, %v2135_v21, %v2136_v11  ;;  %v2192_v21 = vrot.slane %v18018_v25, 2  ;;  %v2158_v49 = vsel %vm387_vm3, %v2153_v44, %v2155_v15  ;;  %v2211_v11 = vrot.slane %v18033_v41, 2 }
 0x385   :  { %2024 = vmatprep.mubr.f32.mxu1 %v1873_v47  ;;  %v2172_v30 = vpop.permute.xlu1 %2171  ;;  %14915 = vmatprep.subr.bf16.mxu0 %v19865_v45  ;;  %v2120_v47 = vsel %vm347_vm1, %v2115_v63, %v2117_v4  ;;  %v19866_v45 = vld [vmem:[#allocation74_spill] sm:$0xff]  ;;  %v2156_v63 = vsel %vm345_vm0, %v2154_v10, %v2155_v15  ;;  %v2123_v20 = vadd.f32 %v2119_v55, %v2104_v38 }
 0x386   :  { %15061 = vmatprep.subr.bf16.mxu1 %v19849_v32  ;;  %v2174_v34 = vrot.slane %v2172_v30, 2  ;;  %v2157_v10 = vsel %vm387_vm3, %v18008_v33, %v2156_v63 }
 0x387   :  { %v18059_v2 = vpop.permute.xlu0 %2551 }
 0x388   :  { %14917 = vmatpush1.bf16.msra.mxu0 %v19866_v45  ;;  %15063 = vmatpush1.bf16.msra.mxu1 %v19850_v57  ;;  %v2124_v45 = vadd.f32 %v2120_v47, %v2105_v0  ;;  %v2138_v57 = vsel %vm367_vm2, %v17999_v48, %v2137_v43  ;;  %v2175_v19 = vsel %vm345_vm0, %v2173_v61, %v2174_v34 }
 0x389   :  { %v2191_v32 = vpop.permute.xlu1 %2190  ;;  %14919 = vmatprep.subr.bf16.mxu0 %v17239_v53  ;;  %15065 = vmatprep.subr.bf16.mxu1 %v19851_v51  ;;  %v2142_v48 = vadd.f32 %v2138_v57, %v2123_v20  ;;  %v2177_v43 = vsel %vm407_vm4, %v2172_v30, %v2174_v34  ;;  %v2230_v20 = vrot.slane %v18039_v14, 2 }
 0x38a   :  { %v2193_v4 = vrot.slane %v2191_v32, 2  ;;  %v2143_v7 = vadd.f32 %v2139_v31, %v2124_v45  ;;  %v2176_v45 = vsel %vm407_vm4, %v18012_v3, %v2175_v19 }
 0x38b   :  { %v18085_v0 = vpop.permute.xlu0 %2570  ;;  %v2161_v33 = vadd.f32 %v2157_v10, %v2142_v48 }
 0x38c   :  { %14921 = vmatpush1.bf16.msra.mxu0 %v17269_v35  ;;  %15067 = vmatpush1.bf16.msra.mxu1 %v17069_v60  ;;  %v2194_v15 = vsel %vm345_vm0, %v2192_v21, %v2193_v4  ;;  %v2162_v38 = vadd.f32 %v2158_v49, %v2143_v7  ;;  %v2196_v31 = vsel %vm427_vm5, %v2191_v32, %v2193_v4 }
 0x38d   :  { %v2210_v51 = vpop.permute.xlu1 %2209  ;;  %14923 = vmatprep.subr.bf16.mxu0 %v17271_v13  ;;  %15069 = vmatprep.subr.bf16.mxu1 %v17072_v26  ;;  %v2195_v57 = vsel %vm427_vm5, %v18018_v25, %v2194_v15  ;;  %v2180_v3 = vadd.f32 %v2176_v45, %v2161_v33 }
 0x38e   :  { %v2212_v44 = vrot.slane %v2210_v51, 2  ;;  %v2181_v34 = vadd.f32 %v2177_v43, %v2162_v38  ;;  %v2259_v38 = vstv %s18096_s14 }
 0x38f   :  { %v18105_v4 = vpop.permute.xlu0 %2589  ;;  %v2199_v21 = vadd.f32 %v2195_v57, %v2180_v3 }
 0x390   :  { %v2213_v47 = vsel %vm345_vm0, %v2211_v11, %v2212_v44  ;;  %14925 = vmatpush1.bf16.msra.mxu0 %v17287_v17  ;;  %15071 = vmatpush1.bf16.msra.mxu1 %v17089_v16  ;;  %v2215_v32 = vsel %vm447_vm6, %v2210_v51, %v2212_v44  ;;  %v2200_v61 = vadd.f32 %v2196_v31, %v2181_v34  ;;  %v2249_v51 = vrot.slane %v18048_v58, 2 }
 0x391   :  { %v2229_v30 = vpop.permute.xlu1 %2228  ;;  %14927 = vmatprep.subr.bf16.mxu0 %v17296_v5  ;;  %15073 = vmatprep.subr.bf16.mxu1 %v17092_v1  ;;  %v2214_v63 = vsel %vm447_vm6, %v18033_v41, %v2213_v47  ;;  %v1415_v34 = vmax.f32 %v17835_v24, %v17991_v23 }
 0x392   :  { %v2231_v55 = vrot.slane %v2229_v30, 2  ;;  %v2219_v11 = vadd.f32 %v2215_v32, %v2200_v61  ;;  %v2218_v48 = vadd.f32 %v2214_v63, %v2199_v21 }
 0x393   :  { %v18108_v25 = vpop.f32.mrb[0].mxu1  ;;  %v18145_v24 = vrot.slane %v1415_v34, %v17009_v50 }
 0x394   :  { %v2234_v49 = vsel %vm467_vm7, %v2229_v30, %v2231_v55  ;;  %19867 = vst [vmem:[#allocation66_spill] sm:$0xff] %v18108_v25  ;;  %v2232_v19 = vsel %vm345_vm0, %v2230_v20, %v2231_v55  ;;  %14929 = vmatpush1.bf16.msra.mxu0 %v17327_v8  ;;  %15075 = vmatpush1.bf16.msra.mxu1 %v19854_v9  ;;  %v18116_v7 = vpop.f32.mrb[1].mxu1  ;;  %v18129_v20 = vpop.permute.xlu0 %2608  ;;  %v19874_v25 = vld [vmem:[#allocation77_spill] sm:$0xff] }
 0x395   :  { %v2233_v41 = vsel %vm467_vm7, %v18039_v14, %v2232_v19  ;;  %19868 = vst [vmem:[#allocation67_spill] sm:$0xff] %v18116_v7  ;;  %v2248_v10 = vpop.permute.xlu1 %2247  ;;  %14931 = vmatprep.subr.bf16.mxu0 %v17332_v28  ;;  %15077 = vmatprep.subr.bf16.mxu1 %v19855_v40  ;;  %v2238_v15 = vadd.f32 %v2234_v49, %v2219_v11  ;;  %v2555_v49 = vrot.slane %v18059_v2, 2  ;;  %v2542_v19 = vstv %s18137_s16 }
 0x396   :  { %v2250_v43 = vrot.slane %v2248_v10, 2  ;;  %v2237_v44 = vadd.f32 %v2233_v41, %v2218_v48  ;;  %v1442_v63 = vcombine.high %v18145_v24, %v18145_v24  ;;  %v2574_v11 = vrot.slane %v18085_v0, 2 }
 0x398   :  { %v2253_v45 = vsel %vm487_vm8, %v2248_v10, %v2250_v43  ;;  %v2251_v31 = vsel %vm345_vm0, %v2249_v51, %v2250_v43  ;;  %14933 = vmatpush1.bf16.msra.mxu0 %v17357_v52  ;;  %15079 = vmatpush1.bf16.msra.mxu1 %v19857_v6  ;;  %v18151_v55 = vpop.permute.xlu0 %2627 }
 0x399   :  { %v2257_v14 = vadd.f32 %v2253_v45, %v2238_v15  ;;  %v2252_v33 = vsel %vm487_vm8, %v18048_v58, %v2251_v31  ;;  %v2554_v47 = vpop.permute.xlu1 %2553  ;;  %14935 = vmatprep.subr.bf16.mxu0 %v17361_v12  ;;  %15081 = vmatprep.subr.bf16.mxu1 %v19858_v18  ;;  %v2593_v15 = vrot.slane %v18105_v4, 2  ;;  %v19871_v45 = vld [vmem:[#allocation98_spill] sm:$0xff] }
 0x39a   :  { %v2256_v57 = vadd.f32 %v2252_v33, %v2237_v44  ;;  %v2556_v21 = vrot.slane %v2554_v47, 2  ;;  %v19870_v44 = vld [vmem:[#allocation100_spill] sm:$0xff]  ;;  %v2543_v31 = vmul.f32 %v19871_v45, %v2542_v19 }
 0x39b   :  { %v18133_v30 = vadd.f32 %v2259_v38, %v2257_v14 }
 0x39c   :  { %v18135_v32 = vadd.f32 %v2259_v38, %v2256_v57  ;;  %14937 = vmatpush1.bf16.msra.mxu0 %v17388_v56  ;;  %15083 = vmatpush1.bf16.msra.mxu1 %v19859_v36  ;;  %v2647_v10 = vpop.permute.xlu0 %2646  ;;  %v2557_v48 = vsel %vm345_vm0, %v2555_v49, %v2556_v21  ;;  %v2544_v38 = vmul.f32 %v19870_v44, %v2542_v19  ;;  %v2612_v57 = vrot.slane %v18129_v20, 2 }
 0x39d   :  { %v19711_v58 = vmax.f32 %v18133_v30, 0.0  ;;  %v2573_v3 = vpop.permute.xlu1 %2572  ;;  %14939 = vmatprep.subr.bf16.mxu0 %v17394_v62  ;;  %15085 = vmatprep.subr.bf16.mxu1 %v19860_v22  ;;  %v2559_v14 = vsel %vm347_vm1, %v2554_v47, %v2556_v21  ;;  %v2558_v49 = vsel %vm347_vm1, %v18059_v2, %v2557_v48  ;;  %v2631_v21 = vrot.slane %v18151_v55, 2 }
 0x39e   :  { %v19710_v23 = vmax.f32 %v18135_v32, 0.0  ;;  %v2575_v51 = vrot.slane %v2573_v3, 2  ;;  %v2562_v2 = vadd.f32 %v2558_v49, %v2543_v31 }
 0x39f   :  { %2268 = vrot.lane.b32.xlu1 %v19711_v58, %s16177_s30 }
 0x3a0   :  { %14941 = vmatpush1.bf16.msra.mxu0 %v17420_v42  ;;  %15087 = vmatpush1.bf16.msra.mxu1 %v19861_v54  ;;  %v2576_v33 = vsel %vm345_vm0, %v2574_v11, %v2575_v51  ;;  %v2578_v44 = vsel %vm367_vm2, %v2573_v3, %v2575_v51  ;;  %v2563_v11 = vadd.f32 %v2559_v14, %v2544_v38  ;;  %v2666_v7 = vpop.permute.xlu0 %2665  ;;  %v2650_v3 = vrot.slane %v2647_v10, 2  ;;  %v19876_v38 = vld [vmem:[#allocation79_spill] sm:$0xff] }
 0x3a1   :  { %2266 = vrot.lane.b32.xlu0 %v19710_v23, %s16177_s30  ;;  %v2592_v61 = vpop.permute.xlu1 %2591  ;;  %14943 = vmatprep.subr.bf16.mxu0 %v17425_v29  ;;  %v19873_v23 = vld [vmem:[#allocation74_spill] sm:$0xff]  ;;  %v2577_v45 = vsel %vm367_vm2, %v18085_v0, %v2576_v33  ;;  %vm16190_vm2 = vmmov 0  }
 0x3a2   :  { %15089 = vmatprep.subr.bf16.mxu1 %v19863_v37  ;;  %v2594_v43 = vrot.slane %v2592_v61, 2  ;;  %v2582_v51 = vadd.f32 %v2578_v44, %v2563_v11  ;;  %v2581_v14 = vadd.f32 %v2577_v45, %v2562_v2  ;;  %v19877_v44 = vld [vmem:[#allocation80_spill] sm:$0xff]  ;;  %v19878_v11 = vld [vmem:[#allocation81_spill] sm:$0xff] }
 0x3a3   :  { %1586 = vmatmul.mubr.f32.vlgmr.msra.gmra.mrb[2].mxu0 %v18002_v59  ;;  %v19869_v59 = vld [vmem:[#allocation73_spill] sm:$0xff] }
 0x3a4   :  { %14945 = vmatpush1.bf16.msra.mxu0 %v17452_v46  ;;  %12960 = vmatprep.mubr.msk.f32.mxu0 %vm562_vm9, %v1442_v63  ;;  %v19872_v63 = vld [vmem:[#allocation76_spill] sm:$0xff]  ;;  %v2595_v19 = vsel %vm345_vm0, %v2593_v15, %v2594_v43  ;;  %v2597_v48 = vsel %vm387_vm3, %v2592_v61, %v2594_v43 }
 0x3a5   :  { %15091 = vmatpush1.bf16.msra.mxu1 %v19864_v39  ;;  %v2611_v41 = vpop.permute.xlu1 %2610  ;;  %14947 = vmatprep.subr.bf16.mxu0 %v17458_v27  ;;  %v2596_v15 = vsel %vm387_vm3, %v18105_v4, %v2595_v19  ;;  %v2601_v43 = vadd.f32 %v2597_v48, %v2582_v51  ;;  %v2669_v19 = vrot.slane %v2666_v7, 2  ;;  %v19879_v51 = vld [vmem:[#allocation82_spill] sm:$0xff] }
 0x3a6   :  { %15093 = vmatprep.subr.bf16.mxu1 %v19869_v59  ;;  %v2613_v34 = vrot.slane %v2611_v41, 2  ;;  %v19875_v59 = vld [vmem:[#allocation78_spill] sm:$0xff] }
 0x3a8   :  { %14949 = vmatpush1.bf16.msra.mxu0 %v19872_v63  ;;  %v2616_v0 = vsel %vm407_vm4, %v2611_v41, %v2613_v34 }
 0x3a9   :  { %15095 = vmatpush1.bf16.msra.mxu1 %v19873_v23  ;;  %v2630_v58 = vpop.permute.xlu1 %2629  ;;  %14951 = vmatprep.subr.bf16.mxu0 %v19874_v25  ;;  %v2614_v23 = vsel %vm345_vm0, %v2612_v57, %v2613_v34  ;;  %v2600_v57 = vadd.f32 %v2596_v15, %v2581_v14  ;;  %v2620_v41 = vadd.f32 %v2616_v0, %v2601_v43 }
 0x3aa   :  { %v2632_v47 = vrot.slane %v2630_v58, 2  ;;  %15097 = vmatprep.subr.bf16.mxu1 %v17239_v53  ;;  %v2615_v33 = vsel %vm407_vm4, %v18129_v20, %v2614_v23  ;;  %v2685_v20 = vpop.permute.xlu0 %2684 }
 0x3ab   :  { %v2619_v23 = vadd.f32 %v2615_v33, %v2600_v57  ;;  %v2688_v15 = vrot.slane %v2685_v20, 2  ;;  %v2698_v57 = vstv %s18204_s18 }
 0x3ac   :  { %14953 = vmatpush1.bf16.msra.mxu0 %v19875_v59  ;;  %v2633_v31 = vsel %vm345_vm0, %v2631_v21, %v2632_v47  ;;  %v2635_v4 = vsel %vm427_vm5, %v2630_v58, %v2632_v47 }
 0x3ad   :  { %15099 = vmatpush1.bf16.msra.mxu1 %v17269_v35  ;;  %v2649_v53 = vpop.permute.xlu1 %2648  ;;  %14955 = vmatprep.subr.bf16.mxu0 %v19876_v38  ;;  %v2634_v34 = vsel %vm427_vm5, %v18151_v55, %v2633_v31  ;;  %v2639_v45 = vadd.f32 %v2635_v4, %v2620_v41  ;;  %v19880_v31 = vld [vmem:[#allocation83_spill] sm:$0xff] }
 0x3ae   :  { %v2651_v61 = vrot.slane %v2649_v53, 2  ;;  %15101 = vmatprep.subr.bf16.mxu1 %v17271_v13  ;;  %v2638_v48 = vadd.f32 %v2634_v34, %v2619_v23  ;;  %v19882_v34 = vld [vmem:[#allocation85_spill] sm:$0xff]  ;;  %v19883_v23 = vld [vmem:[#allocation64_spill] sm:$0xff] }
 0x3b0   :  { %v2652_v49 = vsel %vm345_vm0, %v2650_v3, %v2651_v61  ;;  %14957 = vmatpush1.bf16.msra.mxu0 %v19877_v44  ;;  %v2654_v58 = vsel %vm447_vm6, %v2649_v53, %v2651_v61 }
 0x3b1   :  { %15103 = vmatpush1.bf16.msra.mxu1 %v17287_v17  ;;  %v2668_v21 = vpop.permute.xlu1 %2667  ;;  %14959 = vmatprep.subr.bf16.mxu0 %v19878_v11  ;;  %v2653_v2 = vsel %vm447_vm6, %v2647_v10, %v2652_v49  ;;  %v2658_v14 = vadd.f32 %v2654_v58, %v2639_v45  ;;  %v19884_v58 = vld [vmem:[#allocation99_spill] sm:$0xff] }
 0x3b2   :  { %v2670_v47 = vrot.slane %v2668_v21, 2  ;;  %15105 = vmatprep.subr.bf16.mxu1 %v17296_v5  ;;  %v2657_v61 = vadd.f32 %v2653_v2, %v2638_v48  ;;  %v19885_v48 = vld [vmem:[#allocation86_spill] sm:$0xff] }
 0x3b4   :  { %v2673_v3 = vsel %vm467_vm7, %v2668_v21, %v2670_v47  ;;  %v2671_v55 = vsel %vm345_vm0, %v2669_v19, %v2670_v47  ;;  %14961 = vmatpush1.bf16.msra.mxu0 %v19879_v51  ;;  %v19881_v19 = vld [vmem:[#allocation84_spill] sm:$0xff]  ;;  %v1854_v47 = vmax.f32 %v19884_v58, %v19883_v23  ;;  %v19899_v23 = vld [vmem:[#allocation27_spill] sm:$0xff] }
 0x3b5   :  { %v2672_v0 = vsel %vm467_vm7, %v2666_v7, %v2671_v55  ;;  %15107 = vmatpush1.bf16.msra.mxu1 %v17327_v8  ;;  %v2687_v53 = vpop.permute.xlu1 %2686  ;;  %14963 = vmatprep.subr.bf16.mxu0 %v19880_v31  ;;  %v2677_v10 = vadd.f32 %v2673_v3, %v2658_v14  ;;  %v19887_v14 = vld [vmem:[#allocation88_spill] sm:$0xff] }
 0x3b6   :  { %v2689_v43 = vrot.slane %v2687_v53, 2  ;;  %15109 = vmatprep.subr.bf16.mxu1 %v17332_v28  ;;  %v2676_v33 = vadd.f32 %v2672_v0, %v2657_v61  ;;  %v19888_v0 = vld [vmem:[#allocation89_spill] sm:$0xff]  ;;  %v19900_v58 = vld [vmem:[#allocation28_spill] sm:$0xff] }
 0x3b7   :  { %v19889_v61 = vld [vmem:[#allocation65_spill] sm:$0xff] }
 0x3b8   :  { %v2692_v4 = vsel %vm487_vm8, %v2687_v53, %v2689_v43  ;;  %v2690_v49 = vsel %vm345_vm0, %v2688_v15, %v2689_v43  ;;  %14965 = vmatpush1.bf16.msra.mxu0 %v19881_v19  ;;  %v1880_v15 = vrot.slane %v1854_v47, %v17009_v50  ;;  %v19890_v43 = vld [vmem:[#allocation90_spill] sm:$0xff]  ;;  %v19901_v47 = vld [vmem:[#allocation29_spill] sm:$0xff] }
 0x3b9   :  { %v2696_v41 = vadd.f32 %v2692_v4, %v2677_v10  ;;  %v2691_v7 = vsel %vm487_vm8, %v2685_v20, %v2690_v49  ;;  %15111 = vmatpush1.bf16.msra.mxu1 %v17357_v52  ;;  %14967 = vmatprep.subr.bf16.mxu0 %v19882_v34  ;;  %v19886_v20 = vld [vmem:[#allocation87_spill] sm:$0xff]  ;;  %v19894_v4 = vld [vmem:[#allocation94_spill] sm:$0xff] }
 0x3ba   :  { %v2695_v21 = vadd.f32 %v2691_v7, %v2676_v33  ;;  %15113 = vmatprep.subr.bf16.mxu1 %v17361_v12  ;;  %v1881_v53 = vcombine.high %v1880_v15, %v1880_v15  ;;  %v19891_v10 = vld [vmem:[#allocation91_spill] sm:$0xff]  ;;  %v19892_v33 = vld [vmem:[#allocation92_spill] sm:$0xff]  ;;  %v19897_v7 = vld [vmem:[#allocation97_spill] sm:$0xff] }
 0x3bb   :  { %v18230_v45 = vadd.f32 %v2698_v57, %v2696_v41  ;;  %v19895_v49 = vld [vmem:[#allocation95_spill] sm:$0xff] }
 0x3bc   :  { %v18232_v2 = vadd.f32 %v2698_v57, %v2695_v21  ;;  %14969 = vmatpush1.bf16.msra.mxu0 %v19885_v48  ;;  %v19893_v57 = vld [vmem:[#allocation93_spill] sm:$0xff]  ;;  %v19898_v21 = vld [vmem:[#allocation26_spill] sm:$0xff] }
 0x3bd   :  { %v19715_v3 = vmax.f32 %v18230_v45, 0.0  ;;  %15115 = vmatpush1.bf16.msra.mxu1 %v17388_v56  ;;  %14971 = vmatprep.subr.bf16.mxu0 %v19886_v20 }
 0x3be   :  { %v19714_v55 = vmax.f32 %v18232_v2, 0.0  ;;  %15117 = vmatprep.subr.bf16.mxu1 %v17394_v62 }
 0x3bf   :  { %2707 = vrot.lane.b32.xlu1 %v19715_v3, %s16177_s30  ;;  %v19906_v3 = vld [vmem:[#allocation34_spill] sm:$0xff] }
 0x3c0   :  { %14973 = vmatpush1.bf16.msra.mxu0 %v19887_v14  ;;  %2705 = vrot.lane.b32.xlu0 %v19714_v55, %s16177_s30  ;;  %v19905_v55 = vld [vmem:[#allocation33_spill] sm:$0xff] }
 0x3c1   :  { %15119 = vmatpush1.bf16.msra.mxu1 %v17420_v42  ;;  %14975 = vmatprep.subr.bf16.mxu0 %v19888_v0 }
 0x3c2   :  { %15121 = vmatprep.subr.bf16.mxu1 %v17425_v29 }
 0x3c4   :  { %2025 = vmatmul.mubr.f32.vlgmr.msra.gmra.mrb[2].mxu1 %v19889_v61  ;;  %14977 = vmatpush1.bf16.msra.mxu0 %v19890_v43  ;;  %v19903_v61 = vld [vmem:[#allocation31_spill] sm:$0xff] }
 0x3c5   :  { %15123 = vmatpush1.bf16.msra.mxu1 %v17452_v46  ;;  %12973 = vmatprep.mubr.msk.f32.mxu1 %vm562_vm9, %v1881_v53  ;;  %v19902_v53 = vld [vmem:[#allocation30_spill] sm:$0xff] }
 0x3c6   :  { %14979 = vmatprep.subr.bf16.mxu0 %v19891_v10  ;;  %15125 = vmatprep.subr.bf16.mxu1 %v17458_v27 }
 0x3c8   :  { %14981 = vmatpush1.bf16.msra.mxu0 %v19892_v33 }
 0x3c9   :  { %15127 = vmatpush1.bf16.msra.mxu1 %v19872_v63  ;;  %14983 = vmatprep.subr.bf16.mxu0 %v19893_v57 }
 0x3ca   :  { %15129 = vmatprep.subr.bf16.mxu1 %v19874_v25 }
 0x3cc   :  { %14985 = vmatpush1.bf16.msra.mxu0 %v19894_v4 }
 0x3cd   :  { %15131 = vmatpush1.bf16.msra.mxu1 %v19875_v59  ;;  %14988 = vmatprep.subr.msk.bf16.mxu0 %vm17740_vm12, %v19895_v49 }
 0x3ce   :  { %15133 = vmatprep.subr.bf16.mxu1 %v19876_v38 }
 0x3d0   :  { %14991 = vmatpush1.bf16.msk.msra.mxu0 %vm17740_vm12, %v19897_v7 }
 0x3d1   :  { %15135 = vmatpush1.bf16.msra.mxu1 %v19877_v44  ;;  %15171 = vmatprep.subr.bf16.mxu0 %v19898_v21 }
 0x3d2   :  { %15137 = vmatprep.subr.bf16.mxu1 %v19878_v11 }
 0x3d3   :  { %1657 = vmatmul.mubr.f32.vlgmr.msra.gmra.mrb[2].mxu0 %v18145_v24  ;;  %v19904_v24 = vld [vmem:[#allocation32_spill] sm:$0xff] }
 0x3d4   :  { %15173 = vmatpush1.bf16.msra.mxu0 %v19899_v23 }
 0x3d5   :  { %15139 = vmatpush1.bf16.msra.mxu1 %v19879_v51  ;;  %15175 = vmatprep.subr.bf16.mxu0 %v19900_v58 }
 0x3d6   :  { %15141 = vmatprep.subr.bf16.mxu1 %v19880_v31 }
 0x3d8   :  { %15177 = vmatpush1.bf16.msra.mxu0 %v19901_v47 }
 0x3d9   :  { %15143 = vmatpush1.bf16.msra.mxu1 %v19881_v19  ;;  %15179 = vmatprep.subr.bf16.mxu0 %v19902_v53  ;;  %v19907_v19 = vld [vmem:[#allocation35_spill] sm:$0xff] }
 0x3da   :  { %15145 = vmatprep.subr.bf16.mxu1 %v19882_v34  ;;  %v19908_v34 = vld [vmem:[#allocation36_spill] sm:$0xff] }
 0x3dc   :  { %15181 = vmatpush1.bf16.msra.mxu0 %v19903_v61 }
 0x3dd   :  { %15147 = vmatpush1.bf16.msra.mxu1 %v19885_v48  ;;  %15183 = vmatprep.subr.bf16.mxu0 %v19904_v24  ;;  %v19909_v48 = vld [vmem:[#allocation37_spill] sm:$0xff] }
 0x3de   :  { %15149 = vmatprep.subr.bf16.mxu1 %v19886_v20  ;;  %v19910_v20 = vld [vmem:[#allocation38_spill] sm:$0xff] }
 0x3e0   :  { %15185 = vmatpush1.bf16.msra.mxu0 %v19905_v55 }
 0x3e1   :  { %15151 = vmatpush1.bf16.msra.mxu1 %v19887_v14  ;;  %15187 = vmatprep.subr.bf16.mxu0 %v19906_v3  ;;  %v19911_v14 = vld [vmem:[#allocation39_spill] sm:$0xff] }
 0x3e2   :  { %15153 = vmatprep.subr.bf16.mxu1 %v19888_v0  ;;  %v19912_v0 = vld [vmem:[#allocation40_spill] sm:$0xff] }
 0x3e4   :  { %15189 = vmatpush1.bf16.msra.mxu0 %v19907_v19 }
 0x3e5   :  { %15155 = vmatpush1.bf16.msra.mxu1 %v19890_v43  ;;  %15191 = vmatprep.subr.bf16.mxu0 %v19908_v34  ;;  %v19913_v43 = vld [vmem:[#allocation41_spill] sm:$0xff] }
 0x3e6   :  { %15157 = vmatprep.subr.bf16.mxu1 %v19891_v10  ;;  %v19918_v10 = vld [vmem:[#allocation46_spill] sm:$0xff] }
 0x3e8   :  { %15193 = vmatpush1.bf16.msra.mxu0 %v19909_v48 }
 0x3e9   :  { %15159 = vmatpush1.bf16.msra.mxu1 %v19892_v33  ;;  %15195 = vmatprep.subr.bf16.mxu0 %v19910_v20  ;;  %v19914_v33 = vld [vmem:[#allocation42_spill] sm:$0xff] }
 0x3ea   :  { %15161 = vmatprep.subr.bf16.mxu1 %v19893_v57  ;;  %v19915_v57 = vld [vmem:[#allocation43_spill] sm:$0xff] }
 0x3ec   :  { %15197 = vmatpush1.bf16.msra.mxu0 %v19911_v14 }
 0x3ed   :  { %15163 = vmatpush1.bf16.msra.mxu1 %v19894_v4  ;;  %15199 = vmatprep.subr.bf16.mxu0 %v19912_v0  ;;  %v19916_v4 = vld [vmem:[#allocation44_spill] sm:$0xff] }
 0x3ee   :  { %15166 = vmatprep.subr.msk.bf16.mxu1 %vm17740_vm12, %v19895_v49  ;;  %v19917_v49 = vld [vmem:[#allocation45_spill] sm:$0xff] }
 0x3f0   :  { %15201 = vmatpush1.bf16.msra.mxu0 %v19913_v43 }
 0x3f1   :  { %15169 = vmatpush1.bf16.msk.msra.mxu1 %vm17740_vm12, %v19897_v7  ;;  %15203 = vmatprep.subr.bf16.mxu0 %v19914_v33  ;;  %v19919_v7 = vld [vmem:[#allocation47_spill] sm:$0xff] }
 0x3f2   :  { %15349 = vmatprep.subr.bf16.mxu1 %v19898_v21  ;;  %v19921_v21 = vld [vmem:[#allocation49_spill] sm:$0xff] }
 0x3f4   :  { %2096 = vmatmul.mubr.f32.vlgmr.msra.gmra.mrb[2].mxu1 %v1880_v15  ;;  %15205 = vmatpush1.bf16.msra.mxu0 %v19915_v57  ;;  %v19920_v15 = vld [vmem:[#allocation48_spill] sm:$0xff] }
 0x3f5   :  { %15351 = vmatpush1.bf16.msra.mxu1 %v19899_v23  ;;  %15207 = vmatprep.subr.bf16.mxu0 %v19916_v4  ;;  %v19922_v23 = vld [vmem:[#allocation50_spill] sm:$0xff] }
 0x3f6   :  { %15353 = vmatprep.subr.bf16.mxu1 %v19900_v58  ;;  %v19923_v58 = vld [vmem:[#allocation51_spill] sm:$0xff] }
 0x3f8   :  { %15209 = vmatpush1.bf16.msra.mxu0 %v19917_v49 }
 0x3f9   :  { %15355 = vmatpush1.bf16.msra.mxu1 %v19901_v47  ;;  %15211 = vmatprep.subr.bf16.mxu0 %v19918_v10  ;;  %v19924_v47 = vld [vmem:[#allocation52_spill] sm:$0xff] }
 0x3fa   :  { %15357 = vmatprep.subr.bf16.mxu1 %v19902_v53  ;;  %v19925_v53 = vld [vmem:[#allocation53_spill] sm:$0xff] }
 0x3fc   :  { %15213 = vmatpush1.bf16.msra.mxu0 %v19919_v7 }
 0x3fd   :  { %15359 = vmatpush1.bf16.msra.mxu1 %v19903_v61  ;;  %15215 = vmatprep.subr.bf16.mxu0 %v19920_v15  ;;  %v19926_v61 = vld [vmem:[#allocation54_spill] sm:$0xff] }
 0x3fe   :  { %15361 = vmatprep.subr.bf16.mxu1 %v19904_v24 }
 0x400   :  { %15217 = vmatpush1.bf16.msra.mxu0 %v19921_v21 }
 0x401   :  { %15363 = vmatpush1.bf16.msra.mxu1 %v19905_v55  ;;  %15219 = vmatprep.subr.bf16.mxu0 %v19922_v23  ;;  %v19927_v55 = vld [vmem:[#allocation55_spill] sm:$0xff] }
 0x402   :  { %15365 = vmatprep.subr.bf16.mxu1 %v19906_v3  ;;  %v19928_v3 = vld [vmem:[#allocation56_spill] sm:$0xff] }
 0x404   :  { %15221 = vmatpush1.bf16.msra.mxu0 %v19923_v58 }
 0x405   :  { %15367 = vmatpush1.bf16.msra.mxu1 %v19907_v19  ;;  %15223 = vmatprep.subr.bf16.mxu0 %v19924_v47  ;;  %v19929_v19 = vld [vmem:[#allocation57_spill] sm:$0xff] }
 0x406   :  { %15369 = vmatprep.subr.bf16.mxu1 %v19908_v34  ;;  %v19930_v34 = vld [vmem:[#allocation58_spill] sm:$0xff] }
 0x408   :  { %15225 = vmatpush1.bf16.msra.mxu0 %v19925_v53 }
 0x409   :  { %15371 = vmatpush1.bf16.msra.mxu1 %v19909_v48  ;;  %15227 = vmatprep.subr.bf16.mxu0 %v19926_v61 }
 0x40a   :  { %15373 = vmatprep.subr.bf16.mxu1 %v19910_v20 }
 0x40c   :  { %15229 = vmatpush1.bf16.msra.mxu0 %v19927_v55 }
 0x40d   :  { %15375 = vmatpush1.bf16.msra.mxu1 %v19911_v14  ;;  %15231 = vmatprep.subr.bf16.mxu0 %v19928_v3  ;;  %v19931_v14 = vmax.f32 %v18133_v30, 0.0 }
 0x40e   :  { %15377 = vmatprep.subr.bf16.mxu1 %v19912_v0 }
 0x410   :  { %15233 = vmatpush1.bf16.msra.mxu0 %v19929_v19 }
 0x411   :  { %v2269_v24 = vpop.permute.xlu1 %2268  ;;  %15379 = vmatpush1.bf16.msra.mxu1 %v19913_v43  ;;  %15235 = vmatprep.subr.bf16.mxu0 %v19930_v34 }
 0x412   :  { %v2271_v48 = vrot.slane %v2269_v24, 2  ;;  %15381 = vmatprep.subr.bf16.mxu1 %v19914_v33  ;;  %v19932_v33 = vmax.f32 %v18135_v32, 0.0 }
 0x413   :  { %v2267_v41 = vpop.permute.xlu0 %2266 }
 0x414   :  { %v2274_v20 = vsel %vm347_vm1, %v2269_v24, %v2271_v48  ;;  %v2270_v31 = vrot.slane %v2267_v41, 2 }
 0x415   :  { %v18345_v51 = vmax.f32 %v19931_v14, %v2274_v20  ;;  %15383 = vmatpush1.bf16.msra.mxu1 %v19915_v57  ;;  %v19935_v20 = vld [vmem:[#allocation60_spill] sm:$0xff]  ;;  %v19936_v14 = vld [vmem:[#allocation61_spill] sm:$0xff] }
 0x416   :  { %v2272_v0 = vsel %vm345_vm0, %v2270_v31, %v2271_v48  ;;  %15385 = vmatprep.subr.bf16.mxu1 %v19916_v4  ;;  %v19933_v4 = vmax.f32 %v18230_v45, 0.0 }
 0x417   :  { %v2273_v43 = vsel %vm347_vm1, %v2267_v41, %v2272_v0  ;;  %2283 = vrot.lane.b32.xlu1 %v18345_v51, %s16178_s29  ;;  %v19937_v0 = vld [vmem:[#allocation62_spill] sm:$0xff] }
 0x418   :  { %v2277_v11 = vmax.f32 %v19932_v33, %v2273_v43 }
 0x419   :  { %15387 = vmatpush1.bf16.msra.mxu1 %v19917_v49 }
 0x41a   :  { %2281 = vrot.lane.b32.xlu0 %v2277_v11, %s16178_s29  ;;  %15389 = vmatprep.subr.bf16.mxu1 %v19918_v10 }
 0x41d   :  { %15391 = vmatpush1.bf16.msra.mxu1 %v19919_v7 }
 0x41e   :  { %15393 = vmatprep.subr.bf16.mxu1 %v19920_v15  ;;  %v19934_v15 = vmax.f32 %v18232_v2, 0.0 }
 0x421   :  { %15395 = vmatpush1.bf16.msra.mxu1 %v19921_v21 }
 0x422   :  { %15397 = vmatprep.subr.bf16.mxu1 %v19922_v23 }
 0x425   :  { %15399 = vmatpush1.bf16.msra.mxu1 %v19923_v58 }
 0x426   :  { %15401 = vmatprep.subr.bf16.mxu1 %v19924_v47 }
 0x429   :  { %15403 = vmatpush1.bf16.msra.mxu1 %v19925_v53 }
 0x42a   :  { %15405 = vmatprep.subr.bf16.mxu1 %v19926_v61 }
 0x42d   :  { %15407 = vmatpush1.bf16.msra.mxu1 %v19927_v55 }
 0x42e   :  { %15409 = vmatprep.subr.bf16.mxu1 %v19928_v3 }
 0x431   :  { %v2708_v30 = vpop.permute.xlu1 %2707  ;;  %15411 = vmatpush1.bf16.msra.mxu1 %v19929_v19 }
 0x432   :  { %v2710_v32 = vrot.slane %v2708_v30, 2  ;;  %v2706_v31 = vpop.permute.xlu0 %2705  ;;  %15413 = vmatprep.subr.bf16.mxu1 %v19930_v34 }
 0x433   :  { %v2709_v10 = vrot.slane %v2706_v31, 2 }
 0x434   :  { %v2713_v57 = vsel %vm347_vm1, %v2708_v30, %v2710_v32 }
 0x435   :  { %v18373_v49 = vmax.f32 %v19933_v4, %v2713_v57  ;;  %v2711_v41 = vsel %vm345_vm0, %v2709_v10, %v2710_v32 }
 0x436   :  { %v2712_v7 = vsel %vm347_vm1, %v2706_v31, %v2711_v41 }
 0x437   :  { %v2716_v21 = vmax.f32 %v19934_v15, %v2712_v7  ;;  %2722 = vrot.lane.b32.xlu1 %v18373_v49, %s16178_s29 }
 0x439   :  { %2720 = vrot.lane.b32.xlu0 %v2716_v21, %s16178_s29  ;;  %s16187_s29 = smov 117  }
 0x489   :  { %v2284_v23 = vpop.permute.xlu1 %2283 }
 0x48a   :  { %v2286_v58 = vrot.slane %v2284_v23, 2 }
 0x48c   :  { %v18383_v47 = vsel %vm387_vm3, %v2284_v23, %v2286_v58  ;;  %v2282_v45 = vpop.permute.xlu0 %2281 }
 0x48d   :  { %v2285_v53 = vrot.slane %v2282_v45, 2 }
 0x48f   :  { %v2287_v61 = vsel %vm345_vm0, %v2285_v53, %v2286_v58  ;;  %v19940_v53 = vld [vmem:[#allocation74_spill] sm:$0xff] }
 0x490   :  { %v2288_v55 = vsel %vm387_vm3, %v2282_v45, %v2287_v61  ;;  %v19941_v61 = vld [vmem:[#allocation75_spill] sm:$0xff] }
 0x491   :  { %v2292_v3 = vmax.f32 %v2277_v11, %v2288_v55  ;;  %v19938_v11 = vld [vmem:[#allocation63_spill] sm:$0xff] }
 0x493   :  { %v2296_v19 = vcombine.high %v2292_v3, %v2292_v3  ;;  %v2303_v2 = vrot.slane %v2292_v3, %v17009_v50 }
 0x495   :  { %v2311_v24 = vcombine.high %v2303_v2, %v2303_v2  ;;  %v18389_v34 = vrot.slane %v2296_v19, %v17009_v50 }
 0x497   :  { %2392 = vmatprep.mubr.f32.mxu0 %v2311_v24  ;;  %v2312_v48 = vcombine.high %v18389_v34, %v18389_v34  ;;  %v3217_v24 = vld [vmem:[#allocation8 + $0x740] sm:$0xff] }
 0x498   :  { %2393 = vmatmul.mubr.f32.vlgmr.msra.gmra.mrb[4].mxu0 %v2303_v2  ;;  %v3209_v2 = vld [vmem:[#allocation8 + $0x700] sm:$0xff] }
 0x499   :  { %15237 = vmatpush1.bf16.msra.mxu0 %v19935_v20  ;;  %2463 = vmatprep.mubr.f32.mxu0 %v2312_v48  ;;  %v13049_v48 = vcombine.high %v3209_v2, %v3217_v24 }
 0x49a   :  { %15239 = vmatprep.subr.bf16.mxu0 %v19936_v14 }
 0x49d   :  { %15241 = vmatpush1.bf16.msra.mxu0 %v19937_v0 }
 0x49e   :  { %15243 = vmatprep.subr.bf16.mxu0 %v19938_v11 }
 0x4a1   :  { %15245 = vmatpush1.bf16.msra.mxu0 %v17069_v60 }
 0x4a2   :  { %15247 = vmatprep.subr.bf16.mxu0 %v17072_v26 }
 0x4a5   :  { %15249 = vmatpush1.bf16.msra.mxu0 %v17089_v16 }
 0x4a6   :  { %v18400_v43 = vpop.f32.mrb[2].mxu0  ;;  %15251 = vmatprep.subr.bf16.mxu0 %v17092_v1 }
 0x4a7   :  { %v18403_v33 = vpop.f32.mrb[3].mxu0 }
 0x4a9   :  { %15253 = vmatpush1.bf16.msra.mxu0 %v19854_v9  ;;  %v18406_v30 = vpop.permute.xlu1 %2722 }
 0x4aa   :  { %15255 = vmatprep.subr.bf16.mxu0 %v19855_v40  ;;  %v2725_v31 = vrot.slane %v18406_v30, 2 }
 0x4ab   :  { %v2721_v32 = vpop.permute.xlu0 %2720 }
 0x4ac   :  { %v2724_v10 = vrot.slane %v2721_v32, 2 }
 0x4ad   :  { %15257 = vmatpush1.bf16.msra.mxu0 %v19857_v6 }
 0x4ae   :  { %v2726_v57 = vsel %vm345_vm0, %v2724_v10, %v2725_v31  ;;  %15259 = vmatprep.subr.bf16.mxu0 %v19858_v18  ;;  %vm11839_vm0 = vcmask 957440  }
 0x4af   :  { %v2727_v4 = vsel %vm387_vm3, %v2721_v32, %v2726_v57  ;;  %v3249_v32 = vld [vmem:[#allocation8 + $0x840] sm:$0xff] }
 0x4b0   :  { %v2731_v41 = vmax.f32 %v2716_v21, %v2727_v4  ;;  %v19939_v21 = vld [vmem:[#allocation73_spill] sm:$0xff]  ;;  %v3257_v57 = vld [vmem:[#allocation8 + $0x880] sm:$0xff] }
 0x4b1   :  { %15261 = vmatpush1.bf16.msra.mxu0 %v19859_v36  ;;  %v3265_v4 = vld [vmem:[#allocation8 + $0x8c0] sm:$0xff] }
 0x4b2   :  { %v2735_v7 = vcombine.high %v2731_v41, %v2731_v41  ;;  %v2742_v15 = vrot.slane %v2731_v41, %v17009_v50  ;;  %15263 = vmatprep.subr.bf16.mxu0 %v19860_v22 }
 0x4b4   :  { %v2750_v23 = vcombine.high %v2742_v15, %v2742_v15  ;;  %v18420_v58 = vrot.slane %v2735_v7, %v17009_v50  ;;  %v13097_v7 = vcombine.high %v3257_v57, %v3265_v4 }
 0x4b5   :  { %15265 = vmatpush1.bf16.msra.mxu0 %v19861_v54 }
 0x4b6   :  { %15267 = vmatprep.subr.bf16.mxu0 %v19863_v37  ;;  %2831 = vmatprep.mubr.f32.mxu1 %v2750_v23  ;;  %v2751_v45 = vcombine.high %v18420_v58, %v18420_v58  ;;  %v3281_v23 = vld [vmem:[#allocation8 + $0x940] sm:$0xff] }
 0x4b7   :  { %2832 = vmatmul.mubr.f32.vlgmr.msra.gmra.mrb[4].mxu1 %v2742_v15  ;;  %v3273_v15 = vld [vmem:[#allocation8 + $0x900] sm:$0xff] }
 0x4b8   :  { %15415 = vmatpush1.bf16.msra.mxu1 %v19935_v20  ;;  %2902 = vmatprep.mubr.f32.mxu1 %v2751_v45  ;;  %v3225_v20 = vld [vmem:[#allocation8 + $0x780] sm:$0xff]  ;;  %v13113_v45 = vcombine.high %v3273_v15, %v3281_v23 }
 0x4b9   :  { %15269 = vmatpush1.bf16.msra.mxu0 %v19864_v39  ;;  %15417 = vmatprep.subr.bf16.mxu1 %v19936_v14  ;;  %v3233_v14 = vld [vmem:[#allocation8 + $0x7c0] sm:$0xff] }
 0x4ba   :  { %15271 = vmatprep.subr.bf16.mxu0 %v19939_v21 }
 0x4bc   :  { %15419 = vmatpush1.bf16.msra.mxu1 %v19937_v0  ;;  %v13048_v0 = vcombine.low %v3209_v2, %v3217_v24  ;;  %v3187_v2 = vld [vmem:[#allocation8 + $0x650] sm:$0xff] }
 0x4bd   :  { %15273 = vmatpush1.bf16.msra.mxu0 %v19940_v53  ;;  %15421 = vmatprep.subr.bf16.mxu1 %v19938_v11  ;;  %v13065_v11 = vcombine.high %v3225_v20, %v3233_v14 }
 0x4be   :  { %15275 = vmatprep.subr.bf16.mxu0 %v19941_v61 }
 0x4c0   :  { %15423 = vmatpush1.bf16.msra.mxu1 %v17069_v60  ;;  %v2293_v60 = vmax.f32 %v18345_v51, %v18383_v47  ;;  %v3201_v47 = vld [vmem:[#allocation8 + $0x6c0] sm:$0xff] }
 0x4c1   :  { %15277 = vmatpush1.bf16.msra.mxu0 %v17269_v35  ;;  %15425 = vmatprep.subr.bf16.mxu1 %v17072_v26 }
 0x4c2   :  { %15279 = vmatprep.subr.bf16.mxu0 %v17271_v13  ;;  %v18461_v26 = vrot.slane %v2293_v60, %v17009_v50  ;;  %v3297_v60 = vld [vmem:[#allocation8 + $0x9c0] sm:$0xff] }
 0x4c4   :  { %15427 = vmatpush1.bf16.msra.mxu1 %v17089_v16  ;;  %v2320_v16 = vcombine.high %v18461_v26, %v18461_v26 }
 0x4c5   :  { %15281 = vmatpush1.bf16.msra.mxu0 %v17287_v17  ;;  %15429 = vmatprep.subr.bf16.mxu1 %v17092_v1  ;;  %v19942_v1 = vld [vmem:[#allocation81_spill] sm:$0xff] }
 0x4c6   :  { %15283 = vmatprep.subr.bf16.mxu0 %v17296_v5 }
 0x4c7   :  { %v18442_v55 = vpop.f32.mrb[2].mxu1 }
 0x4c8   :  { %v18444_v3 = vpop.f32.mrb[3].mxu1  ;;  %15431 = vmatpush1.bf16.msra.mxu1 %v19854_v9  ;;  %v19956_v9 = vld [vmem:[#allocation95_spill] sm:$0xff] }
 0x4c9   :  { %15285 = vmatpush1.bf16.msra.mxu0 %v17327_v8  ;;  %15433 = vmatprep.subr.bf16.mxu1 %v19855_v40 }
 0x4ca   :  { %15287 = vmatprep.subr.bf16.mxu0 %v17332_v28 }
 0x4cc   :  { %15435 = vmatpush1.bf16.msra.mxu1 %v19857_v6  ;;  %v19950_v6 = vld [vmem:[#allocation89_spill] sm:$0xff] }
 0x4cd   :  { %15289 = vmatpush1.bf16.msra.mxu0 %v17357_v52  ;;  %15437 = vmatprep.subr.bf16.mxu1 %v19858_v18  ;;  %v19948_v18 = vld [vmem:[#allocation87_spill] sm:$0xff] }
 0x4ce   :  { %15291 = vmatprep.subr.bf16.mxu0 %v17361_v12 }
 0x4d0   :  { %15439 = vmatpush1.bf16.msra.mxu1 %v19859_v36 }
 0x4d1   :  { %15293 = vmatpush1.bf16.msra.mxu0 %v17388_v56  ;;  %15441 = vmatprep.subr.bf16.mxu1 %v19860_v22  ;;  %v3177_v22 = vld [vmem:[#allocation8 + $0x600] sm:$0xff] }
 0x4d2   :  { %15295 = vmatprep.subr.bf16.mxu0 %v17394_v62 }
 0x4d4   :  { %15443 = vmatpush1.bf16.msra.mxu1 %v19861_v54  ;;  %v3169_v54 = vld [vmem:[#allocation8 + $0x5c0] sm:$0xff] }
 0x4d5   :  { %15297 = vmatpush1.bf16.msra.mxu0 %v17420_v42  ;;  %15445 = vmatprep.subr.bf16.mxu1 %v19863_v37  ;;  %v3185_v37 = vld [vmem:[#allocation8 + $0x640] sm:$0xff] }
 0x4d6   :  { %15299 = vmatprep.subr.bf16.mxu0 %v17425_v29 }
 0x4d8   :  { %2464 = vmatmul.mubr.f32.vlgmr.msra.gmra.mrb[4].mxu0 %v18389_v34  ;;  %15447 = vmatpush1.bf16.msra.mxu1 %v19864_v39  ;;  %v19943_v39 = vld [vmem:[#allocation82_spill] sm:$0xff] }
 0x4d9   :  { %15301 = vmatpush1.bf16.msra.mxu0 %v17452_v46  ;;  %12986 = vmatprep.mubr.msk.f32.mxu0 %vm562_vm9, %v2320_v16 }
 0x4da   :  { %15303 = vmatprep.subr.bf16.mxu0 %v17458_v27  ;;  %15449 = vmatprep.subr.bf16.mxu1 %v19939_v21  ;;  %v3162_v21 = vld [vmem:[#allocation8 + $0x588] sm:$0xff] }
 0x4dc   :  { %15451 = vmatpush1.bf16.msra.mxu1 %v19940_v53  ;;  %v3170_v53 = vld [vmem:[#allocation8 + $0x5c8] sm:$0xff] }
 0x4dd   :  { %15305 = vmatpush1.bf16.msra.mxu0 %v19872_v63  ;;  %15453 = vmatprep.subr.bf16.mxu1 %v19941_v61  ;;  %v3289_v61 = vld [vmem:[#allocation8 + $0x980] sm:$0xff]  ;;  %v13003_v16 = vcombine.high %v3162_v21, %v3170_v53 }
 0x4de   :  { %15307 = vmatprep.subr.bf16.mxu0 %v19874_v25 }
 0x4e0   :  { %15455 = vmatpush1.bf16.msra.mxu1 %v17269_v35  ;;  %v19944_v35 = vld [vmem:[#allocation83_spill] sm:$0xff] }
 0x4e1   :  { %15309 = vmatpush1.bf16.msra.mxu0 %v19875_v59  ;;  %15457 = vmatprep.subr.bf16.mxu1 %v17271_v13  ;;  %v2728_v13 = vsel %vm387_vm3, %v18406_v30, %v2725_v31  ;;  %v3241_v30 = vld [vmem:[#allocation8 + $0x800] sm:$0xff]  ;;  %v13064_v31 = vcombine.low %v3225_v20, %v3233_v14  ;;  %vm12890_vm3 = vcmask 74752  }
 0x4e2   :  { %15311 = vmatprep.subr.bf16.mxu0 %v19876_v38  ;;  %v13081_v10 = vcombine.high %v3241_v30, %v3249_v32  ;;  %v13080_v41 = vcombine.low %v3241_v30, %v3249_v32  ;;  %v3250_v30 = vld [vmem:[#allocation8 + $0x848] sm:$0xff]  ;;  %v3195_v32 = vld [vmem:[#allocation8 + $0x690] sm:$0xff] }
 0x4e4   :  { %15459 = vmatpush1.bf16.msra.mxu1 %v17287_v17  ;;  %v19945_v17 = vld [vmem:[#allocation84_spill] sm:$0xff] }
 0x4e5   :  { %15313 = vmatpush1.bf16.msra.mxu0 %v19877_v44  ;;  %15461 = vmatprep.subr.bf16.mxu1 %v17296_v5  ;;  %v2732_v5 = vmax.f32 %v18373_v49, %v2728_v13  ;;  %v3193_v49 = vld [vmem:[#allocation8 + $0x680] sm:$0xff]  ;;  %v3186_v13 = vld [vmem:[#allocation8 + $0x648] sm:$0xff] }
 0x4e6   :  { %15315 = vmatprep.subr.bf16.mxu0 %v19942_v1  ;;  %v13033_v19 = vcombine.high %v3193_v49, %v3201_v47  ;;  %v13032_v34 = vcombine.low %v3193_v49, %v3201_v47  ;;  %v3226_v47 = vld [vmem:[#allocation8 + $0x788] sm:$0xff] }
 0x4e7   :  { %v18504_v36 = vrot.slane %v2732_v5, %v17009_v50  ;;  %v19951_v50 = vld [vmem:[#allocation90_spill] sm:$0xff] }
 0x4e8   :  { %15463 = vmatpush1.bf16.msra.mxu1 %v17327_v8  ;;  %v19946_v8 = vld [vmem:[#allocation85_spill] sm:$0xff]  ;;  %v3321_v5 = vld [vmem:[#allocation8 + $0xa80] sm:$0xff] }
 0x4e9   :  { %15317 = vmatpush1.bf16.msra.mxu0 %v19943_v39  ;;  %15465 = vmatprep.subr.bf16.mxu1 %v17332_v28  ;;  %v19947_v28 = vld [vmem:[#allocation86_spill] sm:$0xff] }
 0x4ea   :  { %15319 = vmatprep.subr.bf16.mxu0 %v19944_v35 }
 0x4ec   :  { %15467 = vmatpush1.bf16.msra.mxu1 %v17357_v52  ;;  %v19949_v52 = vld [vmem:[#allocation88_spill] sm:$0xff] }
 0x4ed   :  { %15321 = vmatpush1.bf16.msra.mxu0 %v19945_v17  ;;  %15469 = vmatprep.subr.bf16.mxu1 %v17361_v12  ;;  %v2759_v12 = vcombine.high %v18504_v36, %v18504_v36 }
 0x4ee   :  { %15323 = vmatprep.subr.bf16.mxu0 %v19946_v8 }
 0x4f0   :  { %15471 = vmatpush1.bf16.msra.mxu1 %v17388_v56  ;;  %v19952_v56 = vld [vmem:[#allocation91_spill] sm:$0xff] }
 0x4f1   :  { %15325 = vmatpush1.bf16.msra.mxu0 %v19947_v28  ;;  %15473 = vmatprep.subr.bf16.mxu1 %v17394_v62  ;;  %v19953_v62 = vld [vmem:[#allocation92_spill] sm:$0xff] }
 0x4f2   :  { %15327 = vmatprep.subr.bf16.mxu0 %v19948_v18 }
 0x4f4   :  { %15475 = vmatpush1.bf16.msra.mxu1 %v17420_v42  ;;  %v19954_v42 = vld [vmem:[#allocation93_spill] sm:$0xff] }
 0x4f5   :  { %15329 = vmatpush1.bf16.msra.mxu0 %v19949_v52  ;;  %15477 = vmatprep.subr.bf16.mxu1 %v17425_v29  ;;  %v3161_v29 = vld [vmem:[#allocation8 + $0x580] sm:$0xff] }
 0x4f6   :  { %15331 = vmatprep.subr.bf16.mxu0 %v19950_v6  ;;  %v13001_v40 = vcombine.high %v3161_v29, %v3169_v54 }
 0x4f7   :  { %2903 = vmatmul.mubr.f32.vlgmr.msra.gmra.mrb[4].mxu1 %v18420_v58  ;;  %v13096_v58 = vcombine.low %v3257_v57, %v3265_v4 }
 0x4f8   :  { %15479 = vmatpush1.bf16.msra.mxu1 %v17452_v46  ;;  %12999 = vmatprep.mubr.msk.f32.mxu1 %vm562_vm9, %v2759_v12  ;;  %v19955_v46 = vld [vmem:[#allocation94_spill] sm:$0xff]  ;;  %v13128_v12 = vcombine.low %v3289_v61, %v3297_v60 }
 0x4f9   :  { %15333 = vmatpush1.bf16.msra.mxu0 %v19951_v50  ;;  %15481 = vmatprep.subr.bf16.mxu1 %v17458_v27 }
 0x4fa   :  { %15335 = vmatprep.subr.bf16.mxu0 %v19952_v56 }
 0x4fc   :  { %15483 = vmatpush1.bf16.msra.mxu1 %v19872_v63  ;;  %v13017_v63 = vcombine.high %v3177_v22, %v3185_v37 }
 0x4fd   :  { %15337 = vmatpush1.bf16.msra.mxu0 %v19953_v62  ;;  %15485 = vmatprep.subr.bf16.mxu1 %v19874_v25  ;;  %v19958_v25 = vld [vmem:[#allocation97_spill] sm:$0xff] }
 0x4fe   :  { %15339 = vmatprep.subr.bf16.mxu0 %v19954_v42 }
 0x500   :  { %15487 = vmatpush1.bf16.msra.mxu1 %v19875_v59  ;;  %v13000_v59 = vcombine.low %v3161_v29, %v3169_v54 }
 0x501   :  { %15341 = vmatpush1.bf16.msra.mxu0 %v19955_v46  ;;  %15489 = vmatprep.subr.bf16.mxu1 %v19876_v38  ;;  %v19959_v38 = vld [vmem:[#allocation67_spill] sm:$0xff] }
 0x502   :  { %15344 = vmatprep.subr.msk.bf16.mxu0 %vm17740_vm12, %v19956_v9  ;;  %v18536_v51 = vpack.c.bf16 %v19959_v38, %v19959_v38 }
 0x504   :  { %15491 = vmatpush1.bf16.msra.mxu1 %v19877_v44  ;;  %v13016_v44 = vcombine.low %v3177_v22, %v3185_v37  ;;  %v3210_v22 = vld [vmem:[#allocation8 + $0x708] sm:$0xff] }
 0x505   :  { %15347 = vmatpush1.bf16.msk.msra.mxu0 %vm17740_vm12, %v19958_v25  ;;  %15493 = vmatprep.subr.bf16.mxu1 %v19942_v1  ;;  %v13129_v1 = vcombine.high %v3289_v61, %v3297_v60  ;;  %v3218_v37 = vld [vmem:[#allocation8 + $0x748] sm:$0xff] }
 0x506   :  { %4257 = vmatprep.subr.bf16.mxu0 %v13001_v40  ;;  %v13051_v38 = vcombine.high %v3210_v22, %v3218_v37  ;;  %v13050_v24 = vcombine.low %v3210_v22, %v3218_v37  ;;  %v3274_v60 = vld [vmem:[#allocation8 + $0x908] sm:$0xff] }
 0x508   :  { %2535 = vmatmul.mubr.f32.vlgmr.msra.gmra.mrb[4].mxu0 %v18461_v26  ;;  %15495 = vmatpush1.bf16.msra.mxu1 %v19943_v39  ;;  %v13112_v26 = vcombine.low %v3273_v15, %v3281_v23  ;;  %v3305_v39 = vld [vmem:[#allocation8 + $0xa00] sm:$0xff]  ;;  %v3266_v15 = vld [vmem:[#allocation8 + $0x8c8] sm:$0xff]  ;;  %v3211_v23 = vld [vmem:[#allocation8 + $0x710] sm:$0xff] }
 0x509   :  { %4258 = vmatpush1.bf16.msra.mxu0 %v13000_v59  ;;  %13176 = vmatprep.mubr.msk.bf16.mxu0 %vm4201_vm13, %v18536_v51  ;;  %v3171_v59 = vld [vmem:[#allocation8 + $0x5d0] sm:$0xff] }
 0x50a   :  { %15497 = vmatprep.subr.bf16.mxu1 %v19944_v35  ;;  %4259 = vmatprep.subr.bf16.mxu0 %v13017_v63  ;;  %v3178_v35 = vld [vmem:[#allocation8 + $0x608] sm:$0xff] }
 0x50b   :  { %v13018_v54 = vcombine.low %v3178_v35, %v3186_v13 }
 0x50c   :  { %15499 = vmatpush1.bf16.msra.mxu1 %v19945_v17  ;;  %v3313_v17 = vld [vmem:[#allocation8 + $0xa40] sm:$0xff] }
 0x50d   :  { %4260 = vmatpush1.bf16.msra.mxu0 %v13016_v44  ;;  %15501 = vmatprep.subr.bf16.mxu1 %v19946_v8  ;;  %v3329_v8 = vld [vmem:[#allocation8 + $0xac0] sm:$0x11]  ;;  %v3234_v44 = vld [vmem:[#allocation8 + $0x7c8] sm:$0xff] }
 0x50e   :  { %4261 = vmatprep.subr.bf16.mxu0 %v13033_v19  ;;  %v3179_v19 = vld [vmem:[#allocation8 + $0x610] sm:$0xff]  ;;  %v13067_v14 = vcombine.high %v3226_v47, %v3234_v44 }
 0x50f   :  { %v13020_v57 = vcombine.low %v3179_v19, %v3187_v2 }
 0x510   :  { %15503 = vmatpush1.bf16.msra.mxu1 %v19947_v28  ;;  %v13002_v28 = vcombine.low %v3162_v21, %v3170_v53 }
 0x511   :  { %4262 = vmatpush1.bf16.msra.mxu0 %v13032_v34  ;;  %15505 = vmatprep.subr.bf16.mxu1 %v19948_v18  ;;  %v16186_v18 = vmov 65535  }
 0x512   :  { %4263 = vmatprep.subr.bf16.mxu0 %v13049_v48  ;;  %v19960_v48 = vld [vmem:[#allocation66_spill] sm:$0xff] }
 0x513   :  { %v18570_v20 = vpack.c.bf16 %v19960_v48, %v19960_v48 }
 0x514   :  { %15507 = vmatpush1.bf16.msra.mxu1 %v19949_v52  ;;  %v4207_v52 = vsel %vm4205_vm14, 4294967295, %v16186_v18  ;;  %v3251_v18 = vld [vmem:[#allocation8 + $0x850] sm:$0xff] }
 0x515   :  { %4264 = vmatpush1.bf16.msra.mxu0 %v13048_v0  ;;  %15509 = vmatprep.subr.bf16.mxu1 %v19950_v6  ;;  %v13019_v6 = vcombine.high %v3178_v35, %v3186_v13  ;;  %v18562_v29 = vsel %vm4206_vm15, %v4207_v52, 0  ;;  %v13021_v0 = vcombine.high %v3179_v19, %v3187_v2  ;;  %v3164_v19 = vld [vmem:[#allocation8 + $0x598] sm:$0xff] }
 0x516   :  { %4265 = vmatprep.subr.bf16.mxu0 %v13065_v11  ;;  %v3242_v11 = vld [vmem:[#allocation8 + $0x808] sm:$0xff]  ;;  %v3172_v2 = vld [vmem:[#allocation8 + $0x5d8] sm:$0xff] }
 0x517   :  { %v13083_v4 = vcombine.high %v3242_v11, %v3250_v30 }
 0x518   :  { %15511 = vmatpush1.bf16.msra.mxu1 %v19951_v50  ;;  %v13145_v50 = vcombine.high %v3305_v39, %v3313_v17 }
 0x519   :  { %4266 = vmatpush1.bf16.msra.mxu0 %v13064_v31  ;;  %15513 = vmatprep.subr.bf16.mxu1 %v19952_v56  ;;  %v13161_v56 = vcombine.high %v3321_v5, %v3329_v8  ;;  %v3203_v31 = vld [vmem:[#allocation8 + $0x6d0] sm:$0xff] }
 0x51a   :  { %4267 = vmatprep.subr.bf16.mxu0 %v13081_v10  ;;  %v13066_v10 = vcombine.low %v3226_v47, %v3234_v44  ;;  %v13036_v21 = vcombine.low %v3195_v32, %v3203_v31 }
 0x51b   :  { %v4213_v40 = vand.u32 %v13161_v56, %v18562_v29 }
 0x51c   :  { %15515 = vmatpush1.bf16.msra.mxu1 %v19953_v62  ;;  %v3194_v62 = vld [vmem:[#allocation8 + $0x688] sm:$0xff] }
 0x51d   :  { %4268 = vmatpush1.bf16.msra.mxu0 %v13080_v41  ;;  %15517 = vmatprep.subr.bf16.mxu1 %v19954_v42  ;;  %v3202_v42 = vld [vmem:[#allocation8 + $0x6c8] sm:$0xff]  ;;  %v13037_v41 = vcombine.high %v3195_v32, %v3203_v31  ;;  %v3180_v32 = vld [vmem:[#allocation8 + $0x618] sm:$0xff] }
 0x51e   :  { %4269 = vmatprep.subr.bf16.mxu0 %v13097_v7  ;;  %v13035_v27 = vcombine.high %v3194_v62, %v3202_v42  ;;  %v3258_v7 = vld [vmem:[#allocation8 + $0x888] sm:$0xff]  ;;  %v3188_v31 = vld [vmem:[#allocation8 + $0x658] sm:$0xff] }
 0x51f   :  { %v13099_v53 = vcombine.high %v3258_v7, %v3266_v15 }
 0x520   :  { %15519 = vmatpush1.bf16.msra.mxu1 %v19955_v46  ;;  %v13144_v46 = vcombine.low %v3305_v39, %v3313_v17  ;;  %v13098_v39 = vcombine.low %v3258_v7, %v3266_v15  ;;  %v13023_v15 = vcombine.high %v3180_v32, %v3188_v31 }
 0x521   :  { %4270 = vmatpush1.bf16.msra.mxu0 %v13096_v58  ;;  %15522 = vmatprep.subr.msk.bf16.mxu1 %vm17740_vm12, %v19956_v9  ;;  %v13160_v9 = vcombine.low %v3321_v5, %v3329_v8  ;;  %v3219_v58 = vld [vmem:[#allocation8 + $0x750] sm:$0xff]  ;;  %v3290_v5 = vld [vmem:[#allocation8 + $0x988] sm:$0xff] }
 0x522   :  { %4271 = vmatprep.subr.bf16.mxu0 %v13113_v45  ;;  %v13082_v45 = vcombine.low %v3242_v11, %v3250_v30  ;;  %v13053_v61 = vcombine.high %v3211_v23, %v3219_v58  ;;  %v13052_v35 = vcombine.low %v3211_v23, %v3219_v58  ;;  %v3298_v8 = vld [vmem:[#allocation8 + $0x9c8] sm:$0xff]  ;;  %v3307_v30 = vld [vmem:[#allocation8 + $0xa10] sm:$0xff] }
 0x523   :  { %v4210_v63 = vand.u32 %v13160_v9, %v18562_v29  ;;  %v3267_v9 = vld [vmem:[#allocation8 + $0x8d0] sm:$0xff] }
 0x524   :  { %15525 = vmatpush1.bf16.msk.msra.mxu1 %vm17740_vm12, %v19958_v25  ;;  %v3163_v25 = vld [vmem:[#allocation8 + $0x590] sm:$0xff] }
 0x525   :  { %4272 = vmatpush1.bf16.msra.mxu0 %v13112_v26  ;;  %4298 = vmatprep.subr.bf16.mxu1 %v13003_v16  ;;  %v13005_v49 = vcombine.high %v3163_v25, %v3171_v59  ;;  %v13004_v34 = vcombine.low %v3163_v25, %v3171_v59  ;;  %v3282_v26 = vld [vmem:[#allocation8 + $0x948] sm:$0xff]  ;;  %v3227_v16 = vld [vmem:[#allocation8 + $0x790] sm:$0xff] }
 0x526   :  { %4273 = vmatprep.subr.bf16.mxu0 %v13129_v1  ;;  %v3235_v1 = vld [vmem:[#allocation8 + $0x7d0] sm:$0xff]  ;;  %v13115_v13 = vcombine.high %v3274_v60, %v3282_v26  ;;  %v13114_v52 = vcombine.low %v3274_v60, %v3282_v26 }
 0x527   :  { %2974 = vmatmul.mubr.f32.vlgmr.msra.gmra.mrb[4].mxu1 %v18504_v36  ;;  %v13034_v36 = vcombine.low %v3194_v62, %v3202_v42  ;;  %v13069_v17 = vcombine.high %v3227_v16, %v3235_v1  ;;  %v3314_v62 = vld [vmem:[#allocation8 + $0xa48] sm:$0xff]  ;;  %v3275_v59 = vld [vmem:[#allocation8 + $0x910] sm:$0xff] }
 0x528   :  { %4299 = vmatpush1.bf16.msra.mxu1 %v13002_v28  ;;  %13177 = vmatprep.mubr.msk.bf16.mxu1 %vm4201_vm13, %v18536_v51  ;;  %v3243_v28 = vld [vmem:[#allocation8 + $0x810] sm:$0xff]  ;;  %v3322_v42 = vld [vmem:[#allocation8 + $0xa88] sm:$0xff] }
 0x529   :  { %4274 = vmatpush1.bf16.msra.mxu0 %v13128_v12  ;;  %4300 = vmatprep.subr.bf16.mxu1 %v13019_v6  ;;  %v13068_v12 = vcombine.low %v3227_v16, %v3235_v1  ;;  %v13131_v6 = vcombine.high %v3290_v5, %v3298_v8  ;;  %v13085_v56 = vcombine.high %v3243_v28, %v3251_v18  ;;  %v3212_v1 = vld [vmem:[#allocation8 + $0x718] sm:$0xff] }
 0x52a   :  { %4275 = vmatprep.subr.bf16.mxu0 %v13145_v50  ;;  %v3306_v50 = vld [vmem:[#allocation8 + $0xa08] sm:$0xff] }
 0x52b   :  { %v13147_v22 = vcombine.high %v3306_v50, %v3314_v62 }
 0x52c   :  { %4301 = vmatpush1.bf16.msra.mxu1 %v13018_v54  ;;  %v3330_v54 = vld [vmem:[#allocation8 + $0xac8] sm:$0x11] }
 0x52d   :  { %4276 = vmatpush1.bf16.msra.mxu0 %v13144_v46  ;;  %4302 = vmatprep.subr.bf16.mxu1 %v13035_v27  ;;  %v3259_v46 = vld [vmem:[#allocation8 + $0x890] sm:$0xff]  ;;  %v13130_v27 = vcombine.low %v3290_v5, %v3298_v8  ;;  %v13163_v37 = vcombine.high %v3322_v42, %v3330_v54 }
 0x52e   :  { %4277 = vmatprep.subr.bf16.mxu0 %v4213_v40  ;;  %v13084_v40 = vcombine.low %v3243_v28, %v3251_v18  ;;  %v13101_v25 = vcombine.high %v3259_v46, %v3267_v9  ;;  %v3228_v18 = vld [vmem:[#allocation8 + $0x798] sm:$0xff] }
 0x52f   :  { %v4219_v47 = vand.u32 %v13163_v37, %v18562_v29 }
 0x530   :  { %4303 = vmatpush1.bf16.msra.mxu1 %v13034_v36  ;;  %v3283_v36 = vld [vmem:[#allocation8 + $0x950] sm:$0xff] }
 0x531   :  { %4278 = vmatpush1.bf16.msra.mxu0 %v4210_v63  ;;  %4304 = vmatprep.subr.bf16.mxu1 %v13051_v38  ;;  %v13146_v63 = vcombine.low %v3306_v50, %v3314_v62  ;;  %v13162_v38 = vcombine.low %v3322_v42, %v3330_v54  ;;  %v13117_v44 = vcombine.high %v3275_v59, %v3283_v36  ;;  %v3244_v54 = vld [vmem:[#allocation8 + $0x818] sm:$0xff] }
 0x532   :  { %4339 = vmatprep.subr.bf16.mxu0 %v13005_v49  ;;  %v13100_v49 = vcombine.low %v3259_v46, %v3267_v9  ;;  %v3252_v46 = vld [vmem:[#allocation8 + $0x858] sm:$0xff]  ;;  %v3197_v9 = vld [vmem:[#allocation8 + $0x6a0] sm:$0xff] }
 0x533   :  { %v4216_v48 = vand.u32 %v13162_v38, %v18562_v29  ;;  %v13087_v37 = vcombine.high %v3244_v54, %v3252_v46  ;;  %v3221_v38 = vld [vmem:[#allocation8 + $0x760] sm:$0xff] }
 0x534   :  { %4290 = vmatmul.mubr.bf16.vlgmr.msra.gmra.mrb[8].mxu0 %v18570_v20  ;;  %4305 = vmatpush1.bf16.msra.mxu1 %v13050_v24  ;;  %v3291_v24 = vld [vmem:[#allocation8 + $0x990] sm:$0xff] }
 0x535   :  { %4340 = vmatpush1.bf16.msra.mxu0 %v13004_v34  ;;  %13178 = vmatprep.mubr.msk.bf16.mxu0 %vm4201_vm13, %v18536_v51  ;;  %v3299_v34 = vld [vmem:[#allocation8 + $0x9d0] sm:$0xff] }
 0x536   :  { %4306 = vmatprep.subr.bf16.mxu1 %v13067_v14  ;;  %4341 = vmatprep.subr.bf16.mxu0 %v13021_v0  ;;  %v13116_v14 = vcombine.low %v3275_v59, %v3283_v36  ;;  %v13007_v0 = vcombine.high %v3164_v19, %v3172_v2  ;;  %v13133_v11 = vcombine.high %v3291_v24, %v3299_v34  ;;  %v3260_v59 = vld [vmem:[#allocation8 + $0x898] sm:$0xff] }
 0x537   :  { %v13132_v7 = vcombine.low %v3291_v24, %v3299_v34  ;;  %v3268_v36 = vld [vmem:[#allocation8 + $0x8d8] sm:$0xff]  ;;  %v3229_v34 = vld [vmem:[#allocation8 + $0x7a0] sm:$0xff] }
 0x538   :  { %4307 = vmatpush1.bf16.msra.mxu1 %v13066_v10  ;;  %v3315_v10 = vld [vmem:[#allocation8 + $0xa50] sm:$0xff]  ;;  %v3284_v24 = vld [vmem:[#allocation8 + $0x958] sm:$0xff] }
 0x539   :  { %4342 = vmatpush1.bf16.msra.mxu0 %v13020_v57  ;;  %4308 = vmatprep.subr.bf16.mxu1 %v13083_v4  ;;  %v3323_v57 = vld [vmem:[#allocation8 + $0xa90] sm:$0xff]  ;;  %v13149_v23 = vcombine.high %v3307_v30, %v3315_v10 }
 0x53a   :  { %4343 = vmatprep.subr.bf16.mxu0 %v13037_v41  ;;  %v3331_v4 = vld [vmem:[#allocation8 + $0xad0] sm:$0x11]  ;;  %v13006_v41 = vcombine.low %v3164_v19, %v3172_v2  ;;  %v3276_v2 = vld [vmem:[#allocation8 + $0x918] sm:$0xff] }
 0x53b   :  { %v13165_v58 = vcombine.high %v3323_v57, %v3331_v4  ;;  %v13164_v60 = vcombine.low %v3323_v57, %v3331_v4  ;;  %v3253_v57 = vld [vmem:[#allocation8 + $0x860] sm:$0xff]  ;;  %v13118_v4 = vcombine.low %v3276_v2, %v3284_v24 }
 0x53c   :  { %4309 = vmatpush1.bf16.msra.mxu1 %v13082_v45  ;;  %v3196_v45 = vld [vmem:[#allocation8 + $0x698] sm:$0xff] }
 0x53d   :  { %4344 = vmatpush1.bf16.msra.mxu0 %v13036_v21  ;;  %4310 = vmatprep.subr.bf16.mxu1 %v13099_v53  ;;  %v3204_v21 = vld [vmem:[#allocation8 + $0x6d8] sm:$0xff]  ;;  %v13022_v53 = vcombine.low %v3180_v32, %v3188_v31  ;;  %v4225_v16 = vand.u32 %v13165_v58, %v18562_v29  ;;  %v4222_v5 = vand.u32 %v13164_v60, %v18562_v29 }
 0x53e   :  { %4345 = vmatprep.subr.bf16.mxu0 %v13053_v61  ;;  %v13148_v61 = vcombine.low %v3307_v30, %v3315_v10  ;;  %v13039_v26 = vcombine.high %v3196_v45, %v3204_v21  ;;  %v3292_v32 = vld [vmem:[#allocation8 + $0x998] sm:$0xff]  ;;  %v3245_v10 = vld [vmem:[#allocation8 + $0x820] sm:$0xff] }
 0x53f   :  { %v3300_v31 = vld [vmem:[#allocation8 + $0x9d8] sm:$0xff] }
 0x540   :  { %4311 = vmatpush1.bf16.msra.mxu1 %v13098_v39  ;;  %v3220_v39 = vld [vmem:[#allocation8 + $0x758] sm:$0xff]  ;;  %v13134_v60 = vcombine.low %v3292_v32, %v3300_v31 }
 0x541   :  { %4346 = vmatpush1.bf16.msra.mxu0 %v13052_v35  ;;  %4312 = vmatprep.subr.bf16.mxu1 %v13115_v13  ;;  %v3165_v35 = vld [vmem:[#allocation8 + $0x5a0] sm:$0xff]  ;;  %v13055_v8 = vcombine.high %v3212_v1, %v3220_v39  ;;  %v13054_v50 = vcombine.low %v3212_v1, %v3220_v39  ;;  %v3316_v58 = vld [vmem:[#allocation8 + $0xa58] sm:$0xff] }
 0x542   :  { %4347 = vmatprep.subr.bf16.mxu0 %v13069_v17  ;;  %v3173_v13 = vld [vmem:[#allocation8 + $0x5e0] sm:$0xff]  ;;  %v13038_v17 = vcombine.low %v3196_v45, %v3204_v21  ;;  %v3324_v45 = vld [vmem:[#allocation8 + $0xa98] sm:$0xff] }
 0x543   :  { %v13009_v28 = vcombine.high %v3165_v35, %v3173_v13  ;;  %v3332_v21 = vld [vmem:[#allocation8 + $0xad8] sm:$0x11] }
 0x544   :  { %4313 = vmatpush1.bf16.msra.mxu1 %v13114_v52  ;;  %v3236_v52 = vld [vmem:[#allocation8 + $0x7d8] sm:$0xff]  ;;  %v13167_v1 = vcombine.high %v3324_v45, %v3332_v21 }
 0x545   :  { %4348 = vmatpush1.bf16.msra.mxu0 %v13068_v12  ;;  %4314 = vmatprep.subr.bf16.mxu1 %v13131_v6  ;;  %v3181_v12 = vld [vmem:[#allocation8 + $0x620] sm:$0xff]  ;;  %v13071_v62 = vcombine.high %v3228_v18, %v3236_v52 }
 0x546   :  { %4349 = vmatprep.subr.bf16.mxu0 %v13085_v56  ;;  %v3189_v6 = vld [vmem:[#allocation8 + $0x660] sm:$0xff]  ;;  %v13008_v56 = vcombine.low %v3165_v35, %v3173_v13 }
 0x547   :  { %v13025_v42 = vcombine.high %v3181_v12, %v3189_v6  ;;  %v3277_v35 = vld [vmem:[#allocation8 + $0x920] sm:$0xff] }
 0x548   :  { %4315 = vmatpush1.bf16.msra.mxu1 %v13130_v27  ;;  %v3205_v27 = vld [vmem:[#allocation8 + $0x6e0] sm:$0xff] }
 0x549   :  { %4350 = vmatpush1.bf16.msra.mxu0 %v13084_v40  ;;  %4316 = vmatprep.subr.bf16.mxu1 %v13147_v22  ;;  %v13070_v40 = vcombine.low %v3228_v18, %v3236_v52  ;;  %v13024_v22 = vcombine.low %v3181_v12, %v3189_v6  ;;  %v3285_v13 = vld [vmem:[#allocation8 + $0x960] sm:$0xff]  ;;  %v3166_v52 = vld [vmem:[#allocation8 + $0x5a8] sm:$0xff] }
 0x54a   :  { %4351 = vmatprep.subr.bf16.mxu0 %v13101_v25  ;;  %v13041_v25 = vcombine.high %v3197_v9, %v3205_v27  ;;  %v13121_v18 = vcombine.high %v3277_v35, %v3285_v13  ;;  %v3174_v12 = vld [vmem:[#allocation8 + $0x5e8] sm:$0xff]  ;;  %v3293_v6 = vld [vmem:[#allocation8 + $0x9a0] sm:$0xff] }
 0x54c   :  { %4317 = vmatpush1.bf16.msra.mxu1 %v13146_v63  ;;  %v3213_v63 = vld [vmem:[#allocation8 + $0x720] sm:$0xff] }
 0x54d   :  { %4352 = vmatpush1.bf16.msra.mxu0 %v13100_v49  ;;  %4318 = vmatprep.subr.bf16.mxu1 %v4219_v47  ;;  %v13086_v49 = vcombine.low %v3244_v54, %v3252_v46  ;;  %v13040_v47 = vcombine.low %v3197_v9, %v3205_v27  ;;  %v13057_v19 = vcombine.high %v3213_v63, %v3221_v38  ;;  %v3309_v46 = vld [vmem:[#allocation8 + $0xa20] sm:$0xff]  ;;  %v3182_v9 = vld [vmem:[#allocation8 + $0x628] sm:$0xff] }
 0x54e   :  { %4353 = vmatprep.subr.bf16.mxu0 %v13117_v44  ;;  %v13103_v44 = vcombine.high %v3260_v59, %v3268_v36  ;;  %v3190_v27 = vld [vmem:[#allocation8 + $0x668] sm:$0xff] }
 0x550   :  { %4319 = vmatpush1.bf16.msra.mxu1 %v4216_v48  ;;  %v3237_v48 = vld [vmem:[#allocation8 + $0x7e0] sm:$0xff] }
 0x551   :  { %4354 = vmatpush1.bf16.msra.mxu0 %v13116_v14  ;;  %4380 = vmatprep.subr.bf16.mxu1 %v13007_v0  ;;  %v13102_v14 = vcombine.low %v3260_v59, %v3268_v36  ;;  %v13056_v0 = vcombine.low %v3213_v63, %v3221_v38  ;;  %v13073_v30 = vcombine.high %v3229_v34, %v3237_v48 }
 0x552   :  { %4355 = vmatprep.subr.bf16.mxu0 %v13133_v11  ;;  %v13119_v11 = vcombine.high %v3276_v2, %v3284_v24  ;;  %v13027_v36 = vcombine.high %v3182_v9, %v3190_v27 }
 0x553   :  { %4331 = vmatmul.mubr.bf16.vlgmr.msra.gmra.mrb[8].mxu1 %v18570_v20 }
 0x554   :  { %4381 = vmatpush1.bf16.msra.mxu1 %v13006_v41  ;;  %13179 = vmatprep.mubr.msk.bf16.mxu1 %vm4201_vm13, %v18536_v51  ;;  %v13072_v41 = vcombine.low %v3229_v34, %v3237_v48  ;;  %v3214_v48 = vld [vmem:[#allocation8 + $0x728] sm:$0xff] }
 0x555   :  { %4356 = vmatpush1.bf16.msra.mxu0 %v13132_v7  ;;  %4382 = vmatprep.subr.bf16.mxu1 %v13023_v15  ;;  %v13135_v7 = vcombine.high %v3292_v32, %v3300_v31  ;;  %v3308_v15 = vld [vmem:[#allocation8 + $0xa18] sm:$0xff] }
 0x556   :  { %4357 = vmatprep.subr.bf16.mxu0 %v13149_v23  ;;  %v13089_v23 = vcombine.high %v3245_v10, %v3253_v57 }
 0x558   :  { %4383 = vmatpush1.bf16.msra.mxu1 %v13022_v53  ;;  %v3261_v53 = vld [vmem:[#allocation8 + $0x8a0] sm:$0xff] }
 0x559   :  { %4358 = vmatpush1.bf16.msra.mxu0 %v13148_v61  ;;  %4384 = vmatprep.subr.bf16.mxu1 %v13039_v26  ;;  %v3269_v61 = vld [vmem:[#allocation8 + $0x8e0] sm:$0xff]  ;;  %v13088_v26 = vcombine.low %v3245_v10, %v3253_v57  ;;  %v3230_v57 = vld [vmem:[#allocation8 + $0x7a8] sm:$0xff] }
 0x55a   :  { %4359 = vmatprep.subr.bf16.mxu0 %v4225_v16  ;;  %v13151_v16 = vcombine.high %v3308_v15, %v3316_v58  ;;  %v13105_v39 = vcombine.high %v3261_v53, %v3269_v61 }
 0x55c   :  { %4385 = vmatpush1.bf16.msra.mxu1 %v13038_v17  ;;  %v13150_v17 = vcombine.low %v3308_v15, %v3316_v58 }
 0x55d   :  { %4360 = vmatpush1.bf16.msra.mxu0 %v4222_v5  ;;  %4386 = vmatprep.subr.bf16.mxu1 %v13055_v8  ;;  %v13166_v5 = vcombine.low %v3324_v45, %v3332_v21  ;;  %v13104_v8 = vcombine.low %v3261_v53, %v3269_v61  ;;  %v3246_v21 = vld [vmem:[#allocation8 + $0x828] sm:$0xff]  ;;  %v3199_v61 = vld [vmem:[#allocation8 + $0x6b0] sm:$0xff] }
 0x55e   :  { %4421 = vmatprep.subr.bf16.mxu0 %v13009_v28  ;;  %v4231_v28 = vand.u32 %v13167_v1, %v18562_v29  ;;  %v3254_v53 = vld [vmem:[#allocation8 + $0x868] sm:$0xff] }
 0x55f   :  { %v13091_v1 = vcombine.high %v3246_v21, %v3254_v53 }
 0x560   :  { %4372 = vmatmul.mubr.bf16.vlgmr.msra.gmra.mrb[12].mxu0 %v18570_v20  ;;  %4387 = vmatpush1.bf16.msra.mxu1 %v13054_v50  ;;  %v3301_v50 = vld [vmem:[#allocation8 + $0x9e0] sm:$0xff] }
 0x561   :  { %4422 = vmatpush1.bf16.msra.mxu0 %v13008_v56  ;;  %13180 = vmatprep.mubr.msk.bf16.mxu0 %vm4201_vm13, %v18536_v51  ;;  %v4228_v56 = vand.u32 %v13166_v5, %v18562_v29  ;;  %v13137_v54 = vcombine.high %v3293_v6, %v3301_v50  ;;  %v13136_v59 = vcombine.low %v3293_v6, %v3301_v50  ;;  %v3223_v5 = vld [vmem:[#allocation8 + $0x770] sm:$0xff]  ;;  %v3286_v6 = vld [vmem:[#allocation8 + $0x968] sm:$0xff] }
 0x562   :  { %4388 = vmatprep.subr.bf16.mxu1 %v13071_v62  ;;  %4423 = vmatprep.subr.bf16.mxu0 %v13025_v42  ;;  %v13120_v62 = vcombine.low %v3277_v35, %v3285_v13  ;;  %v13011_v42 = vcombine.high %v3166_v52, %v3174_v12  ;;  %v3262_v35 = vld [vmem:[#allocation8 + $0x8a8] sm:$0xff]  ;;  %v3231_v50 = vld [vmem:[#allocation8 + $0x7b0] sm:$0xff] }
 0x563   :  { %v3270_v13 = vld [vmem:[#allocation8 + $0x8e8] sm:$0xff] }
 0x564   :  { %4389 = vmatpush1.bf16.msra.mxu1 %v13070_v40  ;;  %v3317_v40 = vld [vmem:[#allocation8 + $0xa60] sm:$0xff] }
 0x565   :  { %4424 = vmatpush1.bf16.msra.mxu0 %v13024_v22  ;;  %4390 = vmatprep.subr.bf16.mxu1 %v13087_v37  ;;  %v3325_v22 = vld [vmem:[#allocation8 + $0xaa0] sm:$0xff]  ;;  %v13153_v63 = vcombine.high %v3309_v46, %v3317_v40 }
 0x566   :  { %4425 = vmatprep.subr.bf16.mxu0 %v13041_v25  ;;  %v3333_v37 = vld [vmem:[#allocation8 + $0xae0] sm:$0x11]  ;;  %v13010_v25 = vcombine.low %v3166_v52, %v3174_v12  ;;  %v3278_v12 = vld [vmem:[#allocation8 + $0x928] sm:$0xff] }
 0x567   :  { %v13169_v38 = vcombine.high %v3325_v22, %v3333_v37  ;;  %v13168_v2 = vcombine.low %v3325_v22, %v3333_v37  ;;  %v3255_v22 = vld [vmem:[#allocation8 + $0x870] sm:$0xff]  ;;  %v13122_v37 = vcombine.low %v3278_v12, %v3286_v6 }
 0x568   :  { %4391 = vmatpush1.bf16.msra.mxu1 %v13086_v49  ;;  %v3198_v49 = vld [vmem:[#allocation8 + $0x6a8] sm:$0xff] }
 0x569   :  { %4426 = vmatpush1.bf16.msra.mxu0 %v13040_v47  ;;  %4392 = vmatprep.subr.bf16.mxu1 %v13103_v44  ;;  %v3206_v47 = vld [vmem:[#allocation8 + $0x6e8] sm:$0xff]  ;;  %v13026_v44 = vcombine.low %v3182_v9, %v3190_v27  ;;  %v4237_v34 = vand.u32 %v13169_v38, %v18562_v29  ;;  %v4234_v32 = vand.u32 %v13168_v2, %v18562_v29 }
 0x56a   :  { %4427 = vmatprep.subr.bf16.mxu0 %v13057_v19  ;;  %v13152_v19 = vcombine.low %v3309_v46, %v3317_v40  ;;  %v13043_v24 = vcombine.high %v3198_v49, %v3206_v47  ;;  %v3294_v9 = vld [vmem:[#allocation8 + $0x9a8] sm:$0xff]  ;;  %v3247_v40 = vld [vmem:[#allocation8 + $0x830] sm:$0xff] }
 0x56b   :  { %v3302_v27 = vld [vmem:[#allocation8 + $0x9e8] sm:$0xff] }
 0x56c   :  { %4393 = vmatpush1.bf16.msra.mxu1 %v13102_v14  ;;  %v3222_v14 = vld [vmem:[#allocation8 + $0x768] sm:$0xff]  ;;  %v13138_v2 = vcombine.low %v3294_v9, %v3302_v27 }
 0x56d   :  { %4428 = vmatpush1.bf16.msra.mxu0 %v13056_v0  ;;  %4394 = vmatprep.subr.bf16.mxu1 %v13119_v11  ;;  %v3167_v0 = vld [vmem:[#allocation8 + $0x5b0] sm:$0xff]  ;;  %v13059_v31 = vcombine.high %v3214_v48, %v3222_v14  ;;  %v13058_v15 = vcombine.low %v3214_v48, %v3222_v14  ;;  %v3318_v38 = vld [vmem:[#allocation8 + $0xa68] sm:$0xff] }
 0x56e   :  { %4429 = vmatprep.subr.bf16.mxu0 %v13073_v30  ;;  %v3175_v11 = vld [vmem:[#allocation8 + $0x5f0] sm:$0xff]  ;;  %v13042_v30 = vcombine.low %v3198_v49, %v3206_v47  ;;  %v3326_v49 = vld [vmem:[#allocation8 + $0xaa8] sm:$0xff] }
 0x56f   :  { %v13013_v10 = vcombine.high %v3167_v0, %v3175_v11  ;;  %v3334_v47 = vld [vmem:[#allocation8 + $0xae8] sm:$0x11] }
 0x570   :  { %4395 = vmatpush1.bf16.msra.mxu1 %v13118_v4  ;;  %v3238_v4 = vld [vmem:[#allocation8 + $0x7e8] sm:$0xff]  ;;  %v13171_v48 = vcombine.high %v3326_v49, %v3334_v47 }
 0x571   :  { %4430 = vmatpush1.bf16.msra.mxu0 %v13072_v41  ;;  %4396 = vmatprep.subr.bf16.mxu1 %v13135_v7  ;;  %v3183_v41 = vld [vmem:[#allocation8 + $0x630] sm:$0xff]  ;;  %v13075_v58 = vcombine.high %v3230_v57, %v3238_v4 }
 0x572   :  { %4431 = vmatprep.subr.bf16.mxu0 %v13089_v23  ;;  %v3191_v7 = vld [vmem:[#allocation8 + $0x670] sm:$0xff]  ;;  %v13012_v23 = vcombine.low %v3167_v0, %v3175_v11 }
 0x573   :  { %v13029_v45 = vcombine.high %v3183_v41, %v3191_v7  ;;  %v3279_v0 = vld [vmem:[#allocation8 + $0x930] sm:$0xff] }
 0x574   :  { %4397 = vmatpush1.bf16.msra.mxu1 %v13134_v60  ;;  %v3207_v60 = vld [vmem:[#allocation8 + $0x6f0] sm:$0xff] }
 0x575   :  { %4432 = vmatpush1.bf16.msra.mxu0 %v13088_v26  ;;  %4398 = vmatprep.subr.bf16.mxu1 %v13151_v16  ;;  %v13074_v26 = vcombine.low %v3230_v57, %v3238_v4  ;;  %v13028_v16 = vcombine.low %v3183_v41, %v3191_v7  ;;  %v3287_v11 = vld [vmem:[#allocation8 + $0x970] sm:$0xff]  ;;  %v3168_v4 = vld [vmem:[#allocation8 + $0x5b8] sm:$0xff] }
 0x576   :  { %4433 = vmatprep.subr.bf16.mxu0 %v13105_v39  ;;  %v13045_v39 = vcombine.high %v3199_v61, %v3207_v60  ;;  %v13125_v57 = vcombine.high %v3279_v0, %v3287_v11  ;;  %v3176_v41 = vld [vmem:[#allocation8 + $0x5f8] sm:$0xff]  ;;  %v3295_v7 = vld [vmem:[#allocation8 + $0x9b0] sm:$0xff] }
 0x578   :  { %4399 = vmatpush1.bf16.msra.mxu1 %v13150_v17  ;;  %v3215_v17 = vld [vmem:[#allocation8 + $0x730] sm:$0xff] }
 0x579   :  { %4434 = vmatpush1.bf16.msra.mxu0 %v13104_v8  ;;  %4400 = vmatprep.subr.bf16.mxu1 %v4231_v28  ;;  %v13090_v8 = vcombine.low %v3246_v21, %v3254_v53  ;;  %v13044_v28 = vcombine.low %v3199_v61, %v3207_v60  ;;  %v13061_v52 = vcombine.high %v3215_v17, %v3223_v5  ;;  %v3311_v53 = vld [vmem:[#allocation8 + $0xa30] sm:$0xff]  ;;  %v3184_v61 = vld [vmem:[#allocation8 + $0x638] sm:$0xff] }
 0x57a   :  { %4435 = vmatprep.subr.bf16.mxu0 %v13121_v18  ;;  %v13107_v18 = vcombine.high %v3262_v35, %v3270_v13  ;;  %v3192_v60 = vld [vmem:[#allocation8 + $0x678] sm:$0xff] }
 0x57c   :  { %4401 = vmatpush1.bf16.msra.mxu1 %v4228_v56  ;;  %v3239_v56 = vld [vmem:[#allocation8 + $0x7f0] sm:$0xff] }
 0x57d   :  { %4436 = vmatpush1.bf16.msra.mxu0 %v13120_v62  ;;  %4462 = vmatprep.subr.bf16.mxu1 %v13011_v42  ;;  %v13106_v62 = vcombine.low %v3262_v35, %v3270_v13  ;;  %v13060_v42 = vcombine.low %v3215_v17, %v3223_v5  ;;  %v13077_v46 = vcombine.high %v3231_v50, %v3239_v56 }
 0x57e   :  { %4437 = vmatprep.subr.bf16.mxu0 %v13137_v54  ;;  %v13123_v54 = vcombine.high %v3278_v12, %v3286_v6  ;;  %v13031_v13 = vcombine.high %v3184_v61, %v3192_v60 }
 0x57f   :  { %4413 = vmatmul.mubr.bf16.vlgmr.msra.gmra.mrb[12].mxu1 %v18570_v20 }
 0x580   :  { %4463 = vmatpush1.bf16.msra.mxu1 %v13010_v25  ;;  %13181 = vmatprep.mubr.msk.bf16.mxu1 %vm4201_vm13, %v18536_v51  ;;  %v13076_v25 = vcombine.low %v3231_v50, %v3239_v56  ;;  %v3216_v56 = vld [vmem:[#allocation8 + $0x738] sm:$0xff] }
 0x581   :  { %4438 = vmatpush1.bf16.msra.mxu0 %v13136_v59  ;;  %4464 = vmatprep.subr.bf16.mxu1 %v13027_v36  ;;  %v13139_v59 = vcombine.high %v3294_v9, %v3302_v27  ;;  %v3310_v36 = vld [vmem:[#allocation8 + $0xa28] sm:$0xff] }
 0x582   :  { %4439 = vmatprep.subr.bf16.mxu0 %v13153_v63  ;;  %v13093_v63 = vcombine.high %v3247_v40, %v3255_v22 }
 0x584   :  { %4465 = vmatpush1.bf16.msra.mxu1 %v13026_v44  ;;  %v3263_v44 = vld [vmem:[#allocation8 + $0x8b0] sm:$0xff] }
 0x585   :  { %4440 = vmatpush1.bf16.msra.mxu0 %v13152_v19  ;;  %4466 = vmatprep.subr.bf16.mxu1 %v13043_v24  ;;  %v3271_v19 = vld [vmem:[#allocation8 + $0x8f0] sm:$0xff]  ;;  %v13092_v24 = vcombine.low %v3247_v40, %v3255_v22  ;;  %v3232_v40 = vld [vmem:[#allocation8 + $0x7b8] sm:$0xff] }
 0x586   :  { %4441 = vmatprep.subr.bf16.mxu0 %v4237_v34  ;;  %v13155_v34 = vcombine.high %v3310_v36, %v3318_v38  ;;  %v13109_v14 = vcombine.high %v3263_v44, %v3271_v19  ;;  %v3240_v22 = vld [vmem:[#allocation8 + $0x7f8] sm:$0xff] }
 0x588   :  { %4467 = vmatpush1.bf16.msra.mxu1 %v13042_v30  ;;  %v13154_v30 = vcombine.low %v3310_v36, %v3318_v38 }
 0x589   :  { %4442 = vmatpush1.bf16.msra.mxu0 %v4234_v32  ;;  %4468 = vmatprep.subr.bf16.mxu1 %v13059_v31  ;;  %v13170_v32 = vcombine.low %v3326_v49, %v3334_v47  ;;  %v13108_v31 = vcombine.low %v3263_v44, %v3271_v19  ;;  %v3248_v49 = vld [vmem:[#allocation8 + $0x838] sm:$0xff]  ;;  %v19961_v44 = vld [vmem:[#allocation102_spill] sm:$0xff] }
 0x58a   :  { %4503 = vmatprep.subr.bf16.mxu0 %v13013_v10  ;;  %v4243_v10 = vand.u32 %v13171_v48, %v18562_v29  ;;  %v3256_v47 = vld [vmem:[#allocation8 + $0x878] sm:$0xff]  ;;  %v18604_v19 = vpack.c.bf16 %v19961_v44, %v19961_v44  ;;  %v3126_v44 = vld [vmem:[#allocation8 + $0x480] sm:$0xff] }
 0x58c   :  { %4454 = vmatmul.mubr.bf16.vlgmr.msra.gmra.mrb[16].mxu0 %v18570_v20  ;;  %4469 = vmatpush1.bf16.msra.mxu1 %v13058_v15  ;;  %v3303_v15 = vld [vmem:[#allocation8 + $0x9f0] sm:$0xff] }
 0x58d   :  { %4504 = vmatpush1.bf16.msra.mxu0 %v13012_v23  ;;  %13182 = vmatprep.mubr.msk.bf16.mxu0 %vm4201_vm13, %v18536_v51  ;;  %v4240_v23 = vand.u32 %v13170_v32, %v18562_v29  ;;  %v13141_v21 = vcombine.high %v3295_v7, %v3303_v15  ;;  %v13140_v35 = vcombine.low %v3295_v7, %v3303_v15  ;;  %v3030_v32 = vld [vmem:[#allocation8 + $0x180] sm:$0xff]  ;;  %v3280_v7 = vld [vmem:[#allocation8 + $0x938] sm:$0xff] }
 0x58e   :  { %4470 = vmatprep.subr.bf16.mxu1 %v13075_v58  ;;  %4505 = vmatprep.subr.bf16.mxu0 %v13029_v45  ;;  %v13124_v58 = vcombine.low %v3279_v0, %v3287_v11  ;;  %v13015_v45 = vcombine.high %v3168_v4, %v3176_v41  ;;  %v3264_v11 = vld [vmem:[#allocation8 + $0x8b8] sm:$0xff] }
 0x58f   :  { %v3288_v15 = vld [vmem:[#allocation8 + $0x978] sm:$0xff] }
 0x590   :  { %4471 = vmatpush1.bf16.msra.mxu1 %v13074_v26  ;;  %v3319_v26 = vld [vmem:[#allocation8 + $0xa70] sm:$0xff] }
 0x591   :  { %4506 = vmatpush1.bf16.msra.mxu0 %v13028_v16  ;;  %4472 = vmatprep.subr.bf16.mxu1 %v13091_v1  ;;  %v3327_v16 = vld [vmem:[#allocation8 + $0xab0] sm:$0xff]  ;;  %v13157_v17 = vcombine.high %v3311_v53, %v3319_v26 }
 0x592   :  { %4507 = vmatprep.subr.bf16.mxu0 %v13045_v39  ;;  %v3335_v1 = vld [vmem:[#allocation8 + $0xaf0] sm:$0x11]  ;;  %v13014_v39 = vcombine.low %v3168_v4, %v3176_v41 }
 0x593   :  { %v13173_v5 = vcombine.high %v3327_v16, %v3335_v1  ;;  %v13172_v12 = vcombine.low %v3327_v16, %v3335_v1  ;;  %v3062_v16 = vld [vmem:[#allocation8 + $0x280] sm:$0xff] }
 0x594   :  { %4473 = vmatpush1.bf16.msra.mxu1 %v13090_v8  ;;  %v3200_v8 = vld [vmem:[#allocation8 + $0x6b8] sm:$0xff]  ;;  %v3070_v1 = vld [vmem:[#allocation8 + $0x2c0] sm:$0xff] }
 0x595   :  { %4508 = vmatpush1.bf16.msra.mxu0 %v13044_v28  ;;  %4474 = vmatprep.subr.bf16.mxu1 %v13107_v18  ;;  %v3208_v28 = vld [vmem:[#allocation8 + $0x6f8] sm:$0xff]  ;;  %v13030_v18 = vcombine.low %v3184_v61, %v3192_v60  ;;  %v4249_v50 = vand.u32 %v13173_v5, %v18562_v29  ;;  %v4246_v9 = vand.u32 %v13172_v12, %v18562_v29  ;;  %v3086_v12 = vld [vmem:[#allocation8 + $0x340] sm:$0xff] }
 0x596   :  { %4509 = vmatprep.subr.bf16.mxu0 %v13061_v52  ;;  %v13156_v52 = vcombine.low %v3311_v53, %v3319_v26  ;;  %v13047_v6 = vcombine.high %v3200_v8, %v3208_v28  ;;  %v13127_v53 = vcombine.high %v3280_v7, %v3288_v15  ;;  %v3296_v60 = vld [vmem:[#allocation8 + $0x9b8] sm:$0xff]  ;;  %v13265_v5 = vcombine.high %v3062_v16, %v3070_v1 }
 0x597   :  { %v3304_v26 = vld [vmem:[#allocation8 + $0x9f8] sm:$0xff] }
 0x598   :  { %4475 = vmatpush1.bf16.msra.mxu1 %v13106_v62  ;;  %v3224_v62 = vld [vmem:[#allocation8 + $0x778] sm:$0xff] }
 0x599   :  { %4510 = vmatpush1.bf16.msra.mxu0 %v13060_v42  ;;  %4476 = vmatprep.subr.bf16.mxu1 %v13123_v54  ;;  %v2982_v42 = vld [vmem:[#allocation8] sm:$0xff] }
 0x59a   :  { %4511 = vmatprep.subr.bf16.mxu0 %v13077_v46  ;;  %v2990_v54 = vld [vmem:[#allocation8 + $0x40] sm:$0xff]  ;;  %v13046_v46 = vcombine.low %v3200_v8, %v3208_v28  ;;  %v3320_v8 = vld [vmem:[#allocation8 + $0xa78] sm:$0xff] }
 0x59b   :  { %v13185_v27 = vcombine.high %v2982_v42, %v2990_v54  ;;  %v13184_v36 = vcombine.low %v2982_v42, %v2990_v54  ;;  %v3328_v28 = vld [vmem:[#allocation8 + $0xab8] sm:$0xff]  ;;  %v3094_v54 = vld [vmem:[#allocation8 + $0x380] sm:$0xff] }
 0x59c   :  { %4477 = vmatpush1.bf16.msra.mxu1 %v13122_v37  ;;  %v2998_v37 = vld [vmem:[#allocation8 + $0x80] sm:$0xff] }
 0x59d   :  { %4512 = vmatpush1.bf16.msra.mxu0 %v13076_v25  ;;  %4478 = vmatprep.subr.bf16.mxu1 %v13139_v59  ;;  %v3006_v25 = vld [vmem:[#allocation8 + $0xc0] sm:$0xff]  ;;  %v13062_v59 = vcombine.low %v3216_v56, %v3224_v62 }
 0x59e   :  { %4513 = vmatprep.subr.bf16.mxu0 %v13093_v63  ;;  %v13079_v63 = vcombine.high %v3232_v40, %v3240_v22  ;;  %v13201_v38 = vcombine.high %v2998_v37, %v3006_v25  ;;  %v13200_v48 = vcombine.low %v2998_v37, %v3006_v25  ;;  %v2983_v37 = vld [vmem:[#allocation8 + $0x8] sm:$0xff] }
 0x59f   :  { %v2991_v25 = vld [vmem:[#allocation8 + $0x48] sm:$0xff] }
 0x5a0   :  { %4479 = vmatpush1.bf16.msra.mxu1 %v13138_v2  ;;  %v3014_v2 = vld [vmem:[#allocation8 + $0x100] sm:$0xff] }
 0x5a1   :  { %4514 = vmatpush1.bf16.msra.mxu0 %v13092_v24  ;;  %4480 = vmatprep.subr.bf16.mxu1 %v13155_v34  ;;  %v3022_v24 = vld [vmem:[#allocation8 + $0x140] sm:$0xff]  ;;  %v13078_v34 = vcombine.low %v3232_v40, %v3240_v22 }
 0x5a2   :  { %4515 = vmatprep.subr.bf16.mxu0 %v13109_v14  ;;  %v13095_v14 = vcombine.high %v3248_v49, %v3256_v47  ;;  %v13217_v0 = vcombine.high %v3014_v2, %v3022_v24 }
 0x5a4   :  { %4481 = vmatpush1.bf16.msra.mxu1 %v13154_v30  ;;  %v3272_v30 = vld [vmem:[#allocation8 + $0x8f8] sm:$0xff] }
 0x5a5   :  { %4516 = vmatpush1.bf16.msra.mxu0 %v13108_v31  ;;  %4482 = vmatprep.subr.bf16.mxu1 %v4243_v10  ;;  %v3038_v31 = vld [vmem:[#allocation8 + $0x1c0] sm:$0xff]  ;;  %v13094_v10 = vcombine.low %v3248_v49, %v3256_v47  ;;  %v13111_v4 = vcombine.high %v3264_v11, %v3272_v30  ;;  %v13187_v49 = vcombine.high %v2983_v37, %v2991_v25 }
 0x5a6   :  { %4517 = vmatprep.subr.bf16.mxu0 %v13125_v57  ;;  %v13216_v57 = vcombine.low %v3014_v2, %v3022_v24  ;;  %v13233_v41 = vcombine.high %v3030_v32, %v3038_v31  ;;  %v2999_v2 = vld [vmem:[#allocation8 + $0x88] sm:$0xff] }
 0x5a7   :  { %v3007_v24 = vld [vmem:[#allocation8 + $0xc8] sm:$0xff] }
 0x5a8   :  { %4483 = vmatpush1.bf16.msra.mxu1 %v4240_v23  ;;  %v3046_v23 = vld [vmem:[#allocation8 + $0x200] sm:$0xff] }
 0x5a9   :  { %4518 = vmatpush1.bf16.msra.mxu0 %v13124_v58  ;;  %4544 = vmatprep.subr.bf16.mxu1 %v13015_v45  ;;  %v3054_v58 = vld [vmem:[#allocation8 + $0x240] sm:$0xff]  ;;  %v13110_v45 = vcombine.low %v3264_v11, %v3272_v30  ;;  %v13203_v30 = vcombine.high %v2999_v2, %v3007_v24 }
 0x5aa   :  { %4519 = vmatprep.subr.bf16.mxu0 %v13141_v21  ;;  %v13232_v21 = vcombine.low %v3030_v32, %v3038_v31  ;;  %v13249_v61 = vcombine.high %v3046_v23, %v3054_v58 }
 0x5ab   :  { %4495 = vmatmul.mubr.bf16.vlgmr.msra.gmra.mrb[16].mxu1 %v18570_v20 }
 0x5ac   :  { %4545 = vmatpush1.bf16.msra.mxu1 %v13014_v39  ;;  %13183 = vmatprep.mubr.msk.bf16.mxu1 %vm4201_vm13, %v18536_v51  ;;  %v13063_v51 = vcombine.high %v3216_v56, %v3224_v62  ;;  %v13126_v39 = vcombine.low %v3280_v7, %v3288_v15 }
 0x5ad   :  { %4520 = vmatpush1.bf16.msra.mxu0 %v13140_v35  ;;  %4546 = vmatprep.subr.bf16.mxu1 %v13031_v13  ;;  %v13248_v35 = vcombine.low %v3046_v23, %v3054_v58  ;;  %v13143_v13 = vcombine.high %v3296_v60, %v3304_v26  ;;  %v3031_v58 = vld [vmem:[#allocation8 + $0x188] sm:$0xff] }
 0x5ae   :  { %4521 = vmatprep.subr.bf16.mxu0 %v13157_v17  ;;  %v3312_v17 = vld [vmem:[#allocation8 + $0xa38] sm:$0xff] }
 0x5af   :  { %v13159_v56 = vcombine.high %v3312_v17, %v3320_v8 }
 0x5b0   :  { %4547 = vmatpush1.bf16.msra.mxu1 %v13030_v18  ;;  %v3336_v18 = vld [vmem:[#allocation8 + $0xaf8] sm:$0x11] }
 0x5b1   :  { %4522 = vmatpush1.bf16.msra.mxu0 %v13156_v52  ;;  %4548 = vmatprep.subr.bf16.mxu1 %v13047_v6  ;;  %v3078_v52 = vld [vmem:[#allocation8 + $0x300] sm:$0xff]  ;;  %v13142_v6 = vcombine.low %v3296_v60, %v3304_v26  ;;  %v13175_v62 = vcombine.high %v3328_v28, %v3336_v18 }
 0x5b2   :  { %4523 = vmatprep.subr.bf16.mxu0 %v4249_v50  ;;  %v13264_v50 = vcombine.low %v3062_v16, %v3070_v1  ;;  %v13281_v42 = vcombine.high %v3078_v52, %v3086_v12 }
 0x5b3   :  { %v4255_v40 = vand.u32 %v13175_v62, %v18562_v29  ;;  %v3024_v62 = vld [vmem:[#allocation8 + $0x150] sm:$0xff] }
 0x5b4   :  { %4549 = vmatpush1.bf16.msra.mxu1 %v13046_v46  ;;  %v3102_v46 = vld [vmem:[#allocation8 + $0x3c0] sm:$0xff] }
 0x5b5   :  { %4524 = vmatpush1.bf16.msra.mxu0 %v4246_v9  ;;  %4550 = vmatprep.subr.bf16.mxu1 %v13063_v51  ;;  %v13158_v9 = vcombine.low %v3312_v17, %v3320_v8  ;;  %v13174_v51 = vcombine.low %v3328_v28, %v3336_v18  ;;  %v13297_v22 = vcombine.high %v3094_v54, %v3102_v46  ;;  %v3008_v17 = vld [vmem:[#allocation8 + $0xd0] sm:$0xff]  ;;  %v19962_v28 = vld [vmem:[#allocation101_spill] sm:$0xff] }
 0x5b6   :  { %5500 = vmatprep.subr.bf16.mxu0 %v13185_v27  ;;  %v13280_v27 = vcombine.low %v3078_v52, %v3086_v12  ;;  %v18622_v18 = vpack.c.bf16 %v19962_v28, %v19962_v28  ;;  %v2993_v28 = vld [vmem:[#allocation8 + $0x58] sm:$0xff] }
 0x5b8   :  { %4536 = vmatmul.mubr.bf16.vlgmr.msra.gmra.mrb[20].mxu0 %v18570_v20  ;;  %4551 = vmatpush1.bf16.msra.mxu1 %v13062_v59  ;;  %v3110_v59 = vld [vmem:[#allocation8 + $0x400] sm:$0xff] }
 0x5b9   :  { %5501 = vmatpush1.bf16.msra.mxu0 %v13184_v36  ;;  %13360 = vmatprep.mubr.msk.bf16.mxu0 %vm4201_vm13, %v18604_v19  ;;  %v3118_v36 = vld [vmem:[#allocation8 + $0x440] sm:$0xff] }
 0x5ba   :  { %4552 = vmatprep.subr.bf16.mxu1 %v13079_v63  ;;  %5502 = vmatprep.subr.bf16.mxu0 %v13201_v38  ;;  %v4252_v63 = vand.u32 %v13174_v51, %v18562_v29  ;;  %v13296_v38 = vcombine.low %v3094_v54, %v3102_v46  ;;  %v13313_v47 = vcombine.high %v3110_v59, %v3118_v36  ;;  %v3079_v51 = vld [vmem:[#allocation8 + $0x308] sm:$0xff] }
 0x5bb   :  { %v13312_v11 = vcombine.low %v3110_v59, %v3118_v36 }
 0x5bc   :  { %4553 = vmatpush1.bf16.msra.mxu1 %v13078_v34  ;;  %v3134_v34 = vld [vmem:[#allocation8 + $0x4c0] sm:$0xff] }
 0x5bd   :  { %5503 = vmatpush1.bf16.msra.mxu0 %v13200_v48  ;;  %4554 = vmatprep.subr.bf16.mxu1 %v13095_v14  ;;  %v3142_v48 = vld [vmem:[#allocation8 + $0x500] sm:$0xff]  ;;  %v13329_v32 = vcombine.high %v3126_v44, %v3134_v34 }
 0x5be   :  { %5504 = vmatprep.subr.bf16.mxu0 %v13217_v0  ;;  %v3150_v14 = vld [vmem:[#allocation8 + $0x540] sm:$0x11]  ;;  %v13186_v0 = vcombine.low %v2983_v37, %v2991_v25 }
 0x5bf   :  { %v13345_v31 = vcombine.high %v3142_v48, %v3150_v14  ;;  %v13344_v7 = vcombine.low %v3142_v48, %v3150_v14  ;;  %v3111_v48 = vld [vmem:[#allocation8 + $0x408] sm:$0xff] }
 0x5c0   :  { %4555 = vmatpush1.bf16.msra.mxu1 %v13094_v10  ;;  %v3015_v10 = vld [vmem:[#allocation8 + $0x108] sm:$0xff] }
 0x5c1   :  { %5505 = vmatpush1.bf16.msra.mxu0 %v13216_v57  ;;  %4556 = vmatprep.subr.bf16.mxu1 %v13111_v4  ;;  %v3023_v57 = vld [vmem:[#allocation8 + $0x148] sm:$0xff]  ;;  %v13202_v4 = vcombine.low %v2999_v2, %v3007_v24  ;;  %v5456_v23 = vand.u32 %v13345_v31, %v18562_v29  ;;  %v5453_v26 = vand.u32 %v13344_v7, %v18562_v29 }
 0x5c2   :  { %5506 = vmatprep.subr.bf16.mxu0 %v13233_v41  ;;  %v13328_v41 = vcombine.low %v3126_v44, %v3134_v34  ;;  %v13219_v15 = vcombine.high %v3015_v10, %v3023_v57  ;;  %v13218_v60 = vcombine.low %v3015_v10, %v3023_v57  ;;  %v3119_v14 = vld [vmem:[#allocation8 + $0x448] sm:$0xff] }
 0x5c3   :  { %v13315_v31 = vcombine.high %v3111_v48, %v3119_v14  ;;  %v3127_v10 = vld [vmem:[#allocation8 + $0x488] sm:$0xff] }
 0x5c4   :  { %4557 = vmatpush1.bf16.msra.mxu1 %v13110_v45  ;;  %v3039_v45 = vld [vmem:[#allocation8 + $0x1c8] sm:$0xff] }
 0x5c5   :  { %5507 = vmatpush1.bf16.msra.mxu0 %v13232_v21  ;;  %4558 = vmatprep.subr.bf16.mxu1 %v13127_v53  ;;  %v2984_v53 = vld [vmem:[#allocation8 + $0x10] sm:$0xff]  ;;  %v13235_v16 = vcombine.high %v3031_v58, %v3039_v45  ;;  %v3151_v7 = vld [vmem:[#allocation8 + $0x548] sm:$0x11] }
 0x5c6   :  { %5508 = vmatprep.subr.bf16.mxu0 %v13249_v61  ;;  %v2992_v61 = vld [vmem:[#allocation8 + $0x50] sm:$0xff] }
 0x5c7   :  { %v13189_v1 = vcombine.high %v2984_v53, %v2992_v61  ;;  %v13188_v8 = vcombine.low %v2984_v53, %v2992_v61 }
 0x5c8   :  { %4559 = vmatpush1.bf16.msra.mxu1 %v13126_v39  ;;  %v3047_v39 = vld [vmem:[#allocation8 + $0x208] sm:$0xff] }
 0x5c9   :  { %5509 = vmatpush1.bf16.msra.mxu0 %v13248_v35  ;;  %4560 = vmatprep.subr.bf16.mxu1 %v13143_v13  ;;  %v3055_v35 = vld [vmem:[#allocation8 + $0x248] sm:$0xff]  ;;  %v3000_v13 = vld [vmem:[#allocation8 + $0x90] sm:$0xff] }
 0x5ca   :  { %5510 = vmatprep.subr.bf16.mxu0 %v13265_v5  ;;  %v13234_v5 = vcombine.low %v3031_v58, %v3039_v45  ;;  %v13251_v52 = vcombine.high %v3047_v39, %v3055_v35  ;;  %v13205_v12 = vcombine.high %v3000_v13, %v3008_v17  ;;  %v13204_v54 = vcombine.low %v3000_v13, %v3008_v17 }
 0x5cb   :  { %v13314_v58 = vcombine.low %v3111_v48, %v3119_v14  ;;  %v3041_v48 = vld [vmem:[#allocation8 + $0x1d8] sm:$0xff] }
 0x5cc   :  { %4561 = vmatpush1.bf16.msra.mxu1 %v13142_v6  ;;  %v3063_v6 = vld [vmem:[#allocation8 + $0x288] sm:$0xff] }
 0x5cd   :  { %5511 = vmatpush1.bf16.msra.mxu0 %v13264_v50  ;;  %4562 = vmatprep.subr.bf16.mxu1 %v13159_v56  ;;  %v3071_v50 = vld [vmem:[#allocation8 + $0x2c8] sm:$0xff]  ;;  %v3016_v56 = vld [vmem:[#allocation8 + $0x110] sm:$0xff] }
 0x5ce   :  { %5512 = vmatprep.subr.bf16.mxu0 %v13281_v42  ;;  %v13250_v42 = vcombine.low %v3047_v39, %v3055_v35  ;;  %v13267_v46 = vcombine.high %v3063_v6, %v3071_v50  ;;  %v13266_v37 = vcombine.low %v3063_v6, %v3071_v50  ;;  %v13220_v25 = vcombine.low %v3016_v56, %v3024_v62  ;;  %v3120_v6 = vld [vmem:[#allocation8 + $0x450] sm:$0xff] }
 0x5d0   :  { %4563 = vmatpush1.bf16.msra.mxu1 %v13158_v9  ;;  %v13221_v9 = vcombine.high %v3016_v56, %v3024_v62 }
 0x5d1   :  { %5513 = vmatpush1.bf16.msra.mxu0 %v13280_v27  ;;  %4564 = vmatprep.subr.bf16.mxu1 %v4255_v40  ;;  %v3087_v27 = vld [vmem:[#allocation8 + $0x348] sm:$0xff]  ;;  %v3032_v40 = vld [vmem:[#allocation8 + $0x190] sm:$0xff] }
 0x5d2   :  { %5514 = vmatprep.subr.bf16.mxu0 %v13297_v22  ;;  %v3040_v22 = vld [vmem:[#allocation8 + $0x1d0] sm:$0xff]  ;;  %v13283_v59 = vcombine.high %v3079_v51, %v3087_v27  ;;  %v13282_v44 = vcombine.low %v3079_v51, %v3087_v27 }
 0x5d3   :  { %v13237_v36 = vcombine.high %v3032_v40, %v3040_v22  ;;  %v13236_v2 = vcombine.low %v3032_v40, %v3040_v22  ;;  %v3136_v51 = vld [vmem:[#allocation8 + $0x4d0] sm:$0xff] }
 0x5d4   :  { %4565 = vmatpush1.bf16.msra.mxu1 %v4252_v63  ;;  %v3095_v63 = vld [vmem:[#allocation8 + $0x388] sm:$0xff]  ;;  %v3144_v27 = vld [vmem:[#allocation8 + $0x510] sm:$0xff] }
 0x5d5   :  { %5515 = vmatpush1.bf16.msra.mxu0 %v13296_v38  ;;  %5541 = vmatprep.subr.bf16.mxu1 %v13187_v49  ;;  %v3103_v38 = vld [vmem:[#allocation8 + $0x3c8] sm:$0xff]  ;;  %v3048_v49 = vld [vmem:[#allocation8 + $0x210] sm:$0xff] }
 0x5d6   :  { %5516 = vmatprep.subr.bf16.mxu0 %v13313_v47  ;;  %v3056_v47 = vld [vmem:[#allocation8 + $0x250] sm:$0xff]  ;;  %v13299_v24 = vcombine.high %v3095_v63, %v3103_v38 }
 0x5d7   :  { %4577 = vmatmul.mubr.bf16.vlgmr.msra.gmra.mrb[20].mxu1 %v18570_v20  ;;  %v13253_v34 = vcombine.high %v3048_v49, %v3056_v47  ;;  %v3152_v40 = vld [vmem:[#allocation8 + $0x550] sm:$0x11] }
 0x5d8   :  { %5542 = vmatpush1.bf16.msra.mxu1 %v13186_v0  ;;  %13361 = vmatprep.mubr.msk.bf16.mxu1 %vm4201_vm13, %v18604_v19  ;;  %v3064_v0 = vld [vmem:[#allocation8 + $0x290] sm:$0xff] }
 0x5d9   :  { %5517 = vmatpush1.bf16.msra.mxu0 %v13312_v11  ;;  %5543 = vmatprep.subr.bf16.mxu1 %v13203_v30  ;;  %v3072_v11 = vld [vmem:[#allocation8 + $0x2d0] sm:$0xff]  ;;  %v13298_v30 = vcombine.low %v3095_v63, %v3103_v38  ;;  %v3017_v63 = vld [vmem:[#allocation8 + $0x118] sm:$0xff] }
 0x5da   :  { %5518 = vmatprep.subr.bf16.mxu0 %v13329_v32  ;;  %v13252_v32 = vcombine.low %v3048_v49, %v3056_v47  ;;  %v13269_v57 = vcombine.high %v3064_v0, %v3072_v11  ;;  %v13268_v45 = vcombine.low %v3064_v0, %v3072_v11  ;;  %v3025_v38 = vld [vmem:[#allocation8 + $0x158] sm:$0xff]  ;;  %v2986_v0 = vld [vmem:[#allocation8 + $0x20] sm:$0xff] }
 0x5db   :  { %v18615_v21 = vpop.f32.mrb[4].mxu0  ;;  %v2994_v11 = vld [vmem:[#allocation8 + $0x60] sm:$0xff] }
 0x5dc   :  { %v18617_v20 = vpop.f32.mrb[5].mxu0  ;;  %5544 = vmatpush1.bf16.msra.mxu1 %v13202_v4  ;;  %v3135_v4 = vld [vmem:[#allocation8 + $0x4c8] sm:$0xff] }
 0x5dd   :  { %5519 = vmatpush1.bf16.msra.mxu0 %v13328_v41  ;;  %5545 = vmatprep.subr.bf16.mxu1 %v13219_v15  ;;  %v3143_v41 = vld [vmem:[#allocation8 + $0x508] sm:$0xff]  ;;  %v3080_v15 = vld [vmem:[#allocation8 + $0x310] sm:$0xff]  ;;  %v13331_v53 = vcombine.high %v3127_v10, %v3135_v4 }
 0x5de   :  { %5520 = vmatprep.subr.bf16.mxu0 %v5456_v23  ;;  %v3088_v23 = vld [vmem:[#allocation8 + $0x350] sm:$0xff]  ;;  %v13347_v61 = vcombine.high %v3143_v41, %v3151_v7  ;;  %v13346_v39 = vcombine.low %v3143_v41, %v3151_v7  ;;  %v13193_v41 = vcombine.high %v2986_v0, %v2994_v11  ;;  %v3049_v7 = vld [vmem:[#allocation8 + $0x218] sm:$0xff] }
 0x5df   :  { %v13284_v35 = vcombine.low %v3080_v15, %v3088_v23 }
 0x5e0   :  { %5546 = vmatpush1.bf16.msra.mxu1 %v13218_v60  ;;  %v13285_v60 = vcombine.high %v3080_v15, %v3088_v23  ;;  %v5462_v13 = vand.u32 %v13347_v61, %v18562_v29  ;;  %v5459_v50 = vand.u32 %v13346_v39, %v18562_v29  ;;  %v3057_v15 = vld [vmem:[#allocation8 + $0x258] sm:$0xff]  ;;  %v3002_v23 = vld [vmem:[#allocation8 + $0xa0] sm:$0xff] }
 0x5e1   :  { %5521 = vmatpush1.bf16.msra.mxu0 %v5453_v26  ;;  %5547 = vmatprep.subr.bf16.mxu1 %v13235_v16  ;;  %v3096_v26 = vld [vmem:[#allocation8 + $0x390] sm:$0xff]  ;;  %v13255_v61 = vcombine.high %v3049_v7, %v3057_v15  ;;  %v3026_v39 = vld [vmem:[#allocation8 + $0x160] sm:$0xff] }
 0x5e2   :  { %5582 = vmatprep.subr.bf16.mxu0 %v13189_v1  ;;  %v3104_v16 = vld [vmem:[#allocation8 + $0x3d0] sm:$0xff]  ;;  %v13330_v1 = vcombine.low %v3127_v10, %v3135_v4 }
 0x5e3   :  { %v13300_v56 = vcombine.low %v3096_v26, %v3104_v16 }
 0x5e4   :  { %5533 = vmatmul.mubr.bf16.vlgmr.msra.gmra.mrb[24].mxu0 %v18622_v18  ;;  %5548 = vmatpush1.bf16.msra.mxu1 %v13234_v5  ;;  %v13301_v5 = vcombine.high %v3096_v26, %v3104_v16  ;;  %v3065_v26 = vld [vmem:[#allocation8 + $0x298] sm:$0xff] }
 0x5e5   :  { %5583 = vmatpush1.bf16.msra.mxu0 %v13188_v8  ;;  %13362 = vmatprep.mubr.msk.bf16.mxu0 %vm4201_vm13, %v18604_v19  ;;  %v2985_v8 = vld [vmem:[#allocation8 + $0x18] sm:$0xff] }
 0x5e6   :  { %5549 = vmatprep.subr.bf16.mxu1 %v13251_v52  ;;  %5584 = vmatprep.subr.bf16.mxu0 %v13205_v12  ;;  %v3112_v12 = vld [vmem:[#allocation8 + $0x410] sm:$0xff]  ;;  %v13191_v62 = vcombine.high %v2985_v8, %v2993_v28  ;;  %v13190_v22 = vcombine.low %v2985_v8, %v2993_v28  ;;  %v3073_v16 = vld [vmem:[#allocation8 + $0x2d8] sm:$0xff] }
 0x5e7   :  { %v3081_v28 = vld [vmem:[#allocation8 + $0x318] sm:$0xff] }
 0x5e8   :  { %5550 = vmatpush1.bf16.msra.mxu1 %v13250_v42  ;;  %v13317_v42 = vcombine.high %v3112_v12, %v3120_v6 }
 0x5e9   :  { %5585 = vmatpush1.bf16.msra.mxu0 %v13204_v54  ;;  %5551 = vmatprep.subr.bf16.mxu1 %v13267_v46  ;;  %v3128_v54 = vld [vmem:[#allocation8 + $0x490] sm:$0xff]  ;;  %v3001_v46 = vld [vmem:[#allocation8 + $0x98] sm:$0xff] }
 0x5ea   :  { %5586 = vmatprep.subr.bf16.mxu0 %v13221_v9  ;;  %v3009_v9 = vld [vmem:[#allocation8 + $0xd8] sm:$0xff]  ;;  %v13332_v47 = vcombine.low %v3128_v54, %v3136_v51 }
 0x5eb   :  { %v13206_v49 = vcombine.low %v3001_v46, %v3009_v9 }
 0x5ec   :  { %5552 = vmatpush1.bf16.msra.mxu1 %v13266_v37  ;;  %v13316_v37 = vcombine.low %v3112_v12, %v3120_v6  ;;  %v3089_v12 = vld [vmem:[#allocation8 + $0x358] sm:$0xff]  ;;  %v3034_v6 = vld [vmem:[#allocation8 + $0x1a0] sm:$0xff] }
 0x5ed   :  { %5587 = vmatpush1.bf16.msra.mxu0 %v13220_v25  ;;  %5553 = vmatprep.subr.bf16.mxu1 %v13283_v59  ;;  %v13207_v25 = vcombine.high %v3001_v46, %v3009_v9  ;;  %v13333_v59 = vcombine.high %v3128_v54, %v3136_v51  ;;  %v3097_v46 = vld [vmem:[#allocation8 + $0x398] sm:$0xff]  ;;  %v3050_v51 = vld [vmem:[#allocation8 + $0x220] sm:$0xff] }
 0x5ee   :  { %5588 = vmatprep.subr.bf16.mxu0 %v13237_v36  ;;  %v13349_v36 = vcombine.high %v3144_v27, %v3152_v40  ;;  %v3105_v9 = vld [vmem:[#allocation8 + $0x3d8] sm:$0xff] }
 0x5f0   :  { %5554 = vmatpush1.bf16.msra.mxu1 %v13282_v44  ;;  %v13348_v44 = vcombine.low %v3144_v27, %v3152_v40  ;;  %v3058_v27 = vld [vmem:[#allocation8 + $0x260] sm:$0xff]  ;;  %v13286_v40 = vcombine.low %v3081_v28, %v3089_v12 }
 0x5f1   :  { %5589 = vmatpush1.bf16.msra.mxu0 %v13236_v2  ;;  %5555 = vmatprep.subr.bf16.mxu1 %v13299_v24  ;;  %v13223_v2 = vcombine.high %v3017_v63, %v3025_v38  ;;  %v5468_v24 = vand.u32 %v13349_v36, %v18562_v29  ;;  %v3121_v36 = vld [vmem:[#allocation8 + $0x458] sm:$0xff] }
 0x5f2   :  { %5590 = vmatprep.subr.bf16.mxu0 %v13253_v34  ;;  %v3033_v34 = vld [vmem:[#allocation8 + $0x198] sm:$0xff]  ;;  %v5465_v10 = vand.u32 %v13348_v44, %v18562_v29 }
 0x5f4   :  { %5556 = vmatpush1.bf16.msra.mxu1 %v13298_v30 }
 0x5f5   :  { %5591 = vmatpush1.bf16.msra.mxu0 %v13252_v32  ;;  %5557 = vmatprep.subr.bf16.mxu1 %v13315_v31  ;;  %v13222_v32 = vcombine.low %v3017_v63, %v3025_v38  ;;  %v3066_v63 = vld [vmem:[#allocation8 + $0x2a0] sm:$0xff] }
 0x5f6   :  { %5592 = vmatprep.subr.bf16.mxu0 %v13269_v57  ;;  %v13239_v57 = vcombine.high %v3033_v34, %v3041_v48  ;;  %v3074_v38 = vld [vmem:[#allocation8 + $0x2e0] sm:$0xff] }
 0x5f8   :  { %5558 = vmatpush1.bf16.msra.mxu1 %v13314_v58  ;;  %v3010_v58 = vld [vmem:[#allocation8 + $0xe0] sm:$0xff] }
 0x5f9   :  { %5593 = vmatpush1.bf16.msra.mxu0 %v13268_v45  ;;  %5559 = vmatprep.subr.bf16.mxu1 %v13331_v53  ;;  %v13238_v45 = vcombine.low %v3033_v34, %v3041_v48  ;;  %v13192_v53 = vcombine.low %v2986_v0, %v2994_v11  ;;  %v3137_v34 = vld [vmem:[#allocation8 + $0x4d8] sm:$0xff]  ;;  %v3082_v11 = vld [vmem:[#allocation8 + $0x320] sm:$0xff] }
 0x5fa   :  { %v18628_v17 = vpop.f32.mrb[4].mxu1  ;;  %5594 = vmatprep.subr.bf16.mxu0 %v13285_v60  ;;  %v13209_v60 = vcombine.high %v3002_v23, %v3010_v58  ;;  %v3145_v48 = vld [vmem:[#allocation8 + $0x518] sm:$0xff] }
 0x5fb   :  { %v18630_v52 = vpop.f32.mrb[5].mxu1  ;;  %v3153_v0 = vld [vmem:[#allocation8 + $0x558] sm:$0x11] }
 0x5fc   :  { %5560 = vmatpush1.bf16.msra.mxu1 %v13330_v1  ;;  %v3018_v1 = vld [vmem:[#allocation8 + $0x120] sm:$0xff] }
 0x5fd   :  { %5595 = vmatpush1.bf16.msra.mxu0 %v13284_v35  ;;  %5561 = vmatprep.subr.bf16.mxu1 %v5462_v13  ;;  %v13254_v35 = vcombine.low %v3049_v7, %v3057_v15  ;;  %v13208_v13 = vcombine.low %v3002_v23, %v3010_v58  ;;  %v13225_v8 = vcombine.high %v3018_v1, %v3026_v39  ;;  %v3098_v7 = vld [vmem:[#allocation8 + $0x3a0] sm:$0xff] }
 0x5fe   :  { %5596 = vmatprep.subr.bf16.mxu0 %v13301_v5  ;;  %v13271_v5 = vcombine.high %v3065_v26, %v3073_v16  ;;  %v3106_v15 = vld [vmem:[#allocation8 + $0x3e0] sm:$0xff]  ;;  %v13350_v58 = vcombine.low %v3145_v48, %v3153_v0 }
 0x600   :  { %5562 = vmatpush1.bf16.msra.mxu1 %v5459_v50  ;;  %v3042_v50 = vld [vmem:[#allocation8 + $0x1e0] sm:$0xff] }
 0x601   :  { %5597 = vmatpush1.bf16.msra.mxu0 %v13300_v56  ;;  %5623 = vmatprep.subr.bf16.mxu1 %v13191_v62  ;;  %v13270_v56 = vcombine.low %v3065_v26, %v3073_v16  ;;  %v13224_v62 = vcombine.low %v3018_v1, %v3026_v39  ;;  %v13241_v54 = vcombine.high %v3034_v6, %v3042_v50  ;;  %v2987_v26 = vld [vmem:[#allocation8 + $0x28] sm:$0xff]  ;;  %v3114_v39 = vld [vmem:[#allocation8 + $0x420] sm:$0xff] }
 0x602   :  { %5598 = vmatprep.subr.bf16.mxu0 %v13317_v42  ;;  %v13287_v42 = vcombine.high %v3081_v28, %v3089_v12  ;;  %v2995_v16 = vld [vmem:[#allocation8 + $0x68] sm:$0xff]  ;;  %v13304_v28 = vcombine.low %v3098_v7, %v3106_v15 }
 0x603   :  { %5574 = vmatmul.mubr.bf16.vlgmr.msra.gmra.mrb[24].mxu1 %v18622_v18  ;;  %v13195_v12 = vcombine.high %v2987_v26, %v2995_v16 }
 0x604   :  { %5624 = vmatpush1.bf16.msra.mxu1 %v13190_v22  ;;  %13363 = vmatprep.mubr.msk.bf16.mxu1 %vm4201_vm13, %v18604_v19  ;;  %v13240_v22 = vcombine.low %v3034_v6, %v3042_v50  ;;  %v3130_v50 = vld [vmem:[#allocation8 + $0x4a0] sm:$0xff] }
 0x605   :  { %5599 = vmatpush1.bf16.msra.mxu0 %v13316_v37  ;;  %5625 = vmatprep.subr.bf16.mxu1 %v13207_v25  ;;  %v13303_v37 = vcombine.high %v3097_v46, %v3105_v9  ;;  %v13257_v25 = vcombine.high %v3050_v51, %v3058_v27 }
 0x606   :  { %5600 = vmatprep.subr.bf16.mxu0 %v13333_v59  ;;  %v3113_v59 = vld [vmem:[#allocation8 + $0x418] sm:$0xff] }
 0x607   :  { %v18637_v14 = vpop.f32.mrb[8].mxu0  ;;  %v13319_v44 = vcombine.high %v3113_v59, %v3121_v36 }
 0x608   :  { %v18639_v30 = vpop.f32.mrb[9].mxu0  ;;  %5626 = vmatpush1.bf16.msra.mxu1 %v13206_v49  ;;  %v13302_v49 = vcombine.low %v3097_v46, %v3105_v9  ;;  %v3154_v46 = vld [vmem:[#allocation8 + $0x560] sm:$0x11]  ;;  %v13194_v9 = vcombine.low %v2987_v26, %v2995_v16  ;;  %v3075_v26 = vld [vmem:[#allocation8 + $0x2e8] sm:$0xff]  ;;  %v3020_v16 = vld [vmem:[#allocation8 + $0x130] sm:$0xff] }
 0x609   :  { %v4295_v31 = vpop.f32.mrb[10].mxu0  ;;  %5601 = vmatpush1.bf16.msra.mxu0 %v13332_v47  ;;  %5627 = vmatprep.subr.bf16.mxu1 %v13223_v2  ;;  %v13256_v47 = vcombine.low %v3050_v51, %v3058_v27  ;;  %v3129_v2 = vld [vmem:[#allocation8 + $0x498] sm:$0xff] }
 0x60a   :  { %v4296_v4 = vpop.f32.mrb[11].mxu0  ;;  %5602 = vmatprep.subr.bf16.mxu0 %v5468_v24  ;;  %v13273_v24 = vcombine.high %v3066_v63, %v3074_v38  ;;  %v13318_v31 = vcombine.low %v3113_v59, %v3121_v36  ;;  %v13334_v23 = vcombine.low %v3129_v2, %v3137_v34 }
 0x60b   :  { %v13351_v4 = vcombine.high %v3145_v48, %v3153_v0 }
 0x60c   :  { %5628 = vmatpush1.bf16.msra.mxu1 %v13222_v32  ;;  %v3090_v32 = vld [vmem:[#allocation8 + $0x360] sm:$0xff] }
 0x60d   :  { %5603 = vmatpush1.bf16.msra.mxu0 %v5465_v10  ;;  %5629 = vmatprep.subr.bf16.mxu1 %v13239_v57  ;;  %v13272_v10 = vcombine.low %v3066_v63, %v3074_v38  ;;  %v13335_v57 = vcombine.high %v3129_v2, %v3137_v34  ;;  %v2996_v34 = vld [vmem:[#allocation8 + $0x70] sm:$0xff] }
 0x60e   :  { %5664 = vmatprep.subr.bf16.mxu0 %v13193_v41  ;;  %v13289_v41 = vcombine.high %v3082_v11, %v3090_v32 }
 0x610   :  { %5615 = vmatmul.mubr.bf16.vlgmr.msra.gmra.mrb[28].mxu0 %v18622_v18  ;;  %5630 = vmatpush1.bf16.msra.mxu1 %v13238_v45  ;;  %v13288_v45 = vcombine.low %v3082_v11, %v3090_v32 }
 0x611   :  { %5665 = vmatpush1.bf16.msra.mxu0 %v13192_v53  ;;  %13364 = vmatprep.mubr.msk.bf16.mxu0 %vm4201_vm13, %v18604_v19  ;;  %v5474_v53 = vand.u32 %v13351_v4, %v18562_v29  ;;  %v3051_v4 = vld [vmem:[#allocation8 + $0x228] sm:$0xff] }
 0x612   :  { %5631 = vmatprep.subr.bf16.mxu1 %v13255_v61  ;;  %5666 = vmatprep.subr.bf16.mxu0 %v13209_v60  ;;  %v13305_v60 = vcombine.high %v3098_v7, %v3106_v15  ;;  %v3004_v7 = vld [vmem:[#allocation8 + $0xb0] sm:$0xff] }
 0x613   :  { %v3012_v15 = vld [vmem:[#allocation8 + $0xf0] sm:$0xff] }
 0x614   :  { %5632 = vmatpush1.bf16.msra.mxu1 %v13254_v35  ;;  %v3122_v35 = vld [vmem:[#allocation8 + $0x460] sm:$0xff] }
 0x615   :  { %5667 = vmatpush1.bf16.msra.mxu0 %v13208_v13  ;;  %5633 = vmatprep.subr.bf16.mxu1 %v13271_v5  ;;  %v5471_v5 = vand.u32 %v13350_v58, %v18562_v29  ;;  %v13321_v6 = vcombine.high %v3114_v39, %v3122_v35  ;;  %v13320_v51 = vcombine.low %v3114_v39, %v3122_v35  ;;  %v3028_v39 = vld [vmem:[#allocation8 + $0x170] sm:$0xff] }
 0x616   :  { %5668 = vmatprep.subr.bf16.mxu0 %v13225_v8 }
 0x618   :  { %5634 = vmatpush1.bf16.msra.mxu1 %v13270_v56  ;;  %v3003_v56 = vld [vmem:[#allocation8 + $0xa8] sm:$0xff] }
 0x619   :  { %5669 = vmatpush1.bf16.msra.mxu0 %v13224_v62  ;;  %5635 = vmatprep.subr.bf16.mxu1 %v13287_v42  ;;  %v3011_v62 = vld [vmem:[#allocation8 + $0xe8] sm:$0xff]  ;;  %v3138_v42 = vld [vmem:[#allocation8 + $0x4e0] sm:$0xff] }
 0x61a   :  { %5670 = vmatprep.subr.bf16.mxu0 %v13241_v54  ;;  %v3146_v54 = vld [vmem:[#allocation8 + $0x520] sm:$0xff]  ;;  %v13211_v27 = vcombine.high %v3003_v56, %v3011_v62  ;;  %v13210_v59 = vcombine.low %v3003_v56, %v3011_v62  ;;  %v13336_v36 = vcombine.low %v3130_v50, %v3138_v42  ;;  %v13228_v62 = vcombine.low %v3020_v16, %v3028_v39 }
 0x61b   :  { %v13352_v63 = vcombine.low %v3146_v54, %v3154_v46 }
 0x61c   :  { %5636 = vmatpush1.bf16.msra.mxu1 %v13286_v40  ;;  %v13337_v40 = vcombine.high %v3130_v50, %v3138_v42  ;;  %v3044_v50 = vld [vmem:[#allocation8 + $0x1f0] sm:$0xff] }
 0x61d   :  { %5671 = vmatpush1.bf16.msra.mxu0 %v13240_v22  ;;  %5637 = vmatprep.subr.bf16.mxu1 %v13303_v37  ;;  %v13353_v22 = vcombine.high %v3146_v54, %v3154_v46  ;;  %v3019_v37 = vld [vmem:[#allocation8 + $0x128] sm:$0xff]  ;;  %v5477_v32 = vand.u32 %v13352_v63, %v18562_v29  ;;  %v3068_v63 = vld [vmem:[#allocation8 + $0x2b0] sm:$0xff] }
 0x61e   :  { %5672 = vmatprep.subr.bf16.mxu0 %v13257_v25  ;;  %v3027_v25 = vld [vmem:[#allocation8 + $0x168] sm:$0xff] }
 0x61f   :  { %v13227_v38 = vcombine.high %v3019_v37, %v3027_v25  ;;  %v13226_v0 = vcombine.low %v3019_v37, %v3027_v25  ;;  %v3099_v46 = vld [vmem:[#allocation8 + $0x3a8] sm:$0xff] }
 0x620   :  { %5638 = vmatpush1.bf16.msra.mxu1 %v13302_v49  ;;  %v5480_v49 = vand.u32 %v13353_v22, %v18562_v29 }
 0x621   :  { %5673 = vmatpush1.bf16.msra.mxu0 %v13256_v47  ;;  %5639 = vmatprep.subr.bf16.mxu1 %v13319_v44  ;;  %v3035_v47 = vld [vmem:[#allocation8 + $0x1a8] sm:$0xff] }
 0x622   :  { %5674 = vmatprep.subr.bf16.mxu0 %v13273_v24  ;;  %v3043_v44 = vld [vmem:[#allocation8 + $0x1e8] sm:$0xff]  ;;  %v2988_v24 = vld [vmem:[#allocation8 + $0x30] sm:$0xff] }
 0x623   :  { %v13196_v58 = vcombine.low %v2988_v24, %v2996_v34 }
 0x624   :  { %5640 = vmatpush1.bf16.msra.mxu1 %v13318_v31  ;;  %v13243_v31 = vcombine.high %v3035_v47, %v3043_v44 }
 0x625   :  { %5675 = vmatpush1.bf16.msra.mxu0 %v13272_v10  ;;  %5641 = vmatprep.subr.bf16.mxu1 %v13335_v57  ;;  %v13197_v57 = vcombine.high %v2988_v24, %v2996_v34  ;;  %v3131_v24 = vld [vmem:[#allocation8 + $0x4a8] sm:$0xff] }
 0x626   :  { %v18646_v61 = vpop.f32.mrb[8].mxu1  ;;  %5676 = vmatprep.subr.bf16.mxu0 %v13289_v41  ;;  %v3059_v41 = vld [vmem:[#allocation8 + $0x268] sm:$0xff] }
 0x627   :  { %v18648_v1 = vpop.f32.mrb[9].mxu1  ;;  %v13258_v35 = vcombine.low %v3051_v4, %v3059_v41 }
 0x628   :  { %v4336_v13 = vpop.f32.mrb[10].mxu1  ;;  %5642 = vmatpush1.bf16.msra.mxu1 %v13334_v23  ;;  %v13242_v23 = vcombine.low %v3035_v47, %v3043_v44 }
 0x629   :  { %5677 = vmatpush1.bf16.msra.mxu0 %v13288_v45  ;;  %v4337_v8 = vpop.f32.mrb[11].mxu1  ;;  %5643 = vmatprep.subr.bf16.mxu1 %v5474_v53  ;;  %v13259_v45 = vcombine.high %v3051_v4, %v3059_v41  ;;  %v13213_v53 = vcombine.high %v3004_v7, %v3012_v15  ;;  %v13212_v13 = vcombine.low %v3004_v7, %v3012_v15 }
 0x62a   :  { %5678 = vmatprep.subr.bf16.mxu0 %v13305_v60  ;;  %v3067_v60 = vld [vmem:[#allocation8 + $0x2a8] sm:$0xff]  ;;  %v13229_v8 = vcombine.high %v3020_v16, %v3028_v39 }
 0x62b   :  { %v13274_v56 = vcombine.low %v3067_v60, %v3075_v26 }
 0x62c   :  { %5644 = vmatpush1.bf16.msra.mxu1 %v5471_v5  ;;  %v13275_v5 = vcombine.high %v3067_v60, %v3075_v26 }
 0x62d   :  { %5679 = vmatpush1.bf16.msra.mxu0 %v13304_v28  ;;  %5705 = vmatprep.subr.bf16.mxu1 %v13195_v12  ;;  %v3083_v28 = vld [vmem:[#allocation8 + $0x328] sm:$0xff] }
 0x62e   :  { %5680 = vmatprep.subr.bf16.mxu0 %v13321_v6  ;;  %v3091_v12 = vld [vmem:[#allocation8 + $0x368] sm:$0xff]  ;;  %v3036_v6 = vld [vmem:[#allocation8 + $0x1b0] sm:$0xff] }
 0x62f   :  { %5656 = vmatmul.mubr.bf16.vlgmr.msra.gmra.mrb[28].mxu1 %v18622_v18  ;;  %v13291_v42 = vcombine.high %v3083_v28, %v3091_v12  ;;  %v13245_v54 = vcombine.high %v3036_v6, %v3044_v50  ;;  %v13244_v22 = vcombine.low %v3036_v6, %v3044_v50 }
 0x630   :  { %5706 = vmatpush1.bf16.msra.mxu1 %v13194_v9  ;;  %13365 = vmatprep.mubr.msk.bf16.mxu1 %vm4201_vm13, %v18604_v19  ;;  %v3107_v9 = vld [vmem:[#allocation8 + $0x3e8] sm:$0xff] }
 0x631   :  { %5681 = vmatpush1.bf16.msra.mxu0 %v13320_v51  ;;  %5707 = vmatprep.subr.bf16.mxu1 %v13211_v27  ;;  %v3052_v51 = vld [vmem:[#allocation8 + $0x230] sm:$0xff]  ;;  %v13307_v37 = vcombine.high %v3099_v46, %v3107_v9 }
 0x632   :  { %5682 = vmatprep.subr.bf16.mxu0 %v13337_v40  ;;  %v3060_v27 = vld [vmem:[#allocation8 + $0x270] sm:$0xff]  ;;  %v13290_v40 = vcombine.low %v3083_v28, %v3091_v12 }
 0x633   :  { %v18655_v2 = vpop.f32.mrb[12].mxu0  ;;  %v13261_v25 = vcombine.high %v3052_v51, %v3060_v27  ;;  %v13260_v47 = vcombine.low %v3052_v51, %v3060_v27  ;;  %v3124_v28 = vld [vmem:[#allocation8 + $0x470] sm:$0xff] }
 0x634   :  { %v18657_v48 = vpop.f32.mrb[13].mxu0  ;;  %5708 = vmatpush1.bf16.msra.mxu1 %v13210_v59  ;;  %v3115_v59 = vld [vmem:[#allocation8 + $0x428] sm:$0xff]  ;;  %v3140_v51 = vld [vmem:[#allocation8 + $0x4f0] sm:$0xff] }
 0x635   :  { %v4377_v11 = vpop.f32.mrb[14].mxu0  ;;  %5683 = vmatpush1.bf16.msra.mxu0 %v13336_v36  ;;  %5709 = vmatprep.subr.bf16.mxu1 %v13227_v38  ;;  %v3123_v36 = vld [vmem:[#allocation8 + $0x468] sm:$0xff]  ;;  %v3076_v38 = vld [vmem:[#allocation8 + $0x2f0] sm:$0xff] }
 0x636   :  { %v4378_v10 = vpop.f32.mrb[15].mxu0  ;;  %5684 = vmatprep.subr.bf16.mxu0 %v5480_v49  ;;  %v13306_v49 = vcombine.low %v3099_v46, %v3107_v9  ;;  %v13323_v44 = vcombine.high %v3115_v59, %v3123_v36  ;;  %v13277_v34 = vcombine.high %v3068_v63, %v3076_v38  ;;  %v3147_v11 = vld [vmem:[#allocation8 + $0x528] sm:$0xff]  ;;  %v13276_v4 = vcombine.low %v3068_v63, %v3076_v38  ;;  %v3005_v46 = vld [vmem:[#allocation8 + $0xb8] sm:$0xff]  ;;  %v3148_v27 = vld [vmem:[#allocation8 + $0x530] sm:$0xff] }
 0x637   :  { %v3092_v10 = vld [vmem:[#allocation8 + $0x370] sm:$0xff]  ;;  %v3013_v9 = vld [vmem:[#allocation8 + $0xf8] sm:$0xff] }
 0x638   :  { %5710 = vmatpush1.bf16.msra.mxu1 %v13226_v0  ;;  %v3139_v0 = vld [vmem:[#allocation8 + $0x4e8] sm:$0xff]  ;;  %v3021_v63 = vld [vmem:[#allocation8 + $0x138] sm:$0xff] }
 0x639   :  { %5685 = vmatpush1.bf16.msra.mxu0 %v5477_v32  ;;  %5711 = vmatprep.subr.bf16.mxu1 %v13243_v31  ;;  %v3155_v32 = vld [vmem:[#allocation8 + $0x568] sm:$0x11]  ;;  %v3084_v31 = vld [vmem:[#allocation8 + $0x330] sm:$0xff]  ;;  %v13339_v41 = vcombine.high %v3131_v24, %v3139_v0  ;;  %v3029_v38 = vld [vmem:[#allocation8 + $0x178] sm:$0xff] }
 0x63a   :  { %5746 = vmatprep.subr.bf16.mxu0 %v13197_v57  ;;  %v13322_v57 = vcombine.low %v3115_v59, %v3123_v36  ;;  %v13355_v7 = vcombine.high %v3147_v11, %v3155_v32  ;;  %v13293_v15 = vcombine.high %v3084_v31, %v3092_v10  ;;  %v13292_v60 = vcombine.low %v3084_v31, %v3092_v10  ;;  %v5831_v31 = vld [vmem:[#allocation8 + $0xb00] sm:$0xff] }
 0x63b   :  { %v5839_v10 = vld [vmem:[#allocation8 + $0xb40] sm:$0xff] }
 0x63c   :  { %5697 = vmatmul.mubr.bf16.vlgmr.msra.gmra.mrb[32].mxu0 %v18622_v18  ;;  %5712 = vmatpush1.bf16.msra.mxu1 %v13242_v23  ;;  %v3100_v23 = vld [vmem:[#allocation8 + $0x3b0] sm:$0xff]  ;;  %v5486_v26 = vand.u32 %v13355_v7, %v18562_v29 }
 0x63d   :  { %5747 = vmatpush1.bf16.msra.mxu0 %v13196_v58  ;;  %13366 = vmatprep.mubr.msk.bf16.mxu0 %vm4201_vm13, %v18604_v19  ;;  %v3108_v58 = vld [vmem:[#allocation8 + $0x3f0] sm:$0xff] }
 0x63e   :  { %5713 = vmatprep.subr.bf16.mxu1 %v13259_v45  ;;  %5748 = vmatprep.subr.bf16.mxu0 %v13213_v53  ;;  %v13338_v45 = vcombine.low %v3131_v24, %v3139_v0  ;;  %v13354_v53 = vcombine.low %v3147_v11, %v3155_v32  ;;  %v13309_v39 = vcombine.high %v3100_v23, %v3108_v58  ;;  %v3037_v0 = vld [vmem:[#allocation8 + $0x1b8] sm:$0xff] }
 0x63f   :  { %v13231_v24 = vcombine.high %v3021_v63, %v3029_v38  ;;  %v3045_v11 = vld [vmem:[#allocation8 + $0x1f8] sm:$0xff] }
 0x640   :  { %5714 = vmatpush1.bf16.msra.mxu1 %v13258_v35  ;;  %v2989_v35 = vld [vmem:[#allocation8 + $0x38] sm:$0xff]  ;;  %v5483_v6 = vand.u32 %v13354_v53, %v18562_v29  ;;  %v13247_v7 = vcombine.high %v3037_v0, %v3045_v11  ;;  %v5847_v53 = vld [vmem:[#allocation8 + $0xb80] sm:$0xff] }
 0x641   :  { %5749 = vmatpush1.bf16.msra.mxu0 %v13212_v13  ;;  %5715 = vmatprep.subr.bf16.mxu1 %v13275_v5  ;;  %v2997_v13 = vld [vmem:[#allocation8 + $0x78] sm:$0xff] }
 0x642   :  { %5750 = vmatprep.subr.bf16.mxu0 %v13229_v8  ;;  %v3116_v8 = vld [vmem:[#allocation8 + $0x430] sm:$0xff] }
 0x644   :  { %5716 = vmatpush1.bf16.msra.mxu1 %v13274_v56  ;;  %v13308_v56 = vcombine.low %v3100_v23, %v3108_v58  ;;  %v13369_v23 = vcombine.high %v5831_v31, %v5839_v10  ;;  %v3053_v58 = vld [vmem:[#allocation8 + $0x238] sm:$0xff] }
 0x645   :  { %5751 = vmatpush1.bf16.msra.mxu0 %v13228_v62  ;;  %5717 = vmatprep.subr.bf16.mxu1 %v13291_v42  ;;  %v13199_v62 = vcombine.high %v2989_v35, %v2997_v13  ;;  %v13325_v42 = vcombine.high %v3116_v8, %v3124_v28 }
 0x646   :  { %5752 = vmatprep.subr.bf16.mxu0 %v13245_v54  ;;  %v3132_v54 = vld [vmem:[#allocation8 + $0x4b0] sm:$0xff] }
 0x647   :  { %v13341_v59 = vcombine.high %v3132_v54, %v3140_v51 }
 0x648   :  { %5718 = vmatpush1.bf16.msra.mxu1 %v13290_v40  ;;  %v3156_v40 = vld [vmem:[#allocation8 + $0x570] sm:$0x11] }
 0x649   :  { %5753 = vmatpush1.bf16.msra.mxu0 %v13244_v22  ;;  %5719 = vmatprep.subr.bf16.mxu1 %v13307_v37  ;;  %v13198_v22 = vcombine.low %v2989_v35, %v2997_v13  ;;  %v13324_v37 = vcombine.low %v3116_v8, %v3124_v28  ;;  %v13357_v36 = vcombine.high %v3148_v27, %v3156_v40  ;;  %v3069_v8 = vld [vmem:[#allocation8 + $0x2b8] sm:$0xff] }
 0x64a   :  { %5754 = vmatprep.subr.bf16.mxu0 %v13261_v25  ;;  %v13215_v25 = vcombine.high %v3005_v46, %v3013_v9  ;;  %v3077_v28 = vld [vmem:[#allocation8 + $0x2f8] sm:$0xff] }
 0x64c   :  { %5720 = vmatpush1.bf16.msra.mxu1 %v13306_v49  ;;  %v13214_v49 = vcombine.low %v3005_v46, %v3013_v9  ;;  %v3085_v46 = vld [vmem:[#allocation8 + $0x338] sm:$0xff] }
 0x64d   :  { %5755 = vmatpush1.bf16.msra.mxu0 %v13260_v47  ;;  %5721 = vmatprep.subr.bf16.mxu1 %v13323_v44  ;;  %v13340_v47 = vcombine.low %v3132_v54, %v3140_v51  ;;  %v13356_v44 = vcombine.low %v3148_v27, %v3156_v40  ;;  %v3093_v9 = vld [vmem:[#allocation8 + $0x378] sm:$0xff]  ;;  %v5879_v51 = vld [vmem:[#allocation8 + $0xc80] sm:$0xff]  ;;  %v13278_v27 = vcombine.low %v3069_v8, %v3077_v28 }
 0x64e   :  { %5756 = vmatprep.subr.bf16.mxu0 %v13277_v34  ;;  %v5492_v34 = vand.u32 %v13357_v36, %v18562_v29  ;;  %v5895_v36 = vld [vmem:[#allocation8 + $0xd00] sm:$0xff] }
 0x650   :  { %5722 = vmatpush1.bf16.msra.mxu1 %v13322_v57 }
 0x651   :  { %5757 = vmatpush1.bf16.msra.mxu0 %v13276_v4  ;;  %5723 = vmatprep.subr.bf16.mxu1 %v13339_v41  ;;  %v13230_v4 = vcombine.low %v3021_v63, %v3029_v38  ;;  %v5489_v41 = vand.u32 %v13356_v44, %v18562_v29  ;;  %v5903_v63 = vld [vmem:[#allocation8 + $0xd40] sm:$0xff]  ;;  %v13294_v38 = vcombine.low %v3085_v46, %v3093_v9 }
 0x652   :  { %v18664_v16 = vpop.f32.mrb[12].mxu1  ;;  %5758 = vmatprep.subr.bf16.mxu0 %v13293_v15  ;;  %v13433_v44 = vcombine.high %v5895_v36, %v5903_v63 }
 0x653   :  { %v18666_v5 = vpop.f32.mrb[13].mxu1 }
 0x654   :  { %v4418_v12 = vpop.f32.mrb[14].mxu1  ;;  %5724 = vmatpush1.bf16.msra.mxu1 %v13338_v45  ;;  %v3061_v45 = vld [vmem:[#allocation8 + $0x278] sm:$0xff] }
 0x655   :  { %5759 = vmatpush1.bf16.msra.mxu0 %v13292_v60  ;;  %v4419_v50 = vpop.f32.mrb[15].mxu1  ;;  %5725 = vmatprep.subr.bf16.mxu1 %v5486_v26  ;;  %v5855_v60 = vld [vmem:[#allocation8 + $0xbc0] sm:$0xff]  ;;  %v13246_v26 = vcombine.low %v3037_v0, %v3045_v11  ;;  %v13263_v35 = vcombine.high %v3053_v58, %v3061_v45  ;;  %v18680_v12 = vpack.c.bf16 %v18403_v33, %v18403_v33 }
 0x656   :  { %5760 = vmatprep.subr.bf16.mxu0 %v13309_v39  ;;  %v13368_v39 = vcombine.low %v5831_v31, %v5839_v10  ;;  %v13385_v13 = vcombine.high %v5847_v53, %v5855_v60  ;;  %v5871_v50 = vld [vmem:[#allocation8 + $0xc40] sm:$0xff]  ;;  %v13432_v10 = vcombine.low %v5895_v36, %v5903_v63  ;;  %v5848_v63 = vld [vmem:[#allocation8 + $0xb88] sm:$0xff] }
 0x657   :  { %v5887_v33 = vld [vmem:[#allocation8 + $0xcc0] sm:$0xff] }
 0x658   :  { %5726 = vmatpush1.bf16.msra.mxu1 %v5483_v6  ;;  %v5863_v6 = vld [vmem:[#allocation8 + $0xc00] sm:$0xff] }
 0x659   :  { %5761 = vmatpush1.bf16.msra.mxu0 %v13308_v56  ;;  %5787 = vmatprep.subr.bf16.mxu1 %v13199_v62  ;;  %v13262_v56 = vcombine.low %v3053_v58, %v3061_v45  ;;  %v13384_v62 = vcombine.low %v5847_v53, %v5855_v60  ;;  %v13401_v54 = vcombine.high %v5863_v6, %v5871_v50  ;;  %v5911_v0 = vld [vmem:[#allocation8 + $0xd80] sm:$0xff] }
 0x65a   :  { %5762 = vmatprep.subr.bf16.mxu0 %v13325_v42  ;;  %v13279_v42 = vcombine.high %v3069_v8, %v3077_v28  ;;  %v13400_v40 = vcombine.low %v5863_v6, %v5871_v50  ;;  %v5919_v11 = vld [vmem:[#allocation8 + $0xdc0] sm:$0xff] }
 0x65b   :  { %5738 = vmatmul.mubr.bf16.vlgmr.msra.gmra.mrb[32].mxu1 %v18622_v18  ;;  %v5927_v58 = vld [vmem:[#allocation8 + $0xe00] sm:$0xff]  ;;  %v13448_v60 = vcombine.low %v5911_v0, %v5919_v11 }
 0x65c   :  { %5788 = vmatpush1.bf16.msra.mxu1 %v13198_v22  ;;  %13367 = vmatprep.mubr.msk.bf16.mxu1 %vm4201_vm13, %v18604_v19  ;;  %v13295_v22 = vcombine.high %v3085_v46, %v3093_v9  ;;  %v5935_v45 = vld [vmem:[#allocation8 + $0xe40] sm:$0xff]  ;;  %v5840_v46 = vld [vmem:[#allocation8 + $0xb48] sm:$0xff] }
 0x65d   :  { %5763 = vmatpush1.bf16.msra.mxu0 %v13324_v37  ;;  %5789 = vmatprep.subr.bf16.mxu1 %v13215_v25  ;;  %v13417_v37 = vcombine.high %v5879_v51, %v5887_v33  ;;  %v3101_v25 = vld [vmem:[#allocation8 + $0x3b8] sm:$0xff]  ;;  %v5951_v8 = vld [vmem:[#allocation8 + $0xec0] sm:$0xff]  ;;  %v13464_v50 = vcombine.low %v5927_v58, %v5935_v45 }
 0x65e   :  { %5764 = vmatprep.subr.bf16.mxu0 %v13341_v59  ;;  %v3109_v59 = vld [vmem:[#allocation8 + $0x3f8] sm:$0xff]  ;;  %v5975_v36 = vld [vmem:[#allocation8 + $0xf80] sm:$0xff] }
 0x65f   :  { %v18673_v32 = vpop.f32.mrb[16].mxu0  ;;  %v13310_v31 = vcombine.low %v3101_v25, %v3109_v59 }
 0x660   :  { %v18675_v57 = vpop.f32.mrb[17].mxu0  ;;  %5790 = vmatpush1.bf16.msra.mxu1 %v13214_v49  ;;  %v13416_v49 = vcombine.low %v5879_v51, %v5887_v33  ;;  %v5959_v51 = vld [vmem:[#allocation8 + $0xf00] sm:$0xff] }
 0x661   :  { %v4459_v19 = vpop.f32.mrb[18].mxu0  ;;  %5765 = vmatpush1.bf16.msra.mxu0 %v13340_v47  ;;  %5791 = vmatprep.subr.bf16.mxu1 %v13231_v24  ;;  %v13311_v47 = vcombine.high %v3101_v25, %v3109_v59  ;;  %v3117_v24 = vld [vmem:[#allocation8 + $0x438] sm:$0xff]  ;;  %v5967_v33 = vld [vmem:[#allocation8 + $0xf40] sm:$0xff] }
 0x662   :  { %v4460_v15 = vpop.f32.mrb[19].mxu0  ;;  %5766 = vmatprep.subr.bf16.mxu0 %v5492_v34  ;;  %v3125_v34 = vld [vmem:[#allocation8 + $0x478] sm:$0xff]  ;;  %v13497_v59 = vcombine.high %v5959_v51, %v5967_v33 }
 0x663   :  { %v3133_v19 = vld [vmem:[#allocation8 + $0x4b8] sm:$0xff]  ;;  %v13326_v53 = vcombine.low %v3117_v24, %v3125_v34 }
 0x664   :  { %5792 = vmatpush1.bf16.msra.mxu1 %v13230_v4  ;;  %v13327_v4 = vcombine.high %v3117_v24, %v3125_v34  ;;  %v3149_v15 = vld [vmem:[#allocation8 + $0x538] sm:$0xff]  ;;  %v13496_v34 = vcombine.low %v5959_v51, %v5967_v33  ;;  %v18702_v33 = vpack.c.bf16 %v18400_v43, %v18400_v43 }
 0x665   :  { %5767 = vmatpush1.bf16.msra.mxu0 %v5489_v41  ;;  %5793 = vmatprep.subr.bf16.mxu1 %v13247_v7  ;;  %v13449_v41 = vcombine.high %v5911_v0, %v5919_v11  ;;  %v3141_v7 = vld [vmem:[#allocation8 + $0x4f8] sm:$0xff] }
 0x666   :  { %6922 = vmatprep.subr.bf16.mxu0 %v13369_v23  ;;  %v3157_v23 = vld [vmem:[#allocation8 + $0x578] sm:$0x11]  ;;  %v13342_v28 = vcombine.low %v3133_v19, %v3141_v7 }
 0x667   :  { %v13358_v6 = vcombine.low %v3149_v15, %v3157_v23 }
 0x668   :  { %5779 = vmatmul.mubr.bf16.vlgmr.msra.gmra.mrb[36].mxu0 %v18622_v18  ;;  %5794 = vmatpush1.bf16.msra.mxu1 %v13246_v26  ;;  %v13343_v26 = vcombine.high %v3133_v19, %v3141_v7 }
 0x669   :  { %6923 = vmatpush1.bf16.msra.mxu0 %v13368_v39  ;;  %13544 = vmatprep.mubr.msk.bf16.mxu0 %vm4201_vm13, %v18680_v12  ;;  %v13359_v39 = vcombine.high %v3149_v15, %v3157_v23 }
 0x66a   :  { %5795 = vmatprep.subr.bf16.mxu1 %v13263_v35  ;;  %6924 = vmatprep.subr.bf16.mxu0 %v13385_v13  ;;  %v13465_v35 = vcombine.high %v5927_v58, %v5935_v45  ;;  %v5943_v13 = vld [vmem:[#allocation8 + $0xe80] sm:$0xff]  ;;  %v5880_v58 = vld [vmem:[#allocation8 + $0xc88] sm:$0xff] }
 0x66b   :  { %v5888_v45 = vld [vmem:[#allocation8 + $0xcc8] sm:$0xff] }
 0x66c   :  { %5796 = vmatpush1.bf16.msra.mxu1 %v13262_v56  ;;  %v5498_v56 = vand.u32 %v13359_v39, %v18562_v29 }
 0x66d   :  { %6925 = vmatpush1.bf16.msra.mxu0 %v13384_v62  ;;  %5797 = vmatprep.subr.bf16.mxu1 %v13279_v42  ;;  %v13481_v42 = vcombine.high %v5943_v13, %v5951_v8 }
 0x66e   :  { %6926 = vmatprep.subr.bf16.mxu0 %v13401_v54  ;;  %v5832_v54 = vld [vmem:[#allocation8 + $0xb08] sm:$0xff] }
 0x66f   :  { %v13371_v25 = vcombine.high %v5832_v54, %v5840_v46  ;;  %v13370_v24 = vcombine.low %v5832_v54, %v5840_v46  ;;  %v5857_v54 = vld [vmem:[#allocation8 + $0xbd0] sm:$0xff]  ;;  %v13418_v46 = vcombine.low %v5880_v58, %v5888_v45 }
 0x670   :  { %5798 = vmatpush1.bf16.msra.mxu1 %v13278_v27 }
 0x671   :  { %6927 = vmatpush1.bf16.msra.mxu0 %v13400_v40  ;;  %5799 = vmatprep.subr.bf16.mxu1 %v13295_v22  ;;  %v5495_v40 = vand.u32 %v13358_v6, %v18562_v29 }
 0x672   :  { %6928 = vmatprep.subr.bf16.mxu0 %v13417_v37  ;;  %v13480_v37 = vcombine.low %v5943_v13, %v5951_v8  ;;  %v13419_v8 = vcombine.high %v5880_v58, %v5888_v45  ;;  %v5960_v45 = vld [vmem:[#allocation8 + $0xf08] sm:$0xff] }
 0x674   :  { %5800 = vmatpush1.bf16.msra.mxu1 %v13294_v38  ;;  %v5856_v38 = vld [vmem:[#allocation8 + $0xbc8] sm:$0xff] }
 0x675   :  { %6929 = vmatpush1.bf16.msra.mxu0 %v13416_v49  ;;  %5801 = vmatprep.subr.bf16.mxu1 %v13311_v47  ;;  %v5983_v49 = vld [vmem:[#allocation8 + $0xfc0] sm:$0xff]  ;;  %v13387_v0 = vcombine.high %v5848_v63, %v5856_v38  ;;  %v13386_v19 = vcombine.low %v5848_v63, %v5856_v38 }
 0x676   :  { %6930 = vmatprep.subr.bf16.mxu0 %v13433_v44  ;;  %v5991_v47 = vld [vmem:[#allocation8 + $0x1000] sm:$0xff]  ;;  %v13513_v11 = vcombine.high %v5975_v36, %v5983_v49 }
 0x677   :  { %v5999_v44 = vld [vmem:[#allocation8 + $0x1040] sm:$0x11] }
 0x678   :  { %5802 = vmatpush1.bf16.msra.mxu1 %v13310_v31  ;;  %v13529_v31 = vcombine.high %v5991_v47, %v5999_v44  ;;  %v13528_v7 = vcombine.low %v5991_v47, %v5999_v44  ;;  %v5936_v47 = vld [vmem:[#allocation8 + $0xe48] sm:$0xff]  ;;  %v5881_v44 = vld [vmem:[#allocation8 + $0xc90] sm:$0xff] }
 0x679   :  { %6931 = vmatpush1.bf16.msra.mxu0 %v13432_v10  ;;  %5803 = vmatprep.subr.bf16.mxu1 %v13327_v4  ;;  %v5864_v10 = vld [vmem:[#allocation8 + $0xc08] sm:$0xff] }
 0x67a   :  { %6932 = vmatprep.subr.bf16.mxu0 %v13449_v41  ;;  %v5872_v4 = vld [vmem:[#allocation8 + $0xc48] sm:$0xff]  ;;  %v13512_v41 = vcombine.low %v5975_v36, %v5983_v49  ;;  %v6878_v23 = vand.u32 %v13529_v31, %v18562_v29  ;;  %v6875_v13 = vand.u32 %v13528_v7, %v18562_v29 }
 0x67b   :  { %v13403_v15 = vcombine.high %v5864_v10, %v5872_v4  ;;  %v13402_v39 = vcombine.low %v5864_v10, %v5872_v4  ;;  %v5928_v49 = vld [vmem:[#allocation8 + $0xe08] sm:$0xff] }
 0x67c   :  { %5804 = vmatpush1.bf16.msra.mxu1 %v13326_v53  ;;  %v5944_v10 = vld [vmem:[#allocation8 + $0xe88] sm:$0xff]  ;;  %v13466_v7 = vcombine.low %v5928_v49, %v5936_v47 }
 0x67d   :  { %6933 = vmatpush1.bf16.msra.mxu0 %v13448_v60  ;;  %5805 = vmatprep.subr.bf16.mxu1 %v13343_v26  ;;  %v5833_v60 = vld [vmem:[#allocation8 + $0xb10] sm:$0xff]  ;;  %v5952_v4 = vld [vmem:[#allocation8 + $0xec8] sm:$0xff] }
 0x67e   :  { %v18686_v62 = vpop.f32.mrb[16].mxu1  ;;  %6934 = vmatprep.subr.bf16.mxu0 %v13465_v35  ;;  %v5841_v26 = vld [vmem:[#allocation8 + $0xb50] sm:$0xff] }
 0x67f   :  { %v18688_v9 = vpop.f32.mrb[17].mxu1  ;;  %v13373_v6 = vcombine.high %v5833_v60, %v5841_v26  ;;  %v13372_v51 = vcombine.low %v5833_v60, %v5841_v26  ;;  %v5968_v60 = vld [vmem:[#allocation8 + $0xf48] sm:$0xff]  ;;  %v5913_v26 = vld [vmem:[#allocation8 + $0xd90] sm:$0xff] }
 0x680   :  { %v4500_v27 = vpop.f32.mrb[18].mxu1  ;;  %5806 = vmatpush1.bf16.msra.mxu1 %v13342_v28 }
 0x681   :  { %6935 = vmatpush1.bf16.msra.mxu0 %v13464_v50  ;;  %v4501_v22 = vpop.f32.mrb[19].mxu1  ;;  %5807 = vmatprep.subr.bf16.mxu1 %v5498_v56  ;;  %v5896_v50 = vld [vmem:[#allocation8 + $0xd08] sm:$0xff] }
 0x682   :  { %6936 = vmatprep.subr.bf16.mxu0 %v13481_v42  ;;  %v5904_v56 = vld [vmem:[#allocation8 + $0xd48] sm:$0xff]  ;;  %v5849_v42 = vld [vmem:[#allocation8 + $0xb90] sm:$0xff] }
 0x683   :  { %v13435_v27 = vcombine.high %v5896_v50, %v5904_v56  ;;  %v5912_v22 = vld [vmem:[#allocation8 + $0xd88] sm:$0xff]  ;;  %v13434_v36 = vcombine.low %v5896_v50, %v5904_v56  ;;  %v13388_v63 = vcombine.low %v5849_v42, %v5857_v54 }
 0x684   :  { %5808 = vmatpush1.bf16.msra.mxu1 %v5495_v40  ;;  %v13389_v40 = vcombine.high %v5849_v42, %v5857_v54  ;;  %v5984_v50 = vld [vmem:[#allocation8 + $0xfc8] sm:$0xff]  ;;  %v5929_v54 = vld [vmem:[#allocation8 + $0xe10] sm:$0xff] }
 0x685   :  { %6937 = vmatpush1.bf16.msra.mxu0 %v13480_v37  ;;  %6963 = vmatprep.subr.bf16.mxu1 %v13371_v25  ;;  %v5920_v37 = vld [vmem:[#allocation8 + $0xdc8] sm:$0xff]  ;;  %v5865_v25 = vld [vmem:[#allocation8 + $0xc10] sm:$0xff] }
 0x686   :  { %6938 = vmatprep.subr.bf16.mxu0 %v13497_v59  ;;  %v5873_v59 = vld [vmem:[#allocation8 + $0xc50] sm:$0xff]  ;;  %v13451_v38 = vcombine.high %v5912_v22, %v5920_v37  ;;  %v5992_v56 = vld [vmem:[#allocation8 + $0x1008] sm:$0xff] }
 0x687   :  { %5820 = vmatmul.mubr.bf16.vlgmr.msra.gmra.mrb[36].mxu1 %v18622_v18  ;;  %v13405_v43 = vcombine.high %v5865_v25, %v5873_v59  ;;  %v6000_v42 = vld [vmem:[#allocation8 + $0x1048] sm:$0x11] }
 0x688   :  { %6964 = vmatpush1.bf16.msra.mxu1 %v13370_v24  ;;  %13545 = vmatprep.mubr.msk.bf16.mxu1 %vm4201_vm13, %v18680_v12  ;;  %v5889_v24 = vld [vmem:[#allocation8 + $0xcd0] sm:$0xff] }
 0x689   :  { %6939 = vmatpush1.bf16.msra.mxu0 %v13496_v34  ;;  %6965 = vmatprep.subr.bf16.mxu1 %v13387_v0  ;;  %v13450_v34 = vcombine.low %v5912_v22, %v5920_v37  ;;  %v13404_v0 = vcombine.low %v5865_v25, %v5873_v59  ;;  %v13421_v31 = vcombine.high %v5881_v44, %v5889_v24  ;;  %v5945_v25 = vld [vmem:[#allocation8 + $0xe90] sm:$0xff] }
 0x68a   :  { %6940 = vmatprep.subr.bf16.mxu0 %v13513_v11  ;;  %v13467_v11 = vcombine.high %v5928_v49, %v5936_v47  ;;  %v13531_v22 = vcombine.high %v5992_v56, %v6000_v42  ;;  %v5953_v59 = vld [vmem:[#allocation8 + $0xed0] sm:$0xff] }
 0x68b   :  { %v18695_v53 = vpop.f32.mrb[20].mxu0  ;;  %v13485_v47 = vcombine.high %v5945_v25, %v5953_v59 }
 0x68c   :  { %v18697_v18 = vpop.f32.mrb[21].mxu0  ;;  %6966 = vmatpush1.bf16.msra.mxu1 %v13386_v19  ;;  %v5897_v19 = vld [vmem:[#allocation8 + $0xd10] sm:$0xff] }
 0x68d   :  { %v4541_v35 = vpop.f32.mrb[22].mxu0  ;;  %6941 = vmatpush1.bf16.msra.mxu0 %v13512_v41  ;;  %6967 = vmatprep.subr.bf16.mxu1 %v13403_v15  ;;  %v5905_v41 = vld [vmem:[#allocation8 + $0xd50] sm:$0xff]  ;;  %v13420_v15 = vcombine.low %v5881_v44, %v5889_v24  ;;  %v5834_v44 = vld [vmem:[#allocation8 + $0xb18] sm:$0xff] }
 0x68e   :  { %v4542_v28 = vpop.f32.mrb[23].mxu0  ;;  %6942 = vmatprep.subr.bf16.mxu0 %v6878_v23  ;;  %v13483_v23 = vcombine.high %v5944_v10, %v5952_v4  ;;  %v13437_v58 = vcombine.high %v5897_v19, %v5905_v41  ;;  %v13482_v35 = vcombine.low %v5944_v10, %v5952_v4  ;;  %v5842_v24 = vld [vmem:[#allocation8 + $0xb58] sm:$0xff] }
 0x68f   :  { %v5976_v28 = vld [vmem:[#allocation8 + $0xf88] sm:$0xff] }
 0x690   :  { %6968 = vmatpush1.bf16.msra.mxu1 %v13402_v39  ;;  %v5921_v39 = vld [vmem:[#allocation8 + $0xdd0] sm:$0xff] }
 0x691   :  { %6943 = vmatpush1.bf16.msra.mxu0 %v6875_v13  ;;  %6969 = vmatprep.subr.bf16.mxu1 %v13419_v8  ;;  %v13436_v13 = vcombine.low %v5897_v19, %v5905_v41  ;;  %v13499_v8 = vcombine.high %v5960_v45, %v5968_v60  ;;  %v13484_v19 = vcombine.low %v5945_v25, %v5953_v59  ;;  %v5843_v25 = vld [vmem:[#allocation8 + $0xb60] sm:$0xff] }
 0x692   :  { %7004 = vmatprep.subr.bf16.mxu0 %v13373_v6  ;;  %v13453_v6 = vcombine.high %v5913_v26, %v5921_v39  ;;  %v13375_v41 = vcombine.high %v5834_v44, %v5842_v24 }
 0x694   :  { %6955 = vmatmul.mubr.bf16.vlgmr.msra.gmra.mrb[40].mxu0 %v18702_v33  ;;  %6970 = vmatpush1.bf16.msra.mxu1 %v13418_v46  ;;  %v5937_v46 = vld [vmem:[#allocation8 + $0xe50] sm:$0xff] }
 0x695   :  { %7005 = vmatpush1.bf16.msra.mxu0 %v13372_v51  ;;  %13546 = vmatprep.mubr.msk.bf16.mxu0 %vm4201_vm13, %v18680_v12  ;;  %v13498_v51 = vcombine.low %v5960_v45, %v5968_v60  ;;  %v13469_v37 = vcombine.high %v5929_v54, %v5937_v46  ;;  %v5985_v45 = vld [vmem:[#allocation8 + $0xfd0] sm:$0xff] }
 0x696   :  { %6971 = vmatprep.subr.bf16.mxu1 %v13435_v27  ;;  %7006 = vmatprep.subr.bf16.mxu0 %v13389_v40  ;;  %v13452_v27 = vcombine.low %v5913_v26, %v5921_v39  ;;  %v13515_v40 = vcombine.high %v5976_v28, %v5984_v50  ;;  %v5993_v60 = vld [vmem:[#allocation8 + $0x1010] sm:$0xff]  ;;  %v13374_v39 = vcombine.low %v5834_v44, %v5842_v24 }
 0x697   :  { %v6001_v26 = vld [vmem:[#allocation8 + $0x1050] sm:$0x11] }
 0x698   :  { %6972 = vmatpush1.bf16.msra.mxu1 %v13434_v36  ;;  %v13514_v36 = vcombine.low %v5976_v28, %v5984_v50  ;;  %v13533_v28 = vcombine.high %v5993_v60, %v6001_v26  ;;  %v5874_v50 = vld [vmem:[#allocation8 + $0xc58] sm:$0xff] }
 0x699   :  { %7007 = vmatpush1.bf16.msra.mxu0 %v13388_v63  ;;  %6973 = vmatprep.subr.bf16.mxu1 %v13451_v38  ;;  %v13530_v63 = vcombine.low %v5992_v56, %v6000_v42  ;;  %v13468_v38 = vcombine.low %v5929_v54, %v5937_v46  ;;  %v13532_v54 = vcombine.low %v5993_v60, %v6001_v26 }
 0x69a   :  { %7008 = vmatprep.subr.bf16.mxu0 %v13405_v43  ;;  %v6884_v43 = vand.u32 %v13531_v22, %v18562_v29 }
 0x69b   :  { %v6881_v10 = vand.u32 %v13530_v63, %v18562_v29 }
 0x69c   :  { %6974 = vmatpush1.bf16.msra.mxu1 %v13450_v34 }
 0x69d   :  { %7009 = vmatpush1.bf16.msra.mxu0 %v13404_v0  ;;  %6975 = vmatprep.subr.bf16.mxu1 %v13467_v11  ;;  %v5961_v0 = vld [vmem:[#allocation8 + $0xf10] sm:$0xff] }
 0x69e   :  { %7010 = vmatprep.subr.bf16.mxu0 %v13421_v31  ;;  %v5969_v11 = vld [vmem:[#allocation8 + $0xf50] sm:$0xff] }
 0x6a0   :  { %6976 = vmatpush1.bf16.msra.mxu1 %v13466_v7  ;;  %v13501_v7 = vcombine.high %v5961_v0, %v5969_v11 }
 0x6a1   :  { %7011 = vmatpush1.bf16.msra.mxu0 %v13420_v15  ;;  %6977 = vmatprep.subr.bf16.mxu1 %v13483_v23  ;;  %v5977_v15 = vld [vmem:[#allocation8 + $0xf90] sm:$0xff]  ;;  %v5850_v23 = vld [vmem:[#allocation8 + $0xb98] sm:$0xff] }
 0x6a2   :  { %7012 = vmatprep.subr.bf16.mxu0 %v13437_v58  ;;  %v5858_v58 = vld [vmem:[#allocation8 + $0xbd8] sm:$0xff]  ;;  %v13516_v42 = vcombine.low %v5977_v15, %v5985_v45 }
 0x6a3   :  { %v13390_v56 = vcombine.low %v5850_v23, %v5858_v58 }
 0x6a4   :  { %6978 = vmatpush1.bf16.msra.mxu1 %v13482_v35  ;;  %v13500_v35 = vcombine.low %v5961_v0, %v5969_v11  ;;  %v5898_v11 = vld [vmem:[#allocation8 + $0xd18] sm:$0xff] }
 0x6a5   :  { %7013 = vmatpush1.bf16.msra.mxu0 %v13436_v13  ;;  %6979 = vmatprep.subr.bf16.mxu1 %v13499_v8  ;;  %v13391_v13 = vcombine.high %v5850_v23, %v5858_v58  ;;  %v13517_v8 = vcombine.high %v5977_v15, %v5985_v45  ;;  %v5922_v15 = vld [vmem:[#allocation8 + $0xdd8] sm:$0xff]  ;;  %v5867_v23 = vld [vmem:[#allocation8 + $0xc20] sm:$0xff] }
 0x6a6   :  { %7014 = vmatprep.subr.bf16.mxu0 %v13453_v6  ;;  %v5866_v6 = vld [vmem:[#allocation8 + $0xc18] sm:$0xff]  ;;  %v5875_v58 = vld [vmem:[#allocation8 + $0xc60] sm:$0xff] }
 0x6a7   :  { %v13407_v46 = vcombine.high %v5866_v6, %v5874_v50  ;;  %v13406_v63 = vcombine.low %v5866_v6, %v5874_v50  ;;  %v13408_v50 = vcombine.low %v5867_v23, %v5875_v58 }
 0x6a8   :  { %6980 = vmatpush1.bf16.msra.mxu1 %v13498_v51  ;;  %v6890_v51 = vand.u32 %v13533_v28, %v18562_v29  ;;  %v5891_v28 = vld [vmem:[#allocation8 + $0xce0] sm:$0xff] }
 0x6a9   :  { %7015 = vmatpush1.bf16.msra.mxu0 %v13452_v27  ;;  %6981 = vmatprep.subr.bf16.mxu1 %v13515_v40  ;;  %v5882_v27 = vld [vmem:[#allocation8 + $0xc98] sm:$0xff] }
 0x6aa   :  { %v18708_v49 = vpop.f32.mrb[20].mxu1  ;;  %7016 = vmatprep.subr.bf16.mxu0 %v13469_v37  ;;  %v5890_v40 = vld [vmem:[#allocation8 + $0xcd8] sm:$0xff]  ;;  %v5835_v37 = vld [vmem:[#allocation8 + $0xb20] sm:$0xff] }
 0x6ab   :  { %v18710_v34 = vpop.f32.mrb[21].mxu1  ;;  %v13423_v44 = vcombine.high %v5882_v27, %v5890_v40  ;;  %v13377_v0 = vcombine.high %v5835_v37, %v5843_v25 }
 0x6ac   :  { %v4582_v31 = vpop.f32.mrb[22].mxu1  ;;  %6982 = vmatpush1.bf16.msra.mxu1 %v13514_v36 }
 0x6ad   :  { %7017 = vmatpush1.bf16.msra.mxu0 %v13468_v38  ;;  %v4583_v4 = vpop.f32.mrb[23].mxu1  ;;  %6983 = vmatprep.subr.bf16.mxu1 %v6884_v43  ;;  %v5906_v31 = vld [vmem:[#allocation8 + $0xd58] sm:$0xff] }
 0x6ae   :  { %7018 = vmatprep.subr.bf16.mxu0 %v13485_v47  ;;  %v6887_v47 = vand.u32 %v13532_v54, %v18562_v29  ;;  %v13422_v4 = vcombine.low %v5882_v27, %v5890_v40  ;;  %v13438_v45 = vcombine.low %v5898_v11, %v5906_v31  ;;  %v5946_v54 = vld [vmem:[#allocation8 + $0xe98] sm:$0xff]  ;;  %v5907_v27 = vld [vmem:[#allocation8 + $0xd60] sm:$0xff] }
 0x6b0   :  { %6984 = vmatpush1.bf16.msra.mxu1 %v6881_v10  ;;  %v5851_v10 = vld [vmem:[#allocation8 + $0xba0] sm:$0xff] }
 0x6b1   :  { %7019 = vmatpush1.bf16.msra.mxu0 %v13484_v19  ;;  %7045 = vmatprep.subr.bf16.mxu1 %v13375_v41  ;;  %v13376_v19 = vcombine.low %v5835_v37, %v5843_v25 }
 0x6b2   :  { %7020 = vmatprep.subr.bf16.mxu0 %v13501_v7  ;;  %v5914_v7 = vld [vmem:[#allocation8 + $0xd98] sm:$0xff] }
 0x6b3   :  { %6996 = vmatmul.mubr.bf16.vlgmr.msra.gmra.mrb[40].mxu1 %v18702_v33  ;;  %v13455_v26 = vcombine.high %v5914_v7, %v5922_v15  ;;  %v13454_v6 = vcombine.low %v5914_v7, %v5922_v15 }
 0x6b4   :  { %7046 = vmatpush1.bf16.msra.mxu1 %v13374_v39  ;;  %13547 = vmatprep.mubr.msk.bf16.mxu1 %vm4201_vm13, %v18680_v12  ;;  %v13409_v39 = vcombine.high %v5867_v23, %v5875_v58 }
 0x6b5   :  { %7021 = vmatpush1.bf16.msra.mxu0 %v13500_v35  ;;  %7047 = vmatprep.subr.bf16.mxu1 %v13391_v13  ;;  %v5930_v35 = vld [vmem:[#allocation8 + $0xe18] sm:$0xff] }
 0x6b6   :  { %7022 = vmatprep.subr.bf16.mxu0 %v13517_v8  ;;  %v5938_v13 = vld [vmem:[#allocation8 + $0xe58] sm:$0xff]  ;;  %v5883_v8 = vld [vmem:[#allocation8 + $0xca0] sm:$0xff] }
 0x6b7   :  { %v5534_v22 = vpop.f32.mrb[24].mxu0  ;;  %v13470_v40 = vcombine.low %v5930_v35, %v5938_v13 }
 0x6b8   :  { %v18718_v59 = vadd.f32 %v5534_v22, %v18637_v14  ;;  %v5536_v36 = vpop.f32.mrb[25].mxu0  ;;  %7048 = vmatpush1.bf16.msra.mxu1 %v13390_v56  ;;  %v5859_v14 = vld [vmem:[#allocation8 + $0xbe0] sm:$0xff]  ;;  %v13471_v56 = vcombine.high %v5930_v35, %v5938_v13  ;;  %v13424_v22 = vcombine.low %v5883_v8, %v5891_v28 }
 0x6b9   :  { %v18721_v38 = vadd.f32 %v5536_v36, %v18639_v30  ;;  %v5538_v43 = vpop.f32.mrb[26].mxu0  ;;  %7023 = vmatpush1.bf16.msra.mxu0 %v13516_v42  ;;  %7049 = vmatprep.subr.bf16.mxu1 %v13407_v46  ;;  %v13439_v30 = vcombine.high %v5898_v11, %v5906_v31  ;;  %v13393_v41 = vcombine.high %v5851_v10, %v5859_v14  ;;  %v5954_v46 = vld [vmem:[#allocation8 + $0xed8] sm:$0xff] }
 0x6ba   :  { %v5539_v24 = vpop.f32.mrb[27].mxu0  ;;  %7024 = vmatprep.subr.bf16.mxu0 %v6890_v51  ;;  %v13392_v60 = vcombine.low %v5851_v10, %v5859_v14  ;;  %v13425_v42 = vcombine.high %v5883_v8, %v5891_v28  ;;  %v5899_v51 = vld [vmem:[#allocation8 + $0xd20] sm:$0xff]  ;;  %v13487_v37 = vcombine.high %v5946_v54, %v5954_v46  ;;  %v5962_v36 = vld [vmem:[#allocation8 + $0xf18] sm:$0xff] }
 0x6bb   :  { %v13441_v25 = vcombine.high %v5899_v51, %v5907_v27  ;;  %v5915_v43 = vld [vmem:[#allocation8 + $0xda0] sm:$0xff]  ;;  %v13440_v24 = vcombine.low %v5899_v51, %v5907_v27  ;;  %v5978_v11 = vld [vmem:[#allocation8 + $0xf98] sm:$0xff] }
 0x6bc   :  { %7050 = vmatpush1.bf16.msra.mxu1 %v13406_v63  ;;  %v5970_v63 = vld [vmem:[#allocation8 + $0xf58] sm:$0xff] }
 0x6bd   :  { %7025 = vmatpush1.bf16.msra.mxu0 %v6887_v47  ;;  %7051 = vmatprep.subr.bf16.mxu1 %v13423_v44  ;;  %v5923_v47 = vld [vmem:[#allocation8 + $0xde0] sm:$0xff]  ;;  %v13486_v44 = vcombine.low %v5946_v54, %v5954_v46  ;;  %v5986_v10 = vld [vmem:[#allocation8 + $0xfd8] sm:$0xff] }
 0x6be   :  { %7086 = vmatprep.subr.bf16.mxu0 %v13377_v0  ;;  %v13503_v0 = vcombine.high %v5962_v36, %v5970_v63  ;;  %v13457_v31 = vcombine.high %v5915_v43, %v5923_v47  ;;  %v5994_v14 = vld [vmem:[#allocation8 + $0x1018] sm:$0xff]  ;;  %v13456_v7 = vcombine.low %v5915_v43, %v5923_v47  ;;  %v13519_v15 = vcombine.high %v5978_v11, %v5986_v10  ;;  %v5963_v54 = vld [vmem:[#allocation8 + $0xf20] sm:$0xff]  ;;  %v5860_v43 = vld [vmem:[#allocation8 + $0xbe8] sm:$0xff] }
 0x6bf   :  { %v5971_v46 = vld [vmem:[#allocation8 + $0xf60] sm:$0xff] }
 0x6c0   :  { %7037 = vmatmul.mubr.bf16.vlgmr.msra.gmra.mrb[44].mxu0 %v18702_v33  ;;  %7052 = vmatpush1.bf16.msra.mxu1 %v13422_v4  ;;  %v6002_v4 = vld [vmem:[#allocation8 + $0x1058] sm:$0x11]  ;;  %v5987_v47 = vld [vmem:[#allocation8 + $0xfe0] sm:$0xff] }
 0x6c1   :  { %7087 = vmatpush1.bf16.msra.mxu0 %v13376_v19  ;;  %13548 = vmatprep.mubr.msk.bf16.mxu0 %vm4201_vm13, %v18680_v12  ;;  %v5931_v19 = vld [vmem:[#allocation8 + $0xe20] sm:$0xff]  ;;  %v13535_v23 = vcombine.high %v5994_v14, %v6002_v4 }
 0x6c2   :  { %7053 = vmatprep.subr.bf16.mxu1 %v13439_v30  ;;  %7088 = vmatprep.subr.bf16.mxu0 %v13393_v41  ;;  %v5939_v30 = vld [vmem:[#allocation8 + $0xe60] sm:$0xff]  ;;  %v13502_v41 = vcombine.low %v5962_v36, %v5970_v63  ;;  %v13505_v36 = vcombine.high %v5963_v54, %v5971_v46 }
 0x6c3   :  { %v13473_v58 = vcombine.high %v5931_v19, %v5939_v30  ;;  %v13472_v35 = vcombine.low %v5931_v19, %v5939_v30  ;;  %v6896_v13 = vand.u32 %v13535_v23, %v18562_v29  ;;  %v5979_v63 = vld [vmem:[#allocation8 + $0xfa0] sm:$0xff]  ;;  %v5884_v23 = vld [vmem:[#allocation8 + $0xca8] sm:$0xff] }
 0x6c4   :  { %7054 = vmatpush1.bf16.msra.mxu1 %v13438_v45  ;;  %v5947_v45 = vld [vmem:[#allocation8 + $0xea0] sm:$0xff]  ;;  %v13520_v30 = vcombine.low %v5979_v63, %v5987_v47 }
 0x6c5   :  { %7089 = vmatpush1.bf16.msra.mxu0 %v13392_v60  ;;  %7055 = vmatprep.subr.bf16.mxu1 %v13455_v26  ;;  %v5955_v60 = vld [vmem:[#allocation8 + $0xee0] sm:$0xff]  ;;  %v13518_v26 = vcombine.low %v5978_v11, %v5986_v10 }
 0x6c6   :  { %7090 = vmatprep.subr.bf16.mxu0 %v13409_v39  ;;  %v13534_v39 = vcombine.low %v5994_v14, %v6002_v4  ;;  %v13489_v28 = vcombine.high %v5947_v45, %v5955_v60  ;;  %v5868_v14 = vld [vmem:[#allocation8 + $0xc28] sm:$0xff] }
 0x6c7   :  { %v5876_v4 = vld [vmem:[#allocation8 + $0xc68] sm:$0xff] }
 0x6c8   :  { %7056 = vmatpush1.bf16.msra.mxu1 %v13454_v6  ;;  %v5836_v6 = vld [vmem:[#allocation8 + $0xb28] sm:$0xff] }
 0x6c9   :  { %7091 = vmatpush1.bf16.msra.mxu0 %v13408_v50  ;;  %7057 = vmatprep.subr.bf16.mxu1 %v13471_v56  ;;  %v5844_v50 = vld [vmem:[#allocation8 + $0xb68] sm:$0xff] }
 0x6ca   :  { %7092 = vmatprep.subr.bf16.mxu0 %v13425_v42 }
 0x6cc   :  { %7058 = vmatpush1.bf16.msra.mxu1 %v13470_v40  ;;  %v6893_v40 = vand.u32 %v13534_v39, %v18562_v29 }
 0x6cd   :  { %7093 = vmatpush1.bf16.msra.mxu0 %v13424_v22  ;;  %7059 = vmatprep.subr.bf16.mxu1 %v13487_v37  ;;  %v13488_v37 = vcombine.low %v5947_v45, %v5955_v60  ;;  %v5837_v60 = vld [vmem:[#allocation8 + $0xb30] sm:$0xff] }
 0x6ce   :  { %7094 = vmatprep.subr.bf16.mxu0 %v13441_v25  ;;  %v13379_v25 = vcombine.high %v5836_v6, %v5844_v50 }
 0x6d0   :  { %7060 = vmatpush1.bf16.msra.mxu1 %v13486_v44  ;;  %v5995_v44 = vld [vmem:[#allocation8 + $0x1020] sm:$0xff] }
 0x6d1   :  { %7095 = vmatpush1.bf16.msra.mxu0 %v13440_v24  ;;  %7061 = vmatprep.subr.bf16.mxu1 %v13503_v0  ;;  %v6003_v24 = vld [vmem:[#allocation8 + $0x1060] sm:$0x11]  ;;  %v13504_v0 = vcombine.low %v5963_v54, %v5971_v46  ;;  %v5900_v46 = vld [vmem:[#allocation8 + $0xd28] sm:$0xff] }
 0x6d2   :  { %7096 = vmatprep.subr.bf16.mxu0 %v13457_v31  ;;  %v13521_v31 = vcombine.high %v5979_v63, %v5987_v47  ;;  %v13537_v10 = vcombine.high %v5995_v44, %v6003_v24  ;;  %v5924_v63 = vld [vmem:[#allocation8 + $0xde8] sm:$0xff] }
 0x6d4   :  { %7062 = vmatpush1.bf16.msra.mxu1 %v13502_v41  ;;  %v13536_v41 = vcombine.low %v5995_v44, %v6003_v24 }
 0x6d5   :  { %7097 = vmatpush1.bf16.msra.mxu0 %v13456_v7  ;;  %7063 = vmatprep.subr.bf16.mxu1 %v13519_v15  ;;  %v13411_v7 = vcombine.high %v5868_v14, %v5876_v4  ;;  %v6902_v15 = vand.u32 %v13537_v10, %v18562_v29  ;;  %v5893_v10 = vld [vmem:[#allocation8 + $0xcf0] sm:$0xff] }
 0x6d6   :  { %v5575_v8 = vpop.f32.mrb[24].mxu1  ;;  %7098 = vmatprep.subr.bf16.mxu0 %v13473_v58  ;;  %v5892_v58 = vld [vmem:[#allocation8 + $0xce8] sm:$0xff] }
 0x6d7   :  { %v18729_v56 = vadd.f32 %v5575_v8, %v18646_v61  ;;  %v5577_v42 = vpop.f32.mrb[25].mxu1  ;;  %v5852_v61 = vld [vmem:[#allocation8 + $0xba8] sm:$0xff] }
 0x6d8   :  { %v18732_v51 = vadd.f32 %v5577_v42, %v18648_v1  ;;  %v5579_v27 = vpop.f32.mrb[26].mxu1  ;;  %7064 = vmatpush1.bf16.msra.mxu1 %v13518_v26  ;;  %v13378_v1 = vcombine.low %v5836_v6, %v5844_v50  ;;  %v13395_v11 = vcombine.high %v5852_v61, %v5860_v43  ;;  %v13394_v19 = vcombine.low %v5852_v61, %v5860_v43  ;;  %v5845_v26 = vld [vmem:[#allocation8 + $0xb70] sm:$0xff] }
 0x6d9   :  { %7099 = vmatpush1.bf16.msra.mxu0 %v13472_v35  ;;  %v5580_v22 = vpop.f32.mrb[27].mxu1  ;;  %7065 = vmatprep.subr.bf16.mxu1 %v6896_v13  ;;  %v13410_v13 = vcombine.low %v5868_v14, %v5876_v4  ;;  %v6899_v6 = vand.u32 %v13536_v41, %v18562_v29  ;;  %v13427_v50 = vcombine.high %v5884_v23, %v5892_v58  ;;  %v5908_v27 = vld [vmem:[#allocation8 + $0xd68] sm:$0xff]  ;;  %v5869_v61 = vld [vmem:[#allocation8 + $0xc30] sm:$0xff] }
 0x6da   :  { %7100 = vmatprep.subr.bf16.mxu0 %v13489_v28  ;;  %v13381_v54 = vcombine.high %v5837_v60, %v5845_v26  ;;  %v13426_v22 = vcombine.low %v5884_v23, %v5892_v58  ;;  %v5877_v43 = vld [vmem:[#allocation8 + $0xc70] sm:$0xff]  ;;  %v13442_v47 = vcombine.low %v5900_v46, %v5908_v27  ;;  %v5948_v41 = vld [vmem:[#allocation8 + $0xea8] sm:$0xff] }
 0x6db   :  { %v13412_v4 = vcombine.low %v5869_v61, %v5877_v43  ;;  %v5909_v23 = vld [vmem:[#allocation8 + $0xd70] sm:$0xff] }
 0x6dc   :  { %7066 = vmatpush1.bf16.msra.mxu1 %v6893_v40  ;;  %v5853_v40 = vld [vmem:[#allocation8 + $0xbb0] sm:$0xff] }
 0x6dd   :  { %7101 = vmatpush1.bf16.msra.mxu0 %v13488_v37  ;;  %7127 = vmatprep.subr.bf16.mxu1 %v13379_v25  ;;  %v13380_v37 = vcombine.low %v5837_v60, %v5845_v26 }
 0x6de   :  { %7102 = vmatprep.subr.bf16.mxu0 %v13505_v36  ;;  %v5916_v36 = vld [vmem:[#allocation8 + $0xda8] sm:$0xff] }
 0x6df   :  { %7078 = vmatmul.mubr.bf16.vlgmr.msra.gmra.mrb[44].mxu1 %v18702_v33  ;;  %v13459_v24 = vcombine.high %v5916_v36, %v5924_v63  ;;  %v13458_v14 = vcombine.low %v5916_v36, %v5924_v63 }
 0x6e0   :  { %7128 = vmatpush1.bf16.msra.mxu1 %v13378_v1  ;;  %13549 = vmatprep.mubr.msk.bf16.mxu1 %vm4201_vm13, %v18680_v12  ;;  %v13413_v1 = vcombine.high %v5869_v61, %v5877_v43 }
 0x6e1   :  { %7103 = vmatpush1.bf16.msra.mxu0 %v13504_v0  ;;  %7129 = vmatprep.subr.bf16.mxu1 %v13395_v11  ;;  %v5932_v0 = vld [vmem:[#allocation8 + $0xe28] sm:$0xff] }
 0x6e2   :  { %7104 = vmatprep.subr.bf16.mxu0 %v13521_v31  ;;  %v5940_v11 = vld [vmem:[#allocation8 + $0xe68] sm:$0xff]  ;;  %v5885_v31 = vld [vmem:[#allocation8 + $0xcb0] sm:$0xff] }
 0x6e3   :  { %v5616_v45 = vpop.f32.mrb[28].mxu0  ;;  %v13474_v58 = vcombine.low %v5932_v0, %v5940_v11 }
 0x6e4   :  { %v18740_v39 = vadd.f32 %v5616_v45, %v18655_v2  ;;  %v5618_v35 = vpop.f32.mrb[29].mxu0  ;;  %7130 = vmatpush1.bf16.msra.mxu1 %v13394_v19  ;;  %v5861_v2 = vld [vmem:[#allocation8 + $0xbf0] sm:$0xff]  ;;  %v13475_v19 = vcombine.high %v5932_v0, %v5940_v11  ;;  %v13428_v45 = vcombine.low %v5885_v31, %v5893_v10 }
 0x6e5   :  { %v18743_v8 = vadd.f32 %v5618_v35, %v18657_v48  ;;  %v5620_v28 = vpop.f32.mrb[30].mxu0  ;;  %7105 = vmatpush1.bf16.msra.mxu0 %v13520_v30  ;;  %7131 = vmatprep.subr.bf16.mxu1 %v13411_v7  ;;  %v13443_v48 = vcombine.high %v5900_v46, %v5908_v27  ;;  %v13397_v25 = vcombine.high %v5853_v40, %v5861_v2  ;;  %v5956_v7 = vld [vmem:[#allocation8 + $0xee8] sm:$0xff] }
 0x6e6   :  { %v5621_v42 = vpop.f32.mrb[31].mxu0  ;;  %7106 = vmatprep.subr.bf16.mxu0 %v6902_v15  ;;  %v13396_v44 = vcombine.low %v5853_v40, %v5861_v2  ;;  %v13429_v30 = vcombine.high %v5885_v31, %v5893_v10  ;;  %v5901_v15 = vld [vmem:[#allocation8 + $0xd30] sm:$0xff]  ;;  %v13491_v60 = vcombine.high %v5948_v41, %v5956_v7  ;;  %v5964_v35 = vld [vmem:[#allocation8 + $0xf28] sm:$0xff] }
 0x6e7   :  { %v13445_v26 = vcombine.high %v5901_v15, %v5909_v23  ;;  %v5917_v28 = vld [vmem:[#allocation8 + $0xdb0] sm:$0xff]  ;;  %v13444_v42 = vcombine.low %v5901_v15, %v5909_v23  ;;  %v5980_v46 = vld [vmem:[#allocation8 + $0xfa8] sm:$0xff] }
 0x6e8   :  { %7132 = vmatpush1.bf16.msra.mxu1 %v13410_v13  ;;  %v5972_v13 = vld [vmem:[#allocation8 + $0xf68] sm:$0xff] }
 0x6e9   :  { %7107 = vmatpush1.bf16.msra.mxu0 %v6899_v6  ;;  %7133 = vmatprep.subr.bf16.mxu1 %v13427_v50  ;;  %v5925_v6 = vld [vmem:[#allocation8 + $0xdf0] sm:$0xff]  ;;  %v13490_v50 = vcombine.low %v5948_v41, %v5956_v7  ;;  %v5988_v40 = vld [vmem:[#allocation8 + $0xfe8] sm:$0xff] }
 0x6ea   :  { %7168 = vmatprep.subr.bf16.mxu0 %v13381_v54  ;;  %v13507_v54 = vcombine.high %v5964_v35, %v5972_v13  ;;  %v13461_v27 = vcombine.high %v5917_v28, %v5925_v6  ;;  %v5996_v2 = vld [vmem:[#allocation8 + $0x1028] sm:$0xff]  ;;  %v13460_v36 = vcombine.low %v5917_v28, %v5925_v6  ;;  %v13523_v63 = vcombine.high %v5980_v46, %v5988_v40  ;;  %v5965_v41 = vld [vmem:[#allocation8 + $0xf30] sm:$0xff]  ;;  %v5862_v28 = vld [vmem:[#allocation8 + $0xbf8] sm:$0xff] }
 0x6eb   :  { %v5973_v7 = vld [vmem:[#allocation8 + $0xf70] sm:$0xff] }
 0x6ec   :  { %7119 = vmatmul.mubr.bf16.vlgmr.msra.gmra.mrb[48].mxu0 %v18702_v33  ;;  %7134 = vmatpush1.bf16.msra.mxu1 %v13426_v22  ;;  %v6004_v22 = vld [vmem:[#allocation8 + $0x1068] sm:$0x11]  ;;  %v5989_v6 = vld [vmem:[#allocation8 + $0xff0] sm:$0xff] }
 0x6ed   :  { %7169 = vmatpush1.bf16.msra.mxu0 %v13380_v37  ;;  %13550 = vmatprep.mubr.msk.bf16.mxu0 %vm4201_vm13, %v18680_v12  ;;  %v5933_v37 = vld [vmem:[#allocation8 + $0xe30] sm:$0xff]  ;;  %v13539_v61 = vcombine.high %v5996_v2, %v6004_v22 }
 0x6ee   :  { %7135 = vmatprep.subr.bf16.mxu1 %v13443_v48  ;;  %7170 = vmatprep.subr.bf16.mxu0 %v13397_v25  ;;  %v5941_v48 = vld [vmem:[#allocation8 + $0xe70] sm:$0xff]  ;;  %v13506_v25 = vcombine.low %v5964_v35, %v5972_v13  ;;  %v13509_v35 = vcombine.high %v5965_v41, %v5973_v7 }
 0x6ef   :  { %v13477_v43 = vcombine.high %v5933_v37, %v5941_v48  ;;  %v13476_v0 = vcombine.low %v5933_v37, %v5941_v48  ;;  %v6908_v11 = vand.u32 %v13539_v61, %v18562_v29  ;;  %v5981_v13 = vld [vmem:[#allocation8 + $0xfb0] sm:$0xff]  ;;  %v5886_v61 = vld [vmem:[#allocation8 + $0xcb8] sm:$0xff] }
 0x6f0   :  { %7136 = vmatpush1.bf16.msra.mxu1 %v13442_v47  ;;  %v5949_v47 = vld [vmem:[#allocation8 + $0xeb0] sm:$0xff]  ;;  %v13524_v48 = vcombine.low %v5981_v13, %v5989_v6 }
 0x6f1   :  { %7171 = vmatpush1.bf16.msra.mxu0 %v13396_v44  ;;  %7137 = vmatprep.subr.bf16.mxu1 %v13459_v24  ;;  %v5957_v44 = vld [vmem:[#allocation8 + $0xef0] sm:$0xff]  ;;  %v13522_v24 = vcombine.low %v5980_v46, %v5988_v40 }
 0x6f2   :  { %7172 = vmatprep.subr.bf16.mxu0 %v13413_v1  ;;  %v13538_v1 = vcombine.low %v5996_v2, %v6004_v22  ;;  %v13493_v10 = vcombine.high %v5949_v47, %v5957_v44  ;;  %v5870_v2 = vld [vmem:[#allocation8 + $0xc38] sm:$0xff] }
 0x6f3   :  { %v5878_v22 = vld [vmem:[#allocation8 + $0xc78] sm:$0xff] }
 0x6f4   :  { %7138 = vmatpush1.bf16.msra.mxu1 %v13458_v14  ;;  %v5838_v14 = vld [vmem:[#allocation8 + $0xb38] sm:$0xff] }
 0x6f5   :  { %7173 = vmatpush1.bf16.msra.mxu0 %v13412_v4  ;;  %7139 = vmatprep.subr.bf16.mxu1 %v13475_v19  ;;  %v5846_v4 = vld [vmem:[#allocation8 + $0xb78] sm:$0xff] }
 0x6f6   :  { %7174 = vmatprep.subr.bf16.mxu0 %v13429_v30 }
 0x6f8   :  { %7140 = vmatpush1.bf16.msra.mxu1 %v13474_v58  ;;  %v6905_v58 = vand.u32 %v13538_v1, %v18562_v29 }
 0x6f9   :  { %7175 = vmatpush1.bf16.msra.mxu0 %v13428_v45  ;;  %7141 = vmatprep.subr.bf16.mxu1 %v13491_v60  ;;  %v13492_v60 = vcombine.low %v5949_v47, %v5957_v44  ;;  %v7269_v44 = vld [vmem:[#allocation8 + $0x1080] sm:$0xff] }
 0x6fa   :  { %7176 = vmatprep.subr.bf16.mxu0 %v13445_v26  ;;  %v13383_v26 = vcombine.high %v5838_v14, %v5846_v4 }
 0x6fc   :  { %7142 = vmatpush1.bf16.msra.mxu1 %v13490_v50  ;;  %v5997_v50 = vld [vmem:[#allocation8 + $0x1030] sm:$0xff] }
 0x6fd   :  { %7177 = vmatpush1.bf16.msra.mxu0 %v13444_v42  ;;  %7143 = vmatprep.subr.bf16.mxu1 %v13507_v54  ;;  %v6005_v42 = vld [vmem:[#allocation8 + $0x1070] sm:$0x11]  ;;  %v13508_v54 = vcombine.low %v5965_v41, %v5973_v7  ;;  %v5902_v41 = vld [vmem:[#allocation8 + $0xd38] sm:$0xff] }
 0x6fe   :  { %7178 = vmatprep.subr.bf16.mxu0 %v13461_v27  ;;  %v13525_v27 = vcombine.high %v5981_v13, %v5989_v6  ;;  %v13541_v40 = vcombine.high %v5997_v50, %v6005_v42  ;;  %v5910_v7 = vld [vmem:[#allocation8 + $0xd78] sm:$0xff]  ;;  %v18770_v13 = vpack.c.bf16 %v18444_v3, %v18444_v3  ;;  %v7325_v3 = vld [vmem:[#allocation8 + $0x1240] sm:$0xff] }
 0x6ff   :  { %v13446_v6 = vcombine.low %v5902_v41, %v5910_v7 }
 0x700   :  { %7144 = vmatpush1.bf16.msra.mxu1 %v13506_v25  ;;  %v13540_v25 = vcombine.low %v5997_v50, %v6005_v42 }
 0x701   :  { %7179 = vmatpush1.bf16.msra.mxu0 %v13460_v36  ;;  %7145 = vmatprep.subr.bf16.mxu1 %v13523_v63  ;;  %v13415_v36 = vcombine.high %v5870_v2, %v5878_v22  ;;  %v6914_v63 = vand.u32 %v13541_v40, %v18562_v29 }
 0x702   :  { %v5657_v31 = vpop.f32.mrb[28].mxu1  ;;  %7180 = vmatprep.subr.bf16.mxu0 %v13477_v43  ;;  %v5894_v43 = vld [vmem:[#allocation8 + $0xcf8] sm:$0xff] }
 0x703   :  { %v18751_v19 = vadd.f32 %v5657_v31, %v18664_v16  ;;  %v5659_v30 = vpop.f32.mrb[29].mxu1  ;;  %v5854_v16 = vld [vmem:[#allocation8 + $0xbb8] sm:$0xff] }
 0x704   :  { %v18754_v15 = vadd.f32 %v5659_v30, %v18666_v5  ;;  %v5661_v23 = vpop.f32.mrb[30].mxu1  ;;  %7146 = vmatpush1.bf16.msra.mxu1 %v13522_v24  ;;  %v13382_v5 = vcombine.low %v5838_v14, %v5846_v4  ;;  %v13399_v46 = vcombine.high %v5854_v16, %v5862_v28  ;;  %v13398_v37 = vcombine.low %v5854_v16, %v5862_v28  ;;  %v7277_v24 = vld [vmem:[#allocation8 + $0x10c0] sm:$0xff] }
 0x705   :  { %7181 = vmatpush1.bf16.msra.mxu0 %v13476_v0  ;;  %v5662_v45 = vpop.f32.mrb[31].mxu1  ;;  %7147 = vmatprep.subr.bf16.mxu1 %v6908_v11  ;;  %v13431_v14 = vcombine.high %v5886_v61, %v5894_v43  ;;  %v13553_v30 = vcombine.high %v7269_v44, %v7277_v24  ;;  %v7285_v23 = vld [vmem:[#allocation8 + $0x1100] sm:$0xff] }
 0x706   :  { %7182 = vmatprep.subr.bf16.mxu0 %v13493_v10  ;;  %v6911_v10 = vand.u32 %v13540_v25, %v18562_v29  ;;  %v13552_v45 = vcombine.low %v7269_v44, %v7277_v24  ;;  %v7301_v16 = vld [vmem:[#allocation8 + $0x1180] sm:$0xff]  ;;  %v5958_v25 = vld [vmem:[#allocation8 + $0xef8] sm:$0xff] }
 0x707   :  { %v7309_v28 = vld [vmem:[#allocation8 + $0x11c0] sm:$0xff]  ;;  %v5966_v24 = vld [vmem:[#allocation8 + $0xf38] sm:$0xff] }
 0x708   :  { %7148 = vmatpush1.bf16.msra.mxu1 %v6905_v58  ;;  %v13430_v58 = vcombine.low %v5886_v61, %v5894_v43 }
 0x709   :  { %7183 = vmatpush1.bf16.msra.mxu0 %v13492_v60  ;;  %7209 = vmatprep.subr.bf16.mxu1 %v13383_v26  ;;  %v5918_v26 = vld [vmem:[#allocation8 + $0xdb8] sm:$0xff] }
 0x70a   :  { %7184 = vmatprep.subr.bf16.mxu0 %v13509_v35  ;;  %v5926_v35 = vld [vmem:[#allocation8 + $0xdf8] sm:$0xff] }
 0x70b   :  { %7160 = vmatmul.mubr.bf16.vlgmr.msra.gmra.mrb[48].mxu1 %v18702_v33  ;;  %v13463_v42 = vcombine.high %v5918_v26, %v5926_v35  ;;  %v13462_v40 = vcombine.low %v5918_v26, %v5926_v35 }
 0x70c   :  { %7210 = vmatpush1.bf16.msra.mxu1 %v13382_v5  ;;  %13551 = vmatprep.mubr.msk.bf16.mxu1 %vm4201_vm13, %v18680_v12  ;;  %v13414_v12 = vcombine.low %v5870_v2, %v5878_v22  ;;  %v13585_v5 = vcombine.high %v7301_v16, %v7309_v28  ;;  %v13584_v2 = vcombine.low %v7301_v16, %v7309_v28  ;;  %v7381_v28 = vld [vmem:[#allocation8 + $0x1400] sm:$0xff] }
 0x70d   :  { %7185 = vmatpush1.bf16.msra.mxu0 %v13508_v54  ;;  %7211 = vmatprep.subr.bf16.mxu1 %v13399_v46  ;;  %v5934_v54 = vld [vmem:[#allocation8 + $0xe38] sm:$0xff] }
 0x70e   :  { %7186 = vmatprep.subr.bf16.mxu0 %v13525_v27  ;;  %v5942_v46 = vld [vmem:[#allocation8 + $0xe78] sm:$0xff]  ;;  %v7317_v27 = vld [vmem:[#allocation8 + $0x1200] sm:$0xff] }
 0x70f   :  { %v5698_v47 = vpop.f32.mrb[32].mxu0  ;;  %v13479_v22 = vcombine.high %v5934_v54, %v5942_v46  ;;  %v13478_v61 = vcombine.low %v5934_v54, %v5942_v46  ;;  %v13600_v43 = vcombine.low %v7317_v27, %v7325_v3 }
 0x710   :  { %v18762_v1 = vadd.f32 %v5698_v47, %v18673_v32  ;;  %v5700_v0 = vpop.f32.mrb[33].mxu0  ;;  %7212 = vmatpush1.bf16.msra.mxu1 %v13398_v37  ;;  %v7293_v32 = vld [vmem:[#allocation8 + $0x1140] sm:$0xff]  ;;  %v13601_v37 = vcombine.high %v7317_v27, %v7325_v3  ;;  %v7270_v3 = vld [vmem:[#allocation8 + $0x1088] sm:$0xff] }
 0x711   :  { %v18765_v11 = vadd.f32 %v5700_v0, %v18675_v57  ;;  %v5702_v31 = vpop.f32.mrb[34].mxu0  ;;  %7187 = vmatpush1.bf16.msra.mxu0 %v13524_v48  ;;  %7213 = vmatprep.subr.bf16.mxu1 %v13415_v36  ;;  %v13447_v57 = vcombine.high %v5902_v41, %v5910_v7  ;;  %v13569_v60 = vcombine.high %v7285_v23, %v7293_v32  ;;  %v5950_v48 = vld [vmem:[#allocation8 + $0xeb8] sm:$0xff]  ;;  %v7333_v36 = vld [vmem:[#allocation8 + $0x1280] sm:$0xff] }
 0x712   :  { %v5703_v4 = vpop.f32.mrb[35].mxu0  ;;  %7188 = vmatprep.subr.bf16.mxu0 %v6914_v63  ;;  %v13568_v50 = vcombine.low %v7285_v23, %v7293_v32  ;;  %v7341_v63 = vld [vmem:[#allocation8 + $0x12c0] sm:$0xff]  ;;  %v13495_v47 = vcombine.high %v5950_v48, %v5958_v25  ;;  %v5974_v0 = vld [vmem:[#allocation8 + $0xf78] sm:$0xff] }
 0x713   :  { %v13617_v44 = vcombine.high %v7333_v36, %v7341_v63  ;;  %v7357_v31 = vld [vmem:[#allocation8 + $0x1340] sm:$0xff]  ;;  %v13511_v4 = vcombine.high %v5966_v24, %v5974_v0  ;;  %v5990_v7 = vld [vmem:[#allocation8 + $0xff8] sm:$0xff] }
 0x714   :  { %7214 = vmatpush1.bf16.msra.mxu1 %v13414_v12  ;;  %v7349_v12 = vld [vmem:[#allocation8 + $0x1300] sm:$0xff]  ;;  %v5998_v23 = vld [vmem:[#allocation8 + $0x1038] sm:$0xff] }
 0x715   :  { %7189 = vmatpush1.bf16.msra.mxu0 %v6911_v10  ;;  %7215 = vmatprep.subr.bf16.mxu1 %v13431_v14  ;;  %v13494_v10 = vcombine.low %v5950_v48, %v5958_v25  ;;  %v13616_v14 = vcombine.low %v7333_v36, %v7341_v63  ;;  %v13633_v41 = vcombine.high %v7349_v12, %v7357_v31  ;;  %v6006_v32 = vld [vmem:[#allocation8 + $0x1078] sm:$0x11]  ;;  %v7405_v48 = vld [vmem:[#allocation8 + $0x14c0] sm:$0xff] }
 0x716   :  { %8360 = vmatprep.subr.bf16.mxu0 %v13553_v30  ;;  %v5982_v30 = vld [vmem:[#allocation8 + $0xfb8] sm:$0xff]  ;;  %v13543_v35 = vcombine.high %v5998_v23, %v6006_v32 }
 0x717   :  { %v13527_v26 = vcombine.high %v5982_v30, %v5990_v7 }
 0x718   :  { %7201 = vmatmul.mubr.bf16.vlgmr.msra.gmra.mrb[52].mxu0 %v18702_v33  ;;  %7216 = vmatpush1.bf16.msra.mxu1 %v13430_v58  ;;  %v7365_v58 = vld [vmem:[#allocation8 + $0x1380] sm:$0xff]  ;;  %v6920_v54 = vand.u32 %v13543_v35, %v18562_v29  ;;  %v7326_v35 = vld [vmem:[#allocation8 + $0x1248] sm:$0xff] }
 0x719   :  { %8361 = vmatpush1.bf16.msra.mxu0 %v13552_v45  ;;  %13728 = vmatprep.mubr.msk.bf16.mxu0 %vm4201_vm13, %v18770_v13  ;;  %v7373_v45 = vld [vmem:[#allocation8 + $0x13c0] sm:$0xff] }
 0x71a   :  { %7217 = vmatprep.subr.bf16.mxu1 %v13447_v57  ;;  %8362 = vmatprep.subr.bf16.mxu0 %v13569_v60  ;;  %v13510_v57 = vcombine.low %v5966_v24, %v5974_v0  ;;  %v13632_v60 = vcombine.low %v7349_v12, %v7357_v31  ;;  %v13649_v16 = vcombine.high %v7365_v58, %v7373_v45  ;;  %v7413_v24 = vld [vmem:[#allocation8 + $0x1500] sm:$0xff]  ;;  %v7294_v0 = vld [vmem:[#allocation8 + $0x1148] sm:$0xff] }
 0x71b   :  { %v7421_v12 = vld [vmem:[#allocation8 + $0x1540] sm:$0xff] }
 0x71c   :  { %7218 = vmatpush1.bf16.msra.mxu1 %v13446_v6  ;;  %v7389_v6 = vld [vmem:[#allocation8 + $0x1440] sm:$0xff] }
 0x71d   :  { %8363 = vmatpush1.bf16.msra.mxu0 %v13568_v50  ;;  %7219 = vmatprep.subr.bf16.mxu1 %v13463_v42  ;;  %v13526_v50 = vcombine.low %v5982_v30, %v5990_v7  ;;  %v13542_v42 = vcombine.low %v5998_v23, %v6006_v32  ;;  %v13665_v27 = vcombine.high %v7381_v28, %v7389_v6  ;;  %v7429_v31 = vld [vmem:[#allocation8 + $0x1580] sm:$0xff]  ;;  %v7302_v7 = vld [vmem:[#allocation8 + $0x1188] sm:$0xff] }
 0x71e   :  { %8364 = vmatprep.subr.bf16.mxu0 %v13585_v5  ;;  %v13648_v5 = vcombine.low %v7365_v58, %v7373_v45  ;;  %v13697_v30 = vcombine.high %v7413_v24, %v7421_v12  ;;  %v7310_v23 = vld [vmem:[#allocation8 + $0x11c8] sm:$0xff]  ;;  %v13696_v58 = vcombine.low %v7413_v24, %v7421_v12  ;;  %v7303_v24 = vld [vmem:[#allocation8 + $0x1190] sm:$0xff] }
 0x71f   :  { %v6917_v63 = vand.u32 %v13542_v42, %v18562_v29  ;;  %v13586_v42 = vcombine.low %v7302_v7, %v7310_v23 }
 0x720   :  { %7220 = vmatpush1.bf16.msra.mxu1 %v13462_v40  ;;  %v7278_v40 = vld [vmem:[#allocation8 + $0x10c8] sm:$0xff] }
 0x721   :  { %8365 = vmatpush1.bf16.msra.mxu0 %v13584_v2  ;;  %7221 = vmatprep.subr.bf16.mxu1 %v13479_v22 }
 0x722   :  { %8366 = vmatprep.subr.bf16.mxu0 %v13601_v37  ;;  %v7397_v37 = vld [vmem:[#allocation8 + $0x1480] sm:$0xff] }
 0x724   :  { %7222 = vmatpush1.bf16.msra.mxu1 %v13478_v61 }
 0x725   :  { %8367 = vmatpush1.bf16.msra.mxu0 %v13600_v43  ;;  %7223 = vmatprep.subr.bf16.mxu1 %v13495_v47  ;;  %v13664_v43 = vcombine.low %v7381_v28, %v7389_v6  ;;  %v13555_v47 = vcombine.high %v7270_v3, %v7278_v40  ;;  %v7271_v28 = vld [vmem:[#allocation8 + $0x1090] sm:$0xff] }
 0x726   :  { %8368 = vmatprep.subr.bf16.mxu0 %v13617_v44  ;;  %v13681_v44 = vcombine.high %v7397_v37, %v7405_v48  ;;  %v7279_v6 = vld [vmem:[#allocation8 + $0x10d0] sm:$0xff] }
 0x728   :  { %7224 = vmatpush1.bf16.msra.mxu1 %v13494_v10  ;;  %v7437_v10 = vld [vmem:[#allocation8 + $0x15c0] sm:$0x11] }
 0x729   :  { %8369 = vmatpush1.bf16.msra.mxu0 %v13616_v14  ;;  %7225 = vmatprep.subr.bf16.mxu1 %v13511_v4  ;;  %v13680_v14 = vcombine.low %v7397_v37, %v7405_v48  ;;  %v13712_v45 = vcombine.low %v7429_v31, %v7437_v10  ;;  %v7342_v37 = vld [vmem:[#allocation8 + $0x12c8] sm:$0xff]  ;;  %v7287_v48 = vld [vmem:[#allocation8 + $0x1110] sm:$0xff] }
 0x72a   :  { %8370 = vmatprep.subr.bf16.mxu0 %v13633_v41  ;;  %v13713_v41 = vcombine.high %v7429_v31, %v7437_v10  ;;  %v7366_v10 = vld [vmem:[#allocation8 + $0x1388] sm:$0xff] }
 0x72c   :  { %7226 = vmatpush1.bf16.msra.mxu1 %v13510_v57  ;;  %v13587_v57 = vcombine.high %v7302_v7, %v7310_v23 }
 0x72d   :  { %8371 = vmatpush1.bf16.msra.mxu0 %v13632_v60  ;;  %7227 = vmatprep.subr.bf16.mxu1 %v13527_v26  ;;  %v8316_v60 = vand.u32 %v13713_v41, %v18562_v29  ;;  %v7318_v26 = vld [vmem:[#allocation8 + $0x1208] sm:$0xff] }
 0x72e   :  { %v5739_v46 = vpop.f32.mrb[32].mxu1  ;;  %8372 = vmatprep.subr.bf16.mxu0 %v13649_v16 }
 0x72f   :  { %v18777_v2 = vadd.f32 %v5739_v46, %v18686_v62  ;;  %v5741_v22 = vpop.f32.mrb[33].mxu1  ;;  %v7286_v62 = vld [vmem:[#allocation8 + $0x1108] sm:$0xff]  ;;  %v8313_v46 = vand.u32 %v13712_v45, %v18562_v29  ;;  %v7335_v45 = vld [vmem:[#allocation8 + $0x1290] sm:$0xff] }
 0x730   :  { %v18780_v25 = vadd.f32 %v5741_v22, %v18688_v9  ;;  %v5743_v36 = vpop.f32.mrb[34].mxu1  ;;  %7228 = vmatpush1.bf16.msra.mxu1 %v13526_v50  ;;  %v13554_v9 = vcombine.low %v7270_v3, %v7278_v40  ;;  %v13571_v4 = vcombine.high %v7286_v62, %v7294_v0  ;;  %v13570_v32 = vcombine.low %v7286_v62, %v7294_v0  ;;  %v7334_v22 = vld [vmem:[#allocation8 + $0x1288] sm:$0xff]  ;;  %v7311_v62 = vld [vmem:[#allocation8 + $0x11d0] sm:$0xff] }
 0x731   :  { %8373 = vmatpush1.bf16.msra.mxu0 %v13648_v5  ;;  %v5744_v61 = vpop.f32.mrb[35].mxu1  ;;  %7229 = vmatprep.subr.bf16.mxu1 %v6920_v54  ;;  %v13557_v40 = vcombine.high %v7271_v28, %v7279_v6  ;;  %v13602_v36 = vcombine.low %v7318_v26, %v7326_v35  ;;  %v13618_v0 = vcombine.low %v7334_v22, %v7342_v37 }
 0x732   :  { %8374 = vmatprep.subr.bf16.mxu0 %v13665_v27  ;;  %v13603_v27 = vcombine.high %v7318_v26, %v7326_v35  ;;  %v13619_v61 = vcombine.high %v7334_v22, %v7342_v37  ;;  %v13588_v41 = vcombine.low %v7303_v24, %v7311_v62  ;;  %v7422_v22 = vld [vmem:[#allocation8 + $0x1548] sm:$0xff] }
 0x733   :  { %v7430_v37 = vld [vmem:[#allocation8 + $0x1588] sm:$0xff] }
 0x734   :  { %7230 = vmatpush1.bf16.msra.mxu1 %v6917_v63  ;;  %v13556_v63 = vcombine.low %v7271_v28, %v7279_v6  ;;  %v7398_v28 = vld [vmem:[#allocation8 + $0x1488] sm:$0xff] }
 0x735   :  { %8375 = vmatpush1.bf16.msra.mxu0 %v13664_v43  ;;  %8401 = vmatprep.subr.bf16.mxu1 %v13555_v47  ;;  %v7350_v47 = vld [vmem:[#allocation8 + $0x1308] sm:$0xff] }
 0x736   :  { %8376 = vmatprep.subr.bf16.mxu0 %v13681_v44  ;;  %v7358_v44 = vld [vmem:[#allocation8 + $0x1348] sm:$0xff] }
 0x737   :  { %7242 = vmatmul.mubr.bf16.vlgmr.msra.gmra.mrb[52].mxu1 %v18702_v33  ;;  %v13635_v31 = vcombine.high %v7350_v47, %v7358_v44  ;;  %v7406_v6 = vld [vmem:[#allocation8 + $0x14c8] sm:$0xff] }
 0x738   :  { %8402 = vmatpush1.bf16.msra.mxu1 %v13554_v9  ;;  %13729 = vmatprep.mubr.msk.bf16.mxu1 %vm4201_vm13, %v18770_v13  ;;  %v7374_v9 = vld [vmem:[#allocation8 + $0x13c8] sm:$0xff] }
 0x739   :  { %8377 = vmatpush1.bf16.msra.mxu0 %v13680_v14  ;;  %8403 = vmatprep.subr.bf16.mxu1 %v13571_v4  ;;  %v7319_v14 = vld [vmem:[#allocation8 + $0x1210] sm:$0xff]  ;;  %v13651_v7 = vcombine.high %v7366_v10, %v7374_v9 }
 0x73a   :  { %8378 = vmatprep.subr.bf16.mxu0 %v13697_v30  ;;  %v7327_v4 = vld [vmem:[#allocation8 + $0x1250] sm:$0xff]  ;;  %v13634_v30 = vcombine.low %v7350_v47, %v7358_v44 }
 0x73b   :  { %v5780_v16 = vpop.f32.mrb[36].mxu0  ;;  %v13605_v23 = vcombine.high %v7319_v14, %v7327_v4  ;;  %v13604_v26 = vcombine.low %v7319_v14, %v7327_v4  ;;  %v7272_v14 = vld [vmem:[#allocation8 + $0x1098] sm:$0xff] }
 0x73c   :  { %v18788_v33 = vadd.f32 %v5780_v16, %v18695_v53  ;;  %v5782_v50 = vpop.f32.mrb[37].mxu0  ;;  %8404 = vmatpush1.bf16.msra.mxu1 %v13570_v32  ;;  %v7295_v53 = vld [vmem:[#allocation8 + $0x1150] sm:$0xff]  ;;  %v7382_v32 = vld [vmem:[#allocation8 + $0x1408] sm:$0xff]  ;;  %v7280_v4 = vld [vmem:[#allocation8 + $0x10d8] sm:$0xff] }
 0x73d   :  { %v18791_v5 = vadd.f32 %v5782_v50, %v18697_v18  ;;  %v5784_v54 = vpop.f32.mrb[38].mxu0  ;;  %8379 = vmatpush1.bf16.msra.mxu0 %v13696_v58  ;;  %8405 = vmatprep.subr.bf16.mxu1 %v13587_v57  ;;  %v18796_v18 = vpack.c.bf16 %v18442_v55, %v18442_v55  ;;  %v13573_v43 = vcombine.high %v7287_v48, %v7295_v53  ;;  %v7390_v58 = vld [vmem:[#allocation8 + $0x1448] sm:$0xff]  ;;  %v7343_v57 = vld [vmem:[#allocation8 + $0x12d0] sm:$0xff] }
 0x73e   :  { %v5785_v3 = vpop.f32.mrb[39].mxu0  ;;  %8380 = vmatprep.subr.bf16.mxu0 %v8316_v60  ;;  %v13572_v12 = vcombine.low %v7287_v48, %v7295_v53  ;;  %v13589_v55 = vcombine.high %v7303_v24, %v7311_v62  ;;  %v13650_v60 = vcombine.low %v7366_v10, %v7374_v9  ;;  %v13667_v35 = vcombine.high %v7382_v32, %v7390_v58  ;;  %v7351_v50 = vld [vmem:[#allocation8 + $0x1310] sm:$0xff]  ;;  %v7438_v48 = vld [vmem:[#allocation8 + $0x15c8] sm:$0x11] }
 0x73f   :  { %v13621_v16 = vcombine.high %v7335_v45, %v7343_v57  ;;  %v13666_v54 = vcombine.low %v7382_v32, %v7390_v58  ;;  %v7414_v3 = vld [vmem:[#allocation8 + $0x1508] sm:$0xff]  ;;  %v7367_v53 = vld [vmem:[#allocation8 + $0x1390] sm:$0xff]  ;;  %v13715_v47 = vcombine.high %v7430_v37, %v7438_v48 }
 0x740   :  { %8406 = vmatpush1.bf16.msra.mxu1 %v13586_v42  ;;  %v7359_v42 = vld [vmem:[#allocation8 + $0x1350] sm:$0xff] }
 0x741   :  { %8381 = vmatpush1.bf16.msra.mxu0 %v8313_v46  ;;  %8407 = vmatprep.subr.bf16.mxu1 %v13603_v27  ;;  %v13620_v46 = vcombine.low %v7335_v45, %v7343_v57  ;;  %v13683_v27 = vcombine.high %v7398_v28, %v7406_v6  ;;  %v7383_v24 = vld [vmem:[#allocation8 + $0x1410] sm:$0xff] }
 0x742   :  { %8442 = vmatprep.subr.bf16.mxu0 %v13557_v40  ;;  %v13637_v40 = vcombine.high %v7351_v50, %v7359_v42  ;;  %v7391_v62 = vld [vmem:[#allocation8 + $0x1450] sm:$0xff] }
 0x743   :  { %v13669_v9 = vcombine.high %v7383_v24, %v7391_v62 }
 0x744   :  { %8393 = vmatmul.mubr.bf16.vlgmr.msra.gmra.mrb[56].mxu0 %v18796_v18  ;;  %8408 = vmatpush1.bf16.msra.mxu1 %v13602_v36  ;;  %v7375_v36 = vld [vmem:[#allocation8 + $0x13d0] sm:$0xff] }
 0x745   :  { %8443 = vmatpush1.bf16.msra.mxu0 %v13556_v63  ;;  %13730 = vmatprep.mubr.msk.bf16.mxu0 %vm4201_vm13, %v18770_v13  ;;  %v13682_v63 = vcombine.low %v7398_v28, %v7406_v6  ;;  %v13653_v44 = vcombine.high %v7367_v53, %v7375_v36  ;;  %v7296_v28 = vld [vmem:[#allocation8 + $0x1158] sm:$0xff]  ;;  %v7423_v6 = vld [vmem:[#allocation8 + $0x1550] sm:$0xff] }
 0x746   :  { %8409 = vmatprep.subr.bf16.mxu1 %v13619_v61  ;;  %8444 = vmatprep.subr.bf16.mxu0 %v13573_v43  ;;  %v13636_v61 = vcombine.low %v7351_v50, %v7359_v42  ;;  %v13699_v43 = vcombine.high %v7414_v3, %v7422_v22  ;;  %v7431_v50 = vld [vmem:[#allocation8 + $0x1590] sm:$0xff] }
 0x747   :  { %v7439_v42 = vld [vmem:[#allocation8 + $0x15d0] sm:$0x11] }
 0x748   :  { %8410 = vmatpush1.bf16.msra.mxu1 %v13618_v0  ;;  %v13698_v0 = vcombine.low %v7414_v3, %v7422_v22  ;;  %v13717_v3 = vcombine.high %v7431_v50, %v7439_v42  ;;  %v7312_v22 = vld [vmem:[#allocation8 + $0x11d8] sm:$0xff] }
 0x749   :  { %8445 = vmatpush1.bf16.msra.mxu0 %v13572_v12  ;;  %8411 = vmatprep.subr.bf16.mxu1 %v13635_v31  ;;  %v13714_v12 = vcombine.low %v7430_v37, %v7438_v48  ;;  %v13652_v31 = vcombine.low %v7367_v53, %v7375_v36  ;;  %v13716_v53 = vcombine.low %v7431_v50, %v7439_v42  ;;  %v7368_v42 = vld [vmem:[#allocation8 + $0x1398] sm:$0xff] }
 0x74a   :  { %8446 = vmatprep.subr.bf16.mxu0 %v13589_v55  ;;  %v8322_v55 = vand.u32 %v13715_v47, %v18562_v29 }
 0x74b   :  { %v8319_v45 = vand.u32 %v13714_v12, %v18562_v29 }
 0x74c   :  { %8412 = vmatpush1.bf16.msra.mxu1 %v13634_v30 }
 0x74d   :  { %8447 = vmatpush1.bf16.msra.mxu0 %v13588_v41  ;;  %8413 = vmatprep.subr.bf16.mxu1 %v13651_v7  ;;  %v7399_v7 = vld [vmem:[#allocation8 + $0x1490] sm:$0xff] }
 0x74e   :  { %8448 = vmatprep.subr.bf16.mxu0 %v13605_v23  ;;  %v7407_v23 = vld [vmem:[#allocation8 + $0x14d0] sm:$0xff] }
 0x750   :  { %8414 = vmatpush1.bf16.msra.mxu1 %v13650_v60  ;;  %v13668_v60 = vcombine.low %v7383_v24, %v7391_v62  ;;  %v7281_v24 = vld [vmem:[#allocation8 + $0x10e0] sm:$0xff] }
 0x751   :  { %8449 = vmatpush1.bf16.msra.mxu0 %v13604_v26  ;;  %8415 = vmatprep.subr.bf16.mxu1 %v13667_v35  ;;  %v13559_v26 = vcombine.high %v7272_v14, %v7280_v4  ;;  %v13685_v35 = vcombine.high %v7399_v7, %v7407_v23 }
 0x752   :  { %8450 = vmatprep.subr.bf16.mxu0 %v13621_v16  ;;  %v7415_v16 = vld [vmem:[#allocation8 + $0x1510] sm:$0xff] }
 0x753   :  { %v13700_v48 = vcombine.low %v7415_v16, %v7423_v6 }
 0x754   :  { %8416 = vmatpush1.bf16.msra.mxu1 %v13666_v54  ;;  %v13684_v54 = vcombine.low %v7399_v7, %v7407_v23  ;;  %v7344_v7 = vld [vmem:[#allocation8 + $0x12d8] sm:$0xff]  ;;  %v7289_v23 = vld [vmem:[#allocation8 + $0x1120] sm:$0xff] }
 0x755   :  { %8451 = vmatpush1.bf16.msra.mxu0 %v13620_v46  ;;  %8417 = vmatprep.subr.bf16.mxu1 %v13683_v27  ;;  %v13701_v27 = vcombine.high %v7415_v16, %v7423_v6  ;;  %v7313_v16 = vld [vmem:[#allocation8 + $0x11e0] sm:$0xff] }
 0x756   :  { %8452 = vmatprep.subr.bf16.mxu0 %v13637_v40  ;;  %v7304_v40 = vld [vmem:[#allocation8 + $0x1198] sm:$0xff] }
 0x757   :  { %v13591_v36 = vcombine.high %v7304_v40, %v7312_v22  ;;  %v13590_v12 = vcombine.low %v7304_v40, %v7312_v22 }
 0x758   :  { %8418 = vmatpush1.bf16.msra.mxu1 %v13682_v63  ;;  %v8328_v63 = vand.u32 %v13717_v3, %v18562_v29 }
 0x759   :  { %8453 = vmatpush1.bf16.msra.mxu0 %v13636_v61  ;;  %8419 = vmatprep.subr.bf16.mxu1 %v13699_v43  ;;  %v7320_v61 = vld [vmem:[#allocation8 + $0x1218] sm:$0xff] }
 0x75a   :  { %v5821_v10 = vpop.f32.mrb[36].mxu1  ;;  %8454 = vmatprep.subr.bf16.mxu0 %v13653_v44  ;;  %v7328_v43 = vld [vmem:[#allocation8 + $0x1258] sm:$0xff]  ;;  %v7273_v44 = vld [vmem:[#allocation8 + $0x10a0] sm:$0xff] }
 0x75b   :  { %v18803_v30 = vadd.f32 %v5821_v10, %v18708_v49  ;;  %v5823_v41 = vpop.f32.mrb[37].mxu1  ;;  %v7288_v49 = vld [vmem:[#allocation8 + $0x1118] sm:$0xff]  ;;  %v8325_v10 = vand.u32 %v13716_v53, %v18562_v29  ;;  %v7337_v53 = vld [vmem:[#allocation8 + $0x12a0] sm:$0xff] }
 0x75c   :  { %v18806_v32 = vadd.f32 %v5823_v41, %v18710_v34  ;;  %v5825_v58 = vpop.f32.mrb[38].mxu1  ;;  %8420 = vmatpush1.bf16.msra.mxu1 %v13698_v0  ;;  %v13558_v34 = vcombine.low %v7272_v14, %v7280_v4  ;;  %v13575_v46 = vcombine.high %v7288_v49, %v7296_v28  ;;  %v13574_v37 = vcombine.low %v7288_v49, %v7296_v28  ;;  %v7336_v41 = vld [vmem:[#allocation8 + $0x1298] sm:$0xff] }
 0x75d   :  { %8455 = vmatpush1.bf16.msra.mxu0 %v13652_v31  ;;  %v5826_v57 = vpop.f32.mrb[39].mxu1  ;;  %8421 = vmatprep.subr.bf16.mxu1 %v8322_v55  ;;  %v13561_v4 = vcombine.high %v7273_v44, %v7281_v24  ;;  %v13606_v58 = vcombine.low %v7320_v61, %v7328_v43  ;;  %v13622_v49 = vcombine.low %v7336_v41, %v7344_v7 }
 0x75e   :  { %8456 = vmatprep.subr.bf16.mxu0 %v13669_v9  ;;  %v13607_v9 = vcombine.high %v7320_v61, %v7328_v43 }
 0x760   :  { %8422 = vmatpush1.bf16.msra.mxu1 %v8319_v45  ;;  %v13560_v45 = vcombine.low %v7273_v44, %v7281_v24  ;;  %v7400_v44 = vld [vmem:[#allocation8 + $0x1498] sm:$0xff] }
 0x761   :  { %8457 = vmatpush1.bf16.msra.mxu0 %v13668_v60  ;;  %8483 = vmatprep.subr.bf16.mxu1 %v13559_v26  ;;  %v7352_v60 = vld [vmem:[#allocation8 + $0x1318] sm:$0xff] }
 0x762   :  { %8458 = vmatprep.subr.bf16.mxu0 %v13685_v35  ;;  %v7360_v26 = vld [vmem:[#allocation8 + $0x1358] sm:$0xff]  ;;  %v7305_v35 = vld [vmem:[#allocation8 + $0x11a0] sm:$0xff] }
 0x763   :  { %8434 = vmatmul.mubr.bf16.vlgmr.msra.gmra.mrb[56].mxu1 %v18796_v18  ;;  %v13639_v6 = vcombine.high %v7352_v60, %v7360_v26  ;;  %v13593_v50 = vcombine.high %v7305_v35, %v7313_v16  ;;  %v13592_v3 = vcombine.low %v7305_v35, %v7313_v16  ;;  %v7408_v24 = vld [vmem:[#allocation8 + $0x14d8] sm:$0xff]  ;;  %v7385_v35 = vld [vmem:[#allocation8 + $0x1420] sm:$0xff] }
 0x764   :  { %8484 = vmatpush1.bf16.msra.mxu1 %v13558_v34  ;;  %13731 = vmatprep.mubr.msk.bf16.mxu1 %vm4201_vm13, %v18770_v13  ;;  %v7376_v34 = vld [vmem:[#allocation8 + $0x13d8] sm:$0xff]  ;;  %v7393_v16 = vld [vmem:[#allocation8 + $0x1460] sm:$0xff] }
 0x765   :  { %8459 = vmatpush1.bf16.msra.mxu0 %v13684_v54  ;;  %8485 = vmatprep.subr.bf16.mxu1 %v13575_v46  ;;  %v7321_v54 = vld [vmem:[#allocation8 + $0x1220] sm:$0xff]  ;;  %v13655_v40 = vcombine.high %v7368_v42, %v7376_v34 }
 0x766   :  { %8460 = vmatprep.subr.bf16.mxu0 %v13701_v27  ;;  %v7329_v46 = vld [vmem:[#allocation8 + $0x1260] sm:$0xff]  ;;  %v13638_v27 = vcombine.low %v7352_v60, %v7360_v26 }
 0x767   :  { %v6956_v47 = vpop.f32.mrb[40].mxu0  ;;  %v13609_v22 = vcombine.high %v7321_v54, %v7329_v46  ;;  %v13608_v61 = vcombine.low %v7321_v54, %v7329_v46  ;;  %v7274_v54 = vld [vmem:[#allocation8 + $0x10a8] sm:$0xff] }
 0x768   :  { %v18814_v62 = vadd.f32 %v6956_v47, %v18718_v59  ;;  %v6958_v0 = vpop.f32.mrb[41].mxu0  ;;  %8486 = vmatpush1.bf16.msra.mxu1 %v13574_v37  ;;  %v7297_v59 = vld [vmem:[#allocation8 + $0x1160] sm:$0xff]  ;;  %v7384_v37 = vld [vmem:[#allocation8 + $0x1418] sm:$0xff]  ;;  %v7282_v46 = vld [vmem:[#allocation8 + $0x10e8] sm:$0xff] }
 0x769   :  { %v18817_v31 = vadd.f32 %v6958_v0, %v18721_v38  ;;  %v6960_v55 = vpop.f32.mrb[42].mxu0  ;;  %8461 = vmatpush1.bf16.msra.mxu0 %v13700_v48  ;;  %8487 = vmatprep.subr.bf16.mxu1 %v13591_v36  ;;  %v13623_v38 = vcombine.high %v7336_v41, %v7344_v7  ;;  %v13577_v57 = vcombine.high %v7289_v23, %v7297_v59  ;;  %v7392_v48 = vld [vmem:[#allocation8 + $0x1458] sm:$0xff]  ;;  %v7345_v36 = vld [vmem:[#allocation8 + $0x12e0] sm:$0xff] }
 0x76a   :  { %v6961_v14 = vpop.f32.mrb[43].mxu0  ;;  %8462 = vmatprep.subr.bf16.mxu0 %v8328_v63  ;;  %v13576_v28 = vcombine.low %v7289_v23, %v7297_v59  ;;  %v13654_v63 = vcombine.low %v7368_v42, %v7376_v34  ;;  %v13671_v43 = vcombine.high %v7384_v37, %v7392_v48  ;;  %v13625_v47 = vcombine.high %v7337_v53, %v7345_v36  ;;  %v7353_v0 = vld [vmem:[#allocation8 + $0x1320] sm:$0xff]  ;;  %v7424_v41 = vld [vmem:[#allocation8 + $0x1558] sm:$0xff] }
 0x76b   :  { %v13670_v55 = vcombine.low %v7384_v37, %v7392_v48  ;;  %v7416_v14 = vld [vmem:[#allocation8 + $0x1518] sm:$0xff]  ;;  %v7369_v59 = vld [vmem:[#allocation8 + $0x13a0] sm:$0xff]  ;;  %v13673_v34 = vcombine.high %v7385_v35, %v7393_v16 }
 0x76c   :  { %8488 = vmatpush1.bf16.msra.mxu1 %v13590_v12  ;;  %v7361_v12 = vld [vmem:[#allocation8 + $0x1360] sm:$0xff]  ;;  %v7432_v7 = vld [vmem:[#allocation8 + $0x1598] sm:$0xff] }
 0x76d   :  { %8463 = vmatpush1.bf16.msra.mxu0 %v8325_v10  ;;  %8489 = vmatprep.subr.bf16.mxu1 %v13607_v9  ;;  %v13624_v10 = vcombine.low %v7337_v53, %v7345_v36  ;;  %v13687_v9 = vcombine.high %v7400_v44, %v7408_v24  ;;  %v7440_v23 = vld [vmem:[#allocation8 + $0x15d8] sm:$0x11] }
 0x76e   :  { %8524 = vmatprep.subr.bf16.mxu0 %v13561_v4  ;;  %v13641_v4 = vcombine.high %v7353_v0, %v7361_v12  ;;  %v13719_v60 = vcombine.high %v7432_v7, %v7440_v23 }
 0x770   :  { %8475 = vmatmul.mubr.bf16.vlgmr.msra.gmra.mrb[60].mxu0 %v18796_v18  ;;  %8490 = vmatpush1.bf16.msra.mxu1 %v13606_v58  ;;  %v7377_v58 = vld [vmem:[#allocation8 + $0x13e0] sm:$0xff] }
 0x771   :  { %8525 = vmatpush1.bf16.msra.mxu0 %v13560_v45  ;;  %13732 = vmatprep.mubr.msk.bf16.mxu0 %vm4201_vm13, %v18770_v13  ;;  %v13686_v45 = vcombine.low %v7400_v44, %v7408_v24  ;;  %v13657_v26 = vcombine.high %v7369_v59, %v7377_v58  ;;  %v7298_v44 = vld [vmem:[#allocation8 + $0x1168] sm:$0xff]  ;;  %v7425_v24 = vld [vmem:[#allocation8 + $0x1560] sm:$0xff] }
 0x772   :  { %8491 = vmatprep.subr.bf16.mxu1 %v13623_v38  ;;  %8526 = vmatprep.subr.bf16.mxu0 %v13577_v57  ;;  %v13640_v38 = vcombine.low %v7353_v0, %v7361_v12  ;;  %v13703_v57 = vcombine.high %v7416_v14, %v7424_v41  ;;  %v7433_v0 = vld [vmem:[#allocation8 + $0x15a0] sm:$0xff] }
 0x773   :  { %v7441_v12 = vld [vmem:[#allocation8 + $0x15e0] sm:$0x11] }
 0x774   :  { %8492 = vmatpush1.bf16.msra.mxu1 %v13622_v49  ;;  %v13702_v49 = vcombine.low %v7416_v14, %v7424_v41  ;;  %v13721_v14 = vcombine.high %v7433_v0, %v7441_v12  ;;  %v7314_v41 = vld [vmem:[#allocation8 + $0x11e8] sm:$0xff] }
 0x775   :  { %8527 = vmatpush1.bf16.msra.mxu0 %v13576_v28  ;;  %8493 = vmatprep.subr.bf16.mxu1 %v13639_v6  ;;  %v13718_v28 = vcombine.low %v7432_v7, %v7440_v23  ;;  %v13656_v6 = vcombine.low %v7369_v59, %v7377_v58  ;;  %v13720_v59 = vcombine.low %v7433_v0, %v7441_v12  ;;  %v7370_v12 = vld [vmem:[#allocation8 + $0x13a8] sm:$0xff] }
 0x776   :  { %8528 = vmatprep.subr.bf16.mxu0 %v13593_v50  ;;  %v8334_v50 = vand.u32 %v13719_v60, %v18562_v29 }
 0x777   :  { %v8331_v53 = vand.u32 %v13718_v28, %v18562_v29 }
 0x778   :  { %8494 = vmatpush1.bf16.msra.mxu1 %v13638_v27 }
 0x779   :  { %8529 = vmatpush1.bf16.msra.mxu0 %v13592_v3  ;;  %8495 = vmatprep.subr.bf16.mxu1 %v13655_v40  ;;  %v7401_v40 = vld [vmem:[#allocation8 + $0x14a0] sm:$0xff] }
 0x77a   :  { %8530 = vmatprep.subr.bf16.mxu0 %v13609_v22  ;;  %v7409_v22 = vld [vmem:[#allocation8 + $0x14e0] sm:$0xff] }
 0x77c   :  { %8496 = vmatpush1.bf16.msra.mxu1 %v13654_v63  ;;  %v13672_v63 = vcombine.low %v7385_v35, %v7393_v16  ;;  %v7283_v35 = vld [vmem:[#allocation8 + $0x10f0] sm:$0xff] }
 0x77d   :  { %8531 = vmatpush1.bf16.msra.mxu0 %v13608_v61  ;;  %8497 = vmatprep.subr.bf16.mxu1 %v13671_v43  ;;  %v13563_v61 = vcombine.high %v7274_v54, %v7282_v46  ;;  %v13689_v43 = vcombine.high %v7401_v40, %v7409_v22 }
 0x77e   :  { %8532 = vmatprep.subr.bf16.mxu0 %v13625_v47  ;;  %v7417_v47 = vld [vmem:[#allocation8 + $0x1520] sm:$0xff] }
 0x77f   :  { %v13704_v23 = vcombine.low %v7417_v47, %v7425_v24 }
 0x780   :  { %8498 = vmatpush1.bf16.msra.mxu1 %v13670_v55  ;;  %v13688_v55 = vcombine.low %v7401_v40, %v7409_v22  ;;  %v7346_v40 = vld [vmem:[#allocation8 + $0x12e8] sm:$0xff]  ;;  %v7291_v22 = vld [vmem:[#allocation8 + $0x1130] sm:$0xff] }
 0x781   :  { %8533 = vmatpush1.bf16.msra.mxu0 %v13624_v10  ;;  %8499 = vmatprep.subr.bf16.mxu1 %v13687_v9  ;;  %v13705_v9 = vcombine.high %v7417_v47, %v7425_v24  ;;  %v7315_v47 = vld [vmem:[#allocation8 + $0x11f0] sm:$0xff] }
 0x782   :  { %8534 = vmatprep.subr.bf16.mxu0 %v13641_v4  ;;  %v7306_v4 = vld [vmem:[#allocation8 + $0x11a8] sm:$0xff] }
 0x783   :  { %v13595_v58 = vcombine.high %v7306_v4, %v7314_v41  ;;  %v13594_v28 = vcombine.low %v7306_v4, %v7314_v41 }
 0x784   :  { %8500 = vmatpush1.bf16.msra.mxu1 %v13686_v45  ;;  %v8340_v45 = vand.u32 %v13721_v14, %v18562_v29 }
 0x785   :  { %8535 = vmatpush1.bf16.msra.mxu0 %v13640_v38  ;;  %8501 = vmatprep.subr.bf16.mxu1 %v13703_v57  ;;  %v7322_v38 = vld [vmem:[#allocation8 + $0x1228] sm:$0xff] }
 0x786   :  { %v6997_v42 = vpop.f32.mrb[40].mxu1  ;;  %8536 = vmatprep.subr.bf16.mxu0 %v13657_v26  ;;  %v7330_v57 = vld [vmem:[#allocation8 + $0x1268] sm:$0xff]  ;;  %v7275_v26 = vld [vmem:[#allocation8 + $0x10b0] sm:$0xff] }
 0x787   :  { %v18825_v27 = vadd.f32 %v6997_v42, %v18729_v56  ;;  %v6999_v3 = vpop.f32.mrb[41].mxu1  ;;  %v7290_v56 = vld [vmem:[#allocation8 + $0x1128] sm:$0xff]  ;;  %v8337_v42 = vand.u32 %v13720_v59, %v18562_v29  ;;  %v7339_v59 = vld [vmem:[#allocation8 + $0x12b0] sm:$0xff] }
 0x788   :  { %v18828_v37 = vadd.f32 %v6999_v3, %v18732_v51  ;;  %v7001_v48 = vpop.f32.mrb[42].mxu1  ;;  %8502 = vmatpush1.bf16.msra.mxu1 %v13702_v49  ;;  %v13562_v51 = vcombine.low %v7274_v54, %v7282_v46  ;;  %v13579_v10 = vcombine.high %v7290_v56, %v7298_v44  ;;  %v13578_v7 = vcombine.low %v7290_v56, %v7298_v44  ;;  %v7338_v3 = vld [vmem:[#allocation8 + $0x12a8] sm:$0xff] }
 0x789   :  { %8537 = vmatpush1.bf16.msra.mxu0 %v13656_v6  ;;  %v7002_v36 = vpop.f32.mrb[43].mxu1  ;;  %8503 = vmatprep.subr.bf16.mxu1 %v8334_v50  ;;  %v13565_v46 = vcombine.high %v7275_v26, %v7283_v35  ;;  %v13610_v48 = vcombine.low %v7322_v38, %v7330_v57  ;;  %v13626_v56 = vcombine.low %v7338_v3, %v7346_v40 }
 0x78a   :  { %8538 = vmatprep.subr.bf16.mxu0 %v13673_v34  ;;  %v13611_v34 = vcombine.high %v7322_v38, %v7330_v57 }
 0x78c   :  { %8504 = vmatpush1.bf16.msra.mxu1 %v8331_v53  ;;  %v13564_v53 = vcombine.low %v7275_v26, %v7283_v35  ;;  %v7402_v26 = vld [vmem:[#allocation8 + $0x14a8] sm:$0xff] }
 0x78d   :  { %8539 = vmatpush1.bf16.msra.mxu0 %v13672_v63  ;;  %8565 = vmatprep.subr.bf16.mxu1 %v13563_v61  ;;  %v7354_v63 = vld [vmem:[#allocation8 + $0x1328] sm:$0xff] }
 0x78e   :  { %8540 = vmatprep.subr.bf16.mxu0 %v13689_v43  ;;  %v7362_v61 = vld [vmem:[#allocation8 + $0x1368] sm:$0xff]  ;;  %v7307_v43 = vld [vmem:[#allocation8 + $0x11b0] sm:$0xff] }
 0x78f   :  { %8516 = vmatmul.mubr.bf16.vlgmr.msra.gmra.mrb[60].mxu1 %v18796_v18  ;;  %v13643_v24 = vcombine.high %v7354_v63, %v7362_v61  ;;  %v13597_v0 = vcombine.high %v7307_v43, %v7315_v47  ;;  %v13596_v14 = vcombine.low %v7307_v43, %v7315_v47  ;;  %v7410_v35 = vld [vmem:[#allocation8 + $0x14e8] sm:$0xff]  ;;  %v7387_v43 = vld [vmem:[#allocation8 + $0x1430] sm:$0xff] }
 0x790   :  { %8566 = vmatpush1.bf16.msra.mxu1 %v13562_v51  ;;  %13733 = vmatprep.mubr.msk.bf16.mxu1 %vm4201_vm13, %v18770_v13  ;;  %v7378_v51 = vld [vmem:[#allocation8 + $0x13e8] sm:$0xff]  ;;  %v7395_v47 = vld [vmem:[#allocation8 + $0x1470] sm:$0xff] }
 0x791   :  { %8541 = vmatpush1.bf16.msra.mxu0 %v13688_v55  ;;  %8567 = vmatprep.subr.bf16.mxu1 %v13579_v10  ;;  %v7323_v55 = vld [vmem:[#allocation8 + $0x1230] sm:$0xff]  ;;  %v13659_v4 = vcombine.high %v7370_v12, %v7378_v51 }
 0x792   :  { %8542 = vmatprep.subr.bf16.mxu0 %v13705_v9  ;;  %v7331_v10 = vld [vmem:[#allocation8 + $0x1270] sm:$0xff]  ;;  %v13642_v9 = vcombine.low %v7354_v63, %v7362_v61 }
 0x793   :  { %v7038_v60 = vpop.f32.mrb[44].mxu0  ;;  %v13613_v41 = vcombine.high %v7323_v55, %v7331_v10  ;;  %v13612_v38 = vcombine.low %v7323_v55, %v7331_v10  ;;  %v7276_v55 = vld [vmem:[#allocation8 + $0x10b8] sm:$0xff] }
 0x794   :  { %v18836_v16 = vadd.f32 %v7038_v60, %v18740_v39  ;;  %v7040_v49 = vpop.f32.mrb[45].mxu0  ;;  %8568 = vmatpush1.bf16.msra.mxu1 %v13578_v7  ;;  %v7299_v39 = vld [vmem:[#allocation8 + $0x1170] sm:$0xff]  ;;  %v7386_v7 = vld [vmem:[#allocation8 + $0x1428] sm:$0xff]  ;;  %v7284_v10 = vld [vmem:[#allocation8 + $0x10f8] sm:$0xff] }
 0x795   :  { %v18839_v6 = vadd.f32 %v7040_v49, %v18743_v8  ;;  %v7042_v50 = vpop.f32.mrb[46].mxu0  ;;  %8543 = vmatpush1.bf16.msra.mxu0 %v13704_v23  ;;  %8569 = vmatprep.subr.bf16.mxu1 %v13595_v58  ;;  %v13627_v8 = vcombine.high %v7338_v3, %v7346_v40  ;;  %v13581_v36 = vcombine.high %v7291_v22, %v7299_v39  ;;  %v7394_v23 = vld [vmem:[#allocation8 + $0x1468] sm:$0xff]  ;;  %v7347_v58 = vld [vmem:[#allocation8 + $0x12f0] sm:$0xff] }
 0x796   :  { %v7043_v54 = vpop.f32.mrb[47].mxu0  ;;  %8544 = vmatprep.subr.bf16.mxu0 %v8340_v45  ;;  %v13580_v44 = vcombine.low %v7291_v22, %v7299_v39  ;;  %v13658_v45 = vcombine.low %v7370_v12, %v7378_v51  ;;  %v13675_v57 = vcombine.high %v7386_v7, %v7394_v23  ;;  %v13629_v60 = vcombine.high %v7339_v59, %v7347_v58  ;;  %v7355_v49 = vld [vmem:[#allocation8 + $0x1330] sm:$0xff]  ;;  %v7426_v3 = vld [vmem:[#allocation8 + $0x1568] sm:$0xff] }
 0x797   :  { %v13674_v50 = vcombine.low %v7386_v7, %v7394_v23  ;;  %v7418_v54 = vld [vmem:[#allocation8 + $0x1528] sm:$0xff]  ;;  %v7371_v39 = vld [vmem:[#allocation8 + $0x13b0] sm:$0xff]  ;;  %v13677_v51 = vcombine.high %v7387_v43, %v7395_v47 }
 0x798   :  { %8570 = vmatpush1.bf16.msra.mxu1 %v13594_v28  ;;  %v7363_v28 = vld [vmem:[#allocation8 + $0x1370] sm:$0xff]  ;;  %v7434_v40 = vld [vmem:[#allocation8 + $0x15a8] sm:$0xff] }
 0x799   :  { %8545 = vmatpush1.bf16.msra.mxu0 %v8337_v42  ;;  %8571 = vmatprep.subr.bf16.mxu1 %v13611_v34  ;;  %v13628_v42 = vcombine.low %v7339_v59, %v7347_v58  ;;  %v13691_v34 = vcombine.high %v7402_v26, %v7410_v35  ;;  %v7442_v22 = vld [vmem:[#allocation8 + $0x15e8] sm:$0x11] }
 0x79a   :  { %8606 = vmatprep.subr.bf16.mxu0 %v13565_v46  ;;  %v13645_v46 = vcombine.high %v7355_v49, %v7363_v28  ;;  %v13723_v63 = vcombine.high %v7434_v40, %v7442_v22 }
 0x79c   :  { %8557 = vmatmul.mubr.bf16.vlgmr.msra.gmra.mrb[64].mxu0 %v18796_v18  ;;  %8572 = vmatpush1.bf16.msra.mxu1 %v13610_v48  ;;  %v7379_v48 = vld [vmem:[#allocation8 + $0x13f0] sm:$0xff] }
 0x79d   :  { %8607 = vmatpush1.bf16.msra.mxu0 %v13564_v53  ;;  %13734 = vmatprep.mubr.msk.bf16.mxu0 %vm4201_vm13, %v18770_v13  ;;  %v13690_v53 = vcombine.low %v7402_v26, %v7410_v35  ;;  %v13661_v61 = vcombine.high %v7371_v39, %v7379_v48  ;;  %v7300_v26 = vld [vmem:[#allocation8 + $0x1178] sm:$0xff]  ;;  %v7427_v35 = vld [vmem:[#allocation8 + $0x1570] sm:$0xff] }
 0x79e   :  { %8573 = vmatprep.subr.bf16.mxu1 %v13627_v8  ;;  %8608 = vmatprep.subr.bf16.mxu0 %v13581_v36  ;;  %v13644_v8 = vcombine.low %v7355_v49, %v7363_v28  ;;  %v13707_v36 = vcombine.high %v7418_v54, %v7426_v3  ;;  %v7435_v49 = vld [vmem:[#allocation8 + $0x15b0] sm:$0xff] }
 0x79f   :  { %v7443_v28 = vld [vmem:[#allocation8 + $0x15f0] sm:$0x11] }
 0x7a0   :  { %8574 = vmatpush1.bf16.msra.mxu1 %v13626_v56  ;;  %v13706_v56 = vcombine.low %v7418_v54, %v7426_v3  ;;  %v13725_v54 = vcombine.high %v7435_v49, %v7443_v28  ;;  %v7316_v3 = vld [vmem:[#allocation8 + $0x11f8] sm:$0xff] }
 0x7a1   :  { %8609 = vmatpush1.bf16.msra.mxu0 %v13580_v44  ;;  %8575 = vmatprep.subr.bf16.mxu1 %v13643_v24  ;;  %v13722_v44 = vcombine.low %v7434_v40, %v7442_v22  ;;  %v13660_v24 = vcombine.low %v7371_v39, %v7379_v48  ;;  %v13724_v39 = vcombine.low %v7435_v49, %v7443_v28  ;;  %v7372_v28 = vld [vmem:[#allocation8 + $0x13b8] sm:$0xff] }
 0x7a2   :  { %8610 = vmatprep.subr.bf16.mxu0 %v13597_v0  ;;  %v8346_v0 = vand.u32 %v13723_v63, %v18562_v29 }
 0x7a3   :  { %v8343_v59 = vand.u32 %v13722_v44, %v18562_v29 }
 0x7a4   :  { %8576 = vmatpush1.bf16.msra.mxu1 %v13642_v9 }
 0x7a5   :  { %8611 = vmatpush1.bf16.msra.mxu0 %v13596_v14  ;;  %8577 = vmatprep.subr.bf16.mxu1 %v13659_v4  ;;  %v7403_v4 = vld [vmem:[#allocation8 + $0x14b0] sm:$0xff] }
 0x7a6   :  { %8612 = vmatprep.subr.bf16.mxu0 %v13613_v41  ;;  %v7411_v41 = vld [vmem:[#allocation8 + $0x14f0] sm:$0xff] }
 0x7a8   :  { %8578 = vmatpush1.bf16.msra.mxu1 %v13658_v45  ;;  %v13676_v45 = vcombine.low %v7387_v43, %v7395_v47  ;;  %v8715_v43 = vld [vmem:[#allocation8 + $0x1640] sm:$0xff] }
 0x7a9   :  { %8613 = vmatpush1.bf16.msra.mxu0 %v13612_v38  ;;  %8579 = vmatprep.subr.bf16.mxu1 %v13675_v57  ;;  %v13567_v38 = vcombine.high %v7276_v55, %v7284_v10  ;;  %v13693_v57 = vcombine.high %v7403_v4, %v7411_v41 }
 0x7aa   :  { %8614 = vmatprep.subr.bf16.mxu0 %v13629_v60  ;;  %v7419_v60 = vld [vmem:[#allocation8 + $0x1530] sm:$0xff] }
 0x7ab   :  { %v13708_v22 = vcombine.low %v7419_v60, %v7427_v35 }
 0x7ac   :  { %8580 = vmatpush1.bf16.msra.mxu1 %v13674_v50  ;;  %v13692_v50 = vcombine.low %v7403_v4, %v7411_v41  ;;  %v8723_v4 = vld [vmem:[#allocation8 + $0x1680] sm:$0xff] }
 0x7ad   :  { %8615 = vmatpush1.bf16.msra.mxu0 %v13628_v42  ;;  %8581 = vmatprep.subr.bf16.mxu1 %v13691_v34  ;;  %v13709_v34 = vcombine.high %v7419_v60, %v7427_v35  ;;  %v8747_v60 = vld [vmem:[#allocation8 + $0x1740] sm:$0xff] }
 0x7ae   :  { %8616 = vmatprep.subr.bf16.mxu0 %v13645_v46  ;;  %v7308_v46 = vld [vmem:[#allocation8 + $0x11b8] sm:$0xff] }
 0x7af   :  { %v13599_v48 = vcombine.high %v7308_v46, %v7316_v3 }
 0x7b0   :  { %8582 = vmatpush1.bf16.msra.mxu1 %v13690_v53  ;;  %v8352_v53 = vand.u32 %v13725_v54, %v18562_v29 }
 0x7b1   :  { %8617 = vmatpush1.bf16.msra.mxu0 %v13644_v8  ;;  %8583 = vmatprep.subr.bf16.mxu1 %v13707_v36  ;;  %v7324_v8 = vld [vmem:[#allocation8 + $0x1238] sm:$0xff] }
 0x7b2   :  { %v7079_v12 = vpop.f32.mrb[44].mxu1  ;;  %8618 = vmatprep.subr.bf16.mxu0 %v13661_v61  ;;  %v7332_v36 = vld [vmem:[#allocation8 + $0x1278] sm:$0xff]  ;;  %v8707_v61 = vld [vmem:[#allocation8 + $0x1600] sm:$0xff] }
 0x7b3   :  { %v18847_v9 = vadd.f32 %v7079_v12, %v18751_v19  ;;  %v7081_v14 = vpop.f32.mrb[45].mxu1  ;;  %v7292_v19 = vld [vmem:[#allocation8 + $0x1138] sm:$0xff]  ;;  %v13615_v12 = vcombine.high %v7324_v8, %v7332_v36  ;;  %v13614_v41 = vcombine.low %v7324_v8, %v7332_v36 }
 0x7b4   :  { %v18850_v7 = vadd.f32 %v7081_v14, %v18754_v15  ;;  %v7083_v23 = vpop.f32.mrb[46].mxu1  ;;  %8584 = vmatpush1.bf16.msra.mxu1 %v13706_v56  ;;  %v13566_v15 = vcombine.low %v7276_v55, %v7284_v10  ;;  %v13583_v42 = vcombine.high %v7292_v19, %v7300_v26  ;;  %v13582_v40 = vcombine.low %v7292_v19, %v7300_v26  ;;  %v7340_v10 = vld [vmem:[#allocation8 + $0x12b8] sm:$0xff] }
 0x7b5   :  { %8619 = vmatpush1.bf16.msra.mxu0 %v13660_v24  ;;  %v7084_v58 = vpop.f32.mrb[47].mxu1  ;;  %8585 = vmatprep.subr.bf16.mxu1 %v8346_v0  ;;  %v8349_v0 = vand.u32 %v13724_v39, %v18562_v29  ;;  %v13737_v55 = vcombine.high %v8707_v61, %v8715_v43  ;;  %v7348_v14 = vld [vmem:[#allocation8 + $0x12f8] sm:$0xff]  ;;  %v13736_v23 = vcombine.low %v8707_v61, %v8715_v43  ;;  %v8779_v39 = vld [vmem:[#allocation8 + $0x1840] sm:$0xff] }
 0x7b6   :  { %8620 = vmatprep.subr.bf16.mxu0 %v13677_v51  ;;  %v7356_v58 = vld [vmem:[#allocation8 + $0x1338] sm:$0xff]  ;;  %v13630_v19 = vcombine.low %v7340_v10, %v7348_v14  ;;  %v8787_v43 = vld [vmem:[#allocation8 + $0x1880] sm:$0xff] }
 0x7b7   :  { %v7412_v61 = vld [vmem:[#allocation8 + $0x14f8] sm:$0xff] }
 0x7b8   :  { %8586 = vmatpush1.bf16.msra.mxu1 %v8343_v59 }
 0x7b9   :  { %8621 = vmatpush1.bf16.msra.mxu0 %v13676_v45  ;;  %8647 = vmatprep.subr.bf16.mxu1 %v13567_v38  ;;  %v7364_v45 = vld [vmem:[#allocation8 + $0x1378] sm:$0xff]  ;;  %v18866_v38 = vpack.c.bf16 %v18617_v20, %v18617_v20  ;;  %v8763_v20 = vld [vmem:[#allocation8 + $0x17c0] sm:$0xff] }
 0x7ba   :  { %8622 = vmatprep.subr.bf16.mxu0 %v13693_v57  ;;  %v8739_v57 = vld [vmem:[#allocation8 + $0x1700] sm:$0xff]  ;;  %v13647_v35 = vcombine.high %v7356_v58, %v7364_v45 }
 0x7bb   :  { %8598 = vmatmul.mubr.bf16.vlgmr.msra.gmra.mrb[64].mxu1 %v18796_v18  ;;  %v13769_v49 = vcombine.high %v8739_v57, %v8747_v60 }
 0x7bc   :  { %8648 = vmatpush1.bf16.msra.mxu1 %v13566_v15  ;;  %13735 = vmatprep.mubr.msk.bf16.mxu1 %vm4201_vm13, %v18770_v13  ;;  %v13598_v13 = vcombine.low %v7308_v46, %v7316_v3  ;;  %v7380_v15 = vld [vmem:[#allocation8 + $0x13f8] sm:$0xff] }
 0x7bd   :  { %8623 = vmatpush1.bf16.msra.mxu0 %v13692_v50  ;;  %8649 = vmatprep.subr.bf16.mxu1 %v13583_v42  ;;  %v8755_v50 = vld [vmem:[#allocation8 + $0x1780] sm:$0xff]  ;;  %v13646_v42 = vcombine.low %v7356_v58, %v7364_v45  ;;  %v13663_v54 = vcombine.high %v7372_v28, %v7380_v15  ;;  %v7388_v3 = vld [vmem:[#allocation8 + $0x1438] sm:$0xff] }
 0x7be   :  { %8624 = vmatprep.subr.bf16.mxu0 %v13709_v34  ;;  %v13768_v34 = vcombine.low %v8739_v57, %v8747_v60  ;;  %v13785_v46 = vcombine.high %v8755_v50, %v8763_v20  ;;  %v8819_v45 = vld [vmem:[#allocation8 + $0x1980] sm:$0xff] }
 0x7bf   :  { %v7120_v63 = vpop.f32.mrb[48].mxu0  ;;  %v8827_v57 = vld [vmem:[#allocation8 + $0x19c0] sm:$0xff] }
 0x7c0   :  { %v18858_v47 = vadd.f32 %v7120_v63, %v18762_v1  ;;  %v7122_v56 = vpop.f32.mrb[49].mxu0  ;;  %8650 = vmatpush1.bf16.msra.mxu1 %v13582_v40  ;;  %v8731_v1 = vld [vmem:[#allocation8 + $0x16c0] sm:$0xff]  ;;  %v7396_v40 = vld [vmem:[#allocation8 + $0x1478] sm:$0xff] }
 0x7c1   :  { %v18861_v44 = vadd.f32 %v7122_v56, %v18765_v11  ;;  %v7124_v24 = vpop.f32.mrb[50].mxu0  ;;  %8625 = vmatpush1.bf16.msra.mxu0 %v13708_v22  ;;  %8651 = vmatprep.subr.bf16.mxu1 %v13599_v48  ;;  %v13631_v11 = vcombine.high %v7340_v10, %v7348_v14  ;;  %v13753_v59 = vcombine.high %v8723_v4, %v8731_v1  ;;  %v8771_v22 = vld [vmem:[#allocation8 + $0x1800] sm:$0xff]  ;;  %v7404_v63 = vld [vmem:[#allocation8 + $0x14b8] sm:$0xff] }
 0x7c2   :  { %v7125_v51 = vpop.f32.mrb[51].mxu0  ;;  %8626 = vmatprep.subr.bf16.mxu0 %v8352_v53  ;;  %v13752_v26 = vcombine.low %v8723_v4, %v8731_v1  ;;  %v13662_v48 = vcombine.low %v7372_v28, %v7380_v15  ;;  %v13784_v53 = vcombine.low %v8755_v50, %v8763_v20  ;;  %v13679_v8 = vcombine.high %v7388_v3, %v7396_v40  ;;  %v8795_v56 = vld [vmem:[#allocation8 + $0x18c0] sm:$0xff]  ;;  %v7436_v10 = vld [vmem:[#allocation8 + $0x15b8] sm:$0xff]  ;;  %v8708_v15 = vld [vmem:[#allocation8 + $0x1608] sm:$0xff] }
 0x7c3   :  { %v13801_v36 = vcombine.high %v8771_v22, %v8779_v39  ;;  %v13800_v24 = vcombine.low %v8771_v22, %v8779_v39  ;;  %v13817_v51 = vcombine.high %v8787_v43, %v8795_v56  ;;  %v7444_v14 = vld [vmem:[#allocation8 + $0x15f8] sm:$0x11]  ;;  %v8803_v4 = vld [vmem:[#allocation8 + $0x1900] sm:$0xff]  ;;  %v13849_v28 = vcombine.high %v8819_v45, %v8827_v57  ;;  %v8716_v50 = vld [vmem:[#allocation8 + $0x1648] sm:$0xff] }
 0x7c4   :  { %8652 = vmatpush1.bf16.msra.mxu1 %v13598_v13  ;;  %v13678_v13 = vcombine.low %v7388_v3, %v7396_v40  ;;  %v8811_v1 = vld [vmem:[#allocation8 + $0x1940] sm:$0xff]  ;;  %v13848_v39 = vcombine.low %v8819_v45, %v8827_v57 }
 0x7c5   :  { %8627 = vmatpush1.bf16.msra.mxu0 %v8349_v0  ;;  %8653 = vmatprep.subr.bf16.mxu1 %v13615_v12  ;;  %v13695_v0 = vcombine.high %v7404_v63, %v7412_v61  ;;  %v7420_v12 = vld [vmem:[#allocation8 + $0x1538] sm:$0xff]  ;;  %v13833_v58 = vcombine.high %v8803_v4, %v8811_v1 }
 0x7c6   :  { %9798 = vmatprep.subr.bf16.mxu0 %v13737_v55  ;;  %v7428_v55 = vld [vmem:[#allocation8 + $0x1578] sm:$0xff] }
 0x7c7   :  { %v13710_v60 = vcombine.low %v7420_v12, %v7428_v55 }
 0x7c8   :  { %8639 = vmatmul.mubr.bf16.vlgmr.msra.gmra.mrb[68].mxu0 %v18796_v18  ;;  %8654 = vmatpush1.bf16.msra.mxu1 %v13614_v41  ;;  %v13694_v41 = vcombine.low %v7404_v63, %v7412_v61  ;;  %v8859_v63 = vld [vmem:[#allocation8 + $0x1ac0] sm:$0xff] }
 0x7c9   :  { %9799 = vmatpush1.bf16.msra.mxu0 %v13736_v23  ;;  %13912 = vmatprep.mubr.msk.bf16.mxu0 %vm4201_vm13, %v18866_v38  ;;  %v13816_v23 = vcombine.low %v8787_v43, %v8795_v56  ;;  %v8867_v61 = vld [vmem:[#allocation8 + $0x1b00] sm:$0xff] }
 0x7ca   :  { %8655 = vmatprep.subr.bf16.mxu1 %v13631_v11  ;;  %9800 = vmatprep.subr.bf16.mxu0 %v13753_v59  ;;  %v13711_v11 = vcombine.high %v7420_v12, %v7428_v55  ;;  %v13727_v59 = vcombine.high %v7436_v10, %v7444_v14  ;;  %v8875_v43 = vld [vmem:[#allocation8 + $0x1b40] sm:$0x11]  ;;  %v8740_v12 = vld [vmem:[#allocation8 + $0x1708] sm:$0xff] }
 0x7cc   :  { %8656 = vmatpush1.bf16.msra.mxu1 %v13630_v19  ;;  %v13726_v19 = vcombine.low %v7436_v10, %v7444_v14  ;;  %v13896_v14 = vcombine.low %v8867_v61, %v8875_v43 }
 0x7cd   :  { %9801 = vmatpush1.bf16.msra.mxu0 %v13752_v26  ;;  %8657 = vmatprep.subr.bf16.mxu1 %v13647_v35  ;;  %v13832_v26 = vcombine.low %v8803_v4, %v8811_v1  ;;  %v8358_v35 = vand.u32 %v13727_v59, %v18562_v29  ;;  %v8709_v59 = vld [vmem:[#allocation8 + $0x1610] sm:$0xff] }
 0x7ce   :  { %9802 = vmatprep.subr.bf16.mxu0 %v13769_v49  ;;  %v8355_v40 = vand.u32 %v13726_v19, %v18562_v29 }
 0x7d0   :  { %8658 = vmatpush1.bf16.msra.mxu1 %v13646_v42 }
 0x7d1   :  { %9803 = vmatpush1.bf16.msra.mxu0 %v13768_v34  ;;  %8659 = vmatprep.subr.bf16.mxu1 %v13663_v54  ;;  %v8835_v34 = vld [vmem:[#allocation8 + $0x1a00] sm:$0xff] }
 0x7d2   :  { %9804 = vmatprep.subr.bf16.mxu0 %v13785_v46  ;;  %v8843_v54 = vld [vmem:[#allocation8 + $0x1a40] sm:$0xff] }
 0x7d3   :  { %v13864_v56 = vcombine.low %v8835_v34, %v8843_v54 }
 0x7d4   :  { %8660 = vmatpush1.bf16.msra.mxu1 %v13662_v48  ;;  %v13739_v48 = vcombine.high %v8708_v15, %v8716_v50 }
 0x7d5   :  { %9805 = vmatpush1.bf16.msra.mxu0 %v13784_v53  ;;  %8661 = vmatprep.subr.bf16.mxu1 %v13679_v8  ;;  %v13865_v53 = vcombine.high %v8835_v34, %v8843_v54  ;;  %v8851_v8 = vld [vmem:[#allocation8 + $0x1a80] sm:$0xff] }
 0x7d6   :  { %9806 = vmatprep.subr.bf16.mxu0 %v13801_v36  ;;  %v8732_v36 = vld [vmem:[#allocation8 + $0x16c8] sm:$0xff]  ;;  %v13880_v10 = vcombine.low %v8851_v8, %v8859_v63 }
 0x7d8   :  { %8662 = vmatpush1.bf16.msra.mxu1 %v13678_v13 }
 0x7d9   :  { %9807 = vmatpush1.bf16.msra.mxu0 %v13800_v24  ;;  %8663 = vmatprep.subr.bf16.mxu1 %v13695_v0  ;;  %v13881_v24 = vcombine.high %v8851_v8, %v8859_v63  ;;  %v13897_v0 = vcombine.high %v8867_v61, %v8875_v43  ;;  %v8804_v63 = vld [vmem:[#allocation8 + $0x1908] sm:$0xff]  ;;  %v8757_v43 = vld [vmem:[#allocation8 + $0x1790] sm:$0xff] }
 0x7da   :  { %9808 = vmatprep.subr.bf16.mxu0 %v13817_v51  ;;  %v8748_v51 = vld [vmem:[#allocation8 + $0x1748] sm:$0xff] }
 0x7db   :  { %v13771_v4 = vcombine.high %v8740_v12, %v8748_v51  ;;  %v9754_v1 = vand.u32 %v13897_v0, %v18562_v29  ;;  %v13770_v57 = vcombine.low %v8740_v12, %v8748_v51  ;;  %v8812_v61 = vld [vmem:[#allocation8 + $0x1948] sm:$0xff] }
 0x7dc   :  { %8664 = vmatpush1.bf16.msra.mxu1 %v13694_v41  ;;  %v8756_v41 = vld [vmem:[#allocation8 + $0x1788] sm:$0xff] }
 0x7dd   :  { %9809 = vmatpush1.bf16.msra.mxu0 %v13816_v23  ;;  %8665 = vmatprep.subr.bf16.mxu1 %v13711_v11  ;;  %v8764_v23 = vld [vmem:[#allocation8 + $0x17c8] sm:$0xff] }
 0x7de   :  { %v7161_v49 = vpop.f32.mrb[48].mxu1  ;;  %9810 = vmatprep.subr.bf16.mxu0 %v13833_v58  ;;  %v8717_v58 = vld [vmem:[#allocation8 + $0x1650] sm:$0xff]  ;;  %v13786_v34 = vcombine.low %v8756_v41, %v8764_v23  ;;  %v8820_v12 = vld [vmem:[#allocation8 + $0x1988] sm:$0xff] }
 0x7df   :  { %v18873_v20 = vadd.f32 %v7161_v49, %v18777_v2  ;;  %v7163_v42 = vpop.f32.mrb[49].mxu1  ;;  %v8724_v2 = vld [vmem:[#allocation8 + $0x1688] sm:$0xff]  ;;  %v13740_v54 = vcombine.low %v8709_v59, %v8717_v58 }
 0x7e0   :  { %v18876_v46 = vadd.f32 %v7163_v42, %v18780_v25  ;;  %v7165_v3 = vpop.f32.mrb[50].mxu1  ;;  %8666 = vmatpush1.bf16.msra.mxu1 %v13710_v60  ;;  %v13738_v25 = vcombine.low %v8708_v15, %v8716_v50  ;;  %v13755_v13 = vcombine.high %v8724_v2, %v8732_v36  ;;  %v13754_v55 = vcombine.low %v8724_v2, %v8732_v36  ;;  %v8772_v15 = vld [vmem:[#allocation8 + $0x1808] sm:$0xff]  ;;  %v8725_v42 = vld [vmem:[#allocation8 + $0x1690] sm:$0xff] }
 0x7e1   :  { %9811 = vmatpush1.bf16.msra.mxu0 %v13832_v26  ;;  %v7166_v22 = vpop.f32.mrb[51].mxu1  ;;  %8667 = vmatprep.subr.bf16.mxu1 %v8358_v35  ;;  %v9751_v26 = vand.u32 %v13896_v14, %v18562_v29  ;;  %v13787_v35 = vcombine.high %v8756_v41, %v8764_v23  ;;  %v8780_v50 = vld [vmem:[#allocation8 + $0x1848] sm:$0xff]  ;;  %v13834_v14 = vcombine.low %v8804_v63, %v8812_v61 }
 0x7e2   :  { %9812 = vmatprep.subr.bf16.mxu0 %v13849_v28  ;;  %v13741_v28 = vcombine.high %v8709_v59, %v8717_v58  ;;  %v13803_v3 = vcombine.high %v8772_v15, %v8780_v50  ;;  %v8788_v22 = vld [vmem:[#allocation8 + $0x1888] sm:$0xff]  ;;  %v13802_v8 = vcombine.low %v8772_v15, %v8780_v50  ;;  %v8789_v59 = vld [vmem:[#allocation8 + $0x1890] sm:$0xff] }
 0x7e3   :  { %v8828_v51 = vld [vmem:[#allocation8 + $0x19c8] sm:$0xff]  ;;  %v8797_v58 = vld [vmem:[#allocation8 + $0x18d0] sm:$0xff] }
 0x7e4   :  { %8668 = vmatpush1.bf16.msra.mxu1 %v8355_v40  ;;  %v8836_v23 = vld [vmem:[#allocation8 + $0x1a08] sm:$0xff]  ;;  %v8805_v50 = vld [vmem:[#allocation8 + $0x1910] sm:$0xff] }
 0x7e5   :  { %9813 = vmatpush1.bf16.msra.mxu0 %v13848_v39  ;;  %9839 = vmatprep.subr.bf16.mxu1 %v13739_v48  ;;  %v8796_v39 = vld [vmem:[#allocation8 + $0x18c8] sm:$0xff]  ;;  %v8741_v48 = vld [vmem:[#allocation8 + $0x1710] sm:$0xff] }
 0x7e6   :  { %9814 = vmatprep.subr.bf16.mxu0 %v13865_v53  ;;  %v8749_v53 = vld [vmem:[#allocation8 + $0x1750] sm:$0xff]  ;;  %v13819_v36 = vcombine.high %v8788_v22, %v8796_v39  ;;  %v8876_v15 = vld [vmem:[#allocation8 + $0x1b48] sm:$0x11] }
 0x7e7   :  { %8680 = vmatmul.mubr.bf16.vlgmr.msra.gmra.mrb[68].mxu1 %v18796_v18 }
 0x7e8   :  { %9840 = vmatpush1.bf16.msra.mxu1 %v13738_v25  ;;  %13913 = vmatprep.mubr.msk.bf16.mxu1 %vm4201_vm13, %v18866_v38  ;;  %v8765_v25 = vld [vmem:[#allocation8 + $0x17d0] sm:$0xff] }
 0x7e9   :  { %9815 = vmatpush1.bf16.msra.mxu0 %v13864_v56  ;;  %9841 = vmatprep.subr.bf16.mxu1 %v13755_v13  ;;  %v13818_v56 = vcombine.low %v8788_v22, %v8796_v39  ;;  %v13772_v13 = vcombine.low %v8741_v48, %v8749_v53  ;;  %v13789_v0 = vcombine.high %v8757_v43, %v8765_v25  ;;  %v8821_v22 = vld [vmem:[#allocation8 + $0x1990] sm:$0xff] }
 0x7ea   :  { %9816 = vmatprep.subr.bf16.mxu0 %v13881_v24  ;;  %v13835_v24 = vcombine.high %v8804_v63, %v8812_v61  ;;  %v8829_v39 = vld [vmem:[#allocation8 + $0x19d0] sm:$0xff]  ;;  %v8710_v63 = vld [vmem:[#allocation8 + $0x1618] sm:$0xff] }
 0x7eb   :  { %v7202_v11 = vpop.f32.mrb[52].mxu0  ;;  %v8718_v61 = vld [vmem:[#allocation8 + $0x1658] sm:$0xff] }
 0x7ec   :  { %v18884_v18 = vadd.f32 %v7202_v11, %v18788_v33  ;;  %v7204_v45 = vpop.f32.mrb[53].mxu0  ;;  %9842 = vmatpush1.bf16.msra.mxu1 %v13754_v55  ;;  %v8733_v33 = vld [vmem:[#allocation8 + $0x16d0] sm:$0xff]  ;;  %v8844_v11 = vld [vmem:[#allocation8 + $0x1a48] sm:$0xff] }
 0x7ed   :  { %v18887_v60 = vadd.f32 %v7204_v45, %v18791_v5  ;;  %v7206_v19 = vpop.f32.mrb[54].mxu0  ;;  %9817 = vmatpush1.bf16.msra.mxu0 %v13880_v10  ;;  %9843 = vmatprep.subr.bf16.mxu1 %v13771_v4  ;;  %v18892_v5 = vpack.c.bf16 %v18615_v21, %v18615_v21  ;;  %v13757_v40 = vcombine.high %v8725_v42, %v8733_v33  ;;  %v8773_v55 = vld [vmem:[#allocation8 + $0x1810] sm:$0xff] }
 0x7ee   :  { %v7207_v49 = vpop.f32.mrb[55].mxu0  ;;  %9818 = vmatprep.subr.bf16.mxu0 %v9754_v1  ;;  %v13756_v2 = vcombine.low %v8725_v42, %v8733_v33  ;;  %v13773_v21 = vcombine.high %v8741_v48, %v8749_v53  ;;  %v8781_v10 = vld [vmem:[#allocation8 + $0x1850] sm:$0xff]  ;;  %v13788_v4 = vcombine.low %v8757_v43, %v8765_v25  ;;  %v13851_v1 = vcombine.high %v8820_v12, %v8828_v51 }
 0x7ef   :  { %v13805_v41 = vcombine.high %v8773_v55, %v8781_v10  ;;  %v13850_v45 = vcombine.low %v8820_v12, %v8828_v51  ;;  %v13867_v19 = vcombine.high %v8836_v23, %v8844_v11  ;;  %v8860_v49 = vld [vmem:[#allocation8 + $0x1ac8] sm:$0xff]  ;;  %v8813_v42 = vld [vmem:[#allocation8 + $0x1950] sm:$0xff]  ;;  %v13866_v33 = vcombine.low %v8836_v23, %v8844_v11 }
 0x7f0   :  { %9844 = vmatpush1.bf16.msra.mxu1 %v13770_v57  ;;  %v13804_v57 = vcombine.low %v8773_v55, %v8781_v10  ;;  %v13852_v55 = vcombine.low %v8821_v22, %v8829_v39  ;;  %v13743_v10 = vcombine.high %v8710_v63, %v8718_v61  ;;  %v8869_v23 = vld [vmem:[#allocation8 + $0x1b10] sm:$0xff] }
 0x7f1   :  { %9819 = vmatpush1.bf16.msra.mxu0 %v9751_v26  ;;  %9845 = vmatprep.subr.bf16.mxu1 %v13787_v35  ;;  %v8852_v26 = vld [vmem:[#allocation8 + $0x1a88] sm:$0xff]  ;;  %v13821_v35 = vcombine.high %v8789_v59, %v8797_v58  ;;  %v8877_v11 = vld [vmem:[#allocation8 + $0x1b50] sm:$0x11] }
 0x7f2   :  { %9880 = vmatprep.subr.bf16.mxu0 %v13741_v28  ;;  %v8868_v28 = vld [vmem:[#allocation8 + $0x1b08] sm:$0xff]  ;;  %v13882_v48 = vcombine.low %v8852_v26, %v8860_v49 }
 0x7f3   :  { %v13898_v53 = vcombine.low %v8868_v28, %v8876_v15 }
 0x7f4   :  { %9831 = vmatmul.mubr.bf16.vlgmr.msra.gmra.mrb[72].mxu0 %v18892_v5  ;;  %9846 = vmatpush1.bf16.msra.mxu1 %v13786_v34  ;;  %v13820_v34 = vcombine.low %v8789_v59, %v8797_v58 }
 0x7f5   :  { %9881 = vmatpush1.bf16.msra.mxu0 %v13740_v54  ;;  %13914 = vmatprep.mubr.msk.bf16.mxu0 %vm4201_vm13, %v18866_v38  ;;  %v13883_v54 = vcombine.high %v8852_v26, %v8860_v49  ;;  %v9757_v12 = vand.u32 %v13898_v53, %v18562_v29  ;;  %v8750_v26 = vld [vmem:[#allocation8 + $0x1758] sm:$0xff] }
 0x7f6   :  { %9847 = vmatprep.subr.bf16.mxu1 %v13803_v3  ;;  %9882 = vmatprep.subr.bf16.mxu0 %v13757_v40  ;;  %v13899_v3 = vcombine.high %v8868_v28, %v8876_v15  ;;  %v13837_v40 = vcombine.high %v8805_v50, %v8813_v42  ;;  %v13900_v28 = vcombine.low %v8869_v23, %v8877_v11 }
 0x7f8   :  { %9848 = vmatpush1.bf16.msra.mxu1 %v13802_v8  ;;  %v13836_v8 = vcombine.low %v8805_v50, %v8813_v42  ;;  %v8758_v42 = vld [vmem:[#allocation8 + $0x1798] sm:$0xff] }
 0x7f9   :  { %9883 = vmatpush1.bf16.msra.mxu0 %v13756_v2  ;;  %9849 = vmatprep.subr.bf16.mxu1 %v13819_v36  ;;  %v9760_v2 = vand.u32 %v13899_v3, %v18562_v29  ;;  %v8719_v3 = vld [vmem:[#allocation8 + $0x1660] sm:$0xff] }
 0x7fa   :  { %9884 = vmatprep.subr.bf16.mxu0 %v13773_v21  ;;  %v13853_v21 = vcombine.high %v8821_v22, %v8829_v39 }
 0x7fc   :  { %9850 = vmatpush1.bf16.msra.mxu1 %v13818_v56  ;;  %v8837_v56 = vld [vmem:[#allocation8 + $0x1a10] sm:$0xff] }
 0x7fd   :  { %9885 = vmatpush1.bf16.msra.mxu0 %v13772_v13  ;;  %9851 = vmatprep.subr.bf16.mxu1 %v13835_v24  ;;  %v8845_v13 = vld [vmem:[#allocation8 + $0x1a50] sm:$0xff] }
 0x7fe   :  { %9886 = vmatprep.subr.bf16.mxu0 %v13789_v0  ;;  %v13868_v59 = vcombine.low %v8837_v56, %v8845_v13 }
 0x800   :  { %9852 = vmatpush1.bf16.msra.mxu1 %v13834_v14  ;;  %v13869_v14 = vcombine.high %v8837_v56, %v8845_v13 }
 0x801   :  { %9887 = vmatpush1.bf16.msra.mxu0 %v13788_v4  ;;  %9853 = vmatprep.subr.bf16.mxu1 %v13851_v1  ;;  %v8853_v4 = vld [vmem:[#allocation8 + $0x1a90] sm:$0xff]  ;;  %v8734_v1 = vld [vmem:[#allocation8 + $0x16d8] sm:$0xff] }
 0x802   :  { %9888 = vmatprep.subr.bf16.mxu0 %v13805_v41  ;;  %v8861_v41 = vld [vmem:[#allocation8 + $0x1ad0] sm:$0xff] }
 0x803   :  { %v13884_v49 = vcombine.low %v8853_v4, %v8861_v41 }
 0x804   :  { %9854 = vmatpush1.bf16.msra.mxu1 %v13850_v45  ;;  %v13885_v45 = vcombine.high %v8853_v4, %v8861_v41  ;;  %v8806_v41 = vld [vmem:[#allocation8 + $0x1918] sm:$0xff] }
 0x805   :  { %9889 = vmatpush1.bf16.msra.mxu0 %v13804_v57  ;;  %9855 = vmatprep.subr.bf16.mxu1 %v13867_v19  ;;  %v13901_v57 = vcombine.high %v8869_v23, %v8877_v11  ;;  %v8742_v19 = vld [vmem:[#allocation8 + $0x1718] sm:$0xff]  ;;  %v8759_v11 = vld [vmem:[#allocation8 + $0x17a0] sm:$0xff] }
 0x806   :  { %9890 = vmatprep.subr.bf16.mxu0 %v13821_v35  ;;  %v13775_v15 = vcombine.high %v8742_v19, %v8750_v26  ;;  %v13774_v39 = vcombine.low %v8742_v19, %v8750_v26  ;;  %v8814_v23 = vld [vmem:[#allocation8 + $0x1958] sm:$0xff] }
 0x807   :  { %v9766_v50 = vand.u32 %v13901_v57, %v18562_v29  ;;  %v8822_v19 = vld [vmem:[#allocation8 + $0x1998] sm:$0xff] }
 0x808   :  { %9856 = vmatpush1.bf16.msra.mxu1 %v13866_v33  ;;  %v8766_v33 = vld [vmem:[#allocation8 + $0x17d8] sm:$0xff] }
 0x809   :  { %9891 = vmatpush1.bf16.msra.mxu0 %v13820_v34  ;;  %9857 = vmatprep.subr.bf16.mxu1 %v13883_v54  ;;  %v8711_v54 = vld [vmem:[#allocation8 + $0x1620] sm:$0xff]  ;;  %v13790_v56 = vcombine.low %v8758_v42, %v8766_v33  ;;  %v8830_v26 = vld [vmem:[#allocation8 + $0x19d8] sm:$0xff] }
 0x80a   :  { %v7243_v36 = vpop.f32.mrb[52].mxu1  ;;  %9892 = vmatprep.subr.bf16.mxu0 %v13837_v40  ;;  %v13744_v13 = vcombine.low %v8711_v54, %v8719_v3 }
 0x80b   :  { %v18899_v43 = vadd.f32 %v7243_v36, %v18803_v30  ;;  %v7245_v25 = vpop.f32.mrb[53].mxu1  ;;  %v8726_v30 = vld [vmem:[#allocation8 + $0x1698] sm:$0xff] }
 0x80c   :  { %v18902_v24 = vadd.f32 %v7245_v25, %v18806_v32  ;;  %v7247_v0 = vpop.f32.mrb[54].mxu1  ;;  %9858 = vmatpush1.bf16.msra.mxu1 %v13882_v48  ;;  %v13742_v32 = vcombine.low %v8710_v63, %v8718_v61  ;;  %v13759_v58 = vcombine.high %v8726_v30, %v8734_v1  ;;  %v13758_v35 = vcombine.low %v8726_v30, %v8734_v1  ;;  %v8774_v63 = vld [vmem:[#allocation8 + $0x1818] sm:$0xff]  ;;  %v8727_v25 = vld [vmem:[#allocation8 + $0x16a0] sm:$0xff] }
 0x80d   :  { %9893 = vmatpush1.bf16.msra.mxu0 %v13836_v8  ;;  %v7248_v51 = vpop.f32.mrb[55].mxu1  ;;  %9859 = vmatprep.subr.bf16.mxu1 %v9760_v2  ;;  %v9763_v8 = vand.u32 %v13900_v28, %v18562_v29  ;;  %v13791_v2 = vcombine.high %v8758_v42, %v8766_v33  ;;  %v8782_v61 = vld [vmem:[#allocation8 + $0x1858] sm:$0xff]  ;;  %v13838_v28 = vcombine.low %v8806_v41, %v8814_v23 }
 0x80e   :  { %9894 = vmatprep.subr.bf16.mxu0 %v13853_v21  ;;  %v13745_v21 = vcombine.high %v8711_v54, %v8719_v3  ;;  %v8798_v51 = vld [vmem:[#allocation8 + $0x18d8] sm:$0xff]  ;;  %v8791_v54 = vld [vmem:[#allocation8 + $0x18a0] sm:$0xff] }
 0x80f   :  { %v8838_v33 = vld [vmem:[#allocation8 + $0x1a18] sm:$0xff]  ;;  %v8799_v3 = vld [vmem:[#allocation8 + $0x18e0] sm:$0xff] }
 0x810   :  { %9860 = vmatpush1.bf16.msra.mxu1 %v9757_v12  ;;  %v8790_v12 = vld [vmem:[#allocation8 + $0x1898] sm:$0xff] }
 0x811   :  { %9895 = vmatpush1.bf16.msra.mxu0 %v13852_v55  ;;  %9921 = vmatprep.subr.bf16.mxu1 %v13743_v10  ;;  %v8743_v55 = vld [vmem:[#allocation8 + $0x1720] sm:$0xff]  ;;  %v13823_v30 = vcombine.high %v8790_v12, %v8798_v51 }
 0x812   :  { %9896 = vmatprep.subr.bf16.mxu0 %v13869_v14  ;;  %v8751_v10 = vld [vmem:[#allocation8 + $0x1760] sm:$0xff]  ;;  %v13806_v14 = vcombine.low %v8774_v63, %v8782_v61 }
 0x813   :  { %9872 = vmatmul.mubr.bf16.vlgmr.msra.gmra.mrb[72].mxu1 %v18892_v5  ;;  %v13777_v1 = vcombine.high %v8743_v55, %v8751_v10 }
 0x814   :  { %9922 = vmatpush1.bf16.msra.mxu1 %v13742_v32  ;;  %13915 = vmatprep.mubr.msk.bf16.mxu1 %vm4201_vm13, %v18866_v38  ;;  %v8767_v32 = vld [vmem:[#allocation8 + $0x17e0] sm:$0xff] }
 0x815   :  { %9897 = vmatpush1.bf16.msra.mxu0 %v13868_v59  ;;  %9923 = vmatprep.subr.bf16.mxu1 %v13759_v58  ;;  %v13822_v59 = vcombine.low %v8790_v12, %v8798_v51  ;;  %v13776_v58 = vcombine.low %v8743_v55, %v8751_v10  ;;  %v13793_v57 = vcombine.high %v8759_v11, %v8767_v32  ;;  %v8823_v12 = vld [vmem:[#allocation8 + $0x19a0] sm:$0xff] }
 0x816   :  { %9898 = vmatprep.subr.bf16.mxu0 %v13885_v45  ;;  %v13839_v45 = vcombine.high %v8806_v41, %v8814_v23  ;;  %v8831_v51 = vld [vmem:[#allocation8 + $0x19e0] sm:$0xff]  ;;  %v8712_v41 = vld [vmem:[#allocation8 + $0x1628] sm:$0xff] }
 0x817   :  { %v8394_v34 = vpop.f32.mrb[56].mxu0  ;;  %v8720_v23 = vld [vmem:[#allocation8 + $0x1668] sm:$0xff] }
 0x818   :  { %v18910_v40 = vadd.f32 %v8394_v34, %v18814_v62  ;;  %v8396_v22 = vpop.f32.mrb[57].mxu0  ;;  %9924 = vmatpush1.bf16.msra.mxu1 %v13758_v35  ;;  %v8735_v62 = vld [vmem:[#allocation8 + $0x16e0] sm:$0xff]  ;;  %v8846_v34 = vld [vmem:[#allocation8 + $0x1a58] sm:$0xff] }
 0x819   :  { %v18913_v48 = vadd.f32 %v8396_v22, %v18817_v31  ;;  %v8398_v53 = vpop.f32.mrb[58].mxu0  ;;  %9899 = vmatpush1.bf16.msra.mxu0 %v13884_v49  ;;  %9925 = vmatprep.subr.bf16.mxu1 %v13775_v15  ;;  %v13807_v31 = vcombine.high %v8774_v63, %v8782_v61  ;;  %v13761_v0 = vcombine.high %v8727_v25, %v8735_v62  ;;  %v8775_v35 = vld [vmem:[#allocation8 + $0x1820] sm:$0xff]  ;;  %v8878_v63 = vld [vmem:[#allocation8 + $0x1b58] sm:$0x11] }
 0x81a   :  { %v8399_v36 = vpop.f32.mrb[59].mxu0  ;;  %9900 = vmatprep.subr.bf16.mxu0 %v9766_v50  ;;  %v13760_v4 = vcombine.low %v8727_v25, %v8735_v62  ;;  %v8783_v49 = vld [vmem:[#allocation8 + $0x1860] sm:$0xff]  ;;  %v13792_v15 = vcombine.low %v8759_v11, %v8767_v32  ;;  %v13855_v50 = vcombine.high %v8822_v19, %v8830_v26  ;;  %v13854_v22 = vcombine.low %v8822_v19, %v8830_v26 }
 0x81b   :  { %v13809_v42 = vcombine.high %v8775_v35, %v8783_v49  ;;  %v13871_v53 = vcombine.high %v8838_v33, %v8846_v34  ;;  %v8862_v36 = vld [vmem:[#allocation8 + $0x1ad8] sm:$0xff]  ;;  %v8807_v61 = vld [vmem:[#allocation8 + $0x1920] sm:$0xff]  ;;  %v13870_v62 = vcombine.low %v8838_v33, %v8846_v34 }
 0x81c   :  { %9926 = vmatpush1.bf16.msra.mxu1 %v13774_v39  ;;  %v13808_v39 = vcombine.low %v8775_v35, %v8783_v49  ;;  %v8815_v25 = vld [vmem:[#allocation8 + $0x1960] sm:$0xff]  ;;  %v13856_v35 = vcombine.low %v8823_v12, %v8831_v51  ;;  %v13747_v49 = vcombine.high %v8712_v41, %v8720_v23 }
 0x81d   :  { %9901 = vmatpush1.bf16.msra.mxu0 %v9763_v8  ;;  %9927 = vmatprep.subr.bf16.mxu1 %v13791_v2  ;;  %v8854_v8 = vld [vmem:[#allocation8 + $0x1a98] sm:$0xff]  ;;  %v13825_v2 = vcombine.high %v8791_v54, %v8799_v3  ;;  %v8871_v33 = vld [vmem:[#allocation8 + $0x1b20] sm:$0xff] }
 0x81e   :  { %9962 = vmatprep.subr.bf16.mxu0 %v13745_v21  ;;  %v8870_v21 = vld [vmem:[#allocation8 + $0x1b18] sm:$0xff]  ;;  %v13886_v55 = vcombine.low %v8854_v8, %v8862_v36  ;;  %v8879_v34 = vld [vmem:[#allocation8 + $0x1b60] sm:$0x11] }
 0x81f   :  { %v13902_v10 = vcombine.low %v8870_v21, %v8878_v63 }
 0x820   :  { %9913 = vmatmul.mubr.bf16.vlgmr.msra.gmra.mrb[76].mxu0 %v18892_v5  ;;  %9928 = vmatpush1.bf16.msra.mxu1 %v13790_v56  ;;  %v13824_v56 = vcombine.low %v8791_v54, %v8799_v3 }
 0x821   :  { %9963 = vmatpush1.bf16.msra.mxu0 %v13744_v13  ;;  %13916 = vmatprep.mubr.msk.bf16.mxu0 %vm4201_vm13, %v18866_v38  ;;  %v13887_v13 = vcombine.high %v8854_v8, %v8862_v36  ;;  %v9769_v19 = vand.u32 %v13902_v10, %v18562_v29  ;;  %v8752_v8 = vld [vmem:[#allocation8 + $0x1768] sm:$0xff] }
 0x822   :  { %9929 = vmatprep.subr.bf16.mxu1 %v13807_v31  ;;  %9964 = vmatprep.subr.bf16.mxu0 %v13761_v0  ;;  %v13903_v31 = vcombine.high %v8870_v21, %v8878_v63  ;;  %v13841_v0 = vcombine.high %v8807_v61, %v8815_v25  ;;  %v13904_v21 = vcombine.low %v8871_v33, %v8879_v34 }
 0x824   :  { %9930 = vmatpush1.bf16.msra.mxu1 %v13806_v14  ;;  %v13840_v14 = vcombine.low %v8807_v61, %v8815_v25  ;;  %v8760_v25 = vld [vmem:[#allocation8 + $0x17a8] sm:$0xff] }
 0x825   :  { %9965 = vmatpush1.bf16.msra.mxu0 %v13760_v4  ;;  %9931 = vmatprep.subr.bf16.mxu1 %v13823_v30  ;;  %v9772_v4 = vand.u32 %v13903_v31, %v18562_v29  ;;  %v8721_v31 = vld [vmem:[#allocation8 + $0x1670] sm:$0xff] }
 0x826   :  { %9966 = vmatprep.subr.bf16.mxu0 %v13777_v1  ;;  %v13857_v1 = vcombine.high %v8823_v12, %v8831_v51 }
 0x828   :  { %9932 = vmatpush1.bf16.msra.mxu1 %v13822_v59  ;;  %v8839_v59 = vld [vmem:[#allocation8 + $0x1a20] sm:$0xff] }
 0x829   :  { %9967 = vmatpush1.bf16.msra.mxu0 %v13776_v58  ;;  %9933 = vmatprep.subr.bf16.mxu1 %v13839_v45  ;;  %v8847_v58 = vld [vmem:[#allocation8 + $0x1a60] sm:$0xff] }
 0x82a   :  { %9968 = vmatprep.subr.bf16.mxu0 %v13793_v57  ;;  %v13872_v54 = vcombine.low %v8839_v59, %v8847_v58 }
 0x82c   :  { %9934 = vmatpush1.bf16.msra.mxu1 %v13838_v28  ;;  %v13873_v28 = vcombine.high %v8839_v59, %v8847_v58 }
 0x82d   :  { %9969 = vmatpush1.bf16.msra.mxu0 %v13792_v15  ;;  %9935 = vmatprep.subr.bf16.mxu1 %v13855_v50  ;;  %v8855_v15 = vld [vmem:[#allocation8 + $0x1aa0] sm:$0xff]  ;;  %v8736_v50 = vld [vmem:[#allocation8 + $0x16e8] sm:$0xff] }
 0x82e   :  { %9970 = vmatprep.subr.bf16.mxu0 %v13809_v42  ;;  %v8863_v42 = vld [vmem:[#allocation8 + $0x1ae0] sm:$0xff] }
 0x82f   :  { %v13888_v36 = vcombine.low %v8855_v15, %v8863_v42 }
 0x830   :  { %9936 = vmatpush1.bf16.msra.mxu1 %v13854_v22  ;;  %v13889_v22 = vcombine.high %v8855_v15, %v8863_v42  ;;  %v8808_v42 = vld [vmem:[#allocation8 + $0x1928] sm:$0xff] }
 0x831   :  { %9971 = vmatpush1.bf16.msra.mxu0 %v13808_v39  ;;  %9937 = vmatprep.subr.bf16.mxu1 %v13871_v53  ;;  %v13905_v39 = vcombine.high %v8871_v33, %v8879_v34  ;;  %v8744_v53 = vld [vmem:[#allocation8 + $0x1728] sm:$0xff]  ;;  %v8761_v34 = vld [vmem:[#allocation8 + $0x17b0] sm:$0xff] }
 0x832   :  { %9972 = vmatprep.subr.bf16.mxu0 %v13825_v2  ;;  %v13779_v63 = vcombine.high %v8744_v53, %v8752_v8  ;;  %v13778_v51 = vcombine.low %v8744_v53, %v8752_v8  ;;  %v8816_v33 = vld [vmem:[#allocation8 + $0x1968] sm:$0xff] }
 0x833   :  { %v9778_v61 = vand.u32 %v13905_v39, %v18562_v29  ;;  %v8824_v53 = vld [vmem:[#allocation8 + $0x19a8] sm:$0xff] }
 0x834   :  { %9938 = vmatpush1.bf16.msra.mxu1 %v13870_v62  ;;  %v8768_v62 = vld [vmem:[#allocation8 + $0x17e8] sm:$0xff] }
 0x835   :  { %9973 = vmatpush1.bf16.msra.mxu0 %v13824_v56  ;;  %9939 = vmatprep.subr.bf16.mxu1 %v13887_v13  ;;  %v8713_v13 = vld [vmem:[#allocation8 + $0x1630] sm:$0xff]  ;;  %v13794_v59 = vcombine.low %v8760_v25, %v8768_v62  ;;  %v8832_v8 = vld [vmem:[#allocation8 + $0x19e8] sm:$0xff] }
 0x836   :  { %v8435_v30 = vpop.f32.mrb[56].mxu1  ;;  %9974 = vmatprep.subr.bf16.mxu0 %v13841_v0  ;;  %v13748_v58 = vcombine.low %v8713_v13, %v8721_v31 }
 0x837   :  { %v18921_v11 = vadd.f32 %v8435_v30, %v18825_v27  ;;  %v8437_v32 = vpop.f32.mrb[57].mxu1  ;;  %v8728_v27 = vld [vmem:[#allocation8 + $0x16a8] sm:$0xff] }
 0x838   :  { %v18924_v45 = vadd.f32 %v8437_v32, %v18828_v37  ;;  %v8439_v57 = vpop.f32.mrb[58].mxu1  ;;  %9940 = vmatpush1.bf16.msra.mxu1 %v13886_v55  ;;  %v13746_v37 = vcombine.low %v8712_v41, %v8720_v23  ;;  %v13763_v3 = vcombine.high %v8728_v27, %v8736_v50  ;;  %v13762_v2 = vcombine.low %v8728_v27, %v8736_v50  ;;  %v8776_v41 = vld [vmem:[#allocation8 + $0x1828] sm:$0xff]  ;;  %v8729_v32 = vld [vmem:[#allocation8 + $0x16b0] sm:$0xff] }
 0x839   :  { %9975 = vmatpush1.bf16.msra.mxu0 %v13840_v14  ;;  %v8440_v26 = vpop.f32.mrb[59].mxu1  ;;  %9941 = vmatprep.subr.bf16.mxu1 %v9772_v4  ;;  %v9775_v14 = vand.u32 %v13904_v21, %v18562_v29  ;;  %v13795_v4 = vcombine.high %v8760_v25, %v8768_v62  ;;  %v8784_v23 = vld [vmem:[#allocation8 + $0x1868] sm:$0xff]  ;;  %v13842_v21 = vcombine.low %v8808_v42, %v8816_v33 }
 0x83a   :  { %9976 = vmatprep.subr.bf16.mxu0 %v13857_v1  ;;  %v13749_v1 = vcombine.high %v8713_v13, %v8721_v31  ;;  %v8800_v26 = vld [vmem:[#allocation8 + $0x18e8] sm:$0xff]  ;;  %v8793_v13 = vld [vmem:[#allocation8 + $0x18b0] sm:$0xff] }
 0x83b   :  { %v8840_v62 = vld [vmem:[#allocation8 + $0x1a28] sm:$0xff]  ;;  %v8801_v31 = vld [vmem:[#allocation8 + $0x18f0] sm:$0xff] }
 0x83c   :  { %9942 = vmatpush1.bf16.msra.mxu1 %v9769_v19  ;;  %v8792_v19 = vld [vmem:[#allocation8 + $0x18a8] sm:$0xff] }
 0x83d   :  { %9977 = vmatpush1.bf16.msra.mxu0 %v13856_v35  ;;  %10003 = vmatprep.subr.bf16.mxu1 %v13747_v49  ;;  %v8745_v35 = vld [vmem:[#allocation8 + $0x1730] sm:$0xff]  ;;  %v13827_v27 = vcombine.high %v8792_v19, %v8800_v26 }
 0x83e   :  { %9978 = vmatprep.subr.bf16.mxu0 %v13873_v28  ;;  %v8753_v49 = vld [vmem:[#allocation8 + $0x1770] sm:$0xff]  ;;  %v13810_v28 = vcombine.low %v8776_v41, %v8784_v23 }
 0x83f   :  { %9954 = vmatmul.mubr.bf16.vlgmr.msra.gmra.mrb[76].mxu1 %v18892_v5  ;;  %v13781_v50 = vcombine.high %v8745_v35, %v8753_v49 }
 0x840   :  { %10004 = vmatpush1.bf16.msra.mxu1 %v13746_v37  ;;  %13917 = vmatprep.mubr.msk.bf16.mxu1 %vm4201_vm13, %v18866_v38  ;;  %v8769_v37 = vld [vmem:[#allocation8 + $0x17f0] sm:$0xff] }
 0x841   :  { %9979 = vmatpush1.bf16.msra.mxu0 %v13872_v54  ;;  %10005 = vmatprep.subr.bf16.mxu1 %v13763_v3  ;;  %v13826_v54 = vcombine.low %v8792_v19, %v8800_v26  ;;  %v13780_v3 = vcombine.low %v8745_v35, %v8753_v49  ;;  %v13797_v39 = vcombine.high %v8761_v34, %v8769_v37  ;;  %v8825_v19 = vld [vmem:[#allocation8 + $0x19b0] sm:$0xff] }
 0x842   :  { %9980 = vmatprep.subr.bf16.mxu0 %v13889_v22  ;;  %v13843_v22 = vcombine.high %v8808_v42, %v8816_v33  ;;  %v8833_v26 = vld [vmem:[#allocation8 + $0x19f0] sm:$0xff]  ;;  %v8714_v42 = vld [vmem:[#allocation8 + $0x1638] sm:$0xff] }
 0x843   :  { %v8476_v56 = vpop.f32.mrb[60].mxu0  ;;  %v8722_v33 = vld [vmem:[#allocation8 + $0x1678] sm:$0xff] }
 0x844   :  { %v18932_v0 = vadd.f32 %v8476_v56, %v18836_v16  ;;  %v8478_v12 = vpop.f32.mrb[61].mxu0  ;;  %10006 = vmatpush1.bf16.msra.mxu1 %v13762_v2  ;;  %v8737_v16 = vld [vmem:[#allocation8 + $0x16f0] sm:$0xff]  ;;  %v8848_v56 = vld [vmem:[#allocation8 + $0x1a68] sm:$0xff] }
 0x845   :  { %v18935_v55 = vadd.f32 %v8478_v12, %v18839_v6  ;;  %v8480_v10 = vpop.f32.mrb[62].mxu0  ;;  %9981 = vmatpush1.bf16.msra.mxu0 %v13888_v36  ;;  %10007 = vmatprep.subr.bf16.mxu1 %v13779_v63  ;;  %v13811_v6 = vcombine.high %v8776_v41, %v8784_v23  ;;  %v13765_v57 = vcombine.high %v8729_v32, %v8737_v16  ;;  %v8777_v2 = vld [vmem:[#allocation8 + $0x1830] sm:$0xff]  ;;  %v8880_v41 = vld [vmem:[#allocation8 + $0x1b68] sm:$0x11] }
 0x846   :  { %v8481_v30 = vpop.f32.mrb[63].mxu0  ;;  %9982 = vmatprep.subr.bf16.mxu0 %v9778_v61  ;;  %v13764_v15 = vcombine.low %v8729_v32, %v8737_v16  ;;  %v8785_v36 = vld [vmem:[#allocation8 + $0x1870] sm:$0xff]  ;;  %v13796_v63 = vcombine.low %v8761_v34, %v8769_v37  ;;  %v13859_v61 = vcombine.high %v8824_v53, %v8832_v8  ;;  %v13858_v12 = vcombine.low %v8824_v53, %v8832_v8 }
 0x847   :  { %v13813_v25 = vcombine.high %v8777_v2, %v8785_v36  ;;  %v13875_v10 = vcombine.high %v8840_v62, %v8848_v56  ;;  %v8864_v30 = vld [vmem:[#allocation8 + $0x1ae8] sm:$0xff]  ;;  %v8809_v23 = vld [vmem:[#allocation8 + $0x1930] sm:$0xff]  ;;  %v13874_v16 = vcombine.low %v8840_v62, %v8848_v56 }
 0x848   :  { %10008 = vmatpush1.bf16.msra.mxu1 %v13778_v51  ;;  %v13812_v51 = vcombine.low %v8777_v2, %v8785_v36  ;;  %v8817_v32 = vld [vmem:[#allocation8 + $0x1970] sm:$0xff]  ;;  %v13860_v2 = vcombine.low %v8825_v19, %v8833_v26  ;;  %v13751_v36 = vcombine.high %v8714_v42, %v8722_v33 }
 0x849   :  { %9983 = vmatpush1.bf16.msra.mxu0 %v9775_v14  ;;  %10009 = vmatprep.subr.bf16.mxu1 %v13795_v4  ;;  %v8856_v14 = vld [vmem:[#allocation8 + $0x1aa8] sm:$0xff]  ;;  %v13829_v4 = vcombine.high %v8793_v13, %v8801_v31  ;;  %v8873_v62 = vld [vmem:[#allocation8 + $0x1b30] sm:$0xff] }
 0x84a   :  { %10044 = vmatprep.subr.bf16.mxu0 %v13749_v1  ;;  %v8872_v1 = vld [vmem:[#allocation8 + $0x1b28] sm:$0xff]  ;;  %v13890_v35 = vcombine.low %v8856_v14, %v8864_v30  ;;  %v8881_v56 = vld [vmem:[#allocation8 + $0x1b70] sm:$0x11] }
 0x84b   :  { %v13906_v49 = vcombine.low %v8872_v1, %v8880_v41 }
 0x84c   :  { %9995 = vmatmul.mubr.bf16.vlgmr.msra.gmra.mrb[80].mxu0 %v18892_v5  ;;  %10010 = vmatpush1.bf16.msra.mxu1 %v13794_v59  ;;  %v13828_v59 = vcombine.low %v8793_v13, %v8801_v31 }
 0x84d   :  { %10045 = vmatpush1.bf16.msra.mxu0 %v13748_v58  ;;  %13918 = vmatprep.mubr.msk.bf16.mxu0 %vm4201_vm13, %v18866_v38  ;;  %v13891_v58 = vcombine.high %v8856_v14, %v8864_v30  ;;  %v9781_v53 = vand.u32 %v13906_v49, %v18562_v29  ;;  %v8754_v14 = vld [vmem:[#allocation8 + $0x1778] sm:$0xff] }
 0x84e   :  { %10011 = vmatprep.subr.bf16.mxu1 %v13811_v6  ;;  %10046 = vmatprep.subr.bf16.mxu0 %v13765_v57  ;;  %v13907_v6 = vcombine.high %v8872_v1, %v8880_v41  ;;  %v13845_v57 = vcombine.high %v8809_v23, %v8817_v32  ;;  %v13908_v1 = vcombine.low %v8873_v62, %v8881_v56 }
 0x850   :  { %10012 = vmatpush1.bf16.msra.mxu1 %v13810_v28  ;;  %v13844_v28 = vcombine.low %v8809_v23, %v8817_v32  ;;  %v8762_v32 = vld [vmem:[#allocation8 + $0x17b8] sm:$0xff]  ;;  %v9787_v49 = vand.u32 %v13908_v1, %v18562_v29 }
 0x851   :  { %10047 = vmatpush1.bf16.msra.mxu0 %v13764_v15  ;;  %10013 = vmatprep.subr.bf16.mxu1 %v13827_v27  ;;  %v9784_v15 = vand.u32 %v13907_v6, %v18562_v29  ;;  %v10153_v6 = vld [vmem:[#allocation8 + $0x1bc0] sm:$0xff] }
 0x852   :  { %10048 = vmatprep.subr.bf16.mxu0 %v13781_v50  ;;  %v13861_v50 = vcombine.high %v8825_v19, %v8833_v26 }
 0x854   :  { %10014 = vmatpush1.bf16.msra.mxu1 %v13826_v54  ;;  %v8841_v54 = vld [vmem:[#allocation8 + $0x1a30] sm:$0xff] }
 0x855   :  { %10049 = vmatpush1.bf16.msra.mxu0 %v13780_v3  ;;  %10015 = vmatprep.subr.bf16.mxu1 %v13843_v22  ;;  %v8849_v3 = vld [vmem:[#allocation8 + $0x1a70] sm:$0xff] }
 0x856   :  { %10050 = vmatprep.subr.bf16.mxu0 %v13797_v39  ;;  %v13876_v13 = vcombine.low %v8841_v54, %v8849_v3 }
 0x858   :  { %10016 = vmatpush1.bf16.msra.mxu1 %v13842_v21  ;;  %v13877_v21 = vcombine.high %v8841_v54, %v8849_v3 }
 0x859   :  { %10051 = vmatpush1.bf16.msra.mxu0 %v13796_v63  ;;  %10017 = vmatprep.subr.bf16.mxu1 %v13859_v61  ;;  %v8857_v63 = vld [vmem:[#allocation8 + $0x1ab0] sm:$0xff]  ;;  %v8738_v61 = vld [vmem:[#allocation8 + $0x16f8] sm:$0xff] }
 0x85a   :  { %10052 = vmatprep.subr.bf16.mxu0 %v13813_v25  ;;  %v8865_v25 = vld [vmem:[#allocation8 + $0x1af0] sm:$0xff] }
 0x85b   :  { %v13892_v30 = vcombine.low %v8857_v63, %v8865_v25 }
 0x85c   :  { %10018 = vmatpush1.bf16.msra.mxu1 %v13858_v12  ;;  %v13893_v12 = vcombine.high %v8857_v63, %v8865_v25  ;;  %v8810_v25 = vld [vmem:[#allocation8 + $0x1938] sm:$0xff] }
 0x85d   :  { %10053 = vmatpush1.bf16.msra.mxu0 %v13812_v51  ;;  %10019 = vmatprep.subr.bf16.mxu1 %v13875_v10  ;;  %v13909_v51 = vcombine.high %v8873_v62, %v8881_v56  ;;  %v8746_v10 = vld [vmem:[#allocation8 + $0x1738] sm:$0xff]  ;;  %v10193_v56 = vld [vmem:[#allocation8 + $0x1d00] sm:$0xff] }
 0x85e   :  { %10054 = vmatprep.subr.bf16.mxu0 %v13829_v4  ;;  %v13783_v41 = vcombine.high %v8746_v10, %v8754_v14  ;;  %v8818_v62 = vld [vmem:[#allocation8 + $0x1978] sm:$0xff] }
 0x85f   :  { %v9790_v23 = vand.u32 %v13909_v51, %v18562_v29  ;;  %v8826_v51 = vld [vmem:[#allocation8 + $0x19b8] sm:$0xff] }
 0x860   :  { %10020 = vmatpush1.bf16.msra.mxu1 %v13874_v16  ;;  %v8770_v16 = vld [vmem:[#allocation8 + $0x17f8] sm:$0xff] }
 0x861   :  { %10055 = vmatpush1.bf16.msra.mxu0 %v13828_v59  ;;  %10021 = vmatprep.subr.bf16.mxu1 %v13891_v58  ;;  %v10145_v58 = vld [vmem:[#allocation8 + $0x1b80] sm:$0xff] }
 0x862   :  { %v8517_v27 = vpop.f32.mrb[60].mxu1  ;;  %10056 = vmatprep.subr.bf16.mxu0 %v13845_v57  ;;  %v13920_v54 = vcombine.low %v10145_v58, %v10153_v6 }
 0x863   :  { %v18943_v34 = vadd.f32 %v8517_v27, %v18847_v9  ;;  %v8519_v37 = vpop.f32.mrb[61].mxu1  ;;  %v8730_v9 = vld [vmem:[#allocation8 + $0x16b8] sm:$0xff]  ;;  %v13921_v27 = vcombine.high %v10145_v58, %v10153_v6  ;;  %v10233_v58 = vld [vmem:[#allocation8 + $0x1e40] sm:$0xff] }
 0x864   :  { %v18946_v22 = vadd.f32 %v8519_v37, %v18850_v7  ;;  %v8521_v39 = vpop.f32.mrb[62].mxu1  ;;  %10022 = vmatpush1.bf16.msra.mxu1 %v13890_v35  ;;  %v13750_v7 = vcombine.low %v8714_v42, %v8722_v33  ;;  %v13767_v31 = vcombine.high %v8730_v9, %v8738_v61  ;;  %v13766_v4 = vcombine.low %v8730_v9, %v8738_v61  ;;  %v8786_v42 = vld [vmem:[#allocation8 + $0x1878] sm:$0xff]  ;;  %v10161_v33 = vld [vmem:[#allocation8 + $0x1c00] sm:$0xff] }
 0x865   :  { %10057 = vmatpush1.bf16.msra.mxu0 %v13844_v28  ;;  %v8522_v8 = vpop.f32.mrb[63].mxu1  ;;  %10023 = vmatprep.subr.bf16.mxu1 %v9784_v15  ;;  %v13799_v28 = vcombine.high %v8762_v32, %v8770_v16  ;;  %v13798_v37 = vcombine.low %v8762_v32, %v8770_v16  ;;  %v8794_v39 = vld [vmem:[#allocation8 + $0x18b8] sm:$0xff] }
 0x866   :  { %10058 = vmatprep.subr.bf16.mxu0 %v13861_v50  ;;  %v8778_v50 = vld [vmem:[#allocation8 + $0x1838] sm:$0xff]  ;;  %v18962_v8 = vpack.c.bf16 %v18630_v52, %v18630_v52  ;;  %v10201_v52 = vld [vmem:[#allocation8 + $0x1d40] sm:$0xff] }
 0x867   :  { %v13968_v1 = vcombine.low %v10193_v56, %v10201_v52  ;;  %v8842_v32 = vld [vmem:[#allocation8 + $0x1a38] sm:$0xff] }
 0x868   :  { %10024 = vmatpush1.bf16.msra.mxu1 %v9781_v53  ;;  %v8802_v53 = vld [vmem:[#allocation8 + $0x18f8] sm:$0xff] }
 0x869   :  { %10059 = vmatpush1.bf16.msra.mxu0 %v13860_v2  ;;  %10085 = vmatprep.subr.bf16.mxu1 %v13751_v36  ;;  %v10177_v2 = vld [vmem:[#allocation8 + $0x1c80] sm:$0xff]  ;;  %v13831_v9 = vcombine.high %v8794_v39, %v8802_v53  ;;  %v8850_v16 = vld [vmem:[#allocation8 + $0x1a78] sm:$0xff] }
 0x86a   :  { %10060 = vmatprep.subr.bf16.mxu0 %v13877_v21  ;;  %v10185_v36 = vld [vmem:[#allocation8 + $0x1cc0] sm:$0xff]  ;;  %v13814_v21 = vcombine.low %v8778_v50, %v8786_v42 }
 0x86b   :  { %10036 = vmatmul.mubr.bf16.vlgmr.msra.gmra.mrb[80].mxu1 %v18892_v5  ;;  %v13953_v61 = vcombine.high %v10177_v2, %v10185_v36 }
 0x86c   :  { %10086 = vmatpush1.bf16.msra.mxu1 %v13750_v7  ;;  %13919 = vmatprep.mubr.msk.bf16.mxu1 %vm4201_vm13, %v18866_v38  ;;  %v13782_v38 = vcombine.low %v8746_v10, %v8754_v14  ;;  %v13830_v7 = vcombine.low %v8794_v39, %v8802_v53  ;;  %v8834_v10 = vld [vmem:[#allocation8 + $0x19f8] sm:$0xff]  ;;  %v10209_v14 = vld [vmem:[#allocation8 + $0x1d80] sm:$0xff] }
 0x86d   :  { %10061 = vmatpush1.bf16.msra.mxu0 %v13876_v13  ;;  %10087 = vmatprep.subr.bf16.mxu1 %v13767_v31  ;;  %v13952_v13 = vcombine.low %v10177_v2, %v10185_v36  ;;  %v13847_v31 = vcombine.high %v8810_v25, %v8818_v62  ;;  %v13862_v6 = vcombine.low %v8826_v51, %v8834_v10  ;;  %v10265_v39 = vld [vmem:[#allocation8 + $0x1f40] sm:$0xff] }
 0x86e   :  { %10062 = vmatprep.subr.bf16.mxu0 %v13893_v12  ;;  %v13969_v12 = vcombine.high %v10193_v56, %v10201_v52  ;;  %v10273_v52 = vld [vmem:[#allocation8 + $0x1f80] sm:$0xff] }
 0x86f   :  { %v8558_v59 = vpop.f32.mrb[64].mxu0 }
 0x870   :  { %v18954_v57 = vadd.f32 %v8558_v59, %v18858_v47  ;;  %v8560_v19 = vpop.f32.mrb[65].mxu0  ;;  %10088 = vmatpush1.bf16.msra.mxu1 %v13766_v4  ;;  %v10169_v47 = vld [vmem:[#allocation8 + $0x1c40] sm:$0xff] }
 0x871   :  { %v18957_v26 = vadd.f32 %v8560_v19, %v18861_v44  ;;  %v8562_v35 = vpop.f32.mrb[66].mxu0  ;;  %10063 = vmatpush1.bf16.msra.mxu0 %v13892_v30  ;;  %10089 = vmatprep.subr.bf16.mxu1 %v13783_v41  ;;  %v13815_v44 = vcombine.high %v8778_v50, %v8786_v42  ;;  %v13937_v3 = vcombine.high %v10161_v33, %v10169_v47  ;;  %v10217_v4 = vld [vmem:[#allocation8 + $0x1dc0] sm:$0xff] }
 0x872   :  { %v8563_v15 = vpop.f32.mrb[67].mxu0  ;;  %10064 = vmatprep.subr.bf16.mxu0 %v9790_v23  ;;  %v13936_v63 = vcombine.low %v10161_v33, %v10169_v47  ;;  %v13846_v30 = vcombine.low %v8810_v25, %v8818_v62  ;;  %v13863_v41 = vcombine.high %v8826_v51, %v8834_v10  ;;  %v13985_v23 = vcombine.high %v10209_v14, %v10217_v4  ;;  %v10225_v59 = vld [vmem:[#allocation8 + $0x1e00] sm:$0xff]  ;;  %v8858_v35 = vld [vmem:[#allocation8 + $0x1ab8] sm:$0xff]  ;;  %v10154_v25 = vld [vmem:[#allocation8 + $0x1bc8] sm:$0xff] }
 0x873   :  { %v13984_v19 = vcombine.low %v10209_v14, %v10217_v4  ;;  %v8874_v15 = vld [vmem:[#allocation8 + $0x1b38] sm:$0xff]  ;;  %v10241_v50 = vld [vmem:[#allocation8 + $0x1e80] sm:$0xff]  ;;  %v13878_v33 = vcombine.low %v8842_v32, %v8850_v16  ;;  %v14000_v47 = vcombine.low %v10225_v59, %v10233_v58 }
 0x874   :  { %10090 = vmatpush1.bf16.msra.mxu1 %v13782_v38  ;;  %v13879_v38 = vcombine.high %v8842_v32, %v8850_v16  ;;  %v10249_v42 = vld [vmem:[#allocation8 + $0x1ec0] sm:$0xff] }
 0x875   :  { %10065 = vmatpush1.bf16.msra.mxu0 %v9787_v49  ;;  %10091 = vmatprep.subr.bf16.mxu1 %v13799_v28  ;;  %v14001_v49 = vcombine.high %v10225_v59, %v10233_v58  ;;  %v8866_v28 = vld [vmem:[#allocation8 + $0x1af8] sm:$0xff]  ;;  %v14016_v36 = vcombine.low %v10241_v50, %v10249_v42  ;;  %v10313_v32 = vld [vmem:[#allocation8 + $0x20c0] sm:$0x11] }
 0x876   :  { %11236 = vmatprep.subr.bf16.mxu0 %v13921_v27  ;;  %v8882_v27 = vld [vmem:[#allocation8 + $0x1b78] sm:$0x11]  ;;  %v13894_v53 = vcombine.low %v8858_v35, %v8866_v28 }
 0x877   :  { %v13910_v2 = vcombine.low %v8874_v15, %v8882_v27 }
 0x878   :  { %10077 = vmatmul.mubr.bf16.vlgmr.msra.gmra.mrb[84].mxu0 %v18892_v5  ;;  %10092 = vmatpush1.bf16.msra.mxu1 %v13798_v37  ;;  %v13895_v37 = vcombine.high %v8858_v35, %v8866_v28 }
 0x879   :  { %11237 = vmatpush1.bf16.msra.mxu0 %v13920_v54  ;;  %14096 = vmatprep.mubr.msk.bf16.mxu0 %vm4201_vm13, %v18962_v8  ;;  %v13911_v54 = vcombine.high %v8874_v15, %v8882_v27 }
 0x87a   :  { %10093 = vmatprep.subr.bf16.mxu1 %v13815_v44  ;;  %11238 = vmatprep.subr.bf16.mxu0 %v13937_v3  ;;  %v14017_v44 = vcombine.high %v10241_v50, %v10249_v42  ;;  %v10257_v3 = vld [vmem:[#allocation8 + $0x1f00] sm:$0xff]  ;;  %v10194_v50 = vld [vmem:[#allocation8 + $0x1d08] sm:$0xff] }
 0x87b   :  { %v14032_v10 = vcombine.low %v10257_v3, %v10265_v39  ;;  %v10202_v42 = vld [vmem:[#allocation8 + $0x1d48] sm:$0xff] }
 0x87c   :  { %10094 = vmatpush1.bf16.msra.mxu1 %v13814_v21  ;;  %v9796_v21 = vand.u32 %v13911_v54, %v18562_v29 }
 0x87d   :  { %11239 = vmatpush1.bf16.msra.mxu0 %v13936_v63  ;;  %10095 = vmatprep.subr.bf16.mxu1 %v13831_v9  ;;  %v14033_v9 = vcombine.high %v10257_v3, %v10265_v39 }
 0x87e   :  { %11240 = vmatprep.subr.bf16.mxu0 %v13953_v61  ;;  %v10146_v61 = vld [vmem:[#allocation8 + $0x1b88] sm:$0xff] }
 0x87f   :  { %v13923_v14 = vcombine.high %v10146_v61, %v10154_v25 }
 0x880   :  { %10096 = vmatpush1.bf16.msra.mxu1 %v13830_v7  ;;  %v10281_v7 = vld [vmem:[#allocation8 + $0x1fc0] sm:$0xff] }
 0x881   :  { %11241 = vmatpush1.bf16.msra.mxu0 %v13952_v13  ;;  %10097 = vmatprep.subr.bf16.mxu1 %v13847_v31  ;;  %v14049_v4 = vcombine.high %v10273_v52, %v10281_v7  ;;  %v14048_v16 = vcombine.low %v10273_v52, %v10281_v7 }
 0x882   :  { %11242 = vmatprep.subr.bf16.mxu0 %v13969_v12  ;;  %v9793_v12 = vand.u32 %v13910_v2, %v18562_v29  ;;  %v13971_v2 = vcombine.high %v10194_v50, %v10202_v42 }
 0x884   :  { %10098 = vmatpush1.bf16.msra.mxu1 %v13846_v30  ;;  %v10289_v30 = vld [vmem:[#allocation8 + $0x2000] sm:$0xff] }
 0x885   :  { %11243 = vmatpush1.bf16.msra.mxu0 %v13968_v1  ;;  %10099 = vmatprep.subr.bf16.mxu1 %v13863_v41  ;;  %v10170_v1 = vld [vmem:[#allocation8 + $0x1c48] sm:$0xff]  ;;  %v10297_v41 = vld [vmem:[#allocation8 + $0x2040] sm:$0xff] }
 0x886   :  { %11244 = vmatprep.subr.bf16.mxu0 %v13985_v23  ;;  %v10305_v23 = vld [vmem:[#allocation8 + $0x2080] sm:$0xff]  ;;  %v14065_v58 = vcombine.high %v10289_v30, %v10297_v41 }
 0x887   :  { %v14080_v28 = vcombine.low %v10305_v23, %v10313_v32 }
 0x888   :  { %10100 = vmatpush1.bf16.msra.mxu1 %v13862_v6  ;;  %v14081_v6 = vcombine.high %v10305_v23, %v10313_v32  ;;  %v10203_v23 = vld [vmem:[#allocation8 + $0x1d50] sm:$0xff] }
 0x889   :  { %11245 = vmatpush1.bf16.msra.mxu0 %v13984_v19  ;;  %10101 = vmatprep.subr.bf16.mxu1 %v13879_v38  ;;  %v10178_v19 = vld [vmem:[#allocation8 + $0x1c88] sm:$0xff] }
 0x88a   :  { %11246 = vmatprep.subr.bf16.mxu0 %v14001_v49  ;;  %v10186_v38 = vld [vmem:[#allocation8 + $0x1cc8] sm:$0xff]  ;;  %v14064_v49 = vcombine.low %v10289_v30, %v10297_v41  ;;  %v11192_v27 = vand.u32 %v14081_v6, %v18562_v29  ;;  %v10195_v41 = vld [vmem:[#allocation8 + $0x1d10] sm:$0xff] }
 0x88b   :  { %v13955_v15 = vcombine.high %v10178_v19, %v10186_v38  ;;  %v10266_v6 = vld [vmem:[#allocation8 + $0x1f48] sm:$0xff] }
 0x88c   :  { %10102 = vmatpush1.bf16.msra.mxu1 %v13878_v33 }
 0x88d   :  { %11247 = vmatpush1.bf16.msra.mxu0 %v14000_v47  ;;  %10103 = vmatprep.subr.bf16.mxu1 %v13895_v37  ;;  %v10147_v47 = vld [vmem:[#allocation8 + $0x1b90] sm:$0xff] }
 0x88e   :  { %v8599_v63 = vpop.f32.mrb[64].mxu1  ;;  %11248 = vmatprep.subr.bf16.mxu0 %v14017_v44  ;;  %v10155_v37 = vld [vmem:[#allocation8 + $0x1bd0] sm:$0xff]  ;;  %v13954_v44 = vcombine.low %v10178_v19, %v10186_v38 }
 0x88f   :  { %v18969_v62 = vadd.f32 %v8599_v63, %v18873_v20  ;;  %v8601_v56 = vpop.f32.mrb[65].mxu1  ;;  %v10162_v20 = vld [vmem:[#allocation8 + $0x1c08] sm:$0xff]  ;;  %v10211_v19 = vld [vmem:[#allocation8 + $0x1d90] sm:$0xff] }
 0x890   :  { %v18972_v13 = vadd.f32 %v8601_v56, %v18876_v46  ;;  %v8603_v31 = vpop.f32.mrb[66].mxu1  ;;  %10104 = vmatpush1.bf16.msra.mxu1 %v13894_v53  ;;  %v13922_v46 = vcombine.low %v10146_v61, %v10154_v25  ;;  %v13939_v59 = vcombine.high %v10162_v20, %v10170_v1  ;;  %v13938_v35 = vcombine.low %v10162_v20, %v10170_v1  ;;  %v10210_v63 = vld [vmem:[#allocation8 + $0x1d88] sm:$0xff]  ;;  %v10163_v61 = vld [vmem:[#allocation8 + $0x1c10] sm:$0xff] }
 0x891   :  { %11249 = vmatpush1.bf16.msra.mxu0 %v14016_v36  ;;  %v8604_v51 = vpop.f32.mrb[67].mxu1  ;;  %10105 = vmatprep.subr.bf16.mxu1 %v9796_v21  ;;  %v11189_v53 = vand.u32 %v14080_v28, %v18562_v29  ;;  %v13925_v21 = vcombine.high %v10147_v47, %v10155_v37  ;;  %v13970_v25 = vcombine.low %v10194_v50, %v10202_v42  ;;  %v10226_v31 = vld [vmem:[#allocation8 + $0x1e08] sm:$0xff]  ;;  %v10219_v38 = vld [vmem:[#allocation8 + $0x1dd0] sm:$0xff] }
 0x892   :  { %11250 = vmatprep.subr.bf16.mxu0 %v14033_v9  ;;  %v10218_v9 = vld [vmem:[#allocation8 + $0x1dc8] sm:$0xff]  ;;  %v13924_v56 = vcombine.low %v10147_v47, %v10155_v37  ;;  %v10179_v51 = vld [vmem:[#allocation8 + $0x1c90] sm:$0xff]  ;;  %v13988_v37 = vcombine.low %v10211_v19, %v10219_v38 }
 0x893   :  { %v13987_v52 = vcombine.high %v10210_v63, %v10218_v9  ;;  %v10242_v20 = vld [vmem:[#allocation8 + $0x1e88] sm:$0xff]  ;;  %v10227_v42 = vld [vmem:[#allocation8 + $0x1e10] sm:$0xff] }
 0x894   :  { %10106 = vmatpush1.bf16.msra.mxu1 %v9793_v12  ;;  %v10234_v12 = vld [vmem:[#allocation8 + $0x1e48] sm:$0xff] }
 0x895   :  { %11251 = vmatpush1.bf16.msra.mxu0 %v14032_v10  ;;  %11277 = vmatprep.subr.bf16.mxu1 %v13923_v14  ;;  %v10187_v10 = vld [vmem:[#allocation8 + $0x1cd0] sm:$0xff]  ;;  %v13986_v14 = vcombine.low %v10210_v63, %v10218_v9  ;;  %v14003_v30 = vcombine.high %v10226_v31, %v10234_v12  ;;  %v10250_v1 = vld [vmem:[#allocation8 + $0x1ec8] sm:$0xff]  ;;  %v14002_v32 = vcombine.low %v10226_v31, %v10234_v12 }
 0x896   :  { %11252 = vmatprep.subr.bf16.mxu0 %v14049_v4  ;;  %v10282_v50 = vld [vmem:[#allocation8 + $0x1fc8] sm:$0xff]  ;;  %v10251_v63 = vld [vmem:[#allocation8 + $0x1ed0] sm:$0xff] }
 0x897   :  { %10118 = vmatmul.mubr.bf16.vlgmr.msra.gmra.mrb[84].mxu1 %v18892_v5 }
 0x898   :  { %11278 = vmatpush1.bf16.msra.mxu1 %v13922_v46  ;;  %14097 = vmatprep.mubr.msk.bf16.mxu1 %vm4201_vm13, %v18962_v8  ;;  %v13956_v46 = vcombine.low %v10179_v51, %v10187_v10 }
 0x899   :  { %11253 = vmatpush1.bf16.msra.mxu0 %v14048_v16  ;;  %11279 = vmatprep.subr.bf16.mxu1 %v13939_v59  ;;  %v14019_v16 = vcombine.high %v10242_v20, %v10250_v1  ;;  %v13973_v59 = vcombine.high %v10195_v41, %v10203_v23 }
 0x89a   :  { %11254 = vmatprep.subr.bf16.mxu0 %v14065_v58  ;;  %v10258_v58 = vld [vmem:[#allocation8 + $0x1f08] sm:$0xff] }
 0x89b   :  { %v8640_v33 = vpop.f32.mrb[68].mxu0  ;;  %v14035_v28 = vcombine.high %v10258_v58, %v10266_v6  ;;  %v14034_v47 = vcombine.low %v10258_v58, %v10266_v6 }
 0x89c   :  { %v18980_v5 = vadd.f32 %v8640_v33, %v18884_v18  ;;  %v8642_v54 = vpop.f32.mrb[69].mxu0  ;;  %11280 = vmatpush1.bf16.msra.mxu1 %v13938_v35  ;;  %v10171_v18 = vld [vmem:[#allocation8 + $0x1c50] sm:$0xff]  ;;  %v14018_v35 = vcombine.low %v10242_v20, %v10250_v1 }
 0x89d   :  { %v18983_v3 = vadd.f32 %v8642_v54, %v18887_v60  ;;  %v8644_v39 = vpop.f32.mrb[70].mxu0  ;;  %11255 = vmatpush1.bf16.msra.mxu0 %v14064_v49  ;;  %11281 = vmatprep.subr.bf16.mxu1 %v13955_v15  ;;  %v18988_v60 = vpack.c.bf16 %v18628_v17, %v18628_v17  ;;  %v13941_v7 = vcombine.high %v10163_v61, %v10171_v18  ;;  %v10235_v33 = vld [vmem:[#allocation8 + $0x1e50] sm:$0xff] }
 0x89e   :  { %v8645_v36 = vpop.f32.mrb[71].mxu0  ;;  %11256 = vmatprep.subr.bf16.mxu0 %v11192_v27  ;;  %v13940_v4 = vcombine.low %v10163_v61, %v10171_v18  ;;  %v13957_v17 = vcombine.high %v10179_v51, %v10187_v10  ;;  %v13972_v49 = vcombine.low %v10195_v41, %v10203_v23  ;;  %v13989_v15 = vcombine.high %v10211_v19, %v10219_v38  ;;  %v10274_v27 = vld [vmem:[#allocation8 + $0x1f88] sm:$0xff]  ;;  %v10275_v41 = vld [vmem:[#allocation8 + $0x1f90] sm:$0xff] }
 0x89f   :  { %v14051_v54 = vcombine.high %v10274_v27, %v10282_v50  ;;  %v14005_v39 = vcombine.high %v10227_v42, %v10235_v33  ;;  %v10314_v36 = vld [vmem:[#allocation8 + $0x20c8] sm:$0x11]  ;;  %v14050_v9 = vcombine.low %v10274_v27, %v10282_v50  ;;  %v14004_v61 = vcombine.low %v10227_v42, %v10235_v33  ;;  %v10283_v23 = vld [vmem:[#allocation8 + $0x1fd0] sm:$0xff] }
 0x8a0   :  { %11282 = vmatpush1.bf16.msra.mxu1 %v13954_v44  ;;  %v10290_v44 = vld [vmem:[#allocation8 + $0x2008] sm:$0xff]  ;;  %v14053_v19 = vcombine.high %v10275_v41, %v10283_v23  ;;  %v10291_v38 = vld [vmem:[#allocation8 + $0x2010] sm:$0xff]  ;;  %v14052_v27 = vcombine.low %v10275_v41, %v10283_v23  ;;  %v10228_v23 = vld [vmem:[#allocation8 + $0x1e18] sm:$0xff] }
 0x8a1   :  { %11257 = vmatpush1.bf16.msra.mxu0 %v11189_v53  ;;  %11283 = vmatprep.subr.bf16.mxu1 %v13971_v2  ;;  %v10298_v53 = vld [vmem:[#allocation8 + $0x2048] sm:$0xff] }
 0x8a2   :  { %11318 = vmatprep.subr.bf16.mxu0 %v13925_v21  ;;  %v10306_v2 = vld [vmem:[#allocation8 + $0x2088] sm:$0xff]  ;;  %v10243_v21 = vld [vmem:[#allocation8 + $0x1e90] sm:$0xff]  ;;  %v14067_v18 = vcombine.high %v10290_v44, %v10298_v53  ;;  %v14066_v31 = vcombine.low %v10290_v44, %v10298_v53 }
 0x8a3   :  { %v14082_v12 = vcombine.low %v10306_v2, %v10314_v36  ;;  %v14020_v51 = vcombine.low %v10243_v21, %v10251_v63 }
 0x8a4   :  { %11269 = vmatmul.mubr.bf16.vlgmr.msra.gmra.mrb[88].mxu0 %v18988_v60  ;;  %11284 = vmatpush1.bf16.msra.mxu1 %v13970_v25  ;;  %v14083_v25 = vcombine.high %v10306_v2, %v10314_v36  ;;  %v10196_v36 = vld [vmem:[#allocation8 + $0x1d18] sm:$0xff] }
 0x8a5   :  { %11319 = vmatpush1.bf16.msra.mxu0 %v13924_v56  ;;  %14098 = vmatprep.mubr.msk.bf16.mxu0 %vm4201_vm13, %v18962_v8  ;;  %v14021_v56 = vcombine.high %v10243_v21, %v10251_v63  ;;  %v10204_v21 = vld [vmem:[#allocation8 + $0x1d58] sm:$0xff] }
 0x8a6   :  { %11285 = vmatprep.subr.bf16.mxu1 %v13987_v52  ;;  %11320 = vmatprep.subr.bf16.mxu0 %v13941_v7  ;;  %v10259_v52 = vld [vmem:[#allocation8 + $0x1f10] sm:$0xff]  ;;  %v11198_v10 = vand.u32 %v14083_v25, %v18562_v29 }
 0x8a7   :  { %v10267_v7 = vld [vmem:[#allocation8 + $0x1f50] sm:$0xff] }
 0x8a8   :  { %11286 = vmatpush1.bf16.msra.mxu1 %v13986_v14  ;;  %v14036_v58 = vcombine.low %v10259_v52, %v10267_v7 }
 0x8a9   :  { %11321 = vmatpush1.bf16.msra.mxu0 %v13940_v4  ;;  %11287 = vmatprep.subr.bf16.mxu1 %v14003_v30  ;;  %v14037_v4 = vcombine.high %v10259_v52, %v10267_v7  ;;  %v10148_v30 = vld [vmem:[#allocation8 + $0x1b98] sm:$0xff] }
 0x8aa   :  { %11322 = vmatprep.subr.bf16.mxu0 %v13957_v17  ;;  %v10156_v17 = vld [vmem:[#allocation8 + $0x1bd8] sm:$0xff] }
 0x8ab   :  { %v13927_v6 = vcombine.high %v10148_v30, %v10156_v17 }
 0x8ac   :  { %11288 = vmatpush1.bf16.msra.mxu1 %v14002_v32 }
 0x8ad   :  { %11323 = vmatpush1.bf16.msra.mxu0 %v13956_v46  ;;  %11289 = vmatprep.subr.bf16.mxu1 %v14019_v16  ;;  %v11195_v16 = vand.u32 %v14082_v12, %v18562_v29  ;;  %v13975_v12 = vcombine.high %v10196_v36, %v10204_v21 }
 0x8ae   :  { %11324 = vmatprep.subr.bf16.mxu0 %v13973_v59 }
 0x8b0   :  { %11290 = vmatpush1.bf16.msra.mxu1 %v14018_v35  ;;  %v10172_v35 = vld [vmem:[#allocation8 + $0x1c58] sm:$0xff] }
 0x8b1   :  { %11325 = vmatpush1.bf16.msra.mxu0 %v13972_v49  ;;  %11291 = vmatprep.subr.bf16.mxu1 %v14035_v28  ;;  %v10299_v49 = vld [vmem:[#allocation8 + $0x2050] sm:$0xff] }
 0x8b2   :  { %11326 = vmatprep.subr.bf16.mxu0 %v13989_v15  ;;  %v10307_v28 = vld [vmem:[#allocation8 + $0x2090] sm:$0xff]  ;;  %v14069_v42 = vcombine.high %v10291_v38, %v10299_v49  ;;  %v14068_v44 = vcombine.low %v10291_v38, %v10299_v49  ;;  %v10197_v49 = vld [vmem:[#allocation8 + $0x1d20] sm:$0xff] }
 0x8b3   :  { %v10315_v15 = vld [vmem:[#allocation8 + $0x20d0] sm:$0x11] }
 0x8b4   :  { %11292 = vmatpush1.bf16.msra.mxu1 %v14034_v47  ;;  %v14085_v33 = vcombine.high %v10307_v28, %v10315_v15  ;;  %v10180_v47 = vld [vmem:[#allocation8 + $0x1c98] sm:$0xff] }
 0x8b5   :  { %11327 = vmatpush1.bf16.msra.mxu0 %v13988_v37  ;;  %11293 = vmatprep.subr.bf16.mxu1 %v14051_v54  ;;  %v10188_v37 = vld [vmem:[#allocation8 + $0x1cd8] sm:$0xff] }
 0x8b6   :  { %11328 = vmatprep.subr.bf16.mxu0 %v14005_v39  ;;  %v14084_v39 = vcombine.low %v10307_v28, %v10315_v15  ;;  %v13959_v53 = vcombine.high %v10180_v47, %v10188_v37  ;;  %v11204_v2 = vand.u32 %v14085_v33, %v18562_v29  ;;  %v10205_v28 = vld [vmem:[#allocation8 + $0x1d60] sm:$0xff]  ;;  %v10268_v33 = vld [vmem:[#allocation8 + $0x1f58] sm:$0xff] }
 0x8b8   :  { %11294 = vmatpush1.bf16.msra.mxu1 %v14050_v9  ;;  %v10149_v9 = vld [vmem:[#allocation8 + $0x1ba0] sm:$0xff] }
 0x8b9   :  { %11329 = vmatpush1.bf16.msra.mxu0 %v14004_v61  ;;  %11295 = vmatprep.subr.bf16.mxu1 %v14067_v18  ;;  %v10157_v61 = vld [vmem:[#allocation8 + $0x1be0] sm:$0xff] }
 0x8ba   :  { %v8681_v14 = vpop.f32.mrb[68].mxu1  ;;  %11330 = vmatprep.subr.bf16.mxu0 %v14021_v56  ;;  %v13958_v56 = vcombine.low %v10180_v47, %v10188_v37  ;;  %v10213_v47 = vld [vmem:[#allocation8 + $0x1da0] sm:$0xff] }
 0x8bb   :  { %v18995_v20 = vadd.f32 %v8681_v14, %v18899_v43  ;;  %v8683_v1 = vpop.f32.mrb[69].mxu1  ;;  %v10164_v43 = vld [vmem:[#allocation8 + $0x1c18] sm:$0xff]  ;;  %v10221_v37 = vld [vmem:[#allocation8 + $0x1de0] sm:$0xff] }
 0x8bc   :  { %v18998_v32 = vadd.f32 %v8683_v1, %v18902_v24  ;;  %v8685_v46 = vpop.f32.mrb[70].mxu1  ;;  %11296 = vmatpush1.bf16.msra.mxu1 %v14066_v31  ;;  %v13926_v24 = vcombine.low %v10148_v30, %v10156_v17  ;;  %v13943_v50 = vcombine.high %v10164_v43, %v10172_v35  ;;  %v13942_v54 = vcombine.low %v10164_v43, %v10172_v35  ;;  %v10212_v14 = vld [vmem:[#allocation8 + $0x1d98] sm:$0xff]  ;;  %v10165_v30 = vld [vmem:[#allocation8 + $0x1c20] sm:$0xff] }
 0x8bd   :  { %11331 = vmatpush1.bf16.msra.mxu0 %v14020_v51  ;;  %v8686_v59 = vpop.f32.mrb[71].mxu1  ;;  %11297 = vmatprep.subr.bf16.mxu1 %v11198_v10  ;;  %v11201_v31 = vand.u32 %v14084_v39, %v18562_v29  ;;  %v13929_v10 = vcombine.high %v10149_v9, %v10157_v61  ;;  %v13974_v17 = vcombine.low %v10196_v36, %v10204_v21  ;;  %v10236_v46 = vld [vmem:[#allocation8 + $0x1e58] sm:$0xff]  ;;  %v10229_v21 = vld [vmem:[#allocation8 + $0x1e20] sm:$0xff] }
 0x8be   :  { %11332 = vmatprep.subr.bf16.mxu0 %v14037_v4  ;;  %v10220_v4 = vld [vmem:[#allocation8 + $0x1dd8] sm:$0xff]  ;;  %v13928_v1 = vcombine.low %v10149_v9, %v10157_v61  ;;  %v10189_v59 = vld [vmem:[#allocation8 + $0x1ce0] sm:$0xff]  ;;  %v14006_v15 = vcombine.low %v10228_v23, %v10236_v46  ;;  %v13992_v61 = vcombine.low %v10213_v47, %v10221_v37 }
 0x8bf   :  { %v10244_v43 = vld [vmem:[#allocation8 + $0x1e98] sm:$0xff] }
 0x8c0   :  { %11298 = vmatpush1.bf16.msra.mxu1 %v11195_v16  ;;  %v10181_v16 = vld [vmem:[#allocation8 + $0x1ca0] sm:$0xff]  ;;  %v10252_v35 = vld [vmem:[#allocation8 + $0x1ed8] sm:$0xff] }
 0x8c1   :  { %11333 = vmatpush1.bf16.msra.mxu0 %v14036_v58  ;;  %11359 = vmatprep.subr.bf16.mxu1 %v13927_v6  ;;  %v13990_v58 = vcombine.low %v10212_v14, %v10220_v4  ;;  %v13961_v38 = vcombine.high %v10181_v16, %v10189_v59  ;;  %v10284_v36 = vld [vmem:[#allocation8 + $0x1fd8] sm:$0xff] }
 0x8c2   :  { %11334 = vmatprep.subr.bf16.mxu0 %v14053_v19  ;;  %v14007_v19 = vcombine.high %v10228_v23, %v10236_v46 }
 0x8c3   :  { %11310 = vmatmul.mubr.bf16.vlgmr.msra.gmra.mrb[88].mxu1 %v18988_v60 }
 0x8c4   :  { %11360 = vmatpush1.bf16.msra.mxu1 %v13926_v24  ;;  %14099 = vmatprep.mubr.msk.bf16.mxu1 %vm4201_vm13, %v18962_v8  ;;  %v13960_v24 = vcombine.low %v10181_v16, %v10189_v59 }
 0x8c5   :  { %11335 = vmatpush1.bf16.msra.mxu0 %v14052_v27  ;;  %11361 = vmatprep.subr.bf16.mxu1 %v13943_v50  ;;  %v14023_v27 = vcombine.high %v10244_v43, %v10252_v35  ;;  %v13977_v50 = vcombine.high %v10197_v49, %v10205_v28 }
 0x8c6   :  { %11336 = vmatprep.subr.bf16.mxu0 %v14069_v42  ;;  %v10260_v42 = vld [vmem:[#allocation8 + $0x1f18] sm:$0xff] }
 0x8c7   :  { %v9832_v63 = vpop.f32.mrb[72].mxu0  ;;  %v14039_v39 = vcombine.high %v10260_v42, %v10268_v33  ;;  %v14038_v9 = vcombine.low %v10260_v42, %v10268_v33 }
 0x8c8   :  { %v19006_v18 = vadd.f32 %v9832_v63, %v18910_v40  ;;  %v9834_v25 = vpop.f32.mrb[73].mxu0  ;;  %11362 = vmatpush1.bf16.msra.mxu1 %v13942_v54  ;;  %v10173_v40 = vld [vmem:[#allocation8 + $0x1c60] sm:$0xff]  ;;  %v14022_v54 = vcombine.low %v10244_v43, %v10252_v35 }
 0x8c9   :  { %v19009_v52 = vadd.f32 %v9834_v25, %v18913_v48  ;;  %v9836_v7 = vpop.f32.mrb[74].mxu0  ;;  %11337 = vmatpush1.bf16.msra.mxu0 %v14068_v44  ;;  %11363 = vmatprep.subr.bf16.mxu1 %v13959_v53  ;;  %v13991_v48 = vcombine.high %v10212_v14, %v10220_v4  ;;  %v13945_v41 = vcombine.high %v10165_v30, %v10173_v40  ;;  %v10237_v63 = vld [vmem:[#allocation8 + $0x1e60] sm:$0xff] }
 0x8ca   :  { %v9837_v51 = vpop.f32.mrb[75].mxu0  ;;  %11338 = vmatprep.subr.bf16.mxu0 %v11204_v2  ;;  %v13944_v6 = vcombine.low %v10165_v30, %v10173_v40  ;;  %v13976_v44 = vcombine.low %v10197_v49, %v10205_v28  ;;  %v13993_v53 = vcombine.high %v10213_v47, %v10221_v37  ;;  %v10276_v2 = vld [vmem:[#allocation8 + $0x1f98] sm:$0xff]  ;;  %v14009_v7 = vcombine.high %v10229_v21, %v10237_v63  ;;  %v10253_v14 = vld [vmem:[#allocation8 + $0x1ee0] sm:$0xff] }
 0x8cb   :  { %v14055_v25 = vcombine.high %v10276_v2, %v10284_v36  ;;  %v10316_v51 = vld [vmem:[#allocation8 + $0x20d8] sm:$0x11]  ;;  %v14054_v4 = vcombine.low %v10276_v2, %v10284_v36  ;;  %v14008_v30 = vcombine.low %v10229_v21, %v10237_v63  ;;  %v10277_v49 = vld [vmem:[#allocation8 + $0x1fa0] sm:$0xff] }
 0x8cc   :  { %11364 = vmatpush1.bf16.msra.mxu1 %v13958_v56  ;;  %v10292_v56 = vld [vmem:[#allocation8 + $0x2018] sm:$0xff]  ;;  %v10285_v28 = vld [vmem:[#allocation8 + $0x1fe0] sm:$0xff] }
 0x8cd   :  { %11339 = vmatpush1.bf16.msra.mxu0 %v11201_v31  ;;  %11365 = vmatprep.subr.bf16.mxu1 %v13975_v12  ;;  %v10300_v31 = vld [vmem:[#allocation8 + $0x2058] sm:$0xff]  ;;  %v14057_v47 = vcombine.high %v10277_v49, %v10285_v28  ;;  %v10293_v37 = vld [vmem:[#allocation8 + $0x2020] sm:$0xff]  ;;  %v14056_v2 = vcombine.low %v10277_v49, %v10285_v28  ;;  %v10230_v28 = vld [vmem:[#allocation8 + $0x1e28] sm:$0xff] }
 0x8ce   :  { %11400 = vmatprep.subr.bf16.mxu0 %v13929_v10  ;;  %v10308_v12 = vld [vmem:[#allocation8 + $0x2098] sm:$0xff]  ;;  %v10245_v10 = vld [vmem:[#allocation8 + $0x1ea0] sm:$0xff]  ;;  %v14071_v40 = vcombine.high %v10292_v56, %v10300_v31  ;;  %v14070_v23 = vcombine.low %v10292_v56, %v10300_v31 }
 0x8cf   :  { %v14086_v46 = vcombine.low %v10308_v12, %v10316_v51  ;;  %v14024_v16 = vcombine.low %v10245_v10, %v10253_v14 }
 0x8d0   :  { %11351 = vmatmul.mubr.bf16.vlgmr.msra.gmra.mrb[92].mxu0 %v18988_v60  ;;  %11366 = vmatpush1.bf16.msra.mxu1 %v13974_v17  ;;  %v14087_v17 = vcombine.high %v10308_v12, %v10316_v51  ;;  %v10198_v51 = vld [vmem:[#allocation8 + $0x1d28] sm:$0xff] }
 0x8d1   :  { %11401 = vmatpush1.bf16.msra.mxu0 %v13928_v1  ;;  %14100 = vmatprep.mubr.msk.bf16.mxu0 %vm4201_vm13, %v18962_v8  ;;  %v14025_v1 = vcombine.high %v10245_v10, %v10253_v14  ;;  %v10206_v10 = vld [vmem:[#allocation8 + $0x1d68] sm:$0xff] }
 0x8d2   :  { %11367 = vmatprep.subr.bf16.mxu1 %v13991_v48  ;;  %11402 = vmatprep.subr.bf16.mxu0 %v13945_v41  ;;  %v10261_v48 = vld [vmem:[#allocation8 + $0x1f20] sm:$0xff]  ;;  %v11210_v59 = vand.u32 %v14087_v17, %v18562_v29 }
 0x8d3   :  { %v10269_v41 = vld [vmem:[#allocation8 + $0x1f60] sm:$0xff] }
 0x8d4   :  { %11368 = vmatpush1.bf16.msra.mxu1 %v13990_v58  ;;  %v14040_v42 = vcombine.low %v10261_v48, %v10269_v41 }
 0x8d5   :  { %11403 = vmatpush1.bf16.msra.mxu0 %v13944_v6  ;;  %11369 = vmatprep.subr.bf16.mxu1 %v14007_v19  ;;  %v14041_v6 = vcombine.high %v10261_v48, %v10269_v41  ;;  %v10150_v19 = vld [vmem:[#allocation8 + $0x1ba8] sm:$0xff] }
 0x8d6   :  { %11404 = vmatprep.subr.bf16.mxu0 %v13961_v38  ;;  %v10158_v38 = vld [vmem:[#allocation8 + $0x1be8] sm:$0xff] }
 0x8d7   :  { %v13931_v33 = vcombine.high %v10150_v19, %v10158_v38 }
 0x8d8   :  { %11370 = vmatpush1.bf16.msra.mxu1 %v14006_v15 }
 0x8d9   :  { %11405 = vmatpush1.bf16.msra.mxu0 %v13960_v24  ;;  %11371 = vmatprep.subr.bf16.mxu1 %v14023_v27  ;;  %v11207_v27 = vand.u32 %v14086_v46, %v18562_v29  ;;  %v13979_v46 = vcombine.high %v10198_v51, %v10206_v10 }
 0x8da   :  { %11406 = vmatprep.subr.bf16.mxu0 %v13977_v50 }
 0x8dc   :  { %11372 = vmatpush1.bf16.msra.mxu1 %v14022_v54  ;;  %v10174_v54 = vld [vmem:[#allocation8 + $0x1c68] sm:$0xff] }
 0x8dd   :  { %11407 = vmatpush1.bf16.msra.mxu0 %v13976_v44  ;;  %11373 = vmatprep.subr.bf16.mxu1 %v14039_v39  ;;  %v10301_v44 = vld [vmem:[#allocation8 + $0x2060] sm:$0xff] }
 0x8de   :  { %11408 = vmatprep.subr.bf16.mxu0 %v13993_v53  ;;  %v10309_v39 = vld [vmem:[#allocation8 + $0x20a0] sm:$0xff]  ;;  %v14073_v21 = vcombine.high %v10293_v37, %v10301_v44  ;;  %v14072_v56 = vcombine.low %v10293_v37, %v10301_v44  ;;  %v10199_v44 = vld [vmem:[#allocation8 + $0x1d30] sm:$0xff] }
 0x8df   :  { %v10317_v53 = vld [vmem:[#allocation8 + $0x20e0] sm:$0x11] }
 0x8e0   :  { %11374 = vmatpush1.bf16.msra.mxu1 %v14038_v9  ;;  %v14089_v63 = vcombine.high %v10309_v39, %v10317_v53  ;;  %v10182_v9 = vld [vmem:[#allocation8 + $0x1ca8] sm:$0xff] }
 0x8e1   :  { %11409 = vmatpush1.bf16.msra.mxu0 %v13992_v61  ;;  %11375 = vmatprep.subr.bf16.mxu1 %v14055_v25  ;;  %v10190_v61 = vld [vmem:[#allocation8 + $0x1ce8] sm:$0xff] }
 0x8e2   :  { %11410 = vmatprep.subr.bf16.mxu0 %v14009_v7  ;;  %v14088_v7 = vcombine.low %v10309_v39, %v10317_v53  ;;  %v13963_v31 = vcombine.high %v10182_v9, %v10190_v61  ;;  %v11216_v12 = vand.u32 %v14089_v63, %v18562_v29  ;;  %v10207_v39 = vld [vmem:[#allocation8 + $0x1d70] sm:$0xff]  ;;  %v10270_v63 = vld [vmem:[#allocation8 + $0x1f68] sm:$0xff] }
 0x8e4   :  { %11376 = vmatpush1.bf16.msra.mxu1 %v14054_v4  ;;  %v10151_v4 = vld [vmem:[#allocation8 + $0x1bb0] sm:$0xff] }
 0x8e5   :  { %11411 = vmatpush1.bf16.msra.mxu0 %v14008_v30  ;;  %11377 = vmatprep.subr.bf16.mxu1 %v14071_v40  ;;  %v10159_v30 = vld [vmem:[#allocation8 + $0x1bf0] sm:$0xff] }
 0x8e6   :  { %v9873_v58 = vpop.f32.mrb[72].mxu1  ;;  %11412 = vmatprep.subr.bf16.mxu0 %v14025_v1  ;;  %v13962_v1 = vcombine.low %v10182_v9, %v10190_v61  ;;  %v10215_v9 = vld [vmem:[#allocation8 + $0x1db0] sm:$0xff] }
 0x8e7   :  { %v19017_v43 = vadd.f32 %v9873_v58, %v18921_v11  ;;  %v9875_v35 = vpop.f32.mrb[73].mxu1  ;;  %v10166_v11 = vld [vmem:[#allocation8 + $0x1c28] sm:$0xff]  ;;  %v10223_v61 = vld [vmem:[#allocation8 + $0x1df0] sm:$0xff] }
 0x8e8   :  { %v19020_v15 = vadd.f32 %v9875_v35, %v18924_v45  ;;  %v9877_v24 = vpop.f32.mrb[74].mxu1  ;;  %11378 = vmatpush1.bf16.msra.mxu1 %v14070_v23  ;;  %v13930_v45 = vcombine.low %v10150_v19, %v10158_v38  ;;  %v13947_v36 = vcombine.high %v10166_v11, %v10174_v54  ;;  %v13946_v25 = vcombine.low %v10166_v11, %v10174_v54  ;;  %v10214_v58 = vld [vmem:[#allocation8 + $0x1da8] sm:$0xff]  ;;  %v10167_v19 = vld [vmem:[#allocation8 + $0x1c30] sm:$0xff] }
 0x8e9   :  { %11413 = vmatpush1.bf16.msra.mxu0 %v14024_v16  ;;  %v9878_v50 = vpop.f32.mrb[75].mxu1  ;;  %11379 = vmatprep.subr.bf16.mxu1 %v11210_v59  ;;  %v11213_v23 = vand.u32 %v14088_v7, %v18562_v29  ;;  %v13933_v59 = vcombine.high %v10151_v4, %v10159_v30  ;;  %v13978_v38 = vcombine.low %v10198_v51, %v10206_v10  ;;  %v10238_v24 = vld [vmem:[#allocation8 + $0x1e68] sm:$0xff]  ;;  %v10231_v10 = vld [vmem:[#allocation8 + $0x1e30] sm:$0xff] }
 0x8ea   :  { %11414 = vmatprep.subr.bf16.mxu0 %v14041_v6  ;;  %v10222_v6 = vld [vmem:[#allocation8 + $0x1de8] sm:$0xff]  ;;  %v13932_v35 = vcombine.low %v10151_v4, %v10159_v30  ;;  %v10191_v50 = vld [vmem:[#allocation8 + $0x1cf0] sm:$0xff]  ;;  %v14010_v53 = vcombine.low %v10230_v28, %v10238_v24  ;;  %v13996_v30 = vcombine.low %v10215_v9, %v10223_v61 }
 0x8eb   :  { %v10246_v11 = vld [vmem:[#allocation8 + $0x1ea8] sm:$0xff] }
 0x8ec   :  { %11380 = vmatpush1.bf16.msra.mxu1 %v11207_v27  ;;  %v10183_v27 = vld [vmem:[#allocation8 + $0x1cb0] sm:$0xff]  ;;  %v10254_v54 = vld [vmem:[#allocation8 + $0x1ee8] sm:$0xff] }
 0x8ed   :  { %11415 = vmatpush1.bf16.msra.mxu0 %v14040_v42  ;;  %11441 = vmatprep.subr.bf16.mxu1 %v13931_v33  ;;  %v13994_v42 = vcombine.low %v10214_v58, %v10222_v6  ;;  %v13965_v37 = vcombine.high %v10183_v27, %v10191_v50  ;;  %v10286_v51 = vld [vmem:[#allocation8 + $0x1fe8] sm:$0xff] }
 0x8ee   :  { %11416 = vmatprep.subr.bf16.mxu0 %v14057_v47  ;;  %v14011_v47 = vcombine.high %v10230_v28, %v10238_v24 }
 0x8ef   :  { %11392 = vmatmul.mubr.bf16.vlgmr.msra.gmra.mrb[92].mxu1 %v18988_v60 }
 0x8f0   :  { %11442 = vmatpush1.bf16.msra.mxu1 %v13930_v45  ;;  %14101 = vmatprep.mubr.msk.bf16.mxu1 %vm4201_vm13, %v18962_v8  ;;  %v13964_v45 = vcombine.low %v10183_v27, %v10191_v50 }
 0x8f1   :  { %11417 = vmatpush1.bf16.msra.mxu0 %v14056_v2  ;;  %11443 = vmatprep.subr.bf16.mxu1 %v13947_v36  ;;  %v14027_v2 = vcombine.high %v10246_v11, %v10254_v54  ;;  %v13981_v36 = vcombine.high %v10199_v44, %v10207_v39 }
 0x8f2   :  { %11418 = vmatprep.subr.bf16.mxu0 %v14073_v21  ;;  %v10262_v21 = vld [vmem:[#allocation8 + $0x1f28] sm:$0xff] }
 0x8f3   :  { %v9914_v14 = vpop.f32.mrb[76].mxu0  ;;  %v14043_v7 = vcombine.high %v10262_v21, %v10270_v63  ;;  %v14042_v4 = vcombine.low %v10262_v21, %v10270_v63 }
 0x8f4   :  { %v19028_v40 = vadd.f32 %v9914_v14, %v18932_v0  ;;  %v9916_v17 = vpop.f32.mrb[77].mxu0  ;;  %11444 = vmatpush1.bf16.msra.mxu1 %v13946_v25  ;;  %v10175_v0 = vld [vmem:[#allocation8 + $0x1c70] sm:$0xff]  ;;  %v14026_v25 = vcombine.low %v10246_v11, %v10254_v54 }
 0x8f5   :  { %v19031_v48 = vadd.f32 %v9916_v17, %v18935_v55  ;;  %v9918_v41 = vpop.f32.mrb[78].mxu0  ;;  %11419 = vmatpush1.bf16.msra.mxu0 %v14072_v56  ;;  %11445 = vmatprep.subr.bf16.mxu1 %v13963_v31  ;;  %v13995_v55 = vcombine.high %v10214_v58, %v10222_v6  ;;  %v13949_v49 = vcombine.high %v10167_v19, %v10175_v0  ;;  %v10239_v14 = vld [vmem:[#allocation8 + $0x1e70] sm:$0xff] }
 0x8f6   :  { %v9919_v16 = vpop.f32.mrb[79].mxu0  ;;  %11420 = vmatprep.subr.bf16.mxu0 %v11216_v12  ;;  %v13948_v33 = vcombine.low %v10167_v19, %v10175_v0  ;;  %v13980_v56 = vcombine.low %v10199_v44, %v10207_v39  ;;  %v13997_v31 = vcombine.high %v10215_v9, %v10223_v61  ;;  %v10278_v12 = vld [vmem:[#allocation8 + $0x1fa8] sm:$0xff]  ;;  %v14013_v41 = vcombine.high %v10231_v10, %v10239_v14  ;;  %v10255_v58 = vld [vmem:[#allocation8 + $0x1ef0] sm:$0xff] }
 0x8f7   :  { %v14059_v17 = vcombine.high %v10278_v12, %v10286_v51  ;;  %v10318_v16 = vld [vmem:[#allocation8 + $0x20e8] sm:$0x11]  ;;  %v14058_v6 = vcombine.low %v10278_v12, %v10286_v51  ;;  %v14012_v19 = vcombine.low %v10231_v10, %v10239_v14  ;;  %v10279_v44 = vld [vmem:[#allocation8 + $0x1fb0] sm:$0xff] }
 0x8f8   :  { %11446 = vmatpush1.bf16.msra.mxu1 %v13962_v1  ;;  %v10294_v1 = vld [vmem:[#allocation8 + $0x2028] sm:$0xff]  ;;  %v10287_v39 = vld [vmem:[#allocation8 + $0x1ff0] sm:$0xff] }
 0x8f9   :  { %11421 = vmatpush1.bf16.msra.mxu0 %v11213_v23  ;;  %11447 = vmatprep.subr.bf16.mxu1 %v13979_v46  ;;  %v10302_v23 = vld [vmem:[#allocation8 + $0x2068] sm:$0xff]  ;;  %v14061_v9 = vcombine.high %v10279_v44, %v10287_v39  ;;  %v10295_v61 = vld [vmem:[#allocation8 + $0x2030] sm:$0xff]  ;;  %v14060_v12 = vcombine.low %v10279_v44, %v10287_v39  ;;  %v10264_v39 = vld [vmem:[#allocation8 + $0x1f38] sm:$0xff] }
 0x8fa   :  { %11482 = vmatprep.subr.bf16.mxu0 %v13933_v59  ;;  %v10310_v46 = vld [vmem:[#allocation8 + $0x20a8] sm:$0xff]  ;;  %v10247_v59 = vld [vmem:[#allocation8 + $0x1eb0] sm:$0xff]  ;;  %v14075_v0 = vcombine.high %v10294_v1, %v10302_v23  ;;  %v14074_v28 = vcombine.low %v10294_v1, %v10302_v23 }
 0x8fb   :  { %v14090_v24 = vcombine.low %v10310_v46, %v10318_v16  ;;  %v14028_v27 = vcombine.low %v10247_v59, %v10255_v58 }
 0x8fc   :  { %11433 = vmatmul.mubr.bf16.vlgmr.msra.gmra.mrb[96].mxu0 %v18988_v60  ;;  %11448 = vmatpush1.bf16.msra.mxu1 %v13978_v38  ;;  %v14091_v38 = vcombine.high %v10310_v46, %v10318_v16  ;;  %v10200_v16 = vld [vmem:[#allocation8 + $0x1d38] sm:$0xff] }
 0x8fd   :  { %11483 = vmatpush1.bf16.msra.mxu0 %v13932_v35  ;;  %14102 = vmatprep.mubr.msk.bf16.mxu0 %vm4201_vm13, %v18962_v8  ;;  %v14029_v35 = vcombine.high %v10247_v59, %v10255_v58  ;;  %v10208_v59 = vld [vmem:[#allocation8 + $0x1d78] sm:$0xff] }
 0x8fe   :  { %11449 = vmatprep.subr.bf16.mxu1 %v13995_v55  ;;  %11484 = vmatprep.subr.bf16.mxu0 %v13949_v49  ;;  %v10263_v55 = vld [vmem:[#allocation8 + $0x1f30] sm:$0xff]  ;;  %v11222_v50 = vand.u32 %v14091_v38, %v18562_v29 }
 0x8ff   :  { %v10271_v49 = vld [vmem:[#allocation8 + $0x1f70] sm:$0xff] }
 0x900   :  { %11450 = vmatpush1.bf16.msra.mxu1 %v13994_v42  ;;  %v14044_v21 = vcombine.low %v10263_v55, %v10271_v49 }
 0x901   :  { %11485 = vmatpush1.bf16.msra.mxu0 %v13948_v33  ;;  %11451 = vmatprep.subr.bf16.mxu1 %v14011_v47  ;;  %v14045_v33 = vcombine.high %v10263_v55, %v10271_v49  ;;  %v10152_v47 = vld [vmem:[#allocation8 + $0x1bb8] sm:$0xff]  ;;  %v13983_v55 = vcombine.high %v10200_v16, %v10208_v59 }
 0x902   :  { %11486 = vmatprep.subr.bf16.mxu0 %v13965_v37  ;;  %v10160_v37 = vld [vmem:[#allocation8 + $0x1bf8] sm:$0xff] }
 0x903   :  { %v13935_v63 = vcombine.high %v10152_v47, %v10160_v37 }
 0x904   :  { %11452 = vmatpush1.bf16.msra.mxu1 %v14010_v53 }
 0x905   :  { %11487 = vmatpush1.bf16.msra.mxu0 %v13964_v45  ;;  %11453 = vmatprep.subr.bf16.mxu1 %v14027_v2  ;;  %v11219_v2 = vand.u32 %v14090_v24, %v18562_v29  ;;  %v10224_v24 = vld [vmem:[#allocation8 + $0x1df8] sm:$0xff] }
 0x906   :  { %11488 = vmatprep.subr.bf16.mxu0 %v13981_v36 }
 0x908   :  { %11454 = vmatpush1.bf16.msra.mxu1 %v14026_v25  ;;  %v10176_v25 = vld [vmem:[#allocation8 + $0x1c78] sm:$0xff] }
 0x909   :  { %11489 = vmatpush1.bf16.msra.mxu0 %v13980_v56  ;;  %11455 = vmatprep.subr.bf16.mxu1 %v14043_v7  ;;  %v10303_v56 = vld [vmem:[#allocation8 + $0x2070] sm:$0xff] }
 0x90a   :  { %11490 = vmatprep.subr.bf16.mxu0 %v13997_v31  ;;  %v10311_v7 = vld [vmem:[#allocation8 + $0x20b0] sm:$0xff]  ;;  %v14077_v10 = vcombine.high %v10295_v61, %v10303_v56  ;;  %v14076_v1 = vcombine.low %v10295_v61, %v10303_v56  ;;  %v10312_v56 = vld [vmem:[#allocation8 + $0x20b8] sm:$0xff] }
 0x90b   :  { %v10319_v31 = vld [vmem:[#allocation8 + $0x20f0] sm:$0x11] }
 0x90c   :  { %11456 = vmatpush1.bf16.msra.mxu1 %v14042_v4  ;;  %v14093_v14 = vcombine.high %v10311_v7, %v10319_v31  ;;  %v10184_v4 = vld [vmem:[#allocation8 + $0x1cb8] sm:$0xff] }
 0x90d   :  { %11491 = vmatpush1.bf16.msra.mxu0 %v13996_v30  ;;  %11457 = vmatprep.subr.bf16.mxu1 %v14059_v17  ;;  %v10192_v30 = vld [vmem:[#allocation8 + $0x1cf8] sm:$0xff] }
 0x90e   :  { %11492 = vmatprep.subr.bf16.mxu0 %v14013_v41  ;;  %v14092_v41 = vcombine.low %v10311_v7, %v10319_v31  ;;  %v13967_v23 = vcombine.high %v10184_v4, %v10192_v30  ;;  %v11228_v46 = vand.u32 %v14093_v14, %v18562_v29  ;;  %v10320_v7 = vld [vmem:[#allocation8 + $0x20f8] sm:$0x11] }
 0x910   :  { %11458 = vmatpush1.bf16.msra.mxu1 %v14058_v6 }
 0x911   :  { %11493 = vmatpush1.bf16.msra.mxu0 %v14012_v19  ;;  %11459 = vmatprep.subr.bf16.mxu1 %v14075_v0  ;;  %v13966_v0 = vcombine.low %v10184_v4, %v10192_v30 }
 0x912   :  { %v9955_v42 = vpop.f32.mrb[76].mxu1  ;;  %11494 = vmatprep.subr.bf16.mxu0 %v14029_v35  ;;  %v11225_v35 = vand.u32 %v14092_v41, %v18562_v29 }
 0x913   :  { %v19039_v11 = vadd.f32 %v9955_v42, %v18943_v34  ;;  %v9957_v54 = vpop.f32.mrb[77].mxu1  ;;  %v10168_v34 = vld [vmem:[#allocation8 + $0x1c38] sm:$0xff] }
 0x914   :  { %v19042_v53 = vadd.f32 %v9957_v54, %v18946_v22  ;;  %v9959_v45 = vpop.f32.mrb[78].mxu1  ;;  %11460 = vmatpush1.bf16.msra.mxu1 %v14074_v28  ;;  %v13934_v22 = vcombine.low %v10152_v47, %v10160_v37  ;;  %v13951_v51 = vcombine.high %v10168_v34, %v10176_v25  ;;  %v13950_v17 = vcombine.low %v10168_v34, %v10176_v25  ;;  %v10216_v28 = vld [vmem:[#allocation8 + $0x1db8] sm:$0xff] }
 0x915   :  { %11495 = vmatpush1.bf16.msra.mxu0 %v14028_v27  ;;  %v9960_v36 = vpop.f32.mrb[79].mxu1  ;;  %11461 = vmatprep.subr.bf16.mxu1 %v11222_v50  ;;  %v13982_v27 = vcombine.low %v10200_v16, %v10208_v59  ;;  %v10232_v50 = vld [vmem:[#allocation8 + $0x1e38] sm:$0xff] }
 0x916   :  { %11496 = vmatprep.subr.bf16.mxu0 %v14045_v33  ;;  %v10240_v42 = vld [vmem:[#allocation8 + $0x1e78] sm:$0xff] }
 0x917   :  { %v14015_v33 = vcombine.high %v10232_v50, %v10240_v42  ;;  %v10248_v47 = vld [vmem:[#allocation8 + $0x1eb8] sm:$0xff]  ;;  %v14014_v54 = vcombine.low %v10232_v50, %v10240_v42  ;;  %v11580_v42 = vld [vmem:[#allocation9] sm:$0xff] }
 0x918   :  { %11462 = vmatpush1.bf16.msra.mxu1 %v11219_v2  ;;  %v10256_v37 = vld [vmem:[#allocation8 + $0x1ef8] sm:$0xff] }
 0x919   :  { %11497 = vmatpush1.bf16.msra.mxu0 %v14044_v21  ;;  %11523 = vmatprep.subr.bf16.mxu1 %v13935_v63  ;;  %v14031_v44 = vcombine.high %v10248_v47, %v10256_v37  ;;  %v10272_v45 = vld [vmem:[#allocation8 + $0x1f78] sm:$0xff]  ;;  %v14030_v2 = vcombine.low %v10248_v47, %v10256_v37 }
 0x91a   :  { %11498 = vmatprep.subr.bf16.mxu0 %v14061_v9  ;;  %v14047_v36 = vcombine.high %v10264_v39, %v10272_v45  ;;  %v10280_v21 = vld [vmem:[#allocation8 + $0x1fb8] sm:$0xff]  ;;  %v14046_v9 = vcombine.low %v10264_v39, %v10272_v45 }
 0x91b   :  { %11474 = vmatmul.mubr.bf16.vlgmr.msra.gmra.mrb[96].mxu1 %v18988_v60  ;;  %v10288_v63 = vld [vmem:[#allocation8 + $0x1ff8] sm:$0xff] }
 0x91c   :  { %11524 = vmatpush1.bf16.msra.mxu1 %v13934_v22  ;;  %14103 = vmatprep.mubr.msk.bf16.mxu1 %vm4201_vm13, %v18962_v8  ;;  %v14063_v61 = vcombine.high %v10280_v21, %v10288_v63  ;;  %v10296_v34 = vld [vmem:[#allocation8 + $0x2038] sm:$0xff]  ;;  %v14062_v31 = vcombine.low %v10280_v21, %v10288_v63 }
 0x91d   :  { %11499 = vmatpush1.bf16.msra.mxu0 %v14060_v12  ;;  %11525 = vmatprep.subr.bf16.mxu1 %v13951_v51  ;;  %v10304_v25 = vld [vmem:[#allocation8 + $0x2078] sm:$0xff]  ;;  %v14095_v12 = vcombine.high %v10312_v56, %v10320_v7 }
 0x91e   :  { %11500 = vmatprep.subr.bf16.mxu0 %v14077_v10  ;;  %v14079_v22 = vcombine.high %v10296_v34, %v10304_v25  ;;  %v14078_v51 = vcombine.low %v10296_v34, %v10304_v25  ;;  %v14094_v10 = vcombine.low %v10312_v56, %v10320_v7 }
 0x91f   :  { %v9996_v58 = vpop.f32.mrb[80].mxu0  ;;  %v11234_v14 = vand.u32 %v14095_v12, %v18562_v29 }
 0x920   :  { %v19050_v6 = vadd.f32 %v9996_v58, %v18954_v57  ;;  %v9998_v19 = vpop.f32.mrb[81].mxu0  ;;  %11526 = vmatpush1.bf16.msra.mxu1 %v13950_v17  ;;  %v13999_v57 = vcombine.high %v10216_v28, %v10224_v24 }
 0x921   :  { %v19053_v8 = vadd.f32 %v9998_v19, %v18957_v26  ;;  %v10000_v38 = vpop.f32.mrb[82].mxu0  ;;  %11501 = vmatpush1.bf16.msra.mxu0 %v14076_v1  ;;  %11527 = vmatprep.subr.bf16.mxu1 %v13967_v23  ;;  %v13998_v26 = vcombine.low %v10216_v28, %v10224_v24  ;;  %v11231_v23 = vand.u32 %v14094_v10, %v18562_v29 }
 0x922   :  { %v10001_v49 = vpop.f32.mrb[83].mxu0  ;;  %11502 = vmatprep.subr.bf16.mxu0 %v11228_v46 }
 0x924   :  { %11528 = vmatpush1.bf16.msra.mxu1 %v13966_v0 }
 0x925   :  { %11503 = vmatpush1.bf16.msra.mxu0 %v11225_v35  ;;  %11529 = vmatprep.subr.bf16.mxu1 %v13983_v55 }
 0x928   :  { %11515 = vmatmul.mubr.bf16.vlgmr.msra.gmra.mrb[100].mxu0 %v18988_v60  ;;  %11530 = vmatpush1.bf16.msra.mxu1 %v13982_v27 }
 0x929   :  { %11531 = vmatprep.subr.bf16.mxu1 %v13999_v57  ;;  %v19963_v57 = vld [vmem:[#allocation59_spill] sm:$0xff] }
 0x92a   :  { %v11590_v50 = vsub.s32 1, %v19963_v57  ;;  %v11602_v7 = vsub.s32 4, %v19963_v57 }
 0x92c   :  { %11532 = vmatpush1.bf16.msra.mxu1 %v13998_v26  ;;  %v11594_v26 = vsub.s32 2, %v19963_v57 }
 0x92d   :  { %11533 = vmatprep.subr.bf16.mxu1 %v14015_v33  ;;  %v11591_v33 = vrot.slane %v11580_v42, %v11590_v50 }
 0x92e   :  { %v11595_v37 = vrot.slane %v11580_v42, %v11594_v26 }
 0x930   :  { %11534 = vmatpush1.bf16.msra.mxu1 %v14014_v54 }
 0x931   :  { %11535 = vmatprep.subr.bf16.mxu1 %v14031_v44 }
 0x934   :  { %11536 = vmatpush1.bf16.msra.mxu1 %v14030_v2 }
 0x935   :  { %11537 = vmatprep.subr.bf16.mxu1 %v14047_v36 }
 0x938   :  { %11538 = vmatpush1.bf16.msra.mxu1 %v14046_v9 }
 0x939   :  { %11539 = vmatprep.subr.bf16.mxu1 %v14063_v61 }
 0x93c   :  { %11540 = vmatpush1.bf16.msra.mxu1 %v14062_v31  ;;  %v11606_v31 = vsub.s32 5, %v19963_v57 }
 0x93d   :  { %11541 = vmatprep.subr.bf16.mxu1 %v14079_v22  ;;  %v11603_v22 = vrot.slane %v11580_v42, %v11602_v7 }
 0x93e   :  { %v10037_v4 = vpop.f32.mrb[80].mxu1 }
 0x93f   :  { %v19059_v30 = vadd.f32 %v10037_v4, %v18969_v62  ;;  %v10039_v17 = vpop.f32.mrb[81].mxu1 }
 0x940   :  { %v19062_v1 = vadd.f32 %v10039_v17, %v18972_v13  ;;  %v10041_v41 = vpop.f32.mrb[82].mxu1  ;;  %11542 = vmatpush1.bf16.msra.mxu1 %v14078_v51  ;;  %v11607_v51 = vrot.slane %v11580_v42, %v11606_v31 }
 0x941   :  { %v10042_v46 = vpop.f32.mrb[83].mxu1  ;;  %11543 = vmatprep.subr.bf16.mxu1 %v11234_v14 }
 0x944   :  { %11544 = vmatpush1.bf16.msra.mxu1 %v11231_v23 }
 0x947   :  { %11556 = vmatmul.mubr.bf16.vlgmr.msra.gmra.mrb[100].mxu1 %v18988_v60 }
 0x94b   :  { %v10078_v16 = vpop.f32.mrb[84].mxu0 }
 0x94c   :  { %v19067_v59 = vadd.f32 %v10078_v16, %v18980_v5  ;;  %v10080_v58 = vpop.f32.mrb[85].mxu0 }
 0x94d   :  { %v19070_v62 = vadd.f32 %v10080_v58, %v18983_v3  ;;  %v10082_v19 = vpop.f32.mrb[86].mxu0 }
 0x94e   :  { %v10083_v13 = vpop.f32.mrb[87].mxu0 }
 0x96a   :  { %v10119_v0 = vpop.f32.mrb[84].mxu1 }
 0x96b   :  { %v19073_v38 = vadd.f32 %v10119_v0, %v18995_v20  ;;  %v10121_v29 = vpop.f32.mrb[85].mxu1  ;;  %v11586_v20 = vsub.s32 0, %v19963_v57 }
 0x96c   :  { %v19076_v35 = vadd.f32 %v10121_v29, %v18998_v32  ;;  %v10123_v55 = vpop.f32.mrb[86].mxu1  ;;  %v11598_v32 = vsub.s32 3, %v19963_v57 }
 0x96d   :  { %v10124_v60 = vpop.f32.mrb[87].mxu1  ;;  %v11587_v47 = vrot.slane %v11580_v42, %v11586_v20 }
 0x977   :  { %v11270_v49 = vpop.f32.mrb[88].mxu0 }
 0x978   :  { %v11564_v5 = vadd.f32 %v11270_v49, %v19006_v18  ;;  %v11272_v28 = vpop.f32.mrb[89].mxu0 }
 0x979   :  { %v11565_v24 = vadd.f32 %v11272_v28, %v19009_v52  ;;  %v11274_v3 = vpop.f32.mrb[90].mxu0  ;;  %v11599_v52 = vrot.slane %v11580_v42, %v11598_v32 }
 0x97a   :  { %v11275_v27 = vpop.f32.mrb[91].mxu0  ;;  %v19091_v45 = vadd.f32 %v11587_v47, %v11564_v5  ;;  %v19149_v47 = vld [vmem:[#allocation9 + $0x8] sm:$0xff] }
 0x97b   :  { %v19088_v54 = vadd.f32 %v11591_v33, %v11565_v24 }
 0x97c   :  { %v11680_v25 = vmax.f32 %v19091_v45, 0.0 }
 0x97d   :  { %v11681_v61 = vmax.f32 %v19088_v54, 0.0  ;;  %v11900_v54 = vld [vmem:[#allocation11 + $0x68] sm:$0xff] }
 0x996   :  { %v11311_v18 = vpop.f32.mrb[88].mxu1 }
 0x997   :  { %v11566_v44 = vadd.f32 %v11311_v18, %v19017_v43  ;;  %v11313_v39 = vpop.f32.mrb[89].mxu1 }
 0x998   :  { %v11567_v2 = vadd.f32 %v11313_v39, %v19020_v15  ;;  %v11315_v36 = vpop.f32.mrb[90].mxu1 }
 0x999   :  { %v19094_v21 = vadd.f32 %v11595_v37, %v11566_v44  ;;  %v11316_v63 = vpop.f32.mrb[91].mxu1  ;;  %v11623_v37 = vrot.slane %v19149_v47, %v11590_v50  ;;  %v11936_v50 = vld [vmem:[#allocation11 + $0x188] sm:$0xff] }
 0x99a   :  { %v19096_v9 = vadd.f32 %v11599_v52, %v11567_v2 }
 0x99b   :  { %v11682_v34 = vmax.f32 %v19094_v21, 0.0 }
 0x99c   :  { %v11683_v56 = vmax.f32 %v19096_v9, 0.0  ;;  %v11999_v9 = vld [vmem:[#allocation11 + $0x380] sm:$0xff] }
 0x99d   :  { %v15875_v43 = vpack.i.bf16 %v11682_v34, %v11681_v61 }
 0x99e   :  { %v15880_v15 = vpack.i.bf16 %v11680_v25, %v11683_v56 }
 0x99f   :  { %15876 = vrot.lane.b32.xlu0 %v15875_v43, %s16177_s30  ;;  %v11903_v43 = vld [vmem:[#allocation11 + $0x80] sm:$0xff] }
 0x9a0   :  { %15881 = vrot.lane.b32.xlu1 %v15880_v15, %s16177_s30  ;;  %v11904_v15 = vld [vmem:[#allocation11 + $0x88] sm:$0xff] }
 0x9a3   :  { %v11352_v12 = vpop.f32.mrb[92].mxu0 }
 0x9a4   :  { %v11568_v10 = vadd.f32 %v11352_v12, %v19028_v40  ;;  %v11354_v14 = vpop.f32.mrb[93].mxu0  ;;  %v11610_v40 = vsub.s32 6, %v19963_v57 }
 0x9a5   :  { %v11569_v4 = vadd.f32 %v11354_v14, %v19031_v48  ;;  %v11356_v17 = vpop.f32.mrb[94].mxu0  ;;  %v11614_v48 = vsub.s32 7, %v19963_v57 }
 0x9a6   :  { %v19120_v41 = vadd.f32 %v11603_v22, %v11568_v10  ;;  %v11357_v23 = vpop.f32.mrb[95].mxu0  ;;  %v11611_v13 = vrot.slane %v11580_v42, %v11610_v40  ;;  %v11887_v22 = vld [vmem:[#allocation11] sm:$0xff]  ;;  %v11906_v17 = vld [vmem:[#allocation11 + $0x98] sm:$0xff] }
 0x9a7   :  { %v19122_v46 = vadd.f32 %v11607_v51, %v11569_v4  ;;  %v11615_v29 = vrot.slane %v11580_v42, %v11614_v48  ;;  %v11888_v51 = vld [vmem:[#allocation11 + $0x8] sm:$0xff]  ;;  %v11935_v10 = vld [vmem:[#allocation11 + $0x180] sm:$0xff] }
 0x9a8   :  { %v11684_v16 = vmax.f32 %v19120_v41, 0.0  ;;  %v15528_v14 = vpack.c.bf16 %v11888_v51, %v11887_v22  ;;  %v15558_v4 = vpack.c.bf16 %v11936_v50, %v11935_v10  ;;  %v11919_v23 = vld [vmem:[#allocation11 + $0x100] sm:$0xff]  ;;  %v11909_v22 = vld [vmem:[#allocation11 + $0xb0] sm:$0xff] }
 0x9a9   :  { %v11685_v58 = vmax.f32 %v19122_v46, 0.0  ;;  %v11923_v50 = vld [vmem:[#allocation11 + $0x120] sm:$0xff] }
 0x9aa   :  { %15559 = vmatprep.subr.bf16.mxu1 %v15558_v4 }
 0x9ab   :  { %v15885_v19 = vpack.i.bf16 %v11685_v58, %v11684_v16 }
 0x9ad   :  { %15886 = vrot.lane.b32.xlu0 %v15885_v19, %s16177_s30 }
 0x9c2   :  { %v11393_v0 = vpop.f32.mrb[92].mxu1 }
 0x9c3   :  { %v11570_v55 = vadd.f32 %v11393_v0, %v19039_v11  ;;  %v11395_v60 = vpop.f32.mrb[93].mxu1  ;;  %v11619_v11 = vrot.slane %v19149_v47, %v11586_v20  ;;  %v15526_v20 = vpack.c.bf16 %v11904_v15, %v11903_v43  ;;  %v11889_v0 = vld [vmem:[#allocation11 + $0x10] sm:$0xff]  ;;  %v11939_v43 = vld [vmem:[#allocation11 + $0x1a0] sm:$0xff]  ;;  %v11940_v15 = vld [vmem:[#allocation11 + $0x1a8] sm:$0xff] }
 0x9c4   :  { %v11571_v49 = vadd.f32 %v11395_v60, %v19042_v53  ;;  %v11397_v5 = vpop.f32.mrb[94].mxu1  ;;  %v15566_v10 = vpack.c.bf16 %v11940_v15, %v11939_v43  ;;  %v11926_v15 = vld [vmem:[#allocation11 + $0x138] sm:$0xff] }
 0x9c5   :  { %v19139_v28 = vadd.f32 %v11611_v13, %v11570_v55  ;;  %v11398_v24 = vpop.f32.mrb[95].mxu1  ;;  %15527 = vmatprep.subr.bf16.mxu0 %v15526_v20  ;;  %v11920_v13 = vld [vmem:[#allocation11 + $0x108] sm:$0xff]  ;;  %v11937_v5 = vld [vmem:[#allocation11 + $0x190] sm:$0xff]  ;;  %v11910_v20 = vld [vmem:[#allocation11 + $0xb8] sm:$0xff] }
 0x9c6   :  { %v19141_v3 = vadd.f32 %v11615_v29, %v11571_v49  ;;  %v11890_v29 = vld [vmem:[#allocation11 + $0x18] sm:$0xff]  ;;  %15529 = vmatpush3.bf16.msra.mxu0 %v15528_v14  ;;  %v15560_v60 = vpack.c.bf16 %v11920_v13, %v11919_v23  ;;  %v11924_v14 = vld [vmem:[#allocation11 + $0x128] sm:$0xff]  ;;  %v15538_v4 = vpack.c.bf16 %v11910_v20, %v11909_v22 }
 0x9c7   :  { %v11686_v27 = vmax.f32 %v19139_v28, 0.0  ;;  %v15532_v49 = vpack.c.bf16 %v11890_v29, %v11889_v0  ;;  %v11938_v24 = vld [vmem:[#allocation11 + $0x198] sm:$0xff]  ;;  %v15568_v23 = vpack.c.bf16 %v11924_v14, %v11923_v50  ;;  %v11896_v22 = vld [vmem:[#allocation11 + $0x48] sm:$0xff] }
 0x9c8   :  { %v11687_v33 = vmax.f32 %v19141_v3, 0.0  ;;  %15561 = vmatpush3.bf16.msra.mxu1 %v15560_v60  ;;  %v11944_v50 = vld [vmem:[#allocation11 + $0x1c8] sm:$0xff] }
 0x9ca   :  { %v15890_v42 = vpack.i.bf16 %v11687_v33, %v11686_v27 }
 0x9cc   :  { %15891 = vrot.lane.b32.xlu1 %v15890_v42, %s16177_s30  ;;  %v11907_v42 = vld [vmem:[#allocation11 + $0xa0] sm:$0xff] }
 0x9cf   :  { %v11434_v53 = vpop.f32.mrb[96].mxu0 }
 0x9d0   :  { %v11572_v18 = vadd.f32 %v11434_v53, %v19050_v6  ;;  %v11436_v52 = vpop.f32.mrb[97].mxu0  ;;  %v11908_v53 = vld [vmem:[#allocation11 + $0xa8] sm:$0xff] }
 0x9d1   :  { %v11573_v44 = vadd.f32 %v11436_v52, %v19053_v8  ;;  %v11438_v39 = vpop.f32.mrb[98].mxu0  ;;  %v11905_v8 = vld [vmem:[#allocation11 + $0x90] sm:$0xff]  ;;  %v15534_v52 = vpack.c.bf16 %v11908_v53, %v11907_v42 }
 0x9d2   :  { %v19156_v2 = vadd.f32 %v11619_v11, %v11572_v18  ;;  %v11439_v36 = vpop.f32.mrb[99].mxu0  ;;  %v15530_v19 = vpack.c.bf16 %v11906_v17, %v11905_v8  ;;  %v15562_v11 = vpack.c.bf16 %v11938_v24, %v11937_v5  ;;  %v11922_v18 = vld [vmem:[#allocation11 + $0x118] sm:$0xff]  ;;  %v11891_v39 = vld [vmem:[#allocation11 + $0x20] sm:$0xff]  ;;  %v11893_v8 = vld [vmem:[#allocation11 + $0x30] sm:$0xff] }
 0x9d3   :  { %v19158_v63 = vadd.f32 %v11623_v37, %v11573_v44  ;;  %v11921_v37 = vld [vmem:[#allocation11 + $0x110] sm:$0xff]  ;;  %v11892_v36 = vld [vmem:[#allocation11 + $0x28] sm:$0xff]  ;;  %v11894_v17 = vld [vmem:[#allocation11 + $0x38] sm:$0xff] }
 0x9d4   :  { %v11688_v12 = vmax.f32 %v19156_v2, 0.0  ;;  %15531 = vmatprep.subr.bf16.mxu0 %v15530_v19  ;;  %v15564_v44 = vpack.c.bf16 %v11922_v18, %v11921_v37  ;;  %15563 = vmatprep.subr.bf16.mxu1 %v15562_v11  ;;  %v15536_v51 = vpack.c.bf16 %v11892_v36, %v11891_v39  ;;  %v15540_v19 = vpack.c.bf16 %v11894_v17, %v11893_v8  ;;  %v11941_v18 = vld [vmem:[#allocation11 + $0x1b0] sm:$0xff]  ;;  %v11911_v39 = vld [vmem:[#allocation11 + $0xc0] sm:$0xff]  ;;  %v11914_v8 = vld [vmem:[#allocation11 + $0xd8] sm:$0xff] }
 0x9d5   :  { %v11689_v6 = vmax.f32 %v19158_v63, 0.0  ;;  %15533 = vmatpush3.bf16.msra.mxu0 %v15532_v49  ;;  %v11925_v36 = vld [vmem:[#allocation11 + $0x130] sm:$0xff]  ;;  %v11927_v17 = vld [vmem:[#allocation11 + $0x140] sm:$0xff] }
 0x9d6   :  { %15535 = vmatprep.subr.bf16.mxu0 %v15534_v52  ;;  %15565 = vmatpush3.bf16.msra.mxu1 %v15564_v44  ;;  %v11942_v52 = vld [vmem:[#allocation11 + $0x1b8] sm:$0xff]  ;;  %v15572_v20 = vpack.c.bf16 %v11926_v15, %v11925_v36 }
 0x9d7   :  { %v15895_v55 = vpack.i.bf16 %v11689_v6, %v11688_v12  ;;  %15567 = vmatprep.subr.bf16.mxu1 %v15566_v10  ;;  %v15570_v44 = vpack.c.bf16 %v11942_v52, %v11941_v18  ;;  %v11943_v10 = vld [vmem:[#allocation11 + $0x1c0] sm:$0xff]  ;;  %v11639_v52 = vrot.slane %v19149_v47, %v11606_v31  ;;  %v11929_v31 = vld [vmem:[#allocation11 + $0x150] sm:$0xff] }
 0x9d9   :  { %15896 = vrot.lane.b32.xlu0 %v15895_v55, %s16177_s30  ;;  %15537 = vmatpush3.bf16.msra.mxu0 %v15536_v51 }
 0x9da   :  { %15539 = vmatprep.subr.bf16.mxu0 %v15538_v4  ;;  %15569 = vmatpush3.bf16.msra.mxu1 %v15568_v23  ;;  %v15574_v4 = vpack.c.bf16 %v11944_v50, %v11943_v10 }
 0x9db   :  { %15571 = vmatprep.subr.bf16.mxu1 %v15570_v44 }
 0x9dd   :  { %15541 = vmatpush3.bf16.msra.mxu0 %v15540_v19 }
 0x9de   :  { %15573 = vmatpush3.bf16.msra.mxu1 %v15572_v20 }
 0x9df   :  { %15575 = vmatprep.subr.bf16.mxu1 %v15574_v4 }
 0x9ee   :  { %v11475_v13 = vpop.f32.mrb[96].mxu1 }
 0x9ef   :  { %v11574_v0 = vadd.f32 %v11475_v13, %v19059_v30  ;;  %v11477_v29 = vpop.f32.mrb[97].mxu1  ;;  %v11912_v30 = vld [vmem:[#allocation11 + $0xc8] sm:$0xff] }
 0x9f0   :  { %v11575_v55 = vadd.f32 %v11477_v29, %v19062_v1  ;;  %v11479_v60 = vpop.f32.mrb[98].mxu1  ;;  %v11627_v1 = vrot.slane %v19149_v47, %v11594_v26  ;;  %v15542_v43 = vpack.c.bf16 %v11912_v30, %v11911_v39  ;;  %v11913_v26 = vld [vmem:[#allocation11 + $0xd0] sm:$0xff]  ;;  %v11946_v39 = vld [vmem:[#allocation11 + $0x1d8] sm:$0xff] }
 0x9f1   :  { %v11480_v49 = vpop.f32.mrb[99].mxu1  ;;  %v15546_v29 = vpack.c.bf16 %v11914_v8, %v11913_v26  ;;  %v11928_v60 = vld [vmem:[#allocation11 + $0x148] sm:$0xff] }
 0x9f2   :  { %15543 = vmatprep.subr.bf16.mxu0 %v15542_v43  ;;  %v19183_v23 = vadd.f32 %v11627_v1, %v11574_v0  ;;  %v11897_v49 = vld [vmem:[#allocation11 + $0x50] sm:$0xff]  ;;  %v11635_v0 = vrot.slane %v19149_v47, %v11602_v7  ;;  %v11915_v7 = vld [vmem:[#allocation11 + $0xe0] sm:$0xff]  ;;  %v11916_v1 = vld [vmem:[#allocation11 + $0xe8] sm:$0xff] }
 0x9f3   :  { %v11948_v26 = vld [vmem:[#allocation11 + $0x1e8] sm:$0xff] }
 0x9fb   :  { %v11516_v5 = vpop.f32.mrb[100].mxu0 }
 0x9fc   :  { %v19170_v24 = vadd.f32 %v11516_v5, %v19067_v59  ;;  %v11518_v42 = vpop.f32.mrb[101].mxu0  ;;  %v11895_v59 = vld [vmem:[#allocation11 + $0x40] sm:$0xff]  ;;  %v11898_v5 = vld [vmem:[#allocation11 + $0x58] sm:$0xff] }
 0x9fd   :  { %v19173_v11 = vadd.f32 %v11518_v42, %v19070_v62  ;;  %v11520_v53 = vpop.f32.mrb[102].mxu0  ;;  %v11631_v62 = vrot.slane %v19149_v47, %v11598_v32  ;;  %v15544_v51 = vpack.c.bf16 %v11896_v22, %v11895_v59  ;;  %v15548_v18 = vpack.c.bf16 %v11898_v5, %v11897_v49  ;;  %v11930_v22 = vld [vmem:[#allocation11 + $0x158] sm:$0xff]  ;;  %v11932_v49 = vld [vmem:[#allocation11 + $0x168] sm:$0xff]  ;;  %v11901_v5 = vld [vmem:[#allocation11 + $0x70] sm:$0xff] }
 0x9fe   :  { %v11521_v37 = vpop.f32.mrb[103].mxu0  ;;  %v15550_v59 = vpack.c.bf16 %v11916_v1, %v11915_v7  ;;  %v19215_v50 = vadd.f32 %v11635_v0, %v19170_v24  ;;  %v11643_v24 = vrot.slane %v19149_v47, %v11610_v40 }
 0x9ff   :  { %15545 = vmatpush3.bf16.msra.mxu0 %v15544_v51  ;;  %v19189_v42 = vadd.f32 %v11631_v62, %v11575_v55  ;;  %v15576_v37 = vpack.c.bf16 %v11928_v60, %v11927_v17  ;;  %v11945_v55 = vld [vmem:[#allocation11 + $0x1d0] sm:$0xff]  ;;  %v11899_v62 = vld [vmem:[#allocation11 + $0x60] sm:$0xff]  ;;  %v15580_v51 = vpack.c.bf16 %v11930_v22, %v11929_v31  ;;  %v19218_v4 = vadd.f32 %v11639_v52, %v19173_v11 }
 0xa00   :  { %15547 = vmatprep.subr.bf16.mxu0 %v15546_v29  ;;  %v15578_v15 = vpack.c.bf16 %v11946_v39, %v11945_v55  ;;  %v15552_v10 = vpack.c.bf16 %v11900_v54, %v11899_v62  ;;  %v11917_v17 = vld [vmem:[#allocation11 + $0xf0] sm:$0xff]  ;;  %v11931_v29 = vld [vmem:[#allocation11 + $0x160] sm:$0xff]  ;;  %v11692_v40 = vmax.f32 %v19215_v50, 0.0  ;;  %v11934_v62 = vld [vmem:[#allocation11 + $0x178] sm:$0xff] }
 0xa01   :  { %15577 = vmatpush3.bf16.msra.mxu1 %v15576_v37  ;;  %v11691_v20 = vmax.f32 %v19189_v42, 0.0  ;;  %v11902_v37 = vld [vmem:[#allocation11 + $0x78] sm:$0xff]  ;;  %v11693_v39 = vmax.f32 %v19218_v4, 0.0  ;;  %v11949_v31 = vld [vmem:[#allocation11 + $0x1f0] sm:$0xff] }
 0xa02   :  { %15579 = vmatprep.subr.bf16.mxu1 %v15578_v15  ;;  %v15556_v55 = vpack.c.bf16 %v11902_v37, %v11901_v5  ;;  %v11950_v15 = vld [vmem:[#allocation11 + $0x1f8] sm:$0xff]  ;;  %v11933_v22 = vld [vmem:[#allocation11 + $0x170] sm:$0xff]  ;;  %v11647_v5 = vrot.slane %v19149_v47, %v11614_v48 }
 0xa03   :  { %15549 = vmatpush3.bf16.msra.mxu0 %v15548_v18  ;;  %v15588_v54 = vpack.c.bf16 %v11934_v62, %v11933_v22  ;;  %v11953_v50 = vld [vmem:[#allocation11 + $0x210] sm:$0xff] }
 0xa04   :  { %15551 = vmatprep.subr.bf16.mxu0 %v15550_v59 }
 0xa05   :  { %15581 = vmatpush3.bf16.msra.mxu1 %v15580_v51  ;;  %v11967_v51 = vld [vmem:[#allocation11 + $0x280] sm:$0xff] }
 0xa07   :  { %15553 = vmatpush3.bf16.msra.mxu0 %v15552_v10  ;;  %v11968_v10 = vld [vmem:[#allocation11 + $0x288] sm:$0xff] }
 0xa11   :  { %v19181_v14 = vpop.permute.xlu0 %15876 }
 0xa12   :  { %v15879_v19 = vunpack.i.h.bf16 %v19181_v14  ;;  %v15878_v32 = vunpack.i.l.bf16 %v19181_v14  ;;  %v19187_v13 = vpop.permute.xlu1 %15881 }
 0xa13   :  { %v15883_v53 = vunpack.i.l.bf16 %v19187_v13 }
 0xa14   :  { %v11745_v44 = vsel %vm347_vm1, %v15878_v32, %v15879_v19 }
 0xa15   :  { %v19203_v30 = vmax.f32 %v11681_v61, %v11745_v44  ;;  %v11746_v36 = vsel %vm347_vm1, %v15879_v19, %v15883_v53  ;;  %v11690_v61 = vmax.f32 %v19183_v23, 0.0  ;;  %v11918_v19 = vld [vmem:[#allocation11 + $0xf8] sm:$0xff]  ;;  %v15584_v44 = vpack.c.bf16 %v11932_v49, %v11931_v29 }
 0xa16   :  { %v19210_v43 = vmax.f32 %v11682_v34, %v11746_v36  ;;  %v11947_v34 = vld [vmem:[#allocation11 + $0x1e0] sm:$0xff]  ;;  %v15554_v11 = vpack.c.bf16 %v11918_v19, %v11917_v17  ;;  %v15884_v36 = vunpack.i.h.bf16 %v19187_v13 }
 0xa17   :  { %v15582_v8 = vpack.c.bf16 %v11948_v26, %v11947_v34  ;;  %v15905_v18 = vpack.i.bf16 %v11691_v20, %v11690_v61  ;;  %v15590_v34 = vpack.c.bf16 %v11968_v10, %v11967_v51 }
 0xa18   :  { %v15900_v21 = vpack.i.bf16 %v19210_v43, %v19203_v30  ;;  %15555 = vmatprep.subr.bf16.mxu0 %v15554_v11  ;;  %v11744_v26 = vsel %vm347_vm1, %v15884_v36, %v15878_v32 }
 0xa19   :  { %15583 = vmatprep.subr.bf16.mxu1 %v15582_v8  ;;  %15557 = vmatpush3.bf16.msra.mxu0 %v15556_v55 }
 0xa1a   :  { %v11557_v60 = vpop.f32.mrb[100].mxu1  ;;  %15901 = vrot.lane.b32.xlu1 %v15900_v21, %s16187_s29  ;;  %15585 = vmatpush3.bf16.msra.mxu1 %v15584_v44 }
 0xa1b   :  { %v11578_v0 = vadd.f32 %v11557_v60, %v19073_v38  ;;  %v11559_v52 = vpop.f32.mrb[101].mxu1  ;;  %v15586_v38 = vpack.c.bf16 %v11950_v15, %v11949_v31  ;;  %15591 = vmatprep.subr.bf16.mxu0 %v15590_v34  ;;  %v19251_v60 = vmax.f32 %v11680_v25, %v11744_v26  ;;  %v12000_v25 = vld [vmem:[#allocation11 + $0x388] sm:$0xff] }
 0xa1c   :  { %v11579_v7 = vadd.f32 %v11559_v52, %v19076_v35  ;;  %v11561_v1 = vpop.f32.mrb[102].mxu1  ;;  %v15915_v35 = vpack.i.bf16 %v11693_v39, %v11692_v40  ;;  %v11952_v34 = vld [vmem:[#allocation11 + $0x208] sm:$0xff] }
 0xa1d   :  { %v11562_v59 = vpop.f32.mrb[103].mxu1  ;;  %15587 = vmatprep.subr.bf16.mxu1 %v15586_v38  ;;  %v19243_v8 = vadd.f32 %v11643_v24, %v11578_v0 }
 0xa1e   :  { %15906 = vrot.lane.b32.xlu1 %v15905_v18, %s16177_s30  ;;  %15589 = vmatpush3.bf16.msra.mxu1 %v15588_v54  ;;  %v19284_v0 = vadd.f32 %v11647_v5, %v11579_v7 }
 0xa1f   :  { %v15887_v21 = vpop.permute.xlu0 %15886  ;;  %v11694_v32 = vmax.f32 %v19243_v8, 0.0  ;;  %v12020_v8 = vld [vmem:[#allocation11 + $0x428] sm:$0xff] }
 0xa20   :  { %v15888_v17 = vunpack.i.l.bf16 %v15887_v21  ;;  %v15889_v19 = vunpack.i.h.bf16 %v15887_v21  ;;  %v11695_v57 = vmax.f32 %v19284_v0, 0.0  ;;  %v11951_v21 = vld [vmem:[#allocation11 + $0x200] sm:$0xff] }
 0xa22   :  { %v11747_v29 = vsel %vm347_vm1, %v15883_v53, %v15888_v17  ;;  %15916 = vrot.lane.b32.xlu1 %v15915_v35, %s16177_s30  ;;  %v11748_v11 = vsel %vm347_vm1, %v15888_v17, %v15889_v19 }
 0xa23   :  { %v19255_v14 = vmax.f32 %v11683_v56, %v11747_v29  ;;  %v19267_v45 = vmax.f32 %v11684_v16, %v11748_v11  ;;  %v15622_v56 = vpack.c.bf16 %v12000_v25, %v11999_v9  ;;  %v11970_v29 = vld [vmem:[#allocation11 + $0x298] sm:$0xff] }
 0xa25   :  { %v15910_v24 = vpack.i.bf16 %v19255_v14, %v19251_v60  ;;  %15623 = vmatprep.subr.bf16.mxu1 %v15622_v56 }
 0xa26   :  { %11740 = vrot.lane.b32.xlu1 %v11694_v32, %s16177_s30 }
 0xa27   :  { %15911 = vrot.lane.b32.xlu0 %v15910_v24, %s16187_s29  ;;  %v11984_v24 = vld [vmem:[#allocation11 + $0x308] sm:$0xff] }
 0xa2b   :  { %11815 = vrot.lane.b32.xlu0 %v19267_v45, %s16187_s29 }
 0xa3e   :  { %v15892_v13 = vpop.permute.xlu1 %15891 }
 0xa3f   :  { %v15894_v53 = vunpack.i.h.bf16 %v15892_v13  ;;  %v15893_v49 = vunpack.i.l.bf16 %v15892_v13  ;;  %v11954_v13 = vld [vmem:[#allocation11 + $0x218] sm:$0xff] }
 0xa41   :  { %v11749_v37 = vsel %vm347_vm1, %v15889_v19, %v15893_v49  ;;  %v11750_v41 = vsel %vm347_vm1, %v15893_v49, %v15894_v53  ;;  %v11969_v19 = vld [vmem:[#allocation11 + $0x290] sm:$0xff]  ;;  %v12002_v49 = vld [vmem:[#allocation11 + $0x398] sm:$0xff] }
 0xa42   :  { %v19278_v16 = vmax.f32 %v11685_v58, %v11749_v37  ;;  %v19282_v18 = vmax.f32 %v11686_v27, %v11750_v41  ;;  %v15594_v56 = vpack.c.bf16 %v11970_v29, %v11969_v19  ;;  %v11971_v37 = vld [vmem:[#allocation11 + $0x2a0] sm:$0xff]  ;;  %v11972_v41 = vld [vmem:[#allocation11 + $0x2a8] sm:$0xff]  ;;  %v11989_v19 = vld [vmem:[#allocation11 + $0x330] sm:$0xff] }
 0xa43   :  { %v11990_v29 = vld [vmem:[#allocation11 + $0x338] sm:$0xff] }
 0xa44   :  { %v15920_v52 = vpack.i.bf16 %v19282_v18, %v19278_v16 }
 0xa46   :  { %15921 = vrot.lane.b32.xlu0 %v15920_v52, %s16187_s29 }
 0xa4a   :  { %11742 = vrot.lane.b32.xlu0 %v11695_v57, %s16177_s30 }
 0xa4b   :  { %v15897_v46 = vpop.permute.xlu0 %15896 }
 0xa4c   :  { %v15899_v58 = vunpack.i.h.bf16 %v15897_v46  ;;  %v15898_v48 = vunpack.i.l.bf16 %v15897_v46 }
 0xa4e   :  { %v11751_v28 = vsel %vm347_vm1, %v15894_v53, %v15898_v48  ;;  %v11752_v27 = vsel %vm347_vm1, %v15898_v48, %v15899_v58  ;;  %v12001_v53 = vld [vmem:[#allocation11 + $0x390] sm:$0xff]  ;;  %v15596_v48 = vpack.c.bf16 %v11954_v13, %v11953_v50  ;;  %v12007_v50 = vld [vmem:[#allocation11 + $0x3c0] sm:$0xff] }
 0xa4f   :  { %v19297_v47 = vmax.f32 %v11687_v33, %v11751_v28  ;;  %v19301_v44 = vmax.f32 %v11688_v12, %v11752_v27  ;;  %v15626_v28 = vpack.c.bf16 %v12002_v49, %v12001_v53  ;;  %v11985_v27 = vld [vmem:[#allocation11 + $0x310] sm:$0xff]  ;;  %v11991_v49 = vld [vmem:[#allocation11 + $0x340] sm:$0xff] }
 0xa50   :  { %v11961_v13 = vld [vmem:[#allocation11 + $0x250] sm:$0xff] }
 0xa51   :  { %v15925_v55 = vpack.i.bf16 %v19301_v44, %v19297_v47 }
 0xa53   :  { %15926 = vrot.lane.b32.xlu1 %v15925_v55, %s16187_s29  ;;  %v11986_v55 = vld [vmem:[#allocation11 + $0x318] sm:$0xff] }
 0xa8c   :  { %v15902_v36 = vpop.permute.xlu1 %15901 }
 0xa8d   :  { %v15904_v7 = vunpack.i.h.bf16 %v15902_v36  ;;  %v15903_v1 = vunpack.i.l.bf16 %v15902_v36  ;;  %v15598_v36 = vpack.c.bf16 %v11972_v41, %v11971_v37  ;;  %v11962_v41 = vld [vmem:[#allocation11 + $0x258] sm:$0xff] }
 0xa8f   :  { %v11841_v31 = vsel %vm11839_vm0, %v15903_v1, %v15904_v7 }
 0xa90   :  { %v15907_v15 = vpop.permute.xlu1 %15906  ;;  %v11872_v3 = vmax.f32 %v19203_v30, %v11841_v31  ;;  %v12004_v31 = vld [vmem:[#allocation11 + $0x3a8] sm:$0xff] }
 0xa91   :  { %v15909_v33 = vunpack.i.h.bf16 %v15907_v15  ;;  %v15908_v59 = vunpack.i.l.bf16 %v15907_v15  ;;  %v11973_v15 = vld [vmem:[#allocation11 + $0x2b0] sm:$0xff] }
 0xa92   :  { %12206 = vmatprep.mubr.f32.mxu0 %v11872_v3  ;;  %v11974_v3 = vld [vmem:[#allocation11 + $0x2b8] sm:$0xff] }
 0xa93   :  { %v11753_v2 = vsel %vm347_vm1, %v15899_v58, %v15908_v59  ;;  %v11754_v12 = vsel %vm347_vm1, %v15908_v59, %v15909_v33 }
 0xa94   :  { %v19312_v38 = vmax.f32 %v11689_v6, %v11753_v2  ;;  %v19316_v22 = vmax.f32 %v11690_v61, %v11754_v12  ;;  %v19318_v62 = vpop.permute.xlu1 %15916  ;;  %v11987_v2 = vld [vmem:[#allocation11 + $0x320] sm:$0xff]  ;;  %v11988_v12 = vld [vmem:[#allocation11 + $0x328] sm:$0xff] }
 0xa95   :  { %v15919_v54 = vunpack.i.h.bf16 %v19318_v62  ;;  %v15918_v30 = vunpack.i.l.bf16 %v19318_v62 }
 0xa96   :  { %v15930_v51 = vpack.i.bf16 %v19316_v22, %v19312_v38 }
 0xa97   :  { %v11755_v10 = vsel %vm347_vm1, %v15909_v33, %v15918_v30  ;;  %v11756_v63 = vsel %vm347_vm1, %v15918_v30, %v15919_v54  ;;  %v15602_v30 = vpack.c.bf16 %v11974_v3, %v11973_v15  ;;  %v12011_v15 = vld [vmem:[#allocation11 + $0x3e0] sm:$0xff]  ;;  %v12012_v3 = vld [vmem:[#allocation11 + $0x3e8] sm:$0xff] }
 0xa98   :  { %v19330_v6 = vmax.f32 %v11691_v20, %v11755_v10  ;;  %v19334_v23 = vmax.f32 %v11692_v40, %v11756_v63  ;;  %15931 = vrot.lane.b32.xlu0 %v15930_v51, %s16187_s29  ;;  %v15592_v20 = vpack.c.bf16 %v11952_v34, %v11951_v21  ;;  %v11983_v40 = vld [vmem:[#allocation11 + $0x300] sm:$0xff]  ;;  %v11958_v51 = vld [vmem:[#allocation11 + $0x238] sm:$0xff]  ;;  %v12005_v10 = vld [vmem:[#allocation11 + $0x3b0] sm:$0xff]  ;;  %v15632_v34 = vpack.c.bf16 %v11988_v12, %v11987_v2 }
 0xa99   :  { %v15912_v61 = vpop.permute.xlu0 %15911  ;;  %v15624_v46 = vpack.c.bf16 %v11984_v24, %v11983_v40  ;;  %v12006_v63 = vld [vmem:[#allocation11 + $0x3b8] sm:$0xff]  ;;  %v11976_v21 = vld [vmem:[#allocation11 + $0x2c8] sm:$0xff]  ;;  %v11977_v24 = vld [vmem:[#allocation11 + $0x2d0] sm:$0xff]  ;;  %v15646_v12 = vpack.c.bf16 %v12012_v3, %v12011_v15 }
 0xa9a   :  { %v15914_v35 = vunpack.i.h.bf16 %v15912_v61  ;;  %v15913_v26 = vunpack.i.l.bf16 %v15912_v61  ;;  %v15935_v17 = vpack.i.bf16 %v19334_v23, %v19330_v6  ;;  %v11975_v61 = vld [vmem:[#allocation11 + $0x2c0] sm:$0xff]  ;;  %v12008_v40 = vld [vmem:[#allocation11 + $0x3c8] sm:$0xff]  ;;  %v11965_v2 = vld [vmem:[#allocation11 + $0x270] sm:$0xff] }
 0xa9b   :  { %v15638_v53 = vpack.c.bf16 %v12008_v40, %v12007_v50  ;;  %v11998_v50 = vld [vmem:[#allocation11 + $0x378] sm:$0xff] }
 0xa9c   :  { %v11840_v42 = vsel %vm11839_vm0, %v15913_v26, %v15903_v1  ;;  %15936 = vrot.lane.b32.xlu1 %v15935_v17, %s16187_s29  ;;  %v11842_v11 = vsel %vm11839_vm0, %v15904_v7, %v15914_v35  ;;  %v11956_v7 = vld [vmem:[#allocation11 + $0x228] sm:$0xff]  ;;  %v12003_v1 = vld [vmem:[#allocation11 + $0x3a0] sm:$0xff]  ;;  %v15634_v17 = vpack.c.bf16 %v12006_v63, %v12005_v10  ;;  %v11966_v63 = vld [vmem:[#allocation11 + $0x278] sm:$0xff] }
 0xa9d   :  { %v11871_v9 = vmax.f32 %v19251_v60, %v11840_v42  ;;  %v19343_v25 = vpop.permute.xlu0 %11815  ;;  %v11873_v58 = vmax.f32 %v19210_v43, %v11842_v11  ;;  %v11955_v60 = vld [vmem:[#allocation11 + $0x220] sm:$0xff]  ;;  %v11957_v43 = vld [vmem:[#allocation11 + $0x230] sm:$0xff]  ;;  %v15630_v59 = vpack.c.bf16 %v12004_v31, %v12003_v1  ;;  %v15606_v42 = vpack.c.bf16 %v11976_v21, %v11975_v61  ;;  %v11978_v11 = vld [vmem:[#allocation11 + $0x2d8] sm:$0xff] }
 0xa9e   :  { %v11843_v5 = vsel %vm11839_vm0, %v15914_v35, %v19343_v25  ;;  %v15600_v33 = vpack.c.bf16 %v11956_v7, %v11955_v60  ;;  %v15604_v35 = vpack.c.bf16 %v11958_v51, %v11957_v43  ;;  %v11959_v26 = vld [vmem:[#allocation11 + $0x240] sm:$0xff]  ;;  %v15610_v37 = vpack.c.bf16 %v11978_v11, %v11977_v24  ;;  %v11994_v7 = vld [vmem:[#allocation11 + $0x358] sm:$0xff]  ;;  %v11964_v31 = vld [vmem:[#allocation11 + $0x268] sm:$0xff] }
 0xa9f   :  { %v11874_v52 = vmax.f32 %v19255_v14, %v11843_v5  ;;  %12207 = vmatmul.mubr.f32.vlgmr.msra.gmra.mrb[6].mxu0 %v11871_v9  ;;  %v15628_v14 = vpack.c.bf16 %v11986_v55, %v11985_v27  ;;  %v15636_v9 = vpack.c.bf16 %v11990_v29, %v11989_v19  ;;  %v11992_v5 = vld [vmem:[#allocation11 + $0x348] sm:$0xff]  ;;  %v11963_v27 = vld [vmem:[#allocation11 + $0x260] sm:$0xff]  ;;  %v12013_v61 = vld [vmem:[#allocation11 + $0x3f0] sm:$0xff]  ;;  %v15620_v29 = vpack.c.bf16 %v11966_v63, %v11965_v2 }
 0xaa0   :  { %15593 = vmatpush3.bf16.msra.mxu0 %v15592_v20  ;;  %v11960_v20 = vld [vmem:[#allocation11 + $0x248] sm:$0xff]  ;;  %v15640_v60 = vpack.c.bf16 %v11992_v5, %v11991_v49  ;;  %v12014_v21 = vld [vmem:[#allocation11 + $0x3f8] sm:$0xff]  ;;  %v12063_v49 = vld [vmem:[#allocation11 + $0x580] sm:$0xff] }
 0xaa1   :  { %12276 = vmatprep.mubr.f32.mxu1 %v11874_v52  ;;  %15595 = vmatprep.subr.bf16.mxu0 %v15594_v56  ;;  %v15608_v56 = vpack.c.bf16 %v11960_v20, %v11959_v26  ;;  %v12009_v52 = vld [vmem:[#allocation11 + $0x3d0] sm:$0xff]  ;;  %v11996_v51 = vld [vmem:[#allocation11 + $0x368] sm:$0xff] }
 0xaa2   :  { %12277 = vmatmul.mubr.f32.vlgmr.msra.gmra.mrb[6].mxu1 %v11873_v58  ;;  %v11979_v58 = vld [vmem:[#allocation11 + $0x2e0] sm:$0xff]  ;;  %v11997_v20 = vld [vmem:[#allocation11 + $0x370] sm:$0xff]  ;;  %v12064_v5 = vld [vmem:[#allocation11 + $0x588] sm:$0xff] }
 0xaa3   :  { %15625 = vmatpush3.bf16.msra.mxu1 %v15624_v46  ;;  %v12010_v46 = vld [vmem:[#allocation11 + $0x3d8] sm:$0xff]  ;;  %v12065_v63 = vld [vmem:[#allocation11 + $0x590] sm:$0xff] }
 0xaa4   :  { %15597 = vmatpush3.bf16.msra.mxu0 %v15596_v48  ;;  %15627 = vmatprep.subr.bf16.mxu1 %v15626_v28  ;;  %v11980_v48 = vld [vmem:[#allocation11 + $0x2e8] sm:$0xff]  ;;  %v15612_v28 = vpack.c.bf16 %v11962_v41, %v11961_v13  ;;  %v15642_v55 = vpack.c.bf16 %v12010_v46, %v12009_v52  ;;  %v12033_v13 = vld [vmem:[#allocation11 + $0x490] sm:$0xff]  ;;  %v15652_v46 = vpack.c.bf16 %v11998_v50, %v11997_v20  ;;  %v12023_v50 = vld [vmem:[#allocation11 + $0x440] sm:$0xff] }
 0xaa5   :  { %15599 = vmatprep.subr.bf16.mxu0 %v15598_v36  ;;  %v11993_v36 = vld [vmem:[#allocation11 + $0x350] sm:$0xff]  ;;  %v15614_v1 = vpack.c.bf16 %v11980_v48, %v11979_v58 }
 0xaa6   :  { %v15644_v43 = vpack.c.bf16 %v11994_v7, %v11993_v36  ;;  %v12018_v36 = vld [vmem:[#allocation11 + $0x418] sm:$0xff]  ;;  %v12035_v7 = vld [vmem:[#allocation11 + $0x4a0] sm:$0xff] }
 0xaa7   :  { %15629 = vmatpush3.bf16.msra.mxu1 %v15628_v14  ;;  %v11981_v14 = vld [vmem:[#allocation11 + $0x2f0] sm:$0xff] }
 0xaa8   :  { %15601 = vmatpush3.bf16.msra.mxu0 %v15600_v33  ;;  %15631 = vmatprep.subr.bf16.mxu1 %v15630_v59  ;;  %v11982_v33 = vld [vmem:[#allocation11 + $0x2f8] sm:$0xff]  ;;  %v15616_v59 = vpack.c.bf16 %v11964_v31, %v11963_v27  ;;  %v15686_v27 = vpack.c.bf16 %v12064_v5, %v12063_v49  ;;  %v12051_v49 = vld [vmem:[#allocation11 + $0x520] sm:$0xff]  ;;  %v12025_v5 = vld [vmem:[#allocation11 + $0x450] sm:$0xff] }
 0xaa9   :  { %15603 = vmatprep.subr.bf16.mxu0 %v15602_v30  ;;  %v11995_v30 = vld [vmem:[#allocation11 + $0x360] sm:$0xff]  ;;  %v15618_v10 = vpack.c.bf16 %v11982_v33, %v11981_v14  ;;  %v12038_v31 = vld [vmem:[#allocation11 + $0x4b8] sm:$0xff] }
 0xaaa   :  { %v15648_v26 = vpack.c.bf16 %v11996_v51, %v11995_v30  ;;  %v12047_v14 = vld [vmem:[#allocation11 + $0x500] sm:$0xff]  ;;  %v12048_v30 = vld [vmem:[#allocation11 + $0x508] sm:$0xff] }
 0xaab   :  { %15633 = vmatpush3.bf16.msra.mxu1 %v15632_v34  ;;  %v12031_v34 = vld [vmem:[#allocation11 + $0x480] sm:$0xff] }
 0xaac   :  { %15605 = vmatpush3.bf16.msra.mxu0 %v15604_v35  ;;  %15635 = vmatprep.subr.bf16.mxu1 %v15634_v17  ;;  %v12032_v35 = vld [vmem:[#allocation11 + $0x488] sm:$0xff]  ;;  %v11741_v17 = vpop.permute.xlu1 %11740  ;;  %v12039_v51 = vld [vmem:[#allocation11 + $0x4c0] sm:$0xff] }
 0xaad   :  { %15607 = vmatprep.subr.bf16.mxu0 %v15606_v42  ;;  %v15650_v42 = vpack.c.bf16 %v12014_v21, %v12013_v61  ;;  %v15654_v11 = vpack.c.bf16 %v12032_v35, %v12031_v34  ;;  %v12066_v61 = vld [vmem:[#allocation11 + $0x598] sm:$0xff] }
 0xaaf   :  { %15637 = vmatpush3.bf16.msra.mxu1 %v15636_v9  ;;  %v12015_v9 = vld [vmem:[#allocation11 + $0x400] sm:$0xff] }
 0xab0   :  { %15609 = vmatpush3.bf16.msra.mxu0 %v15608_v56  ;;  %15639 = vmatprep.subr.bf16.mxu1 %v15638_v53  ;;  %v12016_v56 = vld [vmem:[#allocation11 + $0x408] sm:$0xff]  ;;  %v12034_v53 = vld [vmem:[#allocation11 + $0x498] sm:$0xff] }
 0xab1   :  { %15611 = vmatprep.subr.bf16.mxu0 %v15610_v37  ;;  %v11757_v37 = vsel %vm347_vm1, %v15919_v54, %v11741_v17 }
 0xab3   :  { %15641 = vmatpush3.bf16.msra.mxu1 %v15640_v60 }
 0xab4   :  { %15613 = vmatpush3.bf16.msra.mxu0 %v15612_v28  ;;  %15643 = vmatprep.subr.bf16.mxu1 %v15642_v55  ;;  %v15656_v28 = vpack.c.bf16 %v12016_v56, %v12015_v9  ;;  %v12017_v55 = vld [vmem:[#allocation11 + $0x410] sm:$0xff]  ;;  %v12067_v56 = vld [vmem:[#allocation11 + $0x5a0] sm:$0xff] }
 0xab5   :  { %15615 = vmatprep.subr.bf16.mxu0 %v15614_v1  ;;  %v12036_v1 = vld [vmem:[#allocation11 + $0x4a8] sm:$0xff]  ;;  %v12041_v9 = vld [vmem:[#allocation11 + $0x4d0] sm:$0xff] }
 0xab6   :  { %v15662_v4 = vpack.c.bf16 %v12036_v1, %v12035_v7  ;;  %v12054_v1 = vld [vmem:[#allocation11 + $0x538] sm:$0xff] }
 0xab7   :  { %15645 = vmatpush3.bf16.msra.mxu1 %v15644_v43  ;;  %v12021_v43 = vld [vmem:[#allocation11 + $0x430] sm:$0xff] }
 0xab8   :  { %v19349_v19 = vpop.permute.xlu0 %15921  ;;  %15617 = vmatpush3.bf16.msra.mxu0 %v15616_v59  ;;  %15647 = vmatprep.subr.bf16.mxu1 %v15646_v12  ;;  %v12022_v59 = vld [vmem:[#allocation11 + $0x438] sm:$0xff] }
 0xab9   :  { %v15924_v40 = vunpack.i.h.bf16 %v19349_v19  ;;  %v15923_v24 = vunpack.i.l.bf16 %v19349_v19  ;;  %15619 = vmatprep.subr.bf16.mxu0 %v15618_v10  ;;  %v12040_v10 = vld [vmem:[#allocation11 + $0x4c8] sm:$0xff]  ;;  %v15668_v35 = vpack.c.bf16 %v12022_v59, %v12021_v43  ;;  %v12050_v19 = vld [vmem:[#allocation11 + $0x518] sm:$0xff] }
 0xaba   :  { %v15670_v20 = vpack.c.bf16 %v12040_v10, %v12039_v51  ;;  %v12056_v59 = vld [vmem:[#allocation11 + $0x548] sm:$0xff]  ;;  %v12073_v51 = vld [vmem:[#allocation11 + $0x5d0] sm:$0xff]  ;;  %v12074_v10 = vld [vmem:[#allocation11 + $0x5d8] sm:$0xff] }
 0xabb   :  { %v11844_v41 = vsel %vm11839_vm0, %v19343_v25, %v15923_v24  ;;  %v11845_v52 = vsel %vm11839_vm0, %v15923_v24, %v15924_v40  ;;  %15649 = vmatpush3.bf16.msra.mxu1 %v15648_v26  ;;  %v15658_v25 = vpack.c.bf16 %v12034_v53, %v12033_v13  ;;  %v12024_v24 = vld [vmem:[#allocation11 + $0x448] sm:$0xff] }
 0xabc   :  { %v11875_v58 = vmax.f32 %v19267_v45, %v11844_v41  ;;  %v11743_v48 = vpop.permute.xlu0 %11742  ;;  %15621 = vmatpush3.bf16.msra.mxu0 %v15620_v29  ;;  %v11876_v60 = vmax.f32 %v19278_v16, %v11845_v52  ;;  %15651 = vmatprep.subr.bf16.mxu1 %v15650_v42  ;;  %v19370_v45 = vmax.f32 %v11693_v39, %v11757_v37  ;;  %v12019_v39 = vld [vmem:[#allocation11 + $0x420] sm:$0xff]  ;;  %v12049_v42 = vld [vmem:[#allocation11 + $0x510] sm:$0xff]  ;;  %v12068_v13 = vld [vmem:[#allocation11 + $0x5a8] sm:$0xff] }
 0xabd   :  { %v11758_v62 = vsel %vm347_vm1, %v11741_v17, %v11743_v48  ;;  %v19366_v54 = vmax.f32 %v11695_v57, %v11743_v48  ;;  %15655 = vmatprep.subr.bf16.mxu0 %v15654_v11  ;;  %v15660_v57 = vpack.c.bf16 %v12018_v36, %v12017_v55  ;;  %v15664_v15 = vpack.c.bf16 %v12020_v8, %v12019_v39  ;;  %v12026_v37 = vld [vmem:[#allocation11 + $0x458] sm:$0xff]  ;;  %v12052_v52 = vld [vmem:[#allocation11 + $0x528] sm:$0xff]  ;;  %v12069_v48 = vld [vmem:[#allocation11 + $0x5b0] sm:$0xff] }
 0xabe   :  { %v19374_v16 = vmax.f32 %v11694_v32, %v11758_v62  ;;  %12346 = vmatprep.mubr.f32.mxu0 %v11876_v60  ;;  %v12037_v32 = vld [vmem:[#allocation11 + $0x4b0] sm:$0xff]  ;;  %v15688_v29 = vpack.c.bf16 %v12048_v30, %v12047_v14  ;;  %v15690_v11 = vpack.c.bf16 %v12066_v61, %v12065_v63  ;;  %v15672_v53 = vpack.c.bf16 %v12024_v24, %v12023_v50  ;;  %v12070_v60 = vld [vmem:[#allocation11 + $0x5b8] sm:$0xff]  ;;  %v12027_v55 = vld [vmem:[#allocation11 + $0x460] sm:$0xff] }
 0xabf   :  { %11837 = vrot.lane.b32.xlu1 %v19366_v54, %s16187_s29  ;;  %12347 = vmatmul.mubr.f32.vlgmr.msra.gmra.mrb[104].mxu0 %v11875_v58  ;;  %v15666_v33 = vpack.c.bf16 %v12038_v31, %v12037_v32  ;;  %v15694_v41 = vpack.c.bf16 %v12068_v13, %v12067_v56  ;;  %v12044_v58 = vld [vmem:[#allocation11 + $0x4e8] sm:$0xff]  ;;  %v15696_v62 = vpack.c.bf16 %v12052_v52, %v12051_v49  ;;  %v12055_v31 = vld [vmem:[#allocation11 + $0x540] sm:$0xff]  ;;  %v12029_v14 = vld [vmem:[#allocation11 + $0x470] sm:$0xff]  ;;  %vm12135_vm1 = vcmask 31744  }
 0xac0   :  { %v15940_v0 = vpack.i.bf16 %v19374_v16, %v19370_v45  ;;  %15653 = vmatpush3.bf16.msra.mxu1 %v15652_v46  ;;  %15657 = vmatpush3.bf16.msra.mxu0 %v15656_v28  ;;  %v12043_v46 = vld [vmem:[#allocation11 + $0x4e0] sm:$0xff]  ;;  %v15676_v28 = vpack.c.bf16 %v12026_v37, %v12025_v5  ;;  %v12028_v36 = vld [vmem:[#allocation11 + $0x468] sm:$0xff]  ;;  %v15698_v7 = vpack.c.bf16 %v12070_v60, %v12069_v48  ;;  %v12061_v56 = vld [vmem:[#allocation11 + $0x570] sm:$0xff] }
 0xac1   :  { %15659 = vmatprep.subr.bf16.mxu0 %v15658_v25  ;;  %15687 = vmatprep.subr.bf16.mxu1 %v15686_v27  ;;  %v12053_v25 = vld [vmem:[#allocation11 + $0x530] sm:$0xff]  ;;  %v15678_v27 = vpack.c.bf16 %v12044_v58, %v12043_v46  ;;  %v12072_v39 = vld [vmem:[#allocation11 + $0x5c8] sm:$0xff]  ;;  %v15680_v8 = vpack.c.bf16 %v12028_v36, %v12027_v55  ;;  %v15704_v61 = vpack.c.bf16 %v12056_v59, %v12055_v31  ;;  %v12059_v50 = vld [vmem:[#allocation11 + $0x560] sm:$0xff] }
 0xac2   :  { %15941 = vrot.lane.b32.xlu0 %v15940_v0, %s16187_s29  ;;  %v12045_v0 = vld [vmem:[#allocation11 + $0x4f0] sm:$0xff]  ;;  %v15700_v32 = vpack.c.bf16 %v12054_v1, %v12053_v25  ;;  %v12096_v30 = vld [vmem:[#allocation11 + $0x688] sm:$0xff]  ;;  %v12062_v13 = vld [vmem:[#allocation11 + $0x578] sm:$0xff] }
 0xac3   :  { %v12060_v24 = vld [vmem:[#allocation11 + $0x568] sm:$0xff]  ;;  %v12079_v37 = vld [vmem:[#allocation11 + $0x600] sm:$0xff]  ;;  %v12097_v52 = vld [vmem:[#allocation11 + $0x690] sm:$0xff] }
 0xac4   :  { %15661 = vmatpush3.bf16.msra.mxu0 %v15660_v57  ;;  %v12046_v57 = vld [vmem:[#allocation11 + $0x4f8] sm:$0xff]  ;;  %v12111_v25 = vld [vmem:[#allocation11 + $0x700] sm:$0xff]  ;;  %v12101_v59 = vld [vmem:[#allocation11 + $0x6b0] sm:$0xff] }
 0xac5   :  { %v19381_v3 = vpop.permute.xlu1 %15926  ;;  %15663 = vmatprep.subr.bf16.mxu0 %v15662_v4  ;;  %v12071_v4 = vld [vmem:[#allocation11 + $0x5c0] sm:$0xff]  ;;  %v12098_v46 = vld [vmem:[#allocation11 + $0x698] sm:$0xff] }
 0xac6   :  { %v15929_v2 = vunpack.i.h.bf16 %v19381_v3  ;;  %v15928_v12 = vunpack.i.l.bf16 %v19381_v3  ;;  %v15702_v43 = vpack.c.bf16 %v12072_v39, %v12071_v4  ;;  %v15722_v1 = vpack.c.bf16 %v12098_v46, %v12097_v52  ;;  %v12082_v3 = vld [vmem:[#allocation11 + $0x618] sm:$0xff] }
 0xac7   :  { %v12122_v46 = vld [vmem:[#allocation11 + $0x758] sm:$0xff] }
 0xac8   :  { %v11846_v21 = vsel %vm11839_vm0, %v15924_v40, %v15928_v12  ;;  %v11847_v34 = vsel %vm11839_vm0, %v15928_v12, %v15929_v2  ;;  %15665 = vmatpush3.bf16.msra.mxu0 %v15664_v15  ;;  %v12042_v40 = vld [vmem:[#allocation11 + $0x4d8] sm:$0xff]  ;;  %v15682_v15 = vpack.c.bf16 %v12046_v57, %v12045_v0  ;;  %v12095_v12 = vld [vmem:[#allocation11 + $0x680] sm:$0xff]  ;;  %v12081_v0 = vld [vmem:[#allocation11 + $0x610] sm:$0xff] }
 0xac9   :  { %v11877_v26 = vmax.f32 %v19282_v18, %v11846_v21  ;;  %v11878_v17 = vmax.f32 %v19297_v47, %v11847_v34  ;;  %15667 = vmatprep.subr.bf16.mxu0 %v15666_v33  ;;  %v15692_v18 = vpack.c.bf16 %v12050_v19, %v12049_v42  ;;  %v15674_v47 = vpack.c.bf16 %v12042_v40, %v12041_v9  ;;  %v12030_v33 = vld [vmem:[#allocation11 + $0x478] sm:$0xff]  ;;  %v12100_v57 = vld [vmem:[#allocation11 + $0x6a8] sm:$0xff] }
 0xaca   :  { %v15684_v63 = vpack.c.bf16 %v12030_v33, %v12029_v14  ;;  %v15718_v21 = vpack.c.bf16 %v12096_v30, %v12095_v12  ;;  %v15706_v34 = vpack.c.bf16 %v12074_v10, %v12073_v51  ;;  %v12078_v19 = vld [vmem:[#allocation11 + $0x5f8] sm:$0xff]  ;;  %v15712_v9 = vpack.c.bf16 %v12060_v24, %v12059_v50  ;;  %v12083_v33 = vld [vmem:[#allocation11 + $0x620] sm:$0xff]  ;;  %v12088_v50 = vld [vmem:[#allocation11 + $0x648] sm:$0xff] }
 0xacb   :  { %12416 = vmatprep.mubr.f32.mxu1 %v11878_v17  ;;  %v12075_v17 = vld [vmem:[#allocation11 + $0x5e0] sm:$0xff]  ;;  %v15724_v31 = vpack.c.bf16 %v12082_v3, %v12081_v0  ;;  %v12102_v12 = vld [vmem:[#allocation11 + $0x6b8] sm:$0xff]  ;;  %v12105_v24 = vld [vmem:[#allocation11 + $0x6d0] sm:$0xff] }
 0xacc   :  { %12417 = vmatmul.mubr.f32.vlgmr.msra.gmra.mrb[104].mxu1 %v11877_v26  ;;  %15669 = vmatpush3.bf16.msra.mxu0 %v15668_v35  ;;  %v12057_v35 = vld [vmem:[#allocation11 + $0x550] sm:$0xff]  ;;  %v12058_v26 = vld [vmem:[#allocation11 + $0x558] sm:$0xff]  ;;  %v12115_v51 = vld [vmem:[#allocation11 + $0x720] sm:$0xff]  ;;  %v15730_v10 = vpack.c.bf16 %v12102_v12, %v12101_v59 }
 0xacd   :  { %15689 = vmatpush3.bf16.msra.mxu1 %v15688_v29  ;;  %15671 = vmatprep.subr.bf16.mxu0 %v15670_v20  ;;  %v12076_v29 = vld [vmem:[#allocation11 + $0x5e8] sm:$0xff]  ;;  %v15708_v42 = vpack.c.bf16 %v12058_v26, %v12057_v35  ;;  %v12117_v26 = vld [vmem:[#allocation11 + $0x730] sm:$0xff] }
 0xace   :  { %15691 = vmatprep.subr.bf16.mxu1 %v15690_v11  ;;  %v15710_v20 = vpack.c.bf16 %v12076_v29, %v12075_v17  ;;  %v12077_v11 = vld [vmem:[#allocation11 + $0x5f0] sm:$0xff]  ;;  %v12118_v29 = vld [vmem:[#allocation11 + $0x738] sm:$0xff] }
 0xacf   :  { %v15714_v40 = vpack.c.bf16 %v12078_v19, %v12077_v11  ;;  %v12106_v11 = vld [vmem:[#allocation11 + $0x6d8] sm:$0xff]  ;;  %v15760_v19 = vpack.c.bf16 %v12118_v29, %v12117_v26  ;;  %v12093_v3 = vld [vmem:[#allocation11 + $0x670] sm:$0xff]  ;;  %v12710_v29 = vld [vmem:[#allocation14 + $0x38] sm:$0xff] }
 0xad0   :  { %15673 = vmatpush3.bf16.msra.mxu0 %v15672_v53  ;;  %v15716_v53 = vpack.c.bf16 %v12062_v13, %v12061_v56  ;;  %v12120_v56 = vld [vmem:[#allocation11 + $0x748] sm:$0xff]  ;;  %v15738_v13 = vpack.c.bf16 %v12106_v11, %v12105_v24 }
 0xad1   :  { %15693 = vmatpush3.bf16.msra.mxu1 %v15692_v18  ;;  %15675 = vmatprep.subr.bf16.mxu0 %v15674_v47  ;;  %v16188_v18 = vmov 0.0|0.0  }
 0xad2   :  { %15695 = vmatprep.subr.bf16.mxu1 %v15694_v41  ;;  %v12080_v41 = vld [vmem:[#allocation11 + $0x608] sm:$0xff] }
 0xad4   :  { %15677 = vmatpush3.bf16.msra.mxu0 %v15676_v28 }
 0xad5   :  { %15697 = vmatpush3.bf16.msra.mxu1 %v15696_v62  ;;  %15679 = vmatprep.subr.bf16.mxu0 %v15678_v27  ;;  %v15720_v27 = vpack.c.bf16 %v12080_v41, %v12079_v37  ;;  %v12121_v41 = vld [vmem:[#allocation11 + $0x750] sm:$0xff] }
 0xad6   :  { %15699 = vmatprep.subr.bf16.mxu1 %v15698_v7  ;;  %v12112_v7 = vld [vmem:[#allocation11 + $0x708] sm:$0xff] }
 0xad8   :  { %15681 = vmatpush3.bf16.msra.mxu0 %v15680_v8  ;;  %v15751_v8 = vpack.c.bf16 %v12112_v7, %v12111_v25  ;;  %v12110_v25 = vld [vmem:[#allocation11 + $0x6f8] sm:$0xff] }
 0xad9   :  { %15701 = vmatpush3.bf16.msra.mxu1 %v15700_v32  ;;  %15683 = vmatprep.subr.bf16.mxu0 %v15682_v15  ;;  %v12113_v32 = vld [vmem:[#allocation11 + $0x710] sm:$0xff]  ;;  %v12114_v15 = vld [vmem:[#allocation11 + $0x718] sm:$0xff] }
 0xada   :  { %15703 = vmatprep.subr.bf16.mxu1 %v15702_v43  ;;  %v12084_v43 = vld [vmem:[#allocation11 + $0x628] sm:$0xff]  ;;  %v15754_v30 = vpack.c.bf16 %v12114_v15, %v12113_v32  ;;  %v12127_v15 = vld [vmem:[#allocation11 + $0x780] sm:$0xf] }
 0xadc   :  { %15685 = vmatpush3.bf16.msra.mxu0 %v15684_v63  ;;  %v12085_v63 = vld [vmem:[#allocation11 + $0x630] sm:$0xff] }
 0xadd   :  { %15705 = vmatpush3.bf16.msra.mxu1 %v15704_v61  ;;  %15719 = vmatprep.subr.bf16.mxu0 %v15718_v21  ;;  %v12086_v61 = vld [vmem:[#allocation11 + $0x638] sm:$0xff]  ;;  %v12103_v21 = vld [vmem:[#allocation11 + $0x6c0] sm:$0xff] }
 0xade   :  { %15707 = vmatprep.subr.bf16.mxu1 %v15706_v34  ;;  %v12104_v34 = vld [vmem:[#allocation11 + $0x6c8] sm:$0xff]  ;;  %v15732_v17 = vpack.c.bf16 %v12086_v61, %v12085_v63  ;;  %v12705_v63 = vld [vmem:[#allocation14 + $0x10] sm:$0xff] }
 0xae1   :  { %15709 = vmatpush3.bf16.msra.mxu1 %v15708_v42  ;;  %v15734_v42 = vpack.c.bf16 %v12104_v34, %v12103_v21  ;;  %v12707_v21 = vld [vmem:[#allocation14 + $0x20] sm:$0xff]  ;;  %v12708_v34 = vld [vmem:[#allocation14 + $0x28] sm:$0xff] }
 0xae2   :  { %15711 = vmatprep.subr.bf16.mxu1 %v15710_v20  ;;  %v12087_v20 = vld [vmem:[#allocation11 + $0x640] sm:$0xff] }
 0xae5   :  { %15713 = vmatpush3.bf16.msra.mxu1 %v15712_v9  ;;  %v12119_v9 = vld [vmem:[#allocation11 + $0x740] sm:$0xff] }
 0xae6   :  { %15715 = vmatprep.subr.bf16.mxu1 %v15714_v40  ;;  %v15736_v40 = vpack.c.bf16 %v12088_v50, %v12087_v20  ;;  %v15763_v37 = vpack.c.bf16 %v12120_v56, %v12119_v9  ;;  %v12712_v9 = vld [vmem:[#allocation14 + $0x48] sm:$0xff] }
 0xae9   :  { %15717 = vmatpush3.bf16.msra.mxu1 %v15716_v53  ;;  %v12089_v53 = vld [vmem:[#allocation11 + $0x650] sm:$0xff] }
 0xaea   :  { %15750 = vmatprep.subr.bf16.mxu1 %v16188_v18 }
 0xb0a   :  { %v15932_v49 = vpop.permute.xlu0 %15931 }
 0xb0b   :  { %v15934_v47 = vunpack.i.h.bf16 %v15932_v49  ;;  %v15933_v5 = vunpack.i.l.bf16 %v15932_v49  ;;  %v12090_v49 = vld [vmem:[#allocation11 + $0x658] sm:$0xff] }
 0xb0c   :  { %v15740_v52 = vpack.c.bf16 %v12090_v49, %v12089_v53  ;;  %v12714_v53 = vld [vmem:[#allocation14 + $0x58] sm:$0xff] }
 0xb0d   :  { %v11848_v58 = vsel %vm11839_vm0, %v15929_v2, %v15933_v5  ;;  %v11849_v48 = vsel %vm11839_vm0, %v15933_v5, %v15934_v47  ;;  %v12099_v2 = vld [vmem:[#allocation11 + $0x6a0] sm:$0xff]  ;;  %v12108_v5 = vld [vmem:[#allocation11 + $0x6e8] sm:$0xff] }
 0xb0e   :  { %v11879_v60 = vmax.f32 %v19301_v44, %v11848_v58  ;;  %v19399_v28 = vpop.permute.xlu1 %15936  ;;  %v11880_v62 = vmax.f32 %v19312_v38, %v11849_v48  ;;  %v15726_v14 = vpack.c.bf16 %v12100_v57, %v12099_v2  ;;  %v12091_v48 = vld [vmem:[#allocation11 + $0x660] sm:$0xff]  ;;  %v12094_v2 = vld [vmem:[#allocation11 + $0x678] sm:$0xff] }
 0xb0f   :  { %v15939_v55 = vunpack.i.h.bf16 %v19399_v28  ;;  %v15938_v36 = vunpack.i.l.bf16 %v19399_v28  ;;  %v12706_v28 = vld [vmem:[#allocation14 + $0x18] sm:$0xff] }
 0xb10   :  { %12486 = vmatprep.mubr.f32.mxu0 %v11880_v62  ;;  %v12109_v62 = vld [vmem:[#allocation11 + $0x6f0] sm:$0xff] }
 0xb11   :  { %v11850_v4 = vsel %vm11839_vm0, %v15934_v47, %v15938_v36  ;;  %12487 = vmatmul.mubr.f32.vlgmr.msra.gmra.mrb[106].mxu0 %v11879_v60  ;;  %v11851_v44 = vsel %vm11839_vm0, %v15938_v36, %v15939_v55  ;;  %v12107_v47 = vld [vmem:[#allocation11 + $0x6e0] sm:$0xff]  ;;  %v12092_v60 = vld [vmem:[#allocation11 + $0x668] sm:$0xff]  ;;  %v15746_v0 = vpack.c.bf16 %v12110_v25, %v12109_v62  ;;  %v12797_v25 = vld [vmem:[%s19519_s10] sm:$0xff] }
 0xb12   :  { %v11881_v38 = vmax.f32 %v19316_v22, %v11850_v4  ;;  %v11882_v39 = vmax.f32 %v19330_v6, %v11851_v44  ;;  %15721 = vmatpush3.bf16.msra.mxu0 %v15720_v27  ;;  %v15728_v22 = vpack.c.bf16 %v12084_v43, %v12083_v33  ;;  %v12116_v6 = vld [vmem:[#allocation11 + $0x728] sm:$0xff]  ;;  %v15742_v58 = vpack.c.bf16 %v12108_v5, %v12107_v47  ;;  %v12123_v36 = vld [vmem:[#allocation11 + $0x760] sm:$0xff]  ;;  %v12125_v44 = vld [vmem:[#allocation11 + $0x770] sm:$0xff] }
 0xb13   :  { %15723 = vmatprep.subr.bf16.mxu0 %v15722_v1  ;;  %v15757_v35 = vpack.c.bf16 %v12116_v6, %v12115_v51  ;;  %v15766_v27 = vpack.c.bf16 %v12122_v46, %v12121_v41  ;;  %v15744_v7 = vpack.c.bf16 %v12092_v60, %v12091_v48  ;;  %v12124_v1 = vld [vmem:[#allocation11 + $0x768] sm:$0xff]  ;;  %v15748_v4 = vpack.c.bf16 %v12094_v2, %v12093_v3  ;;  %v12716_v5 = vld [vmem:[#allocation14 + $0x68] sm:$0xff] }
 0xb14   :  { %12556 = vmatprep.mubr.f32.mxu1 %v11882_v39  ;;  %v15769_v57 = vpack.c.bf16 %v12124_v1, %v12123_v36  ;;  %v12703_v6 = vld [vmem:[#allocation14] sm:$0xff]  ;;  %v12718_v48 = vld [vmem:[#allocation14 + $0x78] sm:$0xff]  ;;  %v12802_v2 = vld [vmem:[%s19519_s10 + $0x28] sm:$0xff] }
 0xb15   :  { %12557 = vmatmul.mubr.f32.vlgmr.msra.gmra.mrb[106].mxu1 %v11881_v38  ;;  %v12126_v38 = vld [vmem:[#allocation11 + $0x778] sm:$0xff]  ;;  %v12715_v47 = vld [vmem:[#allocation14 + $0x60] sm:$0xff]  ;;  %v12799_v36 = vld [vmem:[%s19519_s10 + $0x10] sm:$0xff] }
 0xb16   :  { %15752 = vmatpush1.bf16.msra.mxu1 %v15751_v8  ;;  %15725 = vmatpush3.bf16.msra.mxu0 %v15724_v31  ;;  %v15772_v39 = vpack.c.bf16 %v12126_v38, %v12125_v44  ;;  %v16189_v31 = vmov 0.0   ;;  %v12800_v1 = vld [vmem:[%s19519_s10 + $0x18] sm:$0xff]  ;;  %v12801_v3 = vld [vmem:[%s19519_s10 + $0x20] sm:$0xff]  ;;  %v12803_v38 = vld [vmem:[%s19519_s10 + $0x30] sm:$0xff] }
 0xb17   :  { %15753 = vmatprep.subr.bf16.mxu1 %v16188_v18  ;;  %15727 = vmatprep.subr.bf16.mxu0 %v15726_v14 }
 0xb1a   :  { %15755 = vmatpush1.bf16.msra.mxu1 %v15754_v30  ;;  %15729 = vmatpush3.bf16.msra.mxu0 %v15728_v22 }
 0xb1b   :  { %15756 = vmatprep.subr.bf16.mxu1 %v16188_v18  ;;  %15731 = vmatprep.subr.bf16.mxu0 %v15730_v10  ;;  %v12704_v10 = vld [vmem:[#allocation14 + $0x8] sm:$0xff] }
 0xb1c   :  { %v15775_v61 = vpack.c.bf16 %v12704_v10, %v12703_v6 }
 0xb1e   :  { %15758 = vmatpush1.bf16.msra.mxu1 %v15757_v35  ;;  %15733 = vmatpush3.bf16.msra.mxu0 %v15732_v17  ;;  %v12709_v17 = vld [vmem:[#allocation14 + $0x30] sm:$0xff] }
 0xb1f   :  { %15759 = vmatprep.subr.bf16.mxu1 %v16188_v18  ;;  %15735 = vmatprep.subr.bf16.mxu0 %v15734_v42  ;;  %v15784_v11 = vpack.c.bf16 %v12710_v29, %v12709_v17 }
 0xb22   :  { %15761 = vmatpush1.bf16.msra.mxu1 %v15760_v19  ;;  %15737 = vmatpush3.bf16.msra.mxu0 %v15736_v40  ;;  %v12711_v19 = vld [vmem:[#allocation14 + $0x40] sm:$0xff] }
 0xb23   :  { %15762 = vmatprep.subr.bf16.mxu1 %v16188_v18  ;;  %15739 = vmatprep.subr.bf16.mxu0 %v15738_v13  ;;  %v15787_v56 = vpack.c.bf16 %v12712_v9, %v12711_v19  ;;  %v12713_v13 = vld [vmem:[#allocation14 + $0x50] sm:$0xff] }
 0xb24   :  { %v15790_v49 = vpack.c.bf16 %v12714_v53, %v12713_v13 }
 0xb26   :  { %15764 = vmatpush1.bf16.msra.mxu1 %v15763_v37  ;;  %15741 = vmatpush3.bf16.msra.mxu0 %v15740_v52  ;;  %v15793_v37 = vpack.c.bf16 %v12716_v5, %v12715_v47 }
 0xb27   :  { %15765 = vmatprep.subr.bf16.mxu1 %v16188_v18  ;;  %15743 = vmatprep.subr.bf16.mxu0 %v15742_v58  ;;  %v12717_v58 = vld [vmem:[#allocation14 + $0x70] sm:$0xff] }
 0xb28   :  { %v15796_v60 = vpack.c.bf16 %v12718_v48, %v12717_v58 }
 0xb2a   :  { %15767 = vmatpush1.bf16.msra.mxu1 %v15766_v27  ;;  %15745 = vmatpush3.bf16.msra.mxu0 %v15744_v7  ;;  %v12798_v27 = vld [vmem:[%s19519_s10 + $0x8] sm:$0xff] }
 0xb2b   :  { %15768 = vmatprep.subr.bf16.mxu1 %v16188_v18  ;;  %15747 = vmatprep.subr.bf16.mxu0 %v15746_v0  ;;  %v15799_v7 = vpack.c.bf16 %v12798_v27, %v12797_v25  ;;  %v15802_v0 = vpack.c.bf16 %v12800_v1, %v12799_v36 }
 0xb2e   :  { %15770 = vmatpush1.bf16.msra.mxu1 %v15769_v57  ;;  %15749 = vmatpush3.bf16.msra.mxu0 %v15748_v4  ;;  %v15805_v4 = vpack.c.bf16 %v12802_v2, %v12801_v3 }
 0xb2f   :  { %15771 = vmatprep.subr.bf16.mxu1 %v16188_v18  ;;  %15774 = vmatprep.subr.bf16.mxu0 %v16188_v18 }
 0xb31   :  { %v11838_v8 = vpop.permute.xlu1 %11837 }
 0xb32   :  { %v11886_v32 = vmax.f32 %v19366_v54, %v11838_v8  ;;  %15773 = vmatpush1.bf16.msra.mxu1 %v15772_v39  ;;  %v12804_v39 = vld [vmem:[%s19519_s10 + $0x38] sm:$0xff] }
 0xb33   :  { %12664 = vmatprep.subr.mxu1 %v16189_v31 }
 0xb34   :  { %v15942_v14 = vpop.permute.xlu0 %15941  ;;  %14106 = vmatprep.mubr.msk.f32.mxu1 %vm12135_vm1, %v11886_v32 }
 0xb35   :  { %v15944_v33 = vunpack.i.h.bf16 %v15942_v14  ;;  %v15943_v43 = vunpack.i.l.bf16 %v15942_v14  ;;  %v12806_v14 = vld [vmem:[%s19519_s10 + $0x48] sm:$0xff] }
 0xb36   :  { %14105 = vmatpush1.msk.msra.mxu1 %vm4205_vm14, %v12127_v15  ;;  %v12805_v15 = vld [vmem:[%s19519_s10 + $0x40] sm:$0xff] }
 0xb37   :  { %v11854_v59 = vsel %vm11839_vm0, %v15944_v33, %v11838_v8  ;;  %v11852_v12 = vsel %vm11839_vm0, %v15939_v55, %v15943_v43  ;;  %v11853_v30 = vsel %vm11839_vm0, %v15943_v43, %v15944_v33  ;;  %15798 = vmatprep.subr.bf16.mxu1 %v16188_v18  ;;  %v15778_v55 = vpack.c.bf16 %v12706_v28, %v12705_v63  ;;  %v12807_v43 = vld [vmem:[%s19519_s10 + $0x50] sm:$0xff] }
 0xb38   :  { %v11885_v54 = vmax.f32 %v19374_v16, %v11854_v59  ;;  %v11883_v51 = vmax.f32 %v19334_v23, %v11852_v12  ;;  %v11884_v22 = vmax.f32 %v19370_v45, %v11853_v30  ;;  %v14104_v16 = vld [vmem:[#allocation12] ss:$0 sm:$0xff]  ;;  %v15781_v23 = vpack.c.bf16 %v12708_v34, %v12707_v21  ;;  %v12809_v30 = vld [vmem:[%s19519_s10 + $0x60] sm:$0xff] }
 0xb39   :  { %v15811_v33 = vpack.c.bf16 %v12806_v14, %v12805_v15  ;;  %v12808_v59 = vld [vmem:[%s19519_s10 + $0x58] sm:$0xff] }
 0xb3a   :  { %12626 = vmatprep.mubr.f32.mxu0 %v11884_v22  ;;  %12697 = vmatmul.mubr.f32.vlgmr.msra.gmra.mrb[108].mxu1 %v11885_v54  ;;  %v15814_v12 = vpack.c.bf16 %v12808_v59, %v12807_v43  ;;  %v12810_v54 = vld [vmem:[%s19519_s10 + $0x68] sm:$0xff] }
 0xb3b   :  { %12627 = vmatmul.mubr.f32.vlgmr.msra.gmra.mrb[108].mxu0 %v11883_v51  ;;  %14455 = vmatprep.mubr.msk.f32.mxu1 %vm16190_vm2, %v16189_v31  ;;  %v15817_v51 = vpack.c.bf16 %v12810_v54, %v12809_v30 }
 0xb3c   :  { %15776 = vmatpush3.bf16.msra.mxu0 %v15775_v61  ;;  %14420 = vmatprep.mubr.msk.f32.mxu0 %vm16190_vm2, %v16189_v31  ;;  %v15808_v31 = vpack.c.bf16 %v12804_v39, %v12803_v38 }
 0xb3d   :  { %15777 = vmatprep.subr.bf16.mxu0 %v16188_v18  ;;  %15800 = vmatpush3.bf16.msra.mxu1 %v15799_v7 }
 0xb3e   :  { %15801 = vmatprep.subr.bf16.mxu1 %v16188_v18 }
 0xb40   :  { %15779 = vmatpush3.bf16.msra.mxu0 %v15778_v55 }
 0xb41   :  { %15780 = vmatprep.subr.bf16.mxu0 %v16188_v18  ;;  %15803 = vmatpush3.bf16.msra.mxu1 %v15802_v0 }
 0xb42   :  { %15804 = vmatprep.subr.bf16.mxu1 %v16188_v18 }
 0xb44   :  { %15782 = vmatpush3.bf16.msra.mxu0 %v15781_v23 }
 0xb45   :  { %15783 = vmatprep.subr.bf16.mxu0 %v16188_v18  ;;  %15806 = vmatpush3.bf16.msra.mxu1 %v15805_v4 }
 0xb46   :  { %15807 = vmatprep.subr.bf16.mxu1 %v16188_v18 }
 0xb48   :  { %15785 = vmatpush3.bf16.msra.mxu0 %v15784_v11 }
 0xb49   :  { %15786 = vmatprep.subr.bf16.mxu0 %v16188_v18  ;;  %15809 = vmatpush3.bf16.msra.mxu1 %v15808_v31 }
 0xb4a   :  { %15810 = vmatprep.subr.bf16.mxu1 %v16188_v18 }
 0xb4c   :  { %15788 = vmatpush3.bf16.msra.mxu0 %v15787_v56 }
 0xb4d   :  { %15789 = vmatprep.subr.bf16.mxu0 %v16188_v18  ;;  %15812 = vmatpush3.bf16.msra.mxu1 %v15811_v33 }
 0xb4e   :  { %15813 = vmatprep.subr.bf16.mxu1 %v16188_v18 }
 0xb50   :  { %15791 = vmatpush3.bf16.msra.mxu0 %v15790_v49 }
 0xb51   :  { %15792 = vmatprep.subr.bf16.mxu0 %v16188_v18  ;;  %15815 = vmatpush3.bf16.msra.mxu1 %v15814_v12 }
 0xb52   :  { %15816 = vmatprep.subr.bf16.mxu1 %v16188_v18 }
 0xb54   :  { %15794 = vmatpush3.bf16.msra.mxu0 %v15793_v37 }
 0xb55   :  { %15795 = vmatprep.subr.bf16.mxu0 %v16188_v18  ;;  %15818 = vmatpush3.bf16.msra.mxu1 %v15817_v51 }
 0xb56   :  { %15819 = vmatprep.subr.bf16.mxu1 %v16188_v18  ;;  %v12811_v18 = vld [vmem:[%s19519_s10 + $0x70] sm:$0xff] }
 0xb58   :  { %15797 = vmatpush3.bf16.msra.mxu0 %v15796_v60 }
 0xb72   :  { %v14141_v35 = vpop.f32.mrb[6].mxu0 }
 0xb73   :  { %v14142_v26 = vpop.f32.mrb[7].mxu0 }
 0xb74   :  { %v14143_v45 = vadd.f32 %v14142_v26, %v14141_v35 }
 0xb75   :  { %v14176_v42 = vpop.f32.mrb[6].mxu1 }
 0xb76   :  { %v12209_v20 = vadd.f32 %v14143_v45, %v14104_v16  ;;  %v14177_v50 = vpop.f32.mrb[7].mxu1 }
 0xb77   :  { %v14178_v24 = vadd.f32 %v14177_v50, %v14176_v42  ;;  %v12812_v42 = vld [vmem:[%s19519_s10 + $0x78] sm:$0xff]  ;;  %s16191_s10 = smov [#allocation18]  }
 0xb78   :  { %v14107_v50 = vld [vmem:[#allocation15] ss:$0 sm:$0xff]  ;;  %s12910_s20 = sshll.u32 %s16191_s10, 4  ;;  %s12911_s20 = int_to_ptr.vmem [resolvable:$true] %s12910_s20 }
 0xb79   :  { %v12279_v40 = vadd.f32 %v14178_v24, %v12209_v20  ;;  %v15820_v20 = vpack.c.bf16 %v12812_v42, %v12811_v18  ;;  %s16127_s3 = scalar_lea.vmem %s12911_s20, 32  ;;  %p16132_p7 = scmp.lt.s32.totalorder %s12911_s20, %s12911_s20 }
 0xb7a   :  { %p16128_p6 = scmp.ne.s32.totalorder %s12911_s20, %s16127_s3  ;;  %p16133_p8 = scmp.lt.s32.totalorder %s16127_s3, %s16127_s3 }
 0xb7b   :  { %15821 = vmatpush3.bf16.msra.mxu1 %v15820_v20 }
 0xb7c   :  { %p16134_p9 = por %p16133_p8, %p16132_p7 }
 0xb7e   :  { %p16135_p10 = pnand %p16134_p9, %p16128_p6 }
 0xb92   :  { %v14211_v41 = vpop.f32.mrb[104].mxu0 }
 0xb93   :  { %v14212_v52 = vpop.f32.mrb[105].mxu0 }
 0xb94   :  { %v14213_v46 = vadd.f32 %v14212_v52, %v14211_v41 }
 0xb96   :  { %v12349_v62 = vadd.f32 %v14213_v46, %v12279_v40  ;;  %v14108_v40 = vld [vmem:[#allocation17] ss:$0 sm:$0xff] }
 0xb9f   :  { %v14246_v57 = vpop.f32.mrb[104].mxu1 }
 0xba0   :  { %v14247_v44 = vpop.f32.mrb[105].mxu1 }
 0xba1   :  { %v14248_v8 = vadd.f32 %v14247_v44, %v14246_v57 }
 0xba3   :  { %v12419_v32 = vadd.f32 %v14248_v8, %v12349_v62 }
 0xbe4   :  { %v14281_v22 = vpop.f32.mrb[106].mxu0 }
 0xbe5   :  { %v14282_v6 = vpop.f32.mrb[107].mxu0 }
 0xbe6   :  { %v14283_v10 = vadd.f32 %v14282_v6, %v14281_v22 }
 0xbe8   :  { %v12489_v63 = vadd.f32 %v14283_v10, %v12419_v32  ;;  %v14316_v61 = vpop.f32.mrb[106].mxu1 }
 0xbe9   :  { %v14317_v28 = vpop.f32.mrb[107].mxu1 }
 0xbea   :  { %v14318_v55 = vadd.f32 %v14317_v28, %v14316_v61 }
 0xbec   :  { %v12559_v21 = vadd.f32 %v14318_v55, %v12489_v63 }
 0xc0d   :  { %v12698_v34 = vpop.f32.mrb[108].mxu1 }
 0xc0e   :  { %v14351_v35 = vpop.f32.mrb[108].mxu0  ;;  %v12700_v16 = vpop.f32.mrb[109].mxu1 }
 0xc0f   :  { %v14352_v26 = vpop.f32.mrb[109].mxu0 }
 0xc10   :  { %v14353_v23 = vadd.f32 %v14352_v26, %v14351_v35 }
 0xc12   :  { %v12629_v45 = vadd.f32 %v14353_v23, %v12559_v21 }
 0xc14   :  { %v12699_v17 = vadd.f32 %v12698_v34, %v12629_v45 }
 0xc16   :  { %v12702_v29 = vmax.f32 %v12699_v17, 0.0 }
 0xc18   :  { %14421 = vmatmul.mubr.f32.vlgmr.msra.gmra.mrb[110].mxu0 %v12702_v29 }
 0xceb   :  { %v12792_v24 = vpop.f32.mrb[110].mxu0 }
 0xcec   :  { %v12793_v11 = vadd.f32 %v14107_v50, %v12792_v24  ;;  %v14422_v19 = vpop.f32.mrb[111].mxu0 }
 0xcee   :  { %v12796_v9 = vmax.f32 %v12793_v11, 0.0 }
 0xcf0   :  { %14456 = vmatmul.mubr.f32.vlgmr.msra.gmra.mrb[110].mxu1 %v12796_v9 }
 0xdc3   :  { %v12886_v56 = vpop.f32.mrb[110].mxu1 }
 0xdc4   :  { %v12887_v13 = vadd.f32 %v14108_v40, %v12886_v56  ;;  %v14457_v53 = vpop.f32.mrb[111].mxu1 }
 0xdc6   :  { %v12891_v49 = vsel %vm12890_vm3, %v12887_v13, -inf }
 0xdc7   :  { %12892 = vmax.xlane.f32.xlu0 %v12891_v49 }
 0xe54   :  { %v12893_v47 = vpop.xlane.xlu0 %12892 }
 0xe55   :  { %v12894_v5 = vsub.f32 %v12887_v13, %v12893_v47 }
 0xe57   :  { %v12895_v37 = vmul.f32 1.442695, %v12894_v5 }
 0xe59   :  { %15945 = vpow2.f32 %v12895_v37 }
 0xe63   :  { %v15946_v41 = vpop.eup %15945 }
 0xe64   :  { %v12897_v52 = vsel %vm12890_vm3, %v15946_v41, 0.0 }
 0xe65   :  { %12898 = vadd.xlane.f32.xlu1 %v12897_v52 }
 0xef2   :  { %v12899_v46 = vpop.xlane.xlu1 %12898 }
 0xef3   :  { %15947 = vlog2.f32 %v12899_v46 }
 0xefd   :  { %v15948_v58 = vpop.eup %15947 }
 0xefe   :  { %v12901_v48 = vmul.f32 0.6931472, %v15948_v58 }
 0xf00   :  { %v12902_v60 = vsub.f32 %v12894_v5, %v12901_v48 }
 0xf02   :  { %12903 = vst.msk [vmem:[#allocation18] sm:$0x3] %vm12890_vm3, %v12902_v60 }
 0xf03   :  { %16138 = shalt.err (!%p16135_p10)
}
 0xf04   :  { %s16139_s27 = scalar_lea.hbm %s19521_s12, 32 }
 0xf05   :  { %p16140_p11 = scmp.ne.s32.totalorder %s19521_s12, %s16139_s27  ;;  %p16143_p12 = scmp.lt.u32.totalorder %s16139_s27, %s19521_s12 }
 0xf07   :  { %p16145_p13 = pnand %p16143_p12, %p16140_p11 }
 0xf09   :  { %16148 = shalt.err (!%p16145_p13)
}
 0xf0a   :  { %12913 = dma.vmem_to_hbm [thread:$0]  %s12911_s20, 32, %s19521_s12, [#allocation4]  }
 0xf0b   :  { %16161 = dma.done.wait [#allocation4], 32  }
 0xf0c   :  { %16162 = vsyncadd [#allocation4], 4294967264 }
 0xf0d   :  { %12917 = vsyncpa [#allocation3], 1 }
 0xf0e   :  { %12918 = vsyncpa [#allocation10], 1 }
 0xf0f   :  { %12919 = vsyncpa [#allocation13], 1 }
 0xf10   :  { %12920 = vsyncpa [#allocation16], 1 }
 0xf11   :  { %12921 = vsyncpa [#allocation4], 1 }
 0xf12   :  { %12922 = vsyncpa [#allocation5], 1 }
 0xf13   :  { %12923 = vsyncpa [#allocation7], 1 }

</bundles_post_ra>
